<compile_context>
chip_gen: v6e
topology: v6e:2x2x1
jax: 0.10.0
libtpu: 0.0.40
codegen_flags: <defaults>
</compile_context>

<pallas_src>
import functools

import jax
import jax.numpy as jnp
from jax import lax
from jax.experimental import pallas as pl
from jax.experimental.pallas import tpu as pltpu


def _round_up(v, m):
    return ((v + m - 1) // m) * m


# --------------------------------------------------------------------------
# In-kernel helpers
# --------------------------------------------------------------------------
def _im2col_patches(src, Wp, P, Cp, compute_dtype):
    """src: (P + 2*Wp, Cp) guard-extended flat padded image (row stride Wp,
    Wp % 8 == 0).  Returns (P, 9*Cp) patches so that a single matmul against
    the packed (9*Cp, Cp) weight slab implements the whole 3x3 convolution."""
    zrow = jnp.zeros((1, Cp), src.dtype)
    # Column-shifted copies built ONCE per conv; every per-tap slice below is
    # then an aligned row-band slice (base = di*Wp, multiple of 8).
    # (pltpu.roll(src, +/-1, axis=0) is the native XLU sublane-rotate form.)
    left = jnp.concatenate([zrow, src[:-1]], axis=0)     # left[q]  = src[q-1]
    right = jnp.concatenate([src[1:], zrow], axis=0)     # right[q] = src[q+1]
    slabs = []
    for di in range(3):                      # row offset di - 1
        base = di * Wp                       # multiple of 8 -> aligned slice
        for shifted in (left, src, right):   # column offsets -1, 0, +1
            slabs.append(shifted[base:base + P])
    return jnp.concatenate(slabs, axis=1).astype(compute_dtype)   # (P, 9*Cp)


def _conv_stats_kernel(x_ref, mask_ref, w_ref, y_ref, stats_ref,
                       *, Wp, P, Cp, compute_dtype):
    """Pass 1: conv1 (single im2col matmul) + per-sample BN1 partial stats."""
    x = x_ref[0]                                              # (E, Cp) f32
    patches = _im2col_patches(x, Wp, P, Cp, compute_dtype)    # (P, 9*Cp)
    y = jnp.dot(patches, w_ref[...], preferred_element_type=jnp.float32)

    guard = jnp.zeros((Wp, Cp), jnp.float32)
    y_ref[0, :Wp, :] = guard            # zero ONLY the guard rows, not the body
    y_ref[0, Wp:Wp + P, :] = y
    y_ref[0, Wp + P:, :] = guard

    msk = mask_ref[Wp:Wp + P, :]                              # (P, 1) interior
    ym = y * msk
    s = jnp.sum(ym, axis=0, keepdims=True)                    # (1, Cp)
    ss = jnp.sum(ym * y, axis=0, keepdims=True)               # (1, Cp) = sum(m*y^2)
    stats_ref[0] = jnp.concatenate([s, ss], axis=0)           # (2, Cp)


def _bn_relu_conv_stats_kernel(y1_ref, mask_ref, w_ref, sc_ref, sh_ref,
                               y2_ref, stats_ref, *, Wp, P, Cp, compute_dtype):
    """Pass 2: bn1 affine + ReLU + conv2 (single matmul) + BN2 partial stats."""
    a = y1_ref[0]                                             # (E, Cp) raw conv1
    m = mask_ref[...]                                         # (E, 1)
    # bn1 as precomputed per-channel scale/shift; the mask forces the padding
    # ring / guard rows back to zero so conv2 sees correct zero padding.
    h = jnp.maximum(a * sc_ref[...] + sh_ref[...], 0.0) * m

    patches = _im2col_patches(h, Wp, P, Cp, compute_dtype)
    y2 = jnp.dot(patches, w_ref[...], preferred_element_type=jnp.float32)
    y2_ref[0] = y2

    msk = m[Wp:Wp + P, :]
    ym = y2 * msk
    s = jnp.sum(ym, axis=0, keepdims=True)
    ss = jnp.sum(ym * y2, axis=0, keepdims=True)
    stats_ref[0] = jnp.concatenate([s, ss], axis=0)


def _bn_residual_relu_kernel(y2_ref, x_ref, sc_ref, sh_ref, out_ref, *, Hp):
    """Pass 3 (lane-dense layout): bn2 affine + residual add + ReLU."""
    y2 = y2_ref[0]                        # (Hp, Wp*Cp)
    res = x_ref[0][1:Hp + 1, :]           # drop the 2 guard rows of the residual
    out_ref[0] = jnp.maximum(y2 * sc_ref[...] + sh_ref[...] + res, 0.0)


# --------------------------------------------------------------------------
# Host-side packing / glue
# --------------------------------------------------------------------------
def _pack_conv_weight(w, Cp, dtype):
    """torch OIHW (Co, Ci, 3, 3) -> tap-major (9*Cp, Cp) slab, zero-padded chans."""
    co, ci = w.shape[0], w.shape[1]
    wp = jnp.pad(w.astype(jnp.float32), ((0, Cp - co), (0, Cp - ci), (0, 0), (0, 0)))
    return jnp.transpose(wp, (2, 3, 1, 0)).reshape(9 * Cp, Cp).astype(dtype)


def _bn_scale_shift(stats, gamma, beta, count, eps):
    """Fold training-mode batch stats into a per-channel affine (scale, shift)."""
    tot = jnp.sum(stats, axis=0)                       # (2, Cp)
    mean = tot[0] / count
    var = jnp.maximum(tot[1] / count - mean * mean, 0.0)   # E[x^2] - mean^2
    scale = gamma * lax.rsqrt(var + eps)
    shift = beta - mean * scale
    return scale.reshape(1, -1), shift.reshape(1, -1)


@functools.partial(jax.jit, static_argnames=("eps", "compute_dtype"))
def residual_block(x_nchw, w1, w2, g1, b1, g2, b2, *, eps=1e-5,
                   compute_dtype=jnp.bfloat16):
    """Pallas ResidualBlock forward.  x_nchw: (N, C, H, W) float32."""
    N, Cin, H, W = x_nchw.shape
    Cout = w1.shape[0]
    assert Cin == Cout, "downsample=None path requires in_channels == out_channels"
    C = Cin

    Cp = _round_up(max(C, 8), 8)          # channels padded (lane packing)
    Hp = H + 2                            # standard-padded height
    Wp = _round_up(W + 2, 8)              # padded row stride, multiple of 8
    P = Hp * Wp                           # flat pixels per sample (output domain)
    E = P + 2 * Wp                        # + one guard row above / below
    L = Wp * Cp                           # lane-dense row width for pass 3
    cnt = float(N * H * W)                # BN denominator (interior pixels)

    # ---- layout: NCHW -> NHWC, zero-pad (2 rows guard+pad, cols to Wp, chans to Cp)
    # TODO(synk): accept NHWC input directly to avoid this transpose for NHWC callers.
    x_nhwc = jnp.transpose(x_nchw.astype(jnp.float32), (0, 2, 3, 1))
    x_ext = jnp.pad(x_nhwc,
                    ((0, 0), (2, 2), (1, Wp - W - 1), (0, Cp - C))).reshape(N, E, Cp)

    # interior-pixel mask in the guard-extended flat layout (shared by pass 1 & 2)
    mask_ext = (jnp.zeros((Hp + 2, Wp), jnp.float32)
                .at[2:H + 2, 1:W + 1].set(1.0)
                .reshape(E, 1))

    w1s = _pack_conv_weight(w1, Cp, compute_dtype)
    w2s = _pack_conv_weight(w2, Cp, compute_dtype)
    g1p = jnp.pad(g1.astype(jnp.float32), (0, Cp - C))
    b1p = jnp.pad(b1.astype(jnp.float32), (0, Cp - C))
    g2p = jnp.pad(g2.astype(jnp.float32), (0, Cp - C))
    b2p = jnp.pad(b2.astype(jnp.float32), (0, Cp - C))

    # Raise the scoped-VMEM limit (v5e default is only 16 MiB).  Per-sample
    # blocks here are small; for large H*W*C stripe rows within a sample and
    # halve the tile on v7x (64 MiB physical VMEM vs 128 MiB on v5e/v6e).
    # TODO(synk): add row-stripe tiling (with 1-row halo) for images whose
    # padded sample does not fit comfortably in VMEM.
    cparams = pltpu.CompilerParams(
        dimension_semantics=("parallel",),
        vmem_limit_bytes=32 * 1024 * 1024,
    )

    # ---- pass 1: conv1 + per-sample BN1 stats (pipelined over the batch) ----
    y1_ext, stats1 = pl.pallas_call(
        functools.partial(_conv_stats_kernel,
                          Wp=Wp, P=P, Cp=Cp, compute_dtype=compute_dtype),
        grid=(N,),
        in_specs=[
            pl.BlockSpec((1, E, Cp), lambda n: (n, 0, 0)),    # x (guard-extended)
            pl.BlockSpec((E, 1), lambda n: (0, 0)),           # interior mask
            pl.BlockSpec((9 * Cp, Cp), lambda n: (0, 0)),     # packed conv1 weights
        ],
        out_specs=(
            pl.BlockSpec((1, E, Cp), lambda n: (n, 0, 0)),    # raw conv1 (+ zero guards)
            pl.BlockSpec((1, 2, Cp), lambda n: (n, 0, 0)),    # (sum, sum_sq)
        ),
        out_shape=(
            jax.ShapeDtypeStruct((N, E, Cp), jnp.float32),
            jax.ShapeDtypeStruct((N, 2, Cp), jnp.float32),
        ),
        compiler_params=cparams,
    )(x_ext, mask_ext, w1s)

    scale1, shift1 = _bn_scale_shift(stats1, g1p, b1p, cnt, eps)

    # ---- pass 2: bn1 affine + ReLU + conv2 + per-sample BN2 stats ----
    y2, stats2 = pl.pallas_call(
        functools.partial(_bn_relu_conv_stats_kernel,
                          Wp=Wp, P=P, Cp=Cp, compute_dtype=compute_dtype),
        grid=(N,),
        in_specs=[
            pl.BlockSpec((1, E, Cp), lambda n: (n, 0, 0)),    # conv1 output
            pl.BlockSpec((E, 1), lambda n: (0, 0)),           # interior mask
            pl.BlockSpec((9 * Cp, Cp), lambda n: (0, 0)),     # packed conv2 weights
            pl.BlockSpec((1, Cp), lambda n: (0, 0)),          # bn1 scale
            pl.BlockSpec((1, Cp), lambda n: (0, 0)),          # bn1 shift
        ],
        out_specs=(
            pl.BlockSpec((1, P, Cp), lambda n: (n, 0, 0)),
            pl.BlockSpec((1, 2, Cp), lambda n: (n, 0, 0)),
        ),
        out_shape=(
            jax.ShapeDtypeStruct((N, P, Cp), jnp.float32),
            jax.ShapeDtypeStruct((N, 2, Cp), jnp.float32),
        ),
        compiler_params=cparams,
    )(y1_ext, mask_ext, w2s, scale1, shift1)

    scale2, shift2 = _bn_scale_shift(stats2, g2p, b2p, cnt, eps)

    # ---- pass 3: bn2 affine + residual + ReLU, lane-dense (Wp*Cp) layout ----
    scale2_t = jnp.tile(scale2, (1, Wp))            # (1, L): per-lane channel scale
    shift2_t = jnp.tile(shift2, (1, Wp))
    y2_v = y2.reshape(N, Hp, L)                     # free HBM reshapes (row-major)
    x_v = x_ext.reshape(N, Hp + 2, L)

    out_v = pl.pallas_call(
        functools.partial(_bn_residual_relu_kernel, Hp=Hp),
        grid=(N,),
        in_specs=[
            pl.BlockSpec((1, Hp, L), lambda n: (n, 0, 0)),        # conv2 output
            pl.BlockSpec((1, Hp + 2, L), lambda n: (n, 0, 0)),    # residual (x)
            pl.BlockSpec((1, L), lambda n: (0, 0)),               # bn2 scale (tiled)
            pl.BlockSpec((1, L), lambda n: (0, 0)),               # bn2 shift (tiled)
        ],
        out_specs=pl.BlockSpec((1, Hp, L), lambda n: (n, 0, 0)),
        out_shape=jax.ShapeDtypeStruct((N, Hp, L), jnp.float32),
        compiler_params=cparams,
    )(y2_v, x_v, scale2_t, shift2_t)

    out = out_v.reshape(N, Hp, Wp, Cp)[:, 1:H + 1, 1:W + 1, :C]
    return jnp.transpose(out, (0, 3, 1, 2))         # back to NCHW


# --------------------------------------------------------------------------
# Pure-JAX reference (training-mode BN, matches the PyTorch module's forward)
# --------------------------------------------------------------------------
def _reference(x, w1, w2, g1, b1, g2, b2, eps=1e-5):
    def conv(y, w):
        return lax.conv_general_dilated(
            y, w, window_strides=(1, 1), padding=((1, 1), (1, 1)),
            dimension_numbers=('NCHW', 'OIHW', 'NCHW'))

    def bn(y, g, b):
        mean = jnp.mean(y, axis=(0, 2, 3), keepdims=True)
        var = jnp.mean((y - mean) ** 2, axis=(0, 2, 3), keepdims=True)
        return ((y - mean) * lax.rsqrt(var + eps)
                * g.reshape(1, -1, 1, 1) + b.reshape(1, -1, 1, 1))

    out = jax.nn.relu(bn(conv(x, w1), g1, b1))
    out = bn(conv(out, w2), g2, b2)
    return jax.nn.relu(out + x)


if __name__ == "__main__":
    N, C, H, W = 2, 4, 16, 16            # in_channels == out_channels, stride=1

    key = jax.random.PRNGKey(0)
    kx, kw1, kw2, kg1, kb1, kg2, kb2 = jax.random.split(key, 7)

    x = jax.random.normal(kx, (N, C, H, W), dtype=jnp.float32)
    w1 = 0.2 * jax.random.normal(kw1, (C, C, 3, 3), dtype=jnp.float32)
    w2 = 0.2 * jax.random.normal(kw2, (C, C, 3, 3), dtype=jnp.float32)
    g1 = 1.0 + 0.1 * jax.random.normal(kg1, (C,), dtype=jnp.float32)
    b1 = 0.1 * jax.random.normal(kb1, (C,), dtype=jnp.float32)
    g2 = 1.0 + 0.1 * jax.random.normal(kg2, (C,), dtype=jnp.float32)
    b2 = 0.1 * jax.random.normal(kb2, (C,), dtype=jnp.float32)

    # Default bf16-MXU path and an f32 validation path.
    out = jax.block_until_ready(residual_block(x, w1, w2, g1, b1, g2, b2))
    out_f32 = jax.block_until_ready(
        residual_block(x, w1, w2, g1, b1, g2, b2, compute_dtype=jnp.float32))
    ref = jax.block_until_ready(_reference(x, w1, w2, g1, b1, g2, b2))

    assert out.shape == (N, C, H, W), out.shape
    assert bool(jnp.all(jnp.isfinite(out)))
    # f32 path: tight check of the kernel math.
    assert bool(jnp.allclose(out_f32, ref, atol=1e-3, rtol=1e-3)), (
        float(jnp.max(jnp.abs(out_f32 - ref))))
    # bf16 MXU path: looser tolerance for the reduced-precision matmul operands.
    assert bool(jnp.allclose(out, ref, atol=1e-1, rtol=1e-1)), (
        float(jnp.max(jnp.abs(out - ref))))

    print("KERNEL_OK")
</pallas_src>

<mosaic_0001>
module attributes {stable_mosaic.version = 11 : i64} {
  func.func @_conv_stats_kernel(%arg0: i32, %arg1: memref<1x480x8xf32, #tpu.memory_space<vmem>>, %arg2: memref<480x1xf32, #tpu.memory_space<vmem>>, %arg3: memref<72x8xbf16, #tpu.memory_space<vmem>>, %arg4: memref<1x480x8xf32, #tpu.memory_space<vmem>>, %arg5: memref<1x2x8xf32, #tpu.memory_space<vmem>>) attributes {dimension_semantics = [#tpu.dimension_semantics<parallel>], iteration_bounds = array<i64: 2>, scalar_prefetch = 0 : i64, scratch_operands = 0 : i64, tpu.core_type = #tpu.core_type<tc>, window_params = [{transform_indices = @transform_0, window_bounds = array<i64: 1, 480, 8>}, {pipeline_mode = #tpu.pipeline_mode<synchronous>, transform_indices = @transform_1, window_bounds = array<i64: 480, 1>}, {pipeline_mode = #tpu.pipeline_mode<synchronous>, transform_indices = @transform_2, window_bounds = array<i64: 72, 8>}, {transform_indices = @transform_3, window_bounds = array<i64: 1, 480, 8>}, {transform_indices = @transform_4, window_bounds = array<i64: 1, 2, 8>}]} {
    %c0 = arith.constant 0 : index
    %c0_0 = arith.constant 0 : index
    %c0_1 = arith.constant 0 : index
    %0 = vector.load %arg1[%c0, %c0_0, %c0_1] : memref<1x480x8xf32, #tpu.memory_space<vmem>>, vector<1x480x8xf32>
    %1 = vector.shape_cast %0 : vector<1x480x8xf32> to vector<480x8xf32>
    %cst = arith.constant 0.000000e+00 : f32
    %2 = vector.broadcast %cst : f32 to vector<1x8xf32>
    %3 = vector.extract_strided_slice %1 {offsets = [0, 0], sizes = [479, 8], strides = [1, 1]} : vector<480x8xf32> to vector<479x8xf32>
    %4 = tpu.concatenate %2, %3 in 0 : vector<1x8xf32>, vector<479x8xf32> -> vector<480x8xf32>
    %5 = vector.extract_strided_slice %1 {offsets = [1, 0], sizes = [479, 8], strides = [1, 1]} : vector<480x8xf32> to vector<479x8xf32>
    %6 = tpu.concatenate %5, %2 in 0 : vector<479x8xf32>, vector<1x8xf32> -> vector<480x8xf32>
    %7 = vector.extract_strided_slice %4 {offsets = [0, 0], sizes = [432, 8], strides = [1, 1]} : vector<480x8xf32> to vector<432x8xf32>
    %8 = vector.extract_strided_slice %1 {offsets = [0, 0], sizes = [432, 8], strides = [1, 1]} : vector<480x8xf32> to vector<432x8xf32>
    %9 = vector.extract_strided_slice %6 {offsets = [0, 0], sizes = [432, 8], strides = [1, 1]} : vector<480x8xf32> to vector<432x8xf32>
    %10 = vector.extract_strided_slice %4 {offsets = [24, 0], sizes = [432, 8], strides = [1, 1]} : vector<480x8xf32> to vector<432x8xf32>
    %11 = vector.extract_strided_slice %1 {offsets = [24, 0], sizes = [432, 8], strides = [1, 1]} : vector<480x8xf32> to vector<432x8xf32>
    %12 = vector.extract_strided_slice %6 {offsets = [24, 0], sizes = [432, 8], strides = [1, 1]} : vector<480x8xf32> to vector<432x8xf32>
    %13 = vector.extract_strided_slice %4 {offsets = [48, 0], sizes = [432, 8], strides = [1, 1]} : vector<480x8xf32> to vector<432x8xf32>
    %14 = vector.extract_strided_slice %1 {offsets = [48, 0], sizes = [432, 8], strides = [1, 1]} : vector<480x8xf32> to vector<432x8xf32>
    %15 = vector.extract_strided_slice %6 {offsets = [48, 0], sizes = [432, 8], strides = [1, 1]} : vector<480x8xf32> to vector<432x8xf32>
    %16 = tpu.concatenate %7, %8, %9, %10, %11, %12, %13, %14, %15 in 1 : vector<432x8xf32>, vector<432x8xf32>, vector<432x8xf32>, vector<432x8xf32>, vector<432x8xf32>, vector<432x8xf32>, vector<432x8xf32>, vector<432x8xf32>, vector<432x8xf32> -> vector<432x72xf32>
    %17 = arith.truncf %16 : vector<432x72xf32> to vector<432x72xbf16>
    %c0_2 = arith.constant 0 : index
    %c0_3 = arith.constant 0 : index
    %18 = vector.load %arg3[%c0_2, %c0_3] : memref<72x8xbf16, #tpu.memory_space<vmem>>, vector<72x8xbf16>
    %cst_4 = arith.constant dense<0.000000e+00> : vector<432x8xf32>
    %19 = tpu.matmul %17, %18, %cst_4 {dimension_numbers = #tpu.dot_dimension_numbers<[1], [0], [0], [1], [0, 0, 1, 1], [], []>} : vector<432x72xbf16>, vector<72x8xbf16>, vector<432x8xf32> -> vector<432x8xf32>
    %cst_5 = arith.constant 0.000000e+00 : f32
    %20 = vector.broadcast %cst_5 : f32 to vector<24x8xf32>
    %c0_6 = arith.constant 0 : index
    %c0_7 = arith.constant 0 : index
    %c0_8 = arith.constant 0 : index
    %21 = vector.load %arg4[%c0_6, %c0_7, %c0_8] : memref<1x480x8xf32, #tpu.memory_space<vmem>>, vector<1x24x8xf32>
    %22 = vector.shape_cast %21 : vector<1x24x8xf32> to vector<24x8xf32>
    %23 = vector.shape_cast %20 : vector<24x8xf32> to vector<1x24x8xf32>
    tpu.vector_store %arg4[%c0_6, %c0_7, %c0_8], %23 {strides = array<i32>} : memref<1x480x8xf32, #tpu.memory_space<vmem>>, vector<1x24x8xf32>,
    %c0_9 = arith.constant 0 : index
    %c24 = arith.constant 24 : index
    %c0_10 = arith.constant 0 : index
    %24 = vector.load %arg4[%c0_9, %c24, %c0_10] : memref<1x480x8xf32, #tpu.memory_space<vmem>>, vector<1x432x8xf32>
    %25 = vector.shape_cast %24 : vector<1x432x8xf32> to vector<432x8xf32>
    %26 = vector.shape_cast %19 : vector<432x8xf32> to vector<1x432x8xf32>
    tpu.vector_store %arg4[%c0_9, %c24, %c0_10], %26 {strides = array<i32>} : memref<1x480x8xf32, #tpu.memory_space<vmem>>, vector<1x432x8xf32>,
    %c0_11 = arith.constant 0 : index
    %c456 = arith.constant 456 : index
    %c0_12 = arith.constant 0 : index
    %27 = vector.load %arg4[%c0_11, %c456, %c0_12] : memref<1x480x8xf32, #tpu.memory_space<vmem>>, vector<1x24x8xf32>
    %28 = vector.shape_cast %27 : vector<1x24x8xf32> to vector<24x8xf32>
    %29 = vector.shape_cast %20 : vector<24x8xf32> to vector<1x24x8xf32>
    tpu.vector_store %arg4[%c0_11, %c456, %c0_12], %29 {strides = array<i32>} : memref<1x480x8xf32, #tpu.memory_space<vmem>>, vector<1x24x8xf32>,
    %c24_13 = arith.constant 24 : index
    %c0_14 = arith.constant 0 : index
    %30 = vector.load %arg2[%c24_13, %c0_14] : memref<480x1xf32, #tpu.memory_space<vmem>>, vector<432x1xf32>
    %31 = vector.broadcast %30 : vector<432x1xf32> to vector<432x8xf32>
    %32 = arith.mulf %19, %31 : vector<432x8xf32>
    %cst_15 = arith.constant dense<0.000000e+00> : vector<8xf32>
    %33 = vector.multi_reduction <add>, %32, %cst_15 [0] : vector<432x8xf32> to vector<8xf32>
    %34 = vector.shape_cast %33 : vector<8xf32> to vector<1x8xf32>
    %35 = arith.mulf %32, %19 : vector<432x8xf32>
    %cst_16 = arith.constant dense<0.000000e+00> : vector<8xf32>
    %36 = vector.multi_reduction <add>, %35, %cst_16 [0] : vector<432x8xf32> to vector<8xf32>
    %37 = vector.shape_cast %36 : vector<8xf32> to vector<1x8xf32>
    %38 = tpu.concatenate %34, %37 in 0 : vector<1x8xf32>, vector<1x8xf32> -> vector<2x8xf32>
    %c0_17 = arith.constant 0 : index
    %c0_18 = arith.constant 0 : index
    %c0_19 = arith.constant 0 : index
    %39 = vector.load %arg5[%c0_17, %c0_18, %c0_19] : memref<1x2x8xf32, #tpu.memory_space<vmem>>, vector<1x2x8xf32>
    %40 = vector.shape_cast %39 : vector<1x2x8xf32> to vector<2x8xf32>
    %41 = vector.shape_cast %38 : vector<2x8xf32> to vector<1x2x8xf32>
    tpu.vector_store %arg5[%c0_17, %c0_18, %c0_19], %41 {strides = array<i32>} : memref<1x2x8xf32, #tpu.memory_space<vmem>>, vector<1x2x8xf32>,
    return
  }
  func.func @transform_0(%arg0: i32) -> (i32, i32, i32) {
    %c0_i32 = arith.constant 0 : i32
    %c0_i32_0 = arith.constant 0 : i32
    %c0_i32_1 = arith.constant 0 : i32
    return %arg0, %c0_i32, %c0_i32_0 : i32, i32, i32
  }
  func.func @transform_1(%arg0: i32) -> (i32, i32) {
    %c0_i32 = arith.constant 0 : i32
    %c0_i32_0 = arith.constant 0 : i32
    %c0_i32_1 = arith.constant 0 : i32
    return %c0_i32, %c0_i32_0 : i32, i32
  }
  func.func @transform_2(%arg0: i32) -> (i32, i32) {
    %c0_i32 = arith.constant 0 : i32
    %c0_i32_0 = arith.constant 0 : i32
    %c0_i32_1 = arith.constant 0 : i32
    return %c0_i32, %c0_i32_0 : i32, i32
  }
  func.func @transform_3(%arg0: i32) -> (i32, i32, i32) {
    %c0_i32 = arith.constant 0 : i32
    %c0_i32_0 = arith.constant 0 : i32
    %c0_i32_1 = arith.constant 0 : i32
    return %arg0, %c0_i32, %c0_i32_0 : i32, i32, i32
  }
  func.func @transform_4(%arg0: i32) -> (i32, i32, i32) {
    %c0_i32 = arith.constant 0 : i32
    %c0_i32_0 = arith.constant 0 : i32
    %c0_i32_1 = arith.constant 0 : i32
    return %arg0, %c0_i32, %c0_i32_0 : i32, i32, i32
  }
}

module attributes {stable_mosaic.version = 11 : i64} {
  func.func @_bn_relu_conv_stats_kernel(%arg0: i32, %arg1: memref<1x480x8xf32, #tpu.memory_space<vmem>>, %arg2: memref<480x1xf32, #tpu.memory_space<vmem>>, %arg3: memref<72x8xbf16, #tpu.memory_space<vmem>>, %arg4: memref<1x8xf32, #tpu.memory_space<vmem>>, %arg5: memref<1x8xf32, #tpu.memory_space<vmem>>, %arg6: memref<1x432x8xf32, #tpu.memory_space<vmem>>, %arg7: memref<1x2x8xf32, #tpu.memory_space<vmem>>) attributes {dimension_semantics = [#tpu.dimension_semantics<parallel>], iteration_bounds = array<i64: 2>, scalar_prefetch = 0 : i64, scratch_operands = 0 : i64, tpu.core_type = #tpu.core_type<tc>, window_params = [{transform_indices = @transform_0, window_bounds = array<i64: 1, 480, 8>}, {pipeline_mode = #tpu.pipeline_mode<synchronous>, transform_indices = @transform_1, window_bounds = array<i64: 480, 1>}, {pipeline_mode = #tpu.pipeline_mode<synchronous>, transform_indices = @transform_2, window_bounds = array<i64: 72, 8>}, {pipeline_mode = #tpu.pipeline_mode<synchronous>, transform_indices = @transform_3, window_bounds = array<i64: 1, 8>}, {pipeline_mode = #tpu.pipeline_mode<synchronous>, transform_indices = @transform_4, window_bounds = array<i64: 1, 8>}, {transform_indices = @transform_5, window_bounds = array<i64: 1, 432, 8>}, {transform_indices = @transform_6, window_bounds = array<i64: 1, 2, 8>}]} {
    %c0 = arith.constant 0 : index
    %c0_0 = arith.constant 0 : index
    %c0_1 = arith.constant 0 : index
    %0 = vector.load %arg1[%c0, %c0_0, %c0_1] : memref<1x480x8xf32, #tpu.memory_space<vmem>>, vector<1x480x8xf32>
    %1 = vector.shape_cast %0 : vector<1x480x8xf32> to vector<480x8xf32>
    %c0_2 = arith.constant 0 : index
    %c0_3 = arith.constant 0 : index
    %2 = vector.load %arg2[%c0_2, %c0_3] : memref<480x1xf32, #tpu.memory_space<vmem>>, vector<480x1xf32>
    %c0_4 = arith.constant 0 : index
    %c0_5 = arith.constant 0 : index
    %3 = vector.load %arg4[%c0_4, %c0_5] : memref<1x8xf32, #tpu.memory_space<vmem>>, vector<1x8xf32>
    %4 = vector.broadcast %3 : vector<1x8xf32> to vector<480x8xf32>
    %5 = arith.mulf %1, %4 : vector<480x8xf32>
    %c0_6 = arith.constant 0 : index
    %c0_7 = arith.constant 0 : index
    %6 = vector.load %arg5[%c0_6, %c0_7] : memref<1x8xf32, #tpu.memory_space<vmem>>, vector<1x8xf32>
    %7 = vector.broadcast %6 : vector<1x8xf32> to vector<480x8xf32>
    %8 = arith.addf %5, %7 : vector<480x8xf32>
    %cst = arith.constant 0.000000e+00 : f32
    %9 = vector.broadcast %cst : f32 to vector<480x8xf32>
    %10 = arith.maximumf %8, %9 : vector<480x8xf32>
    %11 = vector.broadcast %2 : vector<480x1xf32> to vector<480x8xf32>
    %12 = arith.mulf %10, %11 : vector<480x8xf32>
    %cst_8 = arith.constant 0.000000e+00 : f32
    %13 = vector.broadcast %cst_8 : f32 to vector<1x8xf32>
    %14 = vector.extract_strided_slice %12 {offsets = [0, 0], sizes = [479, 8], strides = [1, 1]} : vector<480x8xf32> to vector<479x8xf32>
    %15 = tpu.concatenate %13, %14 in 0 : vector<1x8xf32>, vector<479x8xf32> -> vector<480x8xf32>
    %16 = vector.extract_strided_slice %12 {offsets = [1, 0], sizes = [479, 8], strides = [1, 1]} : vector<480x8xf32> to vector<479x8xf32>
    %17 = tpu.concatenate %16, %13 in 0 : vector<479x8xf32>, vector<1x8xf32> -> vector<480x8xf32>
    %18 = vector.extract_strided_slice %15 {offsets = [0, 0], sizes = [432, 8], strides = [1, 1]} : vector<480x8xf32> to vector<432x8xf32>
    %19 = vector.extract_strided_slice %12 {offsets = [0, 0], sizes = [432, 8], strides = [1, 1]} : vector<480x8xf32> to vector<432x8xf32>
    %20 = vector.extract_strided_slice %17 {offsets = [0, 0], sizes = [432, 8], strides = [1, 1]} : vector<480x8xf32> to vector<432x8xf32>
    %21 = vector.extract_strided_slice %15 {offsets = [24, 0], sizes = [432, 8], strides = [1, 1]} : vector<480x8xf32> to vector<432x8xf32>
    %22 = vector.extract_strided_slice %12 {offsets = [24, 0], sizes = [432, 8], strides = [1, 1]} : vector<480x8xf32> to vector<432x8xf32>
    %23 = vector.extract_strided_slice %17 {offsets = [24, 0], sizes = [432, 8], strides = [1, 1]} : vector<480x8xf32> to vector<432x8xf32>
    %24 = vector.extract_strided_slice %15 {offsets = [48, 0], sizes = [432, 8], strides = [1, 1]} : vector<480x8xf32> to vector<432x8xf32>
    %25 = vector.extract_strided_slice %12 {offsets = [48, 0], sizes = [432, 8], strides = [1, 1]} : vector<480x8xf32> to vector<432x8xf32>
    %26 = vector.extract_strided_slice %17 {offsets = [48, 0], sizes = [432, 8], strides = [1, 1]} : vector<480x8xf32> to vector<432x8xf32>
    %27 = tpu.concatenate %18, %19, %20, %21, %22, %23, %24, %25, %26 in 1 : vector<432x8xf32>, vector<432x8xf32>, vector<432x8xf32>, vector<432x8xf32>, vector<432x8xf32>, vector<432x8xf32>, vector<432x8xf32>, vector<432x8xf32>, vector<432x8xf32> -> vector<432x72xf32>
    %28 = arith.truncf %27 : vector<432x72xf32> to vector<432x72xbf16>
    %c0_9 = arith.constant 0 : index
    %c0_10 = arith.constant 0 : index
    %29 = vector.load %arg3[%c0_9, %c0_10] : memref<72x8xbf16, #tpu.memory_space<vmem>>, vector<72x8xbf16>
    %cst_11 = arith.constant dense<0.000000e+00> : vector<432x8xf32>
    %30 = tpu.matmul %28, %29, %cst_11 {dimension_numbers = #tpu.dot_dimension_numbers<[1], [0], [0], [1], [0, 0, 1, 1], [], []>} : vector<432x72xbf16>, vector<72x8xbf16>, vector<432x8xf32> -> vector<432x8xf32>
    %c0_12 = arith.constant 0 : index
    %c0_13 = arith.constant 0 : index
    %c0_14 = arith.constant 0 : index
    %31 = vector.load %arg6[%c0_12, %c0_13, %c0_14] : memref<1x432x8xf32, #tpu.memory_space<vmem>>, vector<1x432x8xf32>
    %32 = vector.shape_cast %31 : vector<1x432x8xf32> to vector<432x8xf32>
    %33 = vector.shape_cast %30 : vector<432x8xf32> to vector<1x432x8xf32>
    tpu.vector_store %arg6[%c0_12, %c0_13, %c0_14], %33 {strides = array<i32>} : memref<1x432x8xf32, #tpu.memory_space<vmem>>, vector<1x432x8xf32>,
    %34 = vector.extract_strided_slice %2 {offsets = [24, 0], sizes = [432, 1], strides = [1, 1]} : vector<480x1xf32> to vector<432x1xf32>
    %35 = vector.broadcast %34 : vector<432x1xf32> to vector<432x8xf32>
    %36 = arith.mulf %30, %35 : vector<432x8xf32>
    %cst_15 = arith.constant dense<0.000000e+00> : vector<8xf32>
    %37 = vector.multi_reduction <add>, %36, %cst_15 [0] : vector<432x8xf32> to vector<8xf32>
    %38 = vector.shape_cast %37 : vector<8xf32> to vector<1x8xf32>
    %39 = arith.mulf %36, %30 : vector<432x8xf32>
    %cst_16 = arith.constant dense<0.000000e+00> : vector<8xf32>
    %40 = vector.multi_reduction <add>, %39, %cst_16 [0] : vector<432x8xf32> to vector<8xf32>
    %41 = vector.shape_cast %40 : vector<8xf32> to vector<1x8xf32>
    %42 = tpu.concatenate %38, %41 in 0 : vector<1x8xf32>, vector<1x8xf32> -> vector<2x8xf32>
    %c0_17 = arith.constant 0 : index
    %c0_18 = arith.constant 0 : index
    %c0_19 = arith.constant 0 : index
    %43 = vector.load %arg7[%c0_17, %c0_18, %c0_19] : memref<1x2x8xf32, #tpu.memory_space<vmem>>, vector<1x2x8xf32>
    %44 = vector.shape_cast %43 : vector<1x2x8xf32> to vector<2x8xf32>
    %45 = vector.shape_cast %42 : vector<2x8xf32> to vector<1x2x8xf32>
    tpu.vector_store %arg7[%c0_17, %c0_18, %c0_19], %45 {strides = array<i32>} : memref<1x2x8xf32, #tpu.memory_space<vmem>>, vector<1x2x8xf32>,
    return
  }
  func.func @transform_0(%arg0: i32) -> (i32, i32, i32) {
    %c0_i32 = arith.constant 0 : i32
    %c0_i32_0 = arith.constant 0 : i32
    %c0_i32_1 = arith.constant 0 : i32
    return %arg0, %c0_i32, %c0_i32_0 : i32, i32, i32
  }
  func.func @transform_1(%arg0: i32) -> (i32, i32) {
    %c0_i32 = arith.constant 0 : i32
    %c0_i32_0 = arith.constant 0 : i32
    %c0_i32_1 = arith.constant 0 : i32
    return %c0_i32, %c0_i32_0 : i32, i32
  }
  func.func @transform_2(%arg0: i32) -> (i32, i32) {
    %c0_i32 = arith.constant 0 : i32
    %c0_i32_0 = arith.constant 0 : i32
    %c0_i32_1 = arith.constant 0 : i32
    return %c0_i32, %c0_i32_0 : i32, i32
  }
  func.func @transform_3(%arg0: i32) -> (i32, i32) {
    %c0_i32 = arith.constant 0 : i32
    %c0_i32_0 = arith.constant 0 : i32
    %c0_i32_1 = arith.constant 0 : i32
    return %c0_i32, %c0_i32_0 : i32, i32
  }
  func.func @transform_4(%arg0: i32) -> (i32, i32) {
    %c0_i32 = arith.constant 0 : i32
    %c0_i32_0 = arith.constant 0 : i32
    %c0_i32_1 = arith.constant 0 : i32
    return %c0_i32, %c0_i32_0 : i32, i32
  }
  func.func @transform_5(%arg0: i32) -> (i32, i32, i32) {
    %c0_i32 = arith.constant 0 : i32
    %c0_i32_0 = arith.constant 0 : i32
    %c0_i32_1 = arith.constant 0 : i32
    return %arg0, %c0_i32, %c0_i32_0 : i32, i32, i32
  }
  func.func @transform_6(%arg0: i32) -> (i32, i32, i32) {
    %c0_i32 = arith.constant 0 : i32
    %c0_i32_0 = arith.constant 0 : i32
    %c0_i32_1 = arith.constant 0 : i32
    return %arg0, %c0_i32, %c0_i32_0 : i32, i32, i32
  }
}

module attributes {stable_mosaic.version = 11 : i64} {
  func.func @_bn_residual_relu_kernel(%arg0: i32, %arg1: memref<1x18x192xf32, #tpu.memory_space<vmem>>, %arg2: memref<1x20x192xf32, #tpu.memory_space<vmem>>, %arg3: memref<1x192xf32, #tpu.memory_space<vmem>>, %arg4: memref<1x192xf32, #tpu.memory_space<vmem>>, %arg5: memref<1x18x192xf32, #tpu.memory_space<vmem>>) attributes {dimension_semantics = [#tpu.dimension_semantics<parallel>], iteration_bounds = array<i64: 2>, scalar_prefetch = 0 : i64, scratch_operands = 0 : i64, tpu.core_type = #tpu.core_type<tc>, window_params = [{transform_indices = @transform_0, window_bounds = array<i64: 1, 18, 192>}, {transform_indices = @transform_1, window_bounds = array<i64: 1, 20, 192>}, {pipeline_mode = #tpu.pipeline_mode<synchronous>, transform_indices = @transform_2, window_bounds = array<i64: 1, 192>}, {pipeline_mode = #tpu.pipeline_mode<synchronous>, transform_indices = @transform_3, window_bounds = array<i64: 1, 192>}, {transform_indices = @transform_4, window_bounds = array<i64: 1, 18, 192>}]} {
    %c0 = arith.constant 0 : index
    %c0_0 = arith.constant 0 : index
    %c0_1 = arith.constant 0 : index
    %0 = vector.load %arg1[%c0, %c0_0, %c0_1] : memref<1x18x192xf32, #tpu.memory_space<vmem>>, vector<1x18x192xf32>
    %1 = vector.shape_cast %0 : vector<1x18x192xf32> to vector<18x192xf32>
    %c0_2 = arith.constant 0 : index
    %c0_3 = arith.constant 0 : index
    %c0_4 = arith.constant 0 : index
    %2 = vector.load %arg2[%c0_2, %c0_3, %c0_4] : memref<1x20x192xf32, #tpu.memory_space<vmem>>, vector<1x20x192xf32>
    %3 = vector.shape_cast %2 : vector<1x20x192xf32> to vector<20x192xf32>
    %4 = vector.extract_strided_slice %3 {offsets = [1, 0], sizes = [18, 192], strides = [1, 1]} : vector<20x192xf32> to vector<18x192xf32>
    %c0_5 = arith.constant 0 : index
    %c0_6 = arith.constant 0 : index
    %5 = vector.load %arg3[%c0_5, %c0_6] : memref<1x192xf32, #tpu.memory_space<vmem>>, vector<1x192xf32>
    %6 = vector.broadcast %5 : vector<1x192xf32> to vector<18x192xf32>
    %7 = arith.mulf %1, %6 : vector<18x192xf32>
    %c0_7 = arith.constant 0 : index
    %c0_8 = arith.constant 0 : index
    %8 = vector.load %arg4[%c0_7, %c0_8] : memref<1x192xf32, #tpu.memory_space<vmem>>, vector<1x192xf32>
    %9 = vector.broadcast %8 : vector<1x192xf32> to vector<18x192xf32>
    %10 = arith.addf %7, %9 : vector<18x192xf32>
    %11 = arith.addf %10, %4 : vector<18x192xf32>
    %cst = arith.constant 0.000000e+00 : f32
    %12 = vector.broadcast %cst : f32 to vector<18x192xf32>
    %13 = arith.maximumf %11, %12 : vector<18x192xf32>
    %c0_9 = arith.constant 0 : index
    %c0_10 = arith.constant 0 : index
    %c0_11 = arith.constant 0 : index
    %14 = vector.load %arg5[%c0_9, %c0_10, %c0_11] : memref<1x18x192xf32, #tpu.memory_space<vmem>>, vector<1x18x192xf32>
    %15 = vector.shape_cast %14 : vector<1x18x192xf32> to vector<18x192xf32>
    %16 = vector.shape_cast %13 : vector<18x192xf32> to vector<1x18x192xf32>
    tpu.vector_store %arg5[%c0_9, %c0_10, %c0_11], %16 {strides = array<i32>} : memref<1x18x192xf32, #tpu.memory_space<vmem>>, vector<1x18x192xf32>,
    return
  }
  func.func @transform_0(%arg0: i32) -> (i32, i32, i32) {
    %c0_i32 = arith.constant 0 : i32
    %c0_i32_0 = arith.constant 0 : i32
    %c0_i32_1 = arith.constant 0 : i32
    return %arg0, %c0_i32, %c0_i32_0 : i32, i32, i32
  }
  func.func @transform_1(%arg0: i32) -> (i32, i32, i32) {
    %c0_i32 = arith.constant 0 : i32
    %c0_i32_0 = arith.constant 0 : i32
    %c0_i32_1 = arith.constant 0 : i32
    return %arg0, %c0_i32, %c0_i32_0 : i32, i32, i32
  }
  func.func @transform_2(%arg0: i32) -> (i32, i32) {
    %c0_i32 = arith.constant 0 : i32
    %c0_i32_0 = arith.constant 0 : i32
    %c0_i32_1 = arith.constant 0 : i32
    return %c0_i32, %c0_i32_0 : i32, i32
  }
  func.func @transform_3(%arg0: i32) -> (i32, i32) {
    %c0_i32 = arith.constant 0 : i32
    %c0_i32_0 = arith.constant 0 : i32
    %c0_i32_1 = arith.constant 0 : i32
    return %c0_i32, %c0_i32_0 : i32, i32
  }
  func.func @transform_4(%arg0: i32) -> (i32, i32, i32) {
    %c0_i32 = arith.constant 0 : i32
    %c0_i32_0 = arith.constant 0 : i32
    %c0_i32_1 = arith.constant 0 : i32
    return %arg0, %c0_i32, %c0_i32_0 : i32, i32, i32
  }
}

</mosaic_0001>

<bundles_post_ra>
// kernel: residual_block.5
= control target key start
LH: loop header
LB: loop body
LE: loop exit
PB: predicated region body
PF: predicated region fallthrough
CT: control target
= control target key end

     0   :  { %s428_s15 = smov 0   ;;  %s471_s0 = inlined_call_operand.vmem [shape: f32[2,18,192], index: 0, kind: input, shape index: {}]   ;;  %s472_s1 = inlined_call_operand.vmem [shape: f32[2,20,192], index: 1, kind: input, shape index: {}]   ;;  %s473_s2 = inlined_call_operand.vmem [shape: f32[1,192], index: 2, kind: input, shape index: {}]   ;;  %s474_s3 = inlined_call_operand.vmem [shape: f32[1,192], index: 3, kind: input, shape index: {}]   ;;  %s475_s4 = inlined_call_operand.vmem [shape: f32[2,18,192], index: 4, kind: output, shape index: {}]  }
   0x1 LB: > { %s376_s16 = sadd.s32 4294967295, %s401_s15   ;;  %p380_p0 = scmp.ge.s32.totalorder %s401_s15, 1  ;;  %s401_s15 = sphi %s428_s15, %s14_s15  }
   0x2   : > { %p172_p1 = scmp.lt.s32.totalorder %s401_s15, 3 }
   0x4   : > { %p173_p2 = pnand %p380_p0, %p172_p1 }
   0x5   : > { %p203_p3 = scmp.lt.s32.totalorder (!%p173_p2), %s376_s16, 1 }
   0x6   : > { %176 = sbr.rel (%p173_p2) target bundleno = 31 (0x1f), region = 36 }
   0xb   : > { %v232_v0 = vlaneseq  ;;  %s477_s16 = smov (!%p203_p3, %s376_s16), 1  ;;  %v230_v2 = vld [vmem:[%s473_s2] sm:$0x3]  ;;  %vm272_vm0 = vcmask 1046528   ;;  %vm302_vm1 = vcmask 523264   ;;  %vm307_vm2 = vcmask 517120  }
   0xc   : > { %v248_v3 = vld [vmem:[%s474_s3] sm:$0x3]  ;;  %s442_s21 = smul.u32 48, %s477_s16 }
   0xd   : > { %v233_v1 = vshrl.u32 %v232_v0, 7 }
   0xe   : > { %s448_s24 = scalar_lea.vmem %s471_s0, %s442_s21  ;;  %s212_s27 = scalar_lea.vmem %s472_s1, %s442_s21 }
   0xf   : > { %v234_v4 = vsub.s32 0, %v233_v1  ;;  %v238_v5 = vsub.s32 1, %v233_v1  ;;  %v218_v9 = vld [vmem:[%s448_s24] sm:$0xff]  ;;  %v226_v11 = vld [vmem:[%s212_s27 + $0x10] sm:$0xff]  ;;  %v219_v16 = vld [vmem:[%s448_s24 + $0x8] sm:$0xff]  ;;  %s217_s30 = scalar_lea.vmem %s475_s4, %s442_s21 }
  0x10   : > { %v224_v10 = vld [vmem:[%s212_s27] sm:$0xff]  ;;  %v274_v15 = vrot.slane %v226_v11, 1  ;;  %v225_v17 = vld [vmem:[%s212_s27 + $0x8] sm:$0xff]  ;;  %v227_v18 = vld [vmem:[%s212_s27 + $0x18] sm:$0xff] }
  0x11   : > { %v235_v6 = vrot.slane %v230_v2, %v234_v4  ;;  %v239_v7 = vrot.slane %v230_v2, %v238_v5  ;;  %v253_v8 = vrot.slane %v248_v3, %v234_v4  ;;  %v257_v12 = vrot.slane %v248_v3, %v238_v5  ;;  %v220_v22 = vld [vmem:[%s448_s24 + $0x10] sm:$0xff]  ;;  %v228_v23 = vld [vmem:[%s212_s27 + $0x20] sm:$0xf]  ;;  %v221_v24 = vld [vmem:[%s448_s24 + $0x18] sm:$0xff] }
  0x12   : > { %v273_v14 = vrot.slane %v224_v10, 1  ;;  %v276_v20 = vrot.slane %v225_v17, 1  ;;  %v277_v21 = vrot.slane %v227_v18, 1  ;;  %v279_v28 = vrot.slane %v228_v23, 1  ;;  %v229_v29 = vld [vmem:[%s212_s27 + $0x28] sm:$0xf] }
  0x13   : > { %v242_v13 = vmul.f32 %v235_v6, %v218_v9  ;;  %v243_v19 = vmul.f32 %v239_v7, %v219_v16  ;;  %v244_v27 = vmul.f32 %v235_v6, %v220_v22  ;;  %v222_v30 = vld [vmem:[%s448_s24 + $0x20] sm:$0x3]  ;;  %v245_v33 = vmul.f32 %v239_v7, %v221_v24  ;;  %v223_v35 = vld [vmem:[%s448_s24 + $0x28] sm:$0x3] }
  0x14   : > { %v275_v26 = vsel %vm272_vm0, %v273_v14, %v274_v15  ;;  %v278_v32 = vsel %vm272_vm0, %v276_v20, %v277_v21  ;;  %v281_v34 = vrot.slane %v229_v29, 1  ;;  %v280_v38 = vsel %vm272_vm0, %v274_v15, %v279_v28 }
  0x15   : > { %v260_v25 = vadd.f32 %v253_v8, %v242_v13  ;;  %v261_v31 = vadd.f32 %v257_v12, %v243_v19  ;;  %v262_v37 = vadd.f32 %v253_v8, %v244_v27  ;;  %v246_v39 = vmul.f32 %v235_v6, %v222_v30 }
  0x16   : > { %v263_v41 = vadd.f32 %v257_v12, %v245_v33  ;;  %v282_v42 = vsel %vm272_vm0, %v277_v21, %v281_v34  ;;  %v247_v43 = vmul.f32 %v239_v7, %v223_v35 }
  0x17   : > { %v289_v36 = vadd.f32 %v275_v26, %v260_v25  ;;  %v290_v40 = vadd.f32 %v278_v32, %v261_v31  ;;  %v291_v45 = vadd.f32 %v280_v38, %v262_v37  ;;  %v264_v46 = vadd.f32 %v253_v8, %v246_v39 }
  0x18   : > { %v292_v48 = vadd.f32 %v282_v42, %v263_v41  ;;  %v265_v49 = vadd.f32 %v257_v12, %v247_v43 }
  0x19   : > { %v295_v44 = vmax.f32 %v289_v36, 0.0  ;;  %v296_v47 = vmax.f32 %v290_v40, 0.0  ;;  %v297_v50 = vmax.f32 %v291_v45, 0.0  ;;  %v293_v51 = vadd.f32 %v279_v28, %v264_v46 }
  0x1a   : > { %v298_v52 = vmax.f32 %v292_v48, 0.0  ;;  %v294_v53 = vadd.f32 %v281_v34, %v265_v49 }
  0x1b   : > { %301 = vst [vmem:[%s217_s30] sm:$0xff] %v295_v44  ;;  %303 = vst.msk [vmem:[%s217_s30 + $0x8] sm:$0xff] %vm302_vm1, %v296_v47  ;;  %v299_v54 = vmax.f32 %v293_v51, 0.0 }
  0x1c   : > { %304 = vst [vmem:[%s217_s30 + $0x10] sm:$0xff] %v297_v50  ;;  %305 = vst.msk [vmem:[%s217_s30 + $0x18] sm:$0xff] %vm302_vm1, %v298_v52  ;;  %v300_v55 = vmax.f32 %v294_v53, 0.0 }
  0x1d   : > { %306 = vst [vmem:[%s217_s30 + $0x20] sm:$0x3] %v299_v54 }
  0x1e   : > { %308 = vst.msk [vmem:[%s217_s30 + $0x28] sm:$0x3] %vm307_vm2, %v300_v55 }
  0x1f PF: > { %s14_s15 = sadd.s32 1, %s401_s15  }
  0x20   : > { %p11_p4 = scmp.ge.s32.totalorder %s14_s15, 4  }
  0x22   :  { %13 = sbr.rel (!%p11_p4) target bundleno = 1 (0x1), region = 69 }

// kernel: residual_block.3
= control target key start
LH: loop header
LB: loop body
LE: loop exit
PB: predicated region body
PF: predicated region fallthrough
CT: control target
= control target key end

     0   :  { %s4974_s15 = smov 0   ;;  %s9016_s0 = inlined_call_operand.vmem [shape: f32[2,480,8], index: 0, kind: input, shape index: {}]   ;;  %s9017_s1 = inlined_call_operand.vmem [shape: f32[480,1], index: 1, kind: input, shape index: {}]   ;;  %s9018_s2 = inlined_call_operand.vmem [shape: bf16[72,8], index: 2, kind: input, shape index: {}]   ;;  %s9019_s3 = inlined_call_operand.vmem [shape: f32[2,480,8], index: 3, kind: output, shape index: {0}]   ;;  %s9020_s4 = inlined_call_operand.vmem [shape: f32[2,2,8], index: 4, kind: output, shape index: {1}]  }
   0x1 LB: > { %s3569_s16 = sadd.s32 4294967295, %s4936_s15   ;;  %p3573_p0 = scmp.ge.s32.totalorder %s4936_s15, 1  ;;  %s4936_s15 = sphi %s4974_s15, %s15_s15  }
   0x2   : > { %p165_p1 = scmp.lt.s32.totalorder %s4936_s15, 3 }
   0x4   : > { %p166_p2 = pnand %p3573_p0, %p165_p1 }
   0x6   : > { %169 = sbr.rel (%p166_p2) target bundleno = 844 (0x34c), region = 32 }
   0xb   : > { %p195_p3 = scmp.lt.s32.totalorder %s3569_s16, 1  ;;  %s4938_s21 = smov 8   ;;  %vm505_vm0 = vcmask 1046528   ;;  %vm330_vm1 = vcmask 1040384   ;;  %vm1924_vm2 = vcmask 64512   ;;  %vm1979_vm3 = vcmask 130048  }
   0xc   : > { %s4939_s22 = smov 16   ;;  %s4940_s23 = smov 24   ;;  %vm2034_vm4 = vcmask 195584   ;;  %vm2089_vm5 = vcmask 261120   ;;  %vm2509_vm6 = vcmask 1043456   ;;  %vm4945_vm7 = vmmov 0  }
   0xd   : > { %s10008_s16 = smov (!%p195_p3, %s3569_s16), 1  ;;  %s4941_s24 = smov 32   ;;  %vm2144_vm8 = vcmask 326656   ;;  %vm2199_vm9 = vcmask 392192   ;;  %vm2254_vm10 = vcmask 457728   ;;  %vm2309_vm11 = vcmask 523264  }
   0xe   : > { %s3771_s17 = smul.u32 480, %s10008_s16  ;;  %s4942_s25 = smov 40   ;;  %vm2427_vm12 = vcmask 588800   ;;  %vm3481_vm13 = vcmask 58368  }
   0xf   : > { %s4943_s26 = smov 48   ;;  %s4946_s11 = smov 64  }
  0x10   : > { %s4990_s20 = scalar_lea.vmem %s9016_s0, %s3771_s17  ;;  %s4947_s12 = smov 56  }
  0x11   : > { %v4993_v0 = vld [vmem:[%s4990_s20 + $0x20] sm:$0xff]  ;;  %v4996_v1 = vld [vmem:[%s4990_s20 + $0x28] sm:$0xff]  ;;  %v5007_v5 = vld [vmem:[%s4990_s20 + $0x30] sm:$0xff] }
  0x12   : > { %9369 = vst [vmem:[#allocation2_spill] sm:$0xff] %v4993_v0  ;;  %v4999_v2 = vld [vmem:[%s4990_s20] sm:$0xff]  ;;  %v3801_v3 = vpack.i.bf16 %v4996_v1, %v4993_v0  ;;  %v5004_v4 = vld [vmem:[%s4990_s20 + $0x8] sm:$0xff]  ;;  %9371 = vst [vmem:[#allocation4_spill] sm:$0xff] %v5007_v5  ;;  %v513_v15 = vrot.slane %v4993_v0, 1  ;;  %v9022_v18 = vrot.slane %v4996_v1, 1 }
  0x13   : > { %9370 = vst [vmem:[#allocation3_spill] sm:$0xff] %v4999_v2  ;;  %v5010_v6 = vld [vmem:[%s4990_s20 + $0x38] sm:$0xff]  ;;  %v3791_v7 = vpack.i.bf16 %v5004_v4, %v4999_v2  ;;  %v5015_v8 = vld [vmem:[%s4990_s20 + $0x10] sm:$0xff]  ;;  %v5035_v16 = vld [vmem:[%s4990_s20 + $0x40] sm:$0xff] }
  0x14   : > { %v5018_v9 = vld [vmem:[%s4990_s20 + $0x18] sm:$0xff]  ;;  %3802 = vrot.lane.b32.xlu1 %v3801_v3, %s4938_s21  ;;  %v3806_v10 = vpack.i.bf16 %v5010_v6, %v5007_v5  ;;  %v5027_v12 = vld [vmem:[%s4990_s20 + $0x50] sm:$0xff]  ;;  %v5038_v17 = vld [vmem:[%s4990_s20 + $0x48] sm:$0xff]  ;;  %v5061_v24 = vsel %vm505_vm0, %v513_v15, %v9022_v18 }
  0x15   : > { %3792 = vrot.lane.b32.xlu0 %v3791_v7, %s4938_s21  ;;  %v3796_v11 = vpack.i.bf16 %v5018_v9, %v5015_v8  ;;  %9372 = vst [vmem:[#allocation5_spill] sm:$0xff] %v5027_v12  ;;  %v5030_v13 = vld [vmem:[%s4990_s20 + $0x58] sm:$0xff]  ;;  %v9021_v14 = vrot.slane %v5018_v9, 1  ;;  %v3811_v20 = vpack.i.bf16 %v5038_v17, %v5035_v16  ;;  %v5048_v21 = vld [vmem:[%s4990_s20 + $0x70] sm:$0xff]  ;;  %9375 = vst [vmem:[#allocation8_spill] sm:$0xff] %v5061_v24 }
  0x16   : > { %v3816_v19 = vpack.i.bf16 %v5030_v13, %v5027_v12  ;;  %9373 = vst [vmem:[#allocation6_spill] sm:$0xff] %v5048_v21  ;;  %v5051_v22 = vld [vmem:[%s4990_s20 + $0x78] sm:$0xff]  ;;  %v5064_v25 = vld [vmem:[%s4990_s20 + $0x60] sm:$0xff]  ;;  %v5067_v26 = vld [vmem:[%s4990_s20 + $0x68] sm:$0xff] }
  0x17   : > { %v5056_v23 = vsel %vm505_vm0, %v9021_v14, %v513_v15  ;;  %v3826_v28 = vpack.i.bf16 %v5051_v22, %v5048_v21  ;;  %v3821_v29 = vpack.i.bf16 %v5067_v26, %v5064_v25  ;;  %v5078_v30 = vld [vmem:[%s4990_s20 + $0x90] sm:$0xff]  ;;  %v5081_v31 = vld [vmem:[%s4990_s20 + $0x98] sm:$0xff]  ;;  %v5084_v32 = vld [vmem:[%s4990_s20 + $0x80] sm:$0xff]  ;;  %v9035_v14 = vrot.slane %v5015_v8, 7 }
  0x18   : > { %3807 = vrot.lane.b32.xlu1 %v3806_v10, %s4938_s21  ;;  %9374 = vst [vmem:[#allocation7_spill] sm:$0xff] %v5056_v23  ;;  %9376 = vst [vmem:[#allocation9_spill] sm:$0xff] %v5078_v30  ;;  %v5087_v33 = vld [vmem:[%s4990_s20 + $0x88] sm:$0xff]  ;;  %v3836_v34 = vpack.i.bf16 %v5081_v31, %v5078_v30  ;;  %v5096_v36 = vld [vmem:[%s4990_s20 + $0xb0] sm:$0xff] }
  0x19   : > { %3797 = vrot.lane.b32.xlu0 %v3796_v11, %s4938_s21  ;;  %v3831_v35 = vpack.i.bf16 %v5087_v33, %v5084_v32  ;;  %9377 = vst [vmem:[#allocation10_spill] sm:$0xff] %v5096_v36  ;;  %v5099_v37 = vld [vmem:[%s4990_s20 + $0xb8] sm:$0xff]  ;;  %v5102_v38 = vld [vmem:[%s4990_s20 + $0xa0] sm:$0xff]  ;;  %v5105_v39 = vld [vmem:[%s4990_s20 + $0xa8] sm:$0xff] }
  0x1a   : > { %9378 = vst [vmem:[#allocation11_spill] sm:$0xff] %v5105_v39  ;;  %v3846_v40 = vpack.i.bf16 %v5099_v37, %v5096_v36  ;;  %v3841_v41 = vpack.i.bf16 %v5105_v39, %v5102_v38  ;;  %v5114_v42 = vld [vmem:[%s4990_s20 + $0xd0] sm:$0xff]  ;;  %v5117_v43 = vld [vmem:[%s4990_s20 + $0xd8] sm:$0xff]  ;;  %v5120_v44 = vld [vmem:[%s4990_s20 + $0xc0] sm:$0xff] }
  0x1b   : > { %9379 = vst [vmem:[#allocation12_spill] sm:$0xff] %v5114_v42  ;;  %9380 = vst [vmem:[#allocation13_spill] sm:$0xff] %v5117_v43  ;;  %v5123_v45 = vld [vmem:[%s4990_s20 + $0xc8] sm:$0xff]  ;;  %v3856_v46 = vpack.i.bf16 %v5117_v43, %v5114_v42  ;;  %v5132_v48 = vld [vmem:[%s4990_s20 + $0xf0] sm:$0xff] }
  0x1c   : > { %3817 = vrot.lane.b32.xlu1 %v3816_v19, %s4938_s21  ;;  %9381 = vst [vmem:[#allocation14_spill] sm:$0xff] %v5123_v45  ;;  %v3851_v47 = vpack.i.bf16 %v5123_v45, %v5120_v44  ;;  %9382 = vst [vmem:[#allocation15_spill] sm:$0xff] %v5132_v48  ;;  %v5135_v49 = vld [vmem:[%s4990_s20 + $0xf8] sm:$0xff]  ;;  %v5138_v50 = vld [vmem:[%s4990_s20 + $0xe0] sm:$0xff] }
  0x1d   : > { %3812 = vrot.lane.b32.xlu0 %v3811_v20, %s4938_s21  ;;  %9383 = vst [vmem:[#allocation16_spill] sm:$0xff] %v5135_v49  ;;  %9384 = vst [vmem:[#allocation17_spill] sm:$0xff] %v5138_v50  ;;  %v5141_v51 = vld [vmem:[%s4990_s20 + $0xe8] sm:$0xff]  ;;  %v3866_v52 = vpack.i.bf16 %v5135_v49, %v5132_v48  ;;  %v5150_v54 = vld [vmem:[%s4990_s20 + $0x110] sm:$0xff] }
  0x1e   : > { %9385 = vst [vmem:[#allocation18_spill] sm:$0xff] %v5141_v51  ;;  %v3861_v53 = vpack.i.bf16 %v5141_v51, %v5138_v50  ;;  %9386 = vst [vmem:[#allocation19_spill] sm:$0xff] %v5150_v54  ;;  %v5153_v55 = vld [vmem:[%s4990_s20 + $0x118] sm:$0xff]  ;;  %v5156_v56 = vld [vmem:[%s4990_s20 + $0x100] sm:$0xff] }
  0x1f   : > { %v5159_v57 = vld [vmem:[%s4990_s20 + $0x108] sm:$0xff]  ;;  %v3876_v58 = vpack.i.bf16 %v5153_v55, %v5150_v54  ;;  %v5168_v60 = vld [vmem:[%s4990_s20 + $0x130] sm:$0xff]  ;;  %v5171_v61 = vld [vmem:[%s4990_s20 + $0x138] sm:$0xff] }
  0x20   : > { %3827 = vrot.lane.b32.xlu1 %v3826_v28, %s4938_s21  ;;  %v3871_v59 = vpack.i.bf16 %v5159_v57, %v5156_v56  ;;  %v5174_v62 = vld [vmem:[%s4990_s20 + $0x120] sm:$0xff]  ;;  %v5177_v63 = vld [vmem:[%s4990_s20 + $0x128] sm:$0xff]  ;;  %v3886_v3 = vpack.i.bf16 %v5171_v61, %v5168_v60  ;;  %v5186_v10 = vld [vmem:[%s4990_s20 + $0x150] sm:$0xff] }
  0x21   : > { %3822 = vrot.lane.b32.xlu0 %v3821_v29, %s4938_s21  ;;  %v3881_v7 = vpack.i.bf16 %v5177_v63, %v5174_v62  ;;  %v5189_v11 = vld [vmem:[%s4990_s20 + $0x158] sm:$0xff]  ;;  %v5192_v15 = vld [vmem:[%s4990_s20 + $0x140] sm:$0xff]  ;;  %v5195_v19 = vld [vmem:[%s4990_s20 + $0x148] sm:$0xff] }
  0x22   : > { %v3896_v20 = vpack.i.bf16 %v5189_v11, %v5186_v10  ;;  %v3891_v28 = vpack.i.bf16 %v5195_v19, %v5192_v15  ;;  %v5204_v29 = vld [vmem:[%s4990_s20 + $0x170] sm:$0xff]  ;;  %v5236_v27 = vld [vmem:[%s4990_s20 + $0x188] sm:$0xff] }
  0x24   : > { %3837 = vrot.lane.b32.xlu1 %v3836_v34, %s4938_s21  ;;  %v5207_v34 = vld [vmem:[%s4990_s20 + $0x178] sm:$0xff] }
  0x25   : > { %3832 = vrot.lane.b32.xlu0 %v3831_v35, %s4938_s21  ;;  %9387 = vst [vmem:[#allocation20_spill] sm:$0xff] %v5207_v34  ;;  %v332_v35 = vrot.slane %v5004_v4, 7 }
  0x28   : > { %3847 = vrot.lane.b32.xlu1 %v3846_v40, %s4938_s21  ;;  %v9028_v40 = vrot.slane %v4999_v2, 7 }
  0x29   : > { %3842 = vrot.lane.b32.xlu0 %v3841_v41, %s4938_s21  ;;  %v5212_v41 = vld [vmem:[%s4990_s20 + $0x160] sm:$0xff] }
  0x2c   : > { %3857 = vrot.lane.b32.xlu1 %v3856_v46, %s4938_s21  ;;  %v5215_v46 = vld [vmem:[%s4990_s20 + $0x168] sm:$0xff] }
  0x2d   : > { %3852 = vrot.lane.b32.xlu0 %v3851_v47, %s4938_s21  ;;  %v507_v47 = vrot.slane %v5004_v4, 1  ;;  %v5230_v4 = vld [vmem:[%s4990_s20 + $0x198] sm:$0xff] }
  0x2e   : > { %9389 = vst [vmem:[#allocation22_spill] sm:$0xff] %v5230_v4 }
  0x30   : > { %3867 = vrot.lane.b32.xlu1 %v3866_v52, %s4938_s21  ;;  %v506_v52 = vrot.slane %v4999_v2, 1 }
  0x31   : > { %3862 = vrot.lane.b32.xlu0 %v3861_v53, %s4938_s21  ;;  %v509_v53 = vrot.slane %v5015_v8, 1 }
  0x32   : > { %v508_v18 = vsel %vm505_vm0, %v506_v52, %v507_v47 }
  0x33   : > { %v510_v0 = vsel %vm505_vm0, %v507_v47, %v509_v53  ;;  %v9392_v47 = vrot.slane %v4996_v1, 1 }
  0x34   : > { %3877 = vrot.lane.b32.xlu1 %v3876_v58, %s4938_s21  ;;  %v3906_v58 = vpack.i.bf16 %v5207_v34, %v5204_v29  ;;  %v517_v34 = vrot.slane %v5007_v5, 1  ;;  %v523_v5 = vrot.slane %v5038_v17, 1 }
  0x35   : > { %3872 = vrot.lane.b32.xlu0 %v3871_v59, %s4938_s21  ;;  %v3901_v59 = vpack.i.bf16 %v5215_v46, %v5212_v41 }
  0x36   : > { %v5268_v52 = vsel %vm505_vm0, %v9392_v47, %v517_v34 }
  0x37   : > { %9393 = vst [vmem:[#allocation25_spill] sm:$0xff] %v5268_v52  ;;  %v3936_v47 = vpack.i.bf16 %v5268_v52, %v5061_v24 }
  0x38   : > { %3887 = vrot.lane.b32.xlu1 %v3886_v3, %s4938_s21  ;;  %v5227_v3 = vld [vmem:[%s4990_s20 + $0x190] sm:$0xff] }
  0x39   : > { %3882 = vrot.lane.b32.xlu0 %v3881_v7, %s4938_s21  ;;  %9388 = vst [vmem:[#allocation21_spill] sm:$0xff] %v5227_v3  ;;  %v5233_v7 = vld [vmem:[%s4990_s20 + $0x180] sm:$0xff] }
  0x3a   : > { %v3911_v2 = vpack.i.bf16 %v5236_v27, %v5233_v7 }
  0x3c   : > { %3897 = vrot.lane.b32.xlu1 %v3896_v20, %s4938_s21  ;;  %v5241_v20 = vsel %vm330_vm1, %v9028_v40, %v332_v35  ;;  %v5254_v40 = vld [vmem:[%s4990_s20 + $0x1a0] sm:$0xff] }
  0x3d   : > { %3892 = vrot.lane.b32.xlu0 %v3891_v28, %s4938_s21  ;;  %9390 = vst [vmem:[#allocation23_spill] sm:$0xff] %v5241_v20  ;;  %v3916_v28 = vpack.i.bf16 %v5230_v4, %v5227_v3  ;;  %v5257_v20 = vld [vmem:[%s4990_s20 + $0x1a8] sm:$0xff]  ;;  %v3926_v4 = vpack.i.bf16 %v510_v0, %v508_v18  ;;  %v525_v3 = vrot.slane %v5027_v12, 1  ;;  %v9394_v0 = vrot.slane %v5018_v9, 1 }
  0x3e   : > { %v531_v12 = vrot.slane %v5067_v26, 1 }
  0x3f   : > { %v512_v18 = vsel %vm505_vm0, %v509_v53, %v9394_v0  ;;  %v533_v53 = vrot.slane %v5048_v21, 1 }
  0x40   : > { %3907 = vrot.lane.b32.xlu1 %v3906_v58, %s4938_s21  ;;  %v5262_v58 = vsel %vm330_vm1, %v332_v35, %v9035_v14  ;;  %v3921_v35 = vpack.i.bf16 %v5257_v20, %v5254_v40  ;;  %v529_v14 = vrot.slane %v5064_v25, 1  ;;  %v3931_v0 = vpack.i.bf16 %v5056_v23, %v512_v18 }
  0x41   : > { %3902 = vrot.lane.b32.xlu0 %v3901_v59, %s4938_s21  ;;  %9391 = vst [vmem:[#allocation24_spill] sm:$0xff] %v5262_v58  ;;  %v521_v59 = vrot.slane %v5035_v16, 1  ;;  %v537_v18 = vrot.slane %v5084_v32, 1 }
  0x42   : > { %v5307_v21 = vsel %vm505_vm0, %v529_v14, %v531_v12 }
  0x43   : > { %v5285_v58 = vsel %vm505_vm0, %v521_v59, %v523_v5  ;;  %9400 = vst [vmem:[#allocation31_spill] sm:$0xff] %v5307_v21 }
  0x44   : > { %3917 = vrot.lane.b32.xlu1 %v3916_v28, %s4938_s21  ;;  %v519_v28 = vrot.slane %v5010_v6, 1  ;;  %9395 = vst [vmem:[#allocation26_spill] sm:$0xff] %v5285_v58 }
  0x45   : > { %3912 = vrot.lane.b32.xlu0 %v3911_v2, %s4938_s21  ;;  %v5288_v2 = vsel %vm505_vm0, %v523_v5, %v525_v3 }
  0x46   : > { %9396 = vst [vmem:[#allocation27_spill] sm:$0xff] %v5288_v2  ;;  %v5295_v24 = vsel %vm505_vm0, %v517_v34, %v519_v28  ;;  %v5298_v52 = vsel %vm505_vm0, %v519_v28, %v521_v59  ;;  %v5303_v5 = vpack.i.bf16 %v5288_v2, %v5285_v58  ;;  %v535_v34 = vrot.slane %v5051_v22, 1 }
  0x47   : > { %9397 = vst [vmem:[#allocation28_spill] sm:$0xff] %v5295_v24  ;;  %9398 = vst [vmem:[#allocation29_spill] sm:$0xff] %v5298_v52  ;;  %v5317_v59 = vpack.i.bf16 %v5298_v52, %v5295_v24  ;;  %v539_v28 = vrot.slane %v5087_v33, 1 }
  0x48   : > { %3927 = vrot.lane.b32.xlu1 %v3926_v4, %s4939_s22  ;;  %v527_v4 = vrot.slane %v5030_v13, 1  ;;  %9399 = vst [vmem:[#allocation30_spill] sm:$0xff] %v5303_v5  ;;  %v5335_v52 = vsel %vm505_vm0, %v533_v53, %v535_v34  ;;  %v5338_v2 = vsel %vm505_vm0, %v535_v34, %v537_v18  ;;  %v549_v34 = vrot.slane %v5096_v36, 1 }
  0x49   : > { %3922 = vrot.lane.b32.xlu0 %v3921_v35, %s4938_s21  ;;  %v5310_v35 = vsel %vm505_vm0, %v531_v12, %v533_v53  ;;  %9402 = vst [vmem:[#allocation33_spill] sm:$0xff] %v5317_v59  ;;  %9406 = vst [vmem:[#allocation37_spill] sm:$0xff] %v5335_v52 }
  0x4a   : > { %9401 = vst [vmem:[#allocation32_spill] sm:$0xff] %v5310_v35  ;;  %v5322_v58 = vsel %vm505_vm0, %v525_v3, %v527_v4  ;;  %v5325_v12 = vsel %vm505_vm0, %v527_v4, %v529_v14  ;;  %v5329_v23 = vpack.i.bf16 %v5310_v35, %v5307_v21  ;;  %9407 = vst [vmem:[#allocation38_spill] sm:$0xff] %v5338_v2  ;;  %v545_v3 = vrot.slane %v5102_v38, 1 }
  0x4b   : > { %9403 = vst [vmem:[#allocation34_spill] sm:$0xff] %v5322_v58  ;;  %9404 = vst [vmem:[#allocation35_spill] sm:$0xff] %v5325_v12  ;;  %v547_v14 = vrot.slane %v5105_v39, 1  ;;  %v5346_v4 = vpack.i.bf16 %v5325_v12, %v5322_v58  ;;  %v5349_v21 = vsel %vm505_vm0, %v537_v18, %v539_v28  ;;  %v565_v12 = vrot.slane %v5132_v48, 1  ;;  %v5400_v58 = vld [vmem:[%s4990_s20 + $0x1c0] sm:$0xff] }
  0x4c   : > { %3937 = vrot.lane.b32.xlu1 %v3936_v47, %s4939_s22  ;;  %v541_v47 = vrot.slane %v5078_v30, 1  ;;  %9405 = vst [vmem:[#allocation36_spill] sm:$0xff] %v5329_v23  ;;  %9409 = vst [vmem:[#allocation40_spill] sm:$0xff] %v5349_v21  ;;  %v567_v48 = vrot.slane %v5135_v49, 1  ;;  %v573_v49 = vrot.slane %v5150_v54, 1 }
  0x4d   : > { %3932 = vrot.lane.b32.xlu0 %v3931_v0, %s4939_s22  ;;  %v543_v0 = vrot.slane %v5081_v31, 1  ;;  %9408 = vst [vmem:[#allocation39_spill] sm:$0xff] %v5346_v4  ;;  %9420 = vst [vmem:[#allocation51_spill] sm:$0xff] %v5400_v58 }
  0x4e   : > { %v5352_v53 = vsel %vm505_vm0, %v539_v28, %v541_v47 }
  0x4f   : > { %9410 = vst [vmem:[#allocation41_spill] sm:$0xff] %v5352_v53  ;;  %v5360_v35 = vsel %vm505_vm0, %v541_v47, %v543_v0  ;;  %v5366_v18 = vpack.i.bf16 %v5352_v53, %v5349_v21  ;;  %v5369_v28 = vsel %vm505_vm0, %v543_v0, %v545_v3  ;;  %v5378_v47 = vsel %vm505_vm0, %v547_v14, %v549_v34 }
  0x50   : > { %3947 = vrot.lane.b32.xlu1 %v5303_v5, %s4939_s22  ;;  %v5357_v5 = vpack.i.bf16 %v5338_v2, %v5335_v52  ;;  %9412 = vst [vmem:[#allocation43_spill] sm:$0xff] %v5360_v35  ;;  %9414 = vst [vmem:[#allocation45_spill] sm:$0xff] %v5369_v28  ;;  %v551_v2 = vrot.slane %v5099_v37, 1  ;;  %v555_v53 = vrot.slane %v5123_v45, 1  ;;  %v557_v21 = vrot.slane %v5114_v42, 1  ;;  %v5397_v52 = vld [vmem:[%s4990_s20 + $0x1b8] sm:$0xff] }
  0x51   : > { %3942 = vrot.lane.b32.xlu0 %v5317_v59, %s4939_s22  ;;  %9413 = vst [vmem:[#allocation44_spill] sm:$0xff] %v5366_v18  ;;  %v5372_v59 = vsel %vm505_vm0, %v545_v3, %v547_v14  ;;  %9416 = vst [vmem:[#allocation47_spill] sm:$0xff] %v5378_v47  ;;  %v561_v0 = vrot.slane %v5138_v50, 1  ;;  %v563_v3 = vrot.slane %v5141_v51, 1  ;;  %v5390_v14 = vpack.i.bf16 %v5369_v28, %v5360_v35  ;;  %v5441_v42 = vld [vmem:[%s4990_s20 + $0x1c8] sm:$0xff] }
  0x52   : > { %9411 = vst [vmem:[#allocation42_spill] sm:$0xff] %v5357_v5  ;;  %9415 = vst [vmem:[#allocation46_spill] sm:$0xff] %v5372_v59  ;;  %v5405_v24 = vsel %vm505_vm0, %v549_v34, %v551_v2  ;;  %v5411_v28 = vsel %vm505_vm0, %v555_v53, %v557_v21  ;;  %v440_v50 = vrot.slane %v5397_v52, 7 }
  0x53   : > { %9417 = vst [vmem:[#allocation48_spill] sm:$0xff] %v5390_v14  ;;  %9419 = vst [vmem:[#allocation50_spill] sm:$0xff] %v5397_v52  ;;  %v5424_v51 = vsel %vm505_vm0, %v561_v0, %v563_v3  ;;  %v577_v52 = vrot.slane %v5174_v62, 1 }
  0x54   : > { %3957 = vrot.lane.b32.xlu1 %v5329_v23, %s4939_s22  ;;  %v553_v23 = vrot.slane %v5120_v44, 1  ;;  %9421 = vst [vmem:[#allocation52_spill] sm:$0xff] %v5405_v24  ;;  %9423 = vst [vmem:[#allocation54_spill] sm:$0xff] %v5411_v28 }
  0x55   : > { %3952 = vrot.lane.b32.xlu0 %v5346_v4, %s4939_s22  ;;  %v5394_v4 = vpack.i.bf16 %v5378_v47, %v5372_v59  ;;  %v559_v47 = vrot.slane %v5117_v43, 1  ;;  %v5415_v59 = vld [vmem:[%s4990_s20 + $0x1b0] sm:$0xff]  ;;  %9426 = vst [vmem:[#allocation57_spill] sm:$0xff] %v5424_v51  ;;  %v442_v43 = vrot.slane %v5400_v58, 7  ;;  %9429 = vst [vmem:[#allocation60_spill] sm:$0xff] %v5441_v42 }
  0x56   : > { %9424 = vst [vmem:[#allocation55_spill] sm:$0xff] %v5415_v59  ;;  %v5418_v35 = vsel %vm505_vm0, %v551_v2, %v553_v23  ;;  %v438_v34 = vrot.slane %v5415_v59, 7  ;;  %v569_v2 = vrot.slane %v5156_v56, 1 }
  0x57   : > { %9418 = vst [vmem:[#allocation49_spill] sm:$0xff] %v5394_v4  ;;  %9425 = vst [vmem:[#allocation56_spill] sm:$0xff] %v5418_v35 }
  0x58   : > { %3967 = vrot.lane.b32.xlu1 %v5366_v18, %s4939_s22  ;;  %v5408_v18 = vsel %vm505_vm0, %v553_v23, %v555_v53  ;;  %v5427_v53 = vsel %vm505_vm0, %v563_v3, %v565_v12  ;;  %v5447_v3 = vpack.i.bf16 %v5418_v35, %v5405_v24  ;;  %v5467_v35 = vsel %vm330_vm1, %v438_v34, %v440_v50 }
  0x59   : > { %3962 = vrot.lane.b32.xlu0 %v5357_v5, %s4939_s22  ;;  %9422 = vst [vmem:[#allocation53_spill] sm:$0xff] %v5408_v18  ;;  %9427 = vst [vmem:[#allocation58_spill] sm:$0xff] %v5427_v53  ;;  %v5435_v23 = vpack.i.bf16 %v5411_v28, %v5408_v18  ;;  %v571_v5 = vrot.slane %v5159_v57, 1  ;;  %v5453_v28 = vsel %vm505_vm0, %v559_v47, %v561_v0  ;;  %v9094_v18 = vrot.slane %v5441_v42, 7 }
  0x5a   : > { %9430 = vst [vmem:[#allocation61_spill] sm:$0xff] %v5447_v3  ;;  %9432 = vst [vmem:[#allocation63_spill] sm:$0xff] %v5453_v28  ;;  %v5458_v58 = vpack.i.bf16 %v5427_v53, %v5424_v51  ;;  %v5498_v53 = vsel %vm505_vm0, %v565_v12, %v567_v48  ;;  %v585_v12 = vrot.slane %v5192_v15, 1  ;;  %v591_v51 = vrot.slane %v5189_v11, 1 }
  0x5b   : > { %9428 = vst [vmem:[#allocation59_spill] sm:$0xff] %v5435_v23  ;;  %9436 = vst [vmem:[#allocation66_spill] sm:$0xff] %v5467_v35  ;;  %v5476_v0 = vsel %vm330_vm1, %v442_v43, %v9094_v18  ;;  %v5501_v18 = vsel %vm505_vm0, %v567_v48, %v569_v2  ;;  %v587_v48 = vrot.slane %v5195_v19, 1  ;;  %v354_v24 = vrot.slane %v5064_v25, 7 }
  0x5c   : > { %3977 = vrot.lane.b32.xlu1 %v5394_v4, %s4939_s22  ;;  %v5450_v4 = vsel %vm505_vm0, %v557_v21, %v559_v47  ;;  %9433 = vst [vmem:[#allocation64_spill] sm:$0xff] %v5458_v58  ;;  %v579_v21 = vrot.slane %v5177_v63, 1  ;;  %v5471_v47 = vsel %vm330_vm1, %v440_v50, %v442_v43  ;;  %9438 = vst [vmem:[#allocation68_spill] sm:$0xff] %v5476_v0  ;;  %v581_v50 = vrot.slane %v5168_v60, 1 }
  0x5d   : > { %3972 = vrot.lane.b32.xlu0 %v5390_v14, %s4939_s22  ;;  %9431 = vst [vmem:[#allocation62_spill] sm:$0xff] %v5450_v4  ;;  %v9434_v14 = vrot.slane %v5257_v20, 7  ;;  %9437 = vst [vmem:[#allocation67_spill] sm:$0xff] %v5471_v47  ;;  %v5495_v43 = vpack.i.bf16 %v5453_v28, %v5450_v4  ;;  %v5523_v0 = vpack.i.bf16 %v5501_v18, %v5498_v53  ;;  %v9458_v28 = vld [vmem:[#allocation20_spill] sm:$0xff] }
  0x5e   : > { %9442 = vst [vmem:[#allocation72_spill] sm:$0xff] %v5498_v53  ;;  %9443 = vst [vmem:[#allocation73_spill] sm:$0xff] %v5501_v18  ;;  %v5509_v42 = vsel %vm505_vm0, %v577_v52, %v579_v21  ;;  %v5541_v18 = vsel %vm505_vm0, %v585_v12, %v587_v48  ;;  %v599_v4 = vrot.slane %v9458_v28, 1 }
  0x5f   : > { %v5464_v54 = vsel %vm330_vm1, %v9434_v14, %v438_v34  ;;  %v5483_v14 = vsel %vm505_vm0, %v569_v2, %v571_v5  ;;  %v5486_v34 = vsel %vm505_vm0, %v571_v5, %v573_v49  ;;  %9441 = vst [vmem:[#allocation71_spill] sm:$0xff] %v5495_v43  ;;  %v575_v5 = vrot.slane %v5153_v55, 1  ;;  %9445 = vst [vmem:[#allocation75_spill] sm:$0xff] %v5509_v42 }
  0x60   : > { %9435 = vst [vmem:[#allocation65_spill] sm:$0xff] %v5464_v54  ;;  %3987 = vrot.lane.b32.xlu1 %v5435_v23, %s4939_s22  ;;  %9439 = vst [vmem:[#allocation69_spill] sm:$0xff] %v5483_v14  ;;  %v5506_v23 = vpack.i.bf16 %v5486_v34, %v5483_v14  ;;  %v589_v2 = vrot.slane %v5186_v10, 1 }
  0x61   : > { %9440 = vst [vmem:[#allocation70_spill] sm:$0xff] %v5486_v34  ;;  %3982 = vrot.lane.b32.xlu0 %v5447_v3, %s4939_s22  ;;  %v5514_v3 = vsel %vm505_vm0, %v579_v21, %v581_v50  ;;  %9447 = vst [vmem:[#allocation77_spill] sm:$0xff] %v5523_v0  ;;  %v5526_v34 = vsel %vm505_vm0, %v573_v49, %v575_v5  ;;  %v583_v21 = vrot.slane %v5171_v61, 1 }
  0x62   : > { %9444 = vst [vmem:[#allocation74_spill] sm:$0xff] %v5506_v23  ;;  %9446 = vst [vmem:[#allocation76_spill] sm:$0xff] %v5514_v3  ;;  %v5534_v14 = vpack.i.bf16 %v5514_v3, %v5509_v42  ;;  %v5544_v49 = vsel %vm505_vm0, %v587_v48, %v589_v2  ;;  %v5565_v53 = vsel %vm505_vm0, %v589_v2, %v591_v51 }
  0x63   : > { %9448 = vst [vmem:[#allocation78_spill] sm:$0xff] %v5526_v34  ;;  %9451 = vst [vmem:[#allocation81_spill] sm:$0xff] %v5541_v18  ;;  %v5555_v42 = vsel %vm505_vm0, %v581_v50, %v583_v21  ;;  %v5562_v48 = vpack.i.bf16 %v5544_v49, %v5541_v18 }
  0x64   : > { %3997 = vrot.lane.b32.xlu1 %v5458_v58, %s4939_s22  ;;  %v5529_v58 = vsel %vm505_vm0, %v575_v5, %v577_v52  ;;  %9450 = vst [vmem:[#allocation80_spill] sm:$0xff] %v5534_v14  ;;  %9452 = vst [vmem:[#allocation82_spill] sm:$0xff] %v5544_v49  ;;  %v595_v52 = vrot.slane %v5215_v46, 1  ;;  %v597_v5 = vrot.slane %v5204_v29, 1  ;;  %v9463_v49 = vld [vmem:[#allocation21_spill] sm:$0xff] }
  0x65   : > { %3992 = vrot.lane.b32.xlu0 %v5495_v43, %s4939_s22  ;;  %9449 = vst [vmem:[#allocation79_spill] sm:$0xff] %v5529_v58  ;;  %v593_v43 = vrot.slane %v5212_v41, 1  ;;  %v5552_v3 = vpack.i.bf16 %v5529_v58, %v5526_v34  ;;  %9454 = vst [vmem:[#allocation84_spill] sm:$0xff] %v5555_v42  ;;  %v609_v58 = vrot.slane %v5254_v40, 1  ;;  %v344_v34 = vrot.slane %v5010_v6, 7 }
  0x66   : > { %9456 = vst [vmem:[#allocation86_spill] sm:$0xff] %v5562_v48  ;;  %9457 = vst [vmem:[#allocation87_spill] sm:$0xff] %v5565_v53 }
  0x67   : > { %9453 = vst [vmem:[#allocation83_spill] sm:$0xff] %v5552_v3  ;;  %v5574_v50 = vsel %vm505_vm0, %v593_v43, %v595_v52 }
  0x68   : > { %4007 = vrot.lane.b32.xlu1 %v5506_v23, %s4939_s22  ;;  %v5558_v23 = vsel %vm505_vm0, %v583_v21, %v585_v12  ;;  %9460 = vst [vmem:[#allocation88_spill] sm:$0xff] %v5574_v50  ;;  %v5577_v12 = vsel %vm505_vm0, %v595_v52, %v597_v5  ;;  %v601_v21 = vrot.slane %v5233_v7, 1 }
  0x69   : > { %4002 = vrot.lane.b32.xlu0 %v5523_v0, %s4939_s22  ;;  %9455 = vst [vmem:[#allocation85_spill] sm:$0xff] %v5558_v23  ;;  %v5571_v0 = vsel %vm505_vm0, %v591_v51, %v593_v43  ;;  %9461 = vst [vmem:[#allocation89_spill] sm:$0xff] %v5577_v12  ;;  %v5584_v2 = vpack.i.bf16 %v5558_v23, %v5555_v42  ;;  %v605_v51 = vrot.slane %v9463_v49, 1  ;;  %v9468_v23 = vld [vmem:[#allocation22_spill] sm:$0xff] }
  0x6a   : > { %9459 = vst [vmem:[#allocation20_spill] sm:$0xff] %v5571_v0  ;;  %v5590_v43 = vpack.i.bf16 %v5571_v0, %v5565_v53  ;;  %v5594_v52 = vpack.i.bf16 %v5577_v12, %v5574_v50  ;;  %v5602_v18 = vsel %vm505_vm0, %v599_v4, %v601_v21  ;;  %v607_v42 = vrot.slane %v9468_v23, 1 }
  0x6b   : > { %9462 = vst [vmem:[#allocation90_spill] sm:$0xff] %v5584_v2  ;;  %9467 = vst [vmem:[#allocation93_spill] sm:$0xff] %v5602_v18  ;;  %v336_v50 = vrot.slane %v5018_v9, 7 }
  0x6c   : > { %4017 = vrot.lane.b32.xlu1 %v5534_v14, %s4939_s22  ;;  %v603_v14 = vrot.slane %v5236_v27, 1  ;;  %9464 = vst [vmem:[#allocation21_spill] sm:$0xff] %v5590_v43  ;;  %9465 = vst [vmem:[#allocation91_spill] sm:$0xff] %v5594_v52 }
  0x6d   : > { %4012 = vrot.lane.b32.xlu0 %v5552_v3, %s4939_s22  ;;  %v5599_v3 = vsel %vm505_vm0, %v597_v5, %v599_v4  ;;  %v9475_v5 = vld [vmem:[#allocation2_spill] sm:$0xff] }
  0x6e   : > { %9466 = vst [vmem:[#allocation92_spill] sm:$0xff] %v5599_v3  ;;  %v5609_v0 = vsel %vm505_vm0, %v601_v21, %v603_v14  ;;  %v5612_v12 = vsel %vm505_vm0, %v603_v14, %v605_v51  ;;  %v5618_v4 = vpack.i.bf16 %v5602_v18, %v5599_v3  ;;  %v5628_v14 = vsel %vm505_vm0, %v605_v51, %v607_v42  ;;  %v9479_v51 = vld [vmem:[#allocation4_spill] sm:$0xff] }
  0x6f   : > { %9469 = vst [vmem:[#allocation22_spill] sm:$0xff] %v5609_v0  ;;  %9470 = vst [vmem:[#allocation94_spill] sm:$0xff] %v5612_v12  ;;  %v5625_v21 = vpack.i.bf16 %v5612_v12, %v5609_v0  ;;  %v338_v53 = vrot.slane %v9475_v5, 7  ;;  %v340_v12 = vrot.slane %v4996_v1, 7  ;;  %v342_v0 = vrot.slane %v9479_v51, 7 }
  0x70   : > { %4027 = vrot.lane.b32.xlu1 %v5562_v48, %s4939_s22  ;;  %v611_v48 = vrot.slane %v5257_v20, 1  ;;  %9471 = vst [vmem:[#allocation95_spill] sm:$0xff] %v5618_v4  ;;  %9473 = vst [vmem:[#allocation97_spill] sm:$0xff] %v5628_v14 }
  0x71   : > { %4022 = vrot.lane.b32.xlu0 %v5584_v2, %s4939_s22  ;;  %9472 = vst [vmem:[#allocation96_spill] sm:$0xff] %v5625_v21  ;;  %v5631_v2 = vsel %vm505_vm0, %v607_v42, %v609_v58 }
  0x72   : > { %9474 = vst [vmem:[#allocation98_spill] sm:$0xff] %v5631_v2  ;;  %v5637_v18 = vsel %vm505_vm0, %v609_v58, %v611_v48  ;;  %v5648_v42 = vpack.i.bf16 %v5631_v2, %v5628_v14  ;;  %v346_v2 = vrot.slane %v5035_v16, 7  ;;  %v5669_v14 = vsel %vm330_vm1, %v338_v53, %v340_v12 }
  0x73   : > { %9476 = vst [vmem:[#allocation2_spill] sm:$0xff] %v5637_v18  ;;  %9485 = vst [vmem:[#allocation103_spill] sm:$0xff] %v5669_v14 }
  0x74   : > { %4037 = vrot.lane.b32.xlu1 %v5594_v52, %s4939_s22  ;;  %v9477_v52 = vrot.slane %v5415_v59, 1  ;;  %9480 = vst [vmem:[#allocation4_spill] sm:$0xff] %v5648_v42  ;;  %v362_v59 = vrot.slane %v5084_v32, 7 }
  0x75   : > { %4032 = vrot.lane.b32.xlu0 %v5590_v43, %s4939_s22  ;;  %v5663_v43 = vsel %vm330_vm1, %v336_v50, %v338_v53 }
  0x76   : > { %v5642_v3 = vsel %vm505_vm0, %v611_v48, %v9477_v52  ;;  %v9482_v48 = vrot.slane %v5015_v8, 7  ;;  %9484 = vst [vmem:[#allocation102_spill] sm:$0xff] %v5663_v43  ;;  %v9487_v8 = vld [vmem:[#allocation5_spill] sm:$0xff] }
  0x77   : > { %9478 = vst [vmem:[#allocation99_spill] sm:$0xff] %v5642_v3  ;;  %v5655_v58 = vpack.i.bf16 %v5642_v3, %v5637_v18  ;;  %v348_v3 = vrot.slane %v5038_v17, 7  ;;  %v350_v18 = vrot.slane %v9487_v8, 7 }
  0x78   : > { %4047 = vrot.lane.b32.xlu1 %v5625_v21, %s4939_s22  ;;  %v5660_v52 = vsel %vm330_vm1, %v9482_v48, %v336_v50  ;;  %v5672_v21 = vsel %vm330_vm1, %v340_v12, %v342_v0  ;;  %v5679_v50 = vsel %vm330_vm1, %v342_v0, %v344_v34  ;;  %v352_v12 = vrot.slane %v5030_v13, 7 }
  0x79   : > { %9481 = vst [vmem:[#allocation100_spill] sm:$0xff] %v5655_v58  ;;  %9483 = vst [vmem:[#allocation101_spill] sm:$0xff] %v5660_v52  ;;  %4042 = vrot.lane.b32.xlu0 %v5618_v4, %s4939_s22  ;;  %v4061_v48 = vpack.i.bf16 %v5663_v43, %v5660_v52  ;;  %v4066_v53 = vpack.i.bf16 %v5672_v21, %v5669_v14  ;;  %v5686_v4 = vsel %vm330_vm1, %v344_v34, %v346_v2  ;;  %v9492_v43 = vld [vmem:[#allocation6_spill] sm:$0xff] }
  0x7a   : > { %9486 = vst [vmem:[#allocation104_spill] sm:$0xff] %v5672_v21  ;;  %9488 = vst [vmem:[#allocation5_spill] sm:$0xff] %v5679_v50  ;;  %v5693_v52 = vsel %vm330_vm1, %v346_v2, %v348_v3  ;;  %v5696_v0 = vsel %vm330_vm1, %v348_v3, %v350_v18  ;;  %v358_v14 = vrot.slane %v9492_v43, 7  ;;  %v4071_v34 = vpack.i.bf16 %v5686_v4, %v5679_v50 }
  0x7b   : > { %9489 = vst [vmem:[#allocation105_spill] sm:$0xff] %v5686_v4  ;;  %9490 = vst [vmem:[#allocation106_spill] sm:$0xff] %v5693_v52  ;;  %v360_v21 = vrot.slane %v5051_v22, 7  ;;  %v5707_v2 = vsel %vm330_vm1, %v350_v18, %v352_v12  ;;  %v5710_v3 = vsel %vm330_vm1, %v352_v12, %v354_v24 }
  0x7c   : > { %4057 = vrot.lane.b32.xlu1 %v5655_v58, %s4939_s22  ;;  %9491 = vst [vmem:[#allocation107_spill] sm:$0xff] %v5696_v0  ;;  %v356_v58 = vrot.slane %v5067_v26, 7  ;;  %9493 = vst [vmem:[#allocation6_spill] sm:$0xff] %v5707_v2  ;;  %v4081_v18 = vpack.i.bf16 %v5710_v3, %v5707_v2  ;;  %v376_v2 = vrot.slane %v5099_v37, 7 }
  0x7d   : > { %4052 = vrot.lane.b32.xlu0 %v5648_v42, %s4939_s22  ;;  %v4076_v42 = vpack.i.bf16 %v5696_v0, %v5693_v52  ;;  %9494 = vst [vmem:[#allocation108_spill] sm:$0xff] %v5710_v3  ;;  %v366_v0 = vrot.slane %v5078_v30, 7  ;;  %v5725_v12 = vsel %vm330_vm1, %v358_v14, %v360_v21  ;;  %v370_v52 = vrot.slane %v5102_v38, 7 }
  0x7e   : > { %v5715_v4 = vsel %vm330_vm1, %v354_v24, %v356_v58  ;;  %v5718_v50 = vsel %vm330_vm1, %v356_v58, %v358_v14  ;;  %9497 = vst [vmem:[#allocation111_spill] sm:$0xff] %v5725_v12  ;;  %v5731_v24 = vsel %vm330_vm1, %v360_v21, %v362_v59  ;;  %v368_v58 = vrot.slane %v5081_v31, 7 }
  0x7f   : > { %9495 = vst [vmem:[#allocation109_spill] sm:$0xff] %v5715_v4  ;;  %9496 = vst [vmem:[#allocation110_spill] sm:$0xff] %v5718_v50  ;;  %v374_v3 = vrot.slane %v5096_v36, 7 }
  0x80   : > { %4067 = vrot.lane.b32.xlu1 %v4066_v53, %s4940_s23  ;;  %v364_v53 = vrot.slane %v5087_v33, 7  ;;  %9498 = vst [vmem:[#allocation112_spill] sm:$0xff] %v5731_v24 }
  0x81   : > { %4062 = vrot.lane.b32.xlu0 %v4061_v48, %s4940_s23  ;;  %v4086_v48 = vpack.i.bf16 %v5718_v50, %v5715_v4  ;;  %v4091_v4 = vpack.i.bf16 %v5731_v24, %v5725_v12  ;;  %v9507_v24 = vld [vmem:[#allocation12_spill] sm:$0xff]  ;;  %v5777_v36 = vsel %vm330_vm1, %v374_v3, %v376_v2 }
  0x82   : > { %v5737_v30 = vsel %vm330_vm1, %v362_v59, %v364_v53  ;;  %v5740_v14 = vsel %vm330_vm1, %v364_v53, %v366_v0  ;;  %v5758_v53 = vsel %vm330_vm1, %v368_v58, %v370_v52  ;;  %9510 = vst [vmem:[#allocation123_spill] sm:$0xff] %v5777_v36 }
  0x83   : > { %9499 = vst [vmem:[#allocation113_spill] sm:$0xff] %v5737_v30  ;;  %9500 = vst [vmem:[#allocation114_spill] sm:$0xff] %v5740_v14  ;;  %v4096_v59 = vpack.i.bf16 %v5740_v14, %v5737_v30  ;;  %v382_v30 = vrot.slane %v9507_v24, 7 }
  0x84   : > { %4077 = vrot.lane.b32.xlu1 %v4076_v42, %s4940_s23  ;;  %v372_v42 = vrot.slane %v5105_v39, 7  ;;  %9504 = vst [vmem:[#allocation118_spill] sm:$0xff] %v5758_v53 }
  0x85   : > { %4072 = vrot.lane.b32.xlu0 %v4071_v34, %s4940_s23  ;;  %v5755_v34 = vsel %vm330_vm1, %v366_v0, %v368_v58 }
  0x86   : > { %v5744_v50 = vpop.permute.xlu1 %3802  ;;  %9503 = vst [vmem:[#allocation117_spill] sm:$0xff] %v5755_v34  ;;  %v5766_v12 = vsel %vm330_vm1, %v372_v42, %v374_v3  ;;  %v4101_v58 = vpack.i.bf16 %v5758_v53, %v5755_v34  ;;  %v9516_v53 = vld [vmem:[#allocation18_spill] sm:$0xff]  ;;  %v9517_v34 = vld [vmem:[#allocation15_spill] sm:$0xff] }
  0x87   : > { %9501 = vst [vmem:[#allocation115_spill] sm:$0xff] %v5744_v50  ;;  %v5746_v21 = vpop.permute.xlu0 %3792  ;;  %v378_v50 = vrot.slane %v5120_v44, 7  ;;  %9506 = vst [vmem:[#allocation120_spill] sm:$0xff] %v5766_v12  ;;  %v390_v39 = vrot.slane %v9517_v34, 7 }
  0x88   : > { %9502 = vst [vmem:[#allocation116_spill] sm:$0xff] %v5746_v21  ;;  %4087 = vrot.lane.b32.xlu1 %v4086_v48, %s4940_s23  ;;  %v5763_v21 = vsel %vm330_vm1, %v370_v52, %v372_v42  ;;  %v380_v48 = vrot.slane %v5123_v45, 7  ;;  %v9512_v42 = vld [vmem:[#allocation13_spill] sm:$0xff] }
  0x89   : > { %4082 = vrot.lane.b32.xlu0 %v4081_v18, %s4940_s23  ;;  %9505 = vst [vmem:[#allocation119_spill] sm:$0xff] %v5763_v21  ;;  %v4106_v52 = vpack.i.bf16 %v5766_v12, %v5763_v21  ;;  %v5783_v18 = vsel %vm330_vm1, %v376_v2, %v378_v50  ;;  %v384_v24 = vrot.slane %v9512_v42, 7  ;;  %v9513_v45 = vld [vmem:[#allocation17_spill] sm:$0xff] }
  0x8a   : > { %v5770_v14 = vpop.permute.xlu1 %3807  ;;  %9511 = vst [vmem:[#allocation124_spill] sm:$0xff] %v5783_v18  ;;  %v5792_v3 = vsel %vm330_vm1, %v380_v48, %v382_v30  ;;  %v4111_v12 = vpack.i.bf16 %v5783_v18, %v5777_v36  ;;  %v9525_v36 = vld [vmem:[#allocation19_spill] sm:$0xff] }
  0x8b   : > { %9508 = vst [vmem:[#allocation121_spill] sm:$0xff] %v5770_v14  ;;  %v5772_v0 = vpop.permute.xlu0 %3797  ;;  %v386_v14 = vrot.slane %v9513_v45, 7  ;;  %9515 = vst [vmem:[#allocation126_spill] sm:$0xff] %v5792_v3  ;;  %v9520_v45 = vld [vmem:[#allocation16_spill] sm:$0xff] }
  0x8c   : > { %9509 = vst [vmem:[#allocation122_spill] sm:$0xff] %v5772_v0  ;;  %4097 = vrot.lane.b32.xlu1 %v4096_v59, %s4940_s23  ;;  %v5789_v0 = vsel %vm330_vm1, %v378_v50, %v380_v48  ;;  %v388_v59 = vrot.slane %v9516_v53, 7  ;;  %v392_v42 = vrot.slane %v9520_v45, 7  ;;  %v5807_v50 = vsel %vm330_vm1, %v382_v30, %v384_v24 }
  0x8d   : > { %4092 = vrot.lane.b32.xlu0 %v4091_v4, %s4940_s23  ;;  %9514 = vst [vmem:[#allocation125_spill] sm:$0xff] %v5789_v0  ;;  %v4116_v4 = vpack.i.bf16 %v5792_v3, %v5789_v0  ;;  %9521 = vst [vmem:[#allocation16_spill] sm:$0xff] %v5807_v50  ;;  %v5810_v48 = vsel %vm330_vm1, %v384_v24, %v386_v14  ;;  %v398_v0 = vrot.slane %v9525_v36, 7 }
  0x8e   : > { %v5796_v21 = vpop.permute.xlu1 %3817  ;;  %9522 = vst [vmem:[#allocation128_spill] sm:$0xff] %v5810_v48  ;;  %v5818_v18 = vsel %vm330_vm1, %v388_v59, %v390_v39  ;;  %v4121_v24 = vpack.i.bf16 %v5810_v48, %v5807_v50  ;;  %v5829_v34 = vsel %vm330_vm1, %v390_v39, %v392_v42  ;;  %v406_v48 = vrot.slane %v5168_v60, 7 }
  0x8f   : > { %9518 = vst [vmem:[#allocation18_spill] sm:$0xff] %v5796_v21  ;;  %v5798_v2 = vpop.permute.xlu0 %3812  ;;  %v394_v21 = vrot.slane %v5156_v56, 7  ;;  %9524 = vst [vmem:[#allocation130_spill] sm:$0xff] %v5818_v18  ;;  %v408_v50 = vrot.slane %v5171_v61, 7 }
  0x90   : > { %9519 = vst [vmem:[#allocation127_spill] sm:$0xff] %v5798_v2  ;;  %4107 = vrot.lane.b32.xlu1 %v4106_v52, %s4940_s23  ;;  %v5815_v2 = vsel %vm330_vm1, %v386_v14, %v388_v59  ;;  %v396_v52 = vrot.slane %v5159_v57, 7  ;;  %9528 = vst [vmem:[#allocation132_spill] sm:$0xff] %v5829_v34  ;;  %v400_v59 = vrot.slane %v5153_v55, 7 }
  0x91   : > { %4102 = vrot.lane.b32.xlu0 %v4101_v58, %s4940_s23  ;;  %9523 = vst [vmem:[#allocation129_spill] sm:$0xff] %v5815_v2  ;;  %v4126_v14 = vpack.i.bf16 %v5818_v18, %v5815_v2  ;;  %v5835_v58 = vsel %vm330_vm1, %v392_v42, %v394_v21 }
  0x92   : > { %v5822_v3 = vpop.permute.xlu1 %3827  ;;  %9529 = vst [vmem:[#allocation133_spill] sm:$0xff] %v5835_v58  ;;  %v5844_v39 = vsel %vm330_vm1, %v396_v52, %v398_v0  ;;  %v4131_v18 = vpack.i.bf16 %v5835_v58, %v5829_v34  ;;  %v418_v34 = vrot.slane %v5212_v41, 7 }
  0x93   : > { %9526 = vst [vmem:[#allocation19_spill] sm:$0xff] %v5822_v3  ;;  %v5824_v30 = vpop.permute.xlu0 %3822  ;;  %v402_v3 = vrot.slane %v5174_v62, 7  ;;  %9531 = vst [vmem:[#allocation135_spill] sm:$0xff] %v5844_v39 }
  0x94   : > { %9527 = vst [vmem:[#allocation131_spill] sm:$0xff] %v5824_v30  ;;  %4117 = vrot.lane.b32.xlu1 %v4116_v4, %s4940_s23  ;;  %v5841_v30 = vsel %vm330_vm1, %v394_v21, %v396_v52  ;;  %v404_v4 = vrot.slane %v5177_v63, 7  ;;  %v5859_v21 = vsel %vm330_vm1, %v398_v0, %v400_v59 }
  0x95   : > { %4112 = vrot.lane.b32.xlu0 %v4111_v12, %s4940_s23  ;;  %9530 = vst [vmem:[#allocation134_spill] sm:$0xff] %v5841_v30  ;;  %v4136_v12 = vpack.i.bf16 %v5844_v39, %v5841_v30  ;;  %9534 = vst [vmem:[#allocation138_spill] sm:$0xff] %v5859_v21  ;;  %v5862_v52 = vsel %vm330_vm1, %v400_v59, %v402_v3  ;;  %v414_v30 = vrot.slane %v5186_v10, 7 }
  0x96   : > { %v5848_v2 = vpop.permute.xlu1 %3837  ;;  %9535 = vst [vmem:[#allocation139_spill] sm:$0xff] %v5862_v52  ;;  %v5870_v58 = vsel %vm330_vm1, %v404_v4, %v406_v48  ;;  %v4141_v59 = vpack.i.bf16 %v5862_v52, %v5859_v21  ;;  %v422_v52 = vrot.slane %v5204_v29, 7 }
  0x97   : > { %9532 = vst [vmem:[#allocation136_spill] sm:$0xff] %v5848_v2  ;;  %v5850_v42 = vpop.permute.xlu0 %3832  ;;  %v410_v2 = vrot.slane %v5192_v15, 7  ;;  %9537 = vst [vmem:[#allocation141_spill] sm:$0xff] %v5870_v58 }
  0x98   : > { %9533 = vst [vmem:[#allocation137_spill] sm:$0xff] %v5850_v42  ;;  %4127 = vrot.lane.b32.xlu1 %v4126_v14, %s4940_s23  ;;  %v5867_v42 = vsel %vm330_vm1, %v402_v3, %v404_v4  ;;  %v412_v14 = vrot.slane %v5195_v19, 7 }
  0x99   : > { %4122 = vrot.lane.b32.xlu0 %v4121_v24, %s4940_s23  ;;  %9536 = vst [vmem:[#allocation140_spill] sm:$0xff] %v5867_v42  ;;  %v4146_v3 = vpack.i.bf16 %v5870_v58, %v5867_v42  ;;  %v5884_v24 = vsel %vm330_vm1, %v406_v48, %v408_v50  ;;  %v5887_v4 = vsel %vm330_vm1, %v408_v50, %v410_v2  ;;  %v416_v48 = vrot.slane %v5189_v11, 7 }
  0x9a   : > { %v5874_v39 = vpop.permute.xlu1 %3847  ;;  %9540 = vst [vmem:[#allocation144_spill] sm:$0xff] %v5884_v24  ;;  %9541 = vst [vmem:[#allocation145_spill] sm:$0xff] %v5887_v4  ;;  %v5895_v21 = vsel %vm330_vm1, %v412_v14, %v414_v30 }
  0x9b   : > { %9538 = vst [vmem:[#allocation142_spill] sm:$0xff] %v5874_v39  ;;  %v5876_v0 = vpop.permute.xlu0 %3842  ;;  %9543 = vst [vmem:[#allocation147_spill] sm:$0xff] %v5895_v21 }
  0x9c   : > { %9539 = vst [vmem:[#allocation143_spill] sm:$0xff] %v5876_v0  ;;  %4137 = vrot.lane.b32.xlu1 %v4136_v12, %s4940_s23  ;;  %v5892_v0 = vsel %vm330_vm1, %v410_v2, %v412_v14  ;;  %v420_v12 = vrot.slane %v5215_v46, 7  ;;  %v426_v14 = vrot.slane %v5233_v7, 7 }
  0x9d   : > { %4132 = vrot.lane.b32.xlu0 %v4131_v18, %s4940_s23  ;;  %9542 = vst [vmem:[#allocation146_spill] sm:$0xff] %v5892_v0  ;;  %v4151_v18 = vpack.i.bf16 %v5887_v4, %v5884_v24  ;;  %v4156_v2 = vpack.i.bf16 %v5895_v21, %v5892_v0  ;;  %v5922_v4 = vsel %vm330_vm1, %v414_v30, %v416_v48 }
  0x9e   : > { %v5899_v42 = vpop.permute.xlu1 %3857  ;;  %v5912_v58 = vsel %vm330_vm1, %v418_v34, %v420_v12  ;;  %v5925_v0 = vsel %vm330_vm1, %v416_v48, %v418_v34  ;;  %v434_v48 = vrot.slane %v5254_v40, 7 }
  0x9f   : > { %9544 = vst [vmem:[#allocation148_spill] sm:$0xff] %v5899_v42  ;;  %v5902_v50 = vpop.permute.xlu0 %3852  ;;  %9546 = vst [vmem:[#allocation150_spill] sm:$0xff] %v5912_v58  ;;  %v5915_v42 = vsel %vm330_vm1, %v420_v12, %v422_v52 }
  0xa0   : > { %9545 = vst [vmem:[#allocation149_spill] sm:$0xff] %v5902_v50  ;;  %4147 = vrot.lane.b32.xlu1 %v4146_v3, %s4940_s23  ;;  %9547 = vst [vmem:[#allocation151_spill] sm:$0xff] %v5915_v42  ;;  %v428_v50 = vrot.slane %v5236_v27, 7  ;;  %v430_v3 = vrot.slane %v9463_v49, 7  ;;  %v4166_v12 = vpack.i.bf16 %v5915_v42, %v5912_v58 }
  0xa1   : > { %4142 = vrot.lane.b32.xlu0 %v4141_v59, %s4940_s23  ;;  %9549 = vst [vmem:[#allocation153_spill] sm:$0xff] %v5925_v0  ;;  %v424_v59 = vrot.slane %v9458_v28, 7 }
  0xa2   : > { %v5919_v39 = vpop.permute.xlu1 %3867  ;;  %v5937_v30 = vsel %vm330_vm1, %v426_v14, %v428_v50  ;;  %v5940_v34 = vsel %vm330_vm1, %v428_v50, %v430_v3 }
  0xa3   : > { %9548 = vst [vmem:[#allocation152_spill] sm:$0xff] %v5919_v39  ;;  %v5928_v21 = vpop.permute.xlu0 %3862  ;;  %v4161_v39 = vpack.i.bf16 %v5925_v0, %v5922_v4  ;;  %9551 = vst [vmem:[#allocation155_spill] sm:$0xff] %v5937_v30  ;;  %v4176_v50 = vpack.i.bf16 %v5940_v34, %v5937_v30 }
  0xa4   : > { %9550 = vst [vmem:[#allocation154_spill] sm:$0xff] %v5928_v21  ;;  %4157 = vrot.lane.b32.xlu1 %v4156_v2, %s4940_s23  ;;  %9552 = vst [vmem:[#allocation156_spill] sm:$0xff] %v5940_v34  ;;  %v5946_v2 = vsel %vm330_vm1, %v422_v52, %v424_v59  ;;  %v5949_v21 = vsel %vm330_vm1, %v424_v59, %v426_v14  ;;  %v9557_v52 = vrot.slane %v5257_v20, 7 }
  0xa5   : > { %4152 = vrot.lane.b32.xlu0 %v4151_v18, %s4940_s23  ;;  %9554 = vst [vmem:[#allocation158_spill] sm:$0xff] %v5946_v2  ;;  %9555 = vst [vmem:[#allocation159_spill] sm:$0xff] %v5949_v21  ;;  %v432_v18 = vrot.slane %v9468_v23, 7 }
  0xa6   : > { %v5943_v24 = vpop.permute.xlu1 %3877  ;;  %v5963_v0 = vsel %vm330_vm1, %v434_v48, %v9557_v52 }
  0xa7   : > { %9553 = vst [vmem:[#allocation157_spill] sm:$0xff] %v5943_v24  ;;  %v5952_v58 = vpop.permute.xlu0 %3872  ;;  %v4171_v24 = vpack.i.bf16 %v5949_v21, %v5946_v2  ;;  %9558 = vst [vmem:[#allocation161_spill] sm:$0xff] %v5963_v0  ;;  %v5968_v59 = vsel %vm330_vm1, %v430_v3, %v432_v18  ;;  %v4196_v3 = vpack.i.bf16 %v9475_v5, %v5018_v9  ;;  %v9668_v2 = vld [vmem:[#allocation123_spill] sm:$0xff] }
  0xa8   : > { %9556 = vst [vmem:[#allocation160_spill] sm:$0xff] %v5952_v58  ;;  %4167 = vrot.lane.b32.xlu1 %v4166_v12, %s4940_s23  ;;  %9559 = vst [vmem:[#allocation162_spill] sm:$0xff] %v5968_v59  ;;  %v5971_v12 = vsel %vm330_vm1, %v432_v18, %v434_v48  ;;  %v4191_v48 = vpack.i.bf16 %v5471_v47, %v5467_v35  ;;  %v4201_v9 = vpack.i.bf16 %v9479_v51, %v4996_v1  ;;  %v9635_v47 = vld [vmem:[#allocation81_spill] sm:$0xff] }
  0xa9   : > { %4162 = vrot.lane.b32.xlu0 %v4161_v39, %s4940_s23  ;;  %9560 = vst [vmem:[#allocation163_spill] sm:$0xff] %v5971_v12  ;;  %v4186_v39 = vpack.i.bf16 %v5464_v54, %v5963_v0  ;;  %v4181_v52 = vpack.i.bf16 %v5971_v12, %v5968_v59  ;;  %v4226_v1 = vpack.i.bf16 %v5084_v32, %v5051_v22  ;;  %v9656_v59 = vld [vmem:[#allocation114_spill] sm:$0xff] }
  0xaa   : > { %v5965_v14 = vpop.permute.xlu1 %3887  ;;  %v4221_v51 = vpack.i.bf16 %v9492_v43, %v5067_v26  ;;  %v4246_v26 = vpack.i.bf16 %v5120_v44, %v5099_v37  ;;  %v9568_v43 = vld [vmem:[#allocation11_spill] sm:$0xff] }
  0xab   : > { %v5973_v58 = vpop.permute.xlu0 %3882 }
  0xac   : > { %4177 = vrot.lane.b32.xlu1 %v4176_v50, %s4940_s23  ;;  %v4206_v50 = vpack.i.bf16 %v5035_v16, %v5010_v6 }
  0xad   : > { %4172 = vrot.lane.b32.xlu0 %v4171_v24, %s4940_s23 }
  0xae   : > { %v5981_v21 = vpop.permute.xlu1 %3897 }
  0xaf   : > { %v5983_v30 = vpop.permute.xlu0 %3892 }
  0xb0   : > { %4187 = vrot.lane.b32.xlu1 %v4186_v39, %s4940_s23 }
  0xb1   : > { %4182 = vrot.lane.b32.xlu0 %v4181_v52, %s4940_s23  ;;  %v4216_v52 = vpack.i.bf16 %v5064_v25, %v5030_v13 }
  0xb2   : > { %v5991_v18 = vpop.permute.xlu1 %3907 }
  0xb3   : > { %v5993_v24 = vpop.permute.xlu0 %3902 }
  0xb4   : > { %4197 = vrot.lane.b32.xlu1 %v4196_v3, %s4941_s24  ;;  %v4211_v3 = vpack.i.bf16 %v9487_v8, %v5038_v17  ;;  %v4236_v17 = vpack.i.bf16 %v5102_v38, %v5081_v31  ;;  %v9565_v8 = vld [vmem:[#allocation9_spill] sm:$0xff] }
  0xb5   : > { %4192 = vrot.lane.b32.xlu0 %v4191_v48, %s4940_s23  ;;  %v4231_v48 = vpack.i.bf16 %v9565_v8, %v5087_v33  ;;  %v9572_v33 = vld [vmem:[#allocation13_spill] sm:$0xff]  ;;  %v4266_v8 = vpack.i.bf16 %v5156_v56, %v9520_v45 }
  0xb6   : > { %v6001_v5 = vpop.permute.xlu1 %3917 }
  0xb7   : > { %v6003_v39 = vpop.permute.xlu0 %3912 }
  0xb8   : > { %4207 = vrot.lane.b32.xlu1 %v4206_v50, %s4941_s24  ;;  %v9569_v50 = vld [vmem:[#allocation10_spill] sm:$0xff] }
  0xb9   : > { %4202 = vrot.lane.b32.xlu0 %v4201_v9, %s4941_s24  ;;  %v4241_v9 = vpack.i.bf16 %v9569_v50, %v9568_v43 }
  0xba   : > { %v6011_v6 = vpop.permute.xlu1 %3927 }
  0xbb   : > { %9561 = vst [vmem:[#allocation164_spill] sm:$0xff] %v6011_v6  ;;  %v6013_v16 = vpop.permute.xlu0 %3922 }
  0xbc   : > { %9562 = vst [vmem:[#allocation165_spill] sm:$0xff] %v6013_v16  ;;  %4217 = vrot.lane.b32.xlu1 %v4216_v52, %s4941_s24  ;;  %v9573_v52 = vld [vmem:[#allocation17_spill] sm:$0xff] }
  0xbd   : > { %4212 = vrot.lane.b32.xlu0 %v4211_v3, %s4941_s24  ;;  %v4256_v3 = vpack.i.bf16 %v9573_v52, %v9572_v33  ;;  %v4271_v33 = vpack.i.bf16 %v9525_v36, %v5159_v57  ;;  %v4281_v52 = vpack.i.bf16 %v5168_v60, %v5177_v63  ;;  %v4296_v36 = vpack.i.bf16 %v5212_v41, %v5189_v11 }
  0xbe   : > { %v6021_v13 = vpop.permute.xlu1 %3937  ;;  %v4291_v57 = vpack.i.bf16 %v5186_v10, %v5195_v19  ;;  %v4306_v60 = vpack.i.bf16 %v5233_v7, %v9458_v28  ;;  %v4301_v63 = vpack.i.bf16 %v5204_v29, %v5215_v46  ;;  %v4316_v10 = vpack.i.bf16 %v5254_v40, %v9468_v23  ;;  %v9585_v29 = vld [vmem:[#allocation50_spill] sm:$0xff]  ;;  %v9586_v46 = vld [vmem:[#allocation51_spill] sm:$0xff] }
  0xbf   : > { %9563 = vst [vmem:[#allocation166_spill] sm:$0xff] %v6021_v13  ;;  %v6023_v25 = vpop.permute.xlu0 %3932  ;;  %v4311_v19 = vpack.i.bf16 %v9463_v49, %v5236_v27  ;;  %v9591_v27 = vld [vmem:[#allocation28_spill] sm:$0xff] }
  0xc0   : > { %9564 = vst [vmem:[#allocation167_spill] sm:$0xff] %v6023_v25  ;;  %4227 = vrot.lane.b32.xlu1 %v4226_v1, %s4941_s24  ;;  %v9574_v1 = vld [vmem:[#allocation14_spill] sm:$0xff]  ;;  %v9630_v25 = vld [vmem:[#allocation79_spill] sm:$0xff]  ;;  %v9633_v13 = vld [vmem:[#allocation84_spill] sm:$0xff] }
  0xc1   : > { %4222 = vrot.lane.b32.xlu0 %v4221_v51, %s4941_s24  ;;  %v9575_v51 = vld [vmem:[#allocation12_spill] sm:$0xff] }
  0xc2   : > { %v6031_v22 = vpop.permute.xlu1 %3947 }
  0xc3   : > { %9566 = vst [vmem:[#allocation9_spill] sm:$0xff] %v6031_v22  ;;  %v6033_v32 = vpop.permute.xlu0 %3942  ;;  %v9652_v22 = vld [vmem:[#allocation142_spill] sm:$0xff] }
  0xc4   : > { %9567 = vst [vmem:[#allocation168_spill] sm:$0xff] %v6033_v32  ;;  %4237 = vrot.lane.b32.xlu1 %v4236_v17, %s4941_s24  ;;  %v4251_v17 = vpack.i.bf16 %v9575_v51, %v9574_v1  ;;  %v9587_v1 = vld [vmem:[#allocation55_spill] sm:$0xff]  ;;  %v9626_v32 = vld [vmem:[#allocation69_spill] sm:$0xff]  ;;  %v3850_v54 = vunpack.i.h.bf16 %v9652_v22 }
  0xc5   : > { %4232 = vrot.lane.b32.xlu0 %v4231_v48, %s4941_s24  ;;  %v9577_v48 = vld [vmem:[#allocation15_spill] sm:$0xff]  ;;  %v4321_v51 = vpack.i.bf16 %v9587_v1, %v5257_v20  ;;  %v9595_v20 = vld [vmem:[#allocation34_spill] sm:$0xff] }
  0xc6   : > { %v6041_v31 = vpop.permute.xlu1 %3957 }
  0xc7   : > { %9570 = vst [vmem:[#allocation11_spill] sm:$0xff] %v6041_v31  ;;  %v6043_v38 = vpop.permute.xlu0 %3952  ;;  %v9625_v31 = vld [vmem:[#allocation73_spill] sm:$0xff] }
  0xc8   : > { %9571 = vst [vmem:[#allocation10_spill] sm:$0xff] %v6043_v38  ;;  %4247 = vrot.lane.b32.xlu1 %v4246_v26, %s4941_s24  ;;  %v4261_v26 = vpack.i.bf16 %v9577_v48, %v9516_v53  ;;  %v4286_v53 = vpack.i.bf16 %v5192_v15, %v5171_v61  ;;  %v9634_v38 = vld [vmem:[#allocation85_spill] sm:$0xff] }
  0xc9   : > { %4242 = vrot.lane.b32.xlu0 %v4241_v9, %s4941_s24  ;;  %v4276_v9 = vpack.i.bf16 %v5174_v62, %v5153_v55 }
  0xca   : > { %v6051_v37 = vpop.permute.xlu1 %3967 }
  0xcb   : > { %v6053_v44 = vpop.permute.xlu0 %3962 }
  0xcc   : > { %9576 = vst [vmem:[#allocation13_spill] sm:$0xff] %v6053_v44  ;;  %4257 = vrot.lane.b32.xlu1 %v4256_v3, %s4941_s24  ;;  %v4326_v3 = vpack.i.bf16 %v9586_v46, %v9585_v29  ;;  %v9620_v44 = vld [vmem:[#allocation62_spill] sm:$0xff] }
  0xcd   : > { %4252 = vrot.lane.b32.xlu0 %v4251_v17, %s4941_s24  ;;  %v9590_v17 = vld [vmem:[#allocation25_spill] sm:$0xff] }
  0xce   : > { %v6061_v43 = vpop.permute.xlu1 %3977  ;;  %v4336_v49 = vpack.i.bf16 %v9591_v27, %v9590_v17  ;;  %v9605_v17 = vld [vmem:[#allocation35_spill] sm:$0xff] }
  0xcf   : > { %v6063_v50 = vpop.permute.xlu0 %3972  ;;  %v9606_v27 = vld [vmem:[#allocation31_spill] sm:$0xff] }
  0xd0   : > { %4267 = vrot.lane.b32.xlu1 %v4266_v8, %s4941_s24 }
  0xd1   : > { %4262 = vrot.lane.b32.xlu0 %v4261_v26, %s4941_s24  ;;  %v9594_v26 = vld [vmem:[#allocation27_spill] sm:$0xff] }
  0xd2   : > { %v6071_v45 = vpop.permute.xlu1 %3987 }
  0xd3   : > { %v6073_v56 = vpop.permute.xlu0 %3982 }
  0xd4   : > { %4277 = vrot.lane.b32.xlu1 %v4276_v9, %s4941_s24  ;;  %v4346_v9 = vpack.i.bf16 %v9595_v20, %v9594_v26 }
  0xd5   : > { %4272 = vrot.lane.b32.xlu0 %v4271_v33, %s4941_s24  ;;  %v9596_v33 = vld [vmem:[#allocation8_spill] sm:$0xff] }
  0xd6   : > { %v6081_v55 = vpop.permute.xlu1 %3997 }
  0xd7   : > { %9578 = vst [vmem:[#allocation17_spill] sm:$0xff] %v6081_v55  ;;  %v6083_v62 = vpop.permute.xlu0 %3992  ;;  %v9619_v55 = vld [vmem:[#allocation54_spill] sm:$0xff] }
  0xd8   : > { %4287 = vrot.lane.b32.xlu1 %v4286_v53, %s4941_s24  ;;  %v9597_v53 = vld [vmem:[#allocation7_spill] sm:$0xff] }
  0xd9   : > { %4282 = vrot.lane.b32.xlu0 %v4281_v52, %s4941_s24  ;;  %v9598_v52 = vpack.i.bf16 %v9596_v33, %v9597_v53  ;;  %v9609_v33 = vld [vmem:[#allocation38_spill] sm:$0xff]  ;;  %v9610_v53 = vld [vmem:[#allocation40_spill] sm:$0xff] }
  0xda   : > { %v6091_v61 = vpop.permute.xlu1 %4007 }
  0xdb   : > { %9579 = vst [vmem:[#allocation14_spill] sm:$0xff] %v6091_v61  ;;  %v6093_v15 = vpop.permute.xlu0 %4002  ;;  %v9616_v61 = vld [vmem:[#allocation52_spill] sm:$0xff] }
  0xdc   : > { %9580 = vst [vmem:[#allocation12_spill] sm:$0xff] %v6093_v15  ;;  %4297 = vrot.lane.b32.xlu1 %v4296_v36, %s4941_s24  ;;  %v9599_v36 = vld [vmem:[#allocation29_spill] sm:$0xff] }
  0xdd   : > { %4292 = vrot.lane.b32.xlu0 %v4291_v57, %s4941_s24  ;;  %v9600_v57 = vld [vmem:[#allocation26_spill] sm:$0xff] }
  0xde   : > { %v6101_v11 = vpop.permute.xlu1 %4017 }
  0xdf   : > { %9581 = vst [vmem:[#allocation15_spill] sm:$0xff] %v6101_v11  ;;  %v6103_v41 = vpop.permute.xlu0 %4012 }
  0xe0   : > { %9582 = vst [vmem:[#allocation169_spill] sm:$0xff] %v6103_v41  ;;  %4307 = vrot.lane.b32.xlu1 %v4306_v60, %s4941_s24  ;;  %v4341_v60 = vpack.i.bf16 %v9600_v57, %v9599_v36  ;;  %v9611_v36 = vld [vmem:[#allocation41_spill] sm:$0xff]  ;;  %v9612_v57 = vld [vmem:[#allocation43_spill] sm:$0xff] }
  0xe1   : > { %4302 = vrot.lane.b32.xlu0 %v4301_v63, %s4941_s24  ;;  %v4366_v41 = vpack.i.bf16 %v9612_v57, %v9611_v36  ;;  %v9623_v36 = vld [vmem:[#allocation58_spill] sm:$0xff]  ;;  %v9624_v57 = vld [vmem:[#allocation72_spill] sm:$0xff] }
  0xe2   : > { %v6111_v7 = vpop.permute.xlu1 %4027 }
  0xe3   : > { %9583 = vst [vmem:[#allocation170_spill] sm:$0xff] %v6111_v7  ;;  %v6113_v28 = vpop.permute.xlu0 %4022  ;;  %v9647_v7 = vld [vmem:[#allocation137_spill] sm:$0xff] }
  0xe4   : > { %9584 = vst [vmem:[#allocation171_spill] sm:$0xff] %v6113_v28  ;;  %4317 = vrot.lane.b32.xlu1 %v4316_v10, %s4941_s24  ;;  %v3834_v11 = vunpack.i.l.bf16 %v9647_v7  ;;  %v9669_v28 = vld [vmem:[#allocation120_spill] sm:$0xff] }
  0xe5   : > { %4312 = vrot.lane.b32.xlu0 %v4311_v19, %s4941_s24  ;;  %v9603_v19 = vld [vmem:[#allocation32_spill] sm:$0xff] }
  0xe6   : > { %v6121_v40 = vpop.permute.xlu1 %4037 }
  0xe7   : > { %9588 = vst [vmem:[#allocation50_spill] sm:$0xff] %v6121_v40  ;;  %v6123_v23 = vpop.permute.xlu0 %4032 }
  0xe8   : > { %9589 = vst [vmem:[#allocation51_spill] sm:$0xff] %v6123_v23  ;;  %4327 = vrot.lane.b32.xlu1 %v4326_v3, %s4941_s24  ;;  %v9604_v3 = vld [vmem:[#allocation37_spill] sm:$0xff]  ;;  %v9646_v23 = vld [vmem:[#allocation60_spill] sm:$0xff] }
  0xe9   : > { %4322 = vrot.lane.b32.xlu0 %v4321_v51, %s4941_s24  ;;  %v4356_v51 = vpack.i.bf16 %v9604_v3, %v9603_v19  ;;  %v9614_v19 = vld [vmem:[#allocation46_spill] sm:$0xff] }
  0xea   : > { %v6129_v8 = vpop.permute.xlu1 %4047 }
  0xeb   : > { %9592 = vst [vmem:[#allocation55_spill] sm:$0xff] %v6129_v8  ;;  %v6131_v48 = vpop.permute.xlu0 %4042  ;;  %v9653_v8 = vld [vmem:[#allocation143_spill] sm:$0xff] }
  0xec   : > { %9593 = vst [vmem:[#allocation25_spill] sm:$0xff] %v6131_v48  ;;  %4337 = vrot.lane.b32.xlu1 %v4336_v49, %s4942_s25  ;;  %v4351_v49 = vpack.i.bf16 %v9606_v27, %v9605_v17  ;;  %v9617_v17 = vld [vmem:[#allocation56_spill] sm:$0xff]  ;;  %v9618_v27 = vld [vmem:[#allocation53_spill] sm:$0xff]  ;;  %v617_v48 = vrot.slane %v9586_v46, 1  ;;  %v3849_v46 = vunpack.i.l.bf16 %v9652_v22  ;;  %v3844_v40 = vunpack.i.l.bf16 %v9653_v8 }
  0xed   : > { %4332 = vrot.lane.b32.xlu0 %v9598_v52, %s4942_s25  ;;  %v4361_v52 = vpack.i.bf16 %v9610_v53, %v9609_v33  ;;  %v9621_v33 = vld [vmem:[#allocation63_spill] sm:$0xff]  ;;  %v9622_v53 = vld [vmem:[#allocation57_spill] sm:$0xff] }
  0xee   : > { %v6142_v63 = vpop.permute.xlu1 %4057  ;;  %v9659_v22 = vld [vmem:[#allocation149_spill] sm:$0xff] }
  0xef   : > { %9601 = vst [vmem:[#allocation28_spill] sm:$0xff] %v6142_v63  ;;  %v6144_v10 = vpop.permute.xlu0 %4052 }
  0xf0   : > { %9602 = vst [vmem:[#allocation27_spill] sm:$0xff] %v6144_v10  ;;  %4347 = vrot.lane.b32.xlu1 %v4346_v9, %s4942_s25  ;;  %v9613_v9 = vld [vmem:[#allocation45_spill] sm:$0xff]  ;;  %v3854_v10 = vunpack.i.l.bf16 %v9659_v22 }
  0xf1   : > { %4342 = vrot.lane.b32.xlu0 %v4341_v60, %s4942_s25  ;;  %v4371_v3 = vpack.i.bf16 %v9614_v19, %v9613_v9  ;;  %v9615_v60 = vld [vmem:[#allocation47_spill] sm:$0xff]  ;;  %v615_v19 = vrot.slane %v9585_v29, 1  ;;  %v9638_v29 = vld [vmem:[#allocation82_spill] sm:$0xff] }
  0xf2   : > { %v6152_v26 = vpop.permute.xlu1 %4067  ;;  %v4376_v15 = vpack.i.bf16 %v9616_v61, %v9615_v60  ;;  %v9628_v60 = vld [vmem:[#allocation70_spill] sm:$0xff] }
  0xf3   : > { %9607 = vst [vmem:[#allocation34_spill] sm:$0xff] %v6152_v26  ;;  %v6154_v20 = vpop.permute.xlu0 %4062  ;;  %v9629_v26 = vld [vmem:[#allocation78_spill] sm:$0xff] }
  0xf4   : > { %9608 = vst [vmem:[#allocation8_spill] sm:$0xff] %v6154_v20  ;;  %4357 = vrot.lane.b32.xlu1 %v4356_v51, %s4942_s25  ;;  %v4386_v20 = vpack.i.bf16 %v9620_v44, %v9619_v55  ;;  %v9631_v44 = vld [vmem:[#allocation75_spill] sm:$0xff]  ;;  %v9636_v51 = vld [vmem:[#allocation136_spill] sm:$0xff]  ;;  %v3855_v55 = vunpack.i.h.bf16 %v9659_v22  ;;  %v9674_v22 = vld [vmem:[#allocation126_spill] sm:$0xff] }
  0xf5   : > { %4352 = vrot.lane.b32.xlu0 %v4351_v49, %s4942_s25  ;;  %v9632_v49 = vld [vmem:[#allocation76_spill] sm:$0xff]  ;;  %v3840_v35 = vunpack.i.h.bf16 %v9636_v51  ;;  %v3839_v9 = vunpack.i.l.bf16 %v9636_v51  ;;  %v3845_v51 = vunpack.i.h.bf16 %v9653_v8  ;;  %v6230_v8 = vsel %vm505_vm0, %v615_v19, %v617_v48 }
  0xf6   : > { %v6177_v61 = vpop.permute.xlu1 %4077  ;;  %9660 = vst [vmem:[#allocation35_spill] sm:$0xff] %v6230_v8  ;;  %v3980_v8 = vunpack.i.h.bf16 %v6061_v43 }
  0xf7   : > { %9627 = vst [vmem:[#allocation7_spill] sm:$0xff] %v6177_v61  ;;  %v6189_v12 = vpop.permute.xlu0 %4072  ;;  %v9639_v61 = vld [vmem:[#allocation87_spill] sm:$0xff]  ;;  %v1943_v63 = vsel %vm1924_vm2, %v9656_v59, %v3839_v9 }
  0xf8   : > { %9637 = vst [vmem:[#allocation29_spill] sm:$0xff] %v6189_v12  ;;  %4367 = vrot.lane.b32.xlu1 %v4366_v41, %s4942_s25  ;;  %v3835_v12 = vunpack.i.h.bf16 %v9647_v7  ;;  %v9650_v41 = vrot.slane %v9587_v1, 1  ;;  %v9655_v7 = vld [vmem:[#allocation117_spill] sm:$0xff]  ;;  %v9657_v1 = vld [vmem:[#allocation148_spill] sm:$0xff]  ;;  %v9688_v59 = vld [vmem:[#allocation111_spill] sm:$0xff] }
  0xf9   : > { %4362 = vrot.lane.b32.xlu0 %v4361_v52, %s4942_s25  ;;  %v1944_v52 = vsel %vm1924_vm2, %v9655_v7, %v3840_v35  ;;  %v3860_v0 = vunpack.i.h.bf16 %v9657_v1  ;;  %v9661_v35 = vrot.slane %v9646_v23, 1  ;;  %v9664_v7 = vld [vmem:[#allocation112_spill] sm:$0xff]  ;;  %v1948_v23 = vsel %vm1924_vm2, %v9668_v2, %v3850_v54  ;;  %v9686_v2 = vld [vmem:[#allocation109_spill] sm:$0xff] }
  0xfa   : > { %v6210_v6 = vsel %vm505_vm0, %v9650_v41, %v615_v19  ;;  %v6216_v34 = vpop.permute.xlu1 %4087  ;;  %v3859_v41 = vunpack.i.l.bf16 %v9657_v1 }
  0xfb   : > { %9651 = vst [vmem:[#allocation26_spill] sm:$0xff] %v6210_v6  ;;  %9654 = vst [vmem:[#allocation32_spill] sm:$0xff] %v6216_v34  ;;  %v6224_v16 = vpop.permute.xlu0 %4082  ;;  %v6235_v9 = vsel %vm505_vm0, %v617_v48, %v9661_v35  ;;  %v9663_v34 = vld [vmem:[#allocation113_spill] sm:$0xff]  ;;  %v1947_v48 = vsel %vm1924_vm2, %v9669_v28, %v3849_v46  ;;  %v9670_v35 = vld [vmem:[#allocation119_spill] sm:$0xff]  ;;  %v3969_v46 = vunpack.i.l.bf16 %v6051_v37 }
  0xfc   : > { %9658 = vst [vmem:[#allocation37_spill] sm:$0xff] %v6224_v16  ;;  %4377 = vrot.lane.b32.xlu1 %v4376_v15, %s4942_s25  ;;  %9662 = vst [vmem:[#allocation31_spill] sm:$0xff] %v6235_v9  ;;  %v1942_v1 = vsel %vm1924_vm2, %v9663_v34, %v3835_v12  ;;  %v1941_v16 = vsel %vm1924_vm2, %v9664_v7, %v3834_v11  ;;  %v1946_v12 = vsel %vm1924_vm2, %v9670_v35, %v3845_v51  ;;  %v9671_v34 = vld [vmem:[#allocation118_spill] sm:$0xff]  ;;  %v9678_v28 = vld [vmem:[#allocation125_spill] sm:$0xff] }
  0xfd   : > { %4372 = vrot.lane.b32.xlu0 %v4371_v3, %s4942_s25  ;;  %v1945_v11 = vsel %vm1924_vm2, %v9671_v34, %v3844_v40  ;;  %v9673_v3 = vld [vmem:[#allocation16_spill] sm:$0xff]  ;;  %v6262_v19 = vsel %vm1924_vm2, %v9674_v22, %v3859_v41  ;;  %v6272_v40 = vsel %vm1924_vm2, %v9678_v28, %v3855_v55  ;;  %v3974_v41 = vunpack.i.l.bf16 %v6063_v50 }
  0xfe   : > { %v6254_v7 = vpop.permute.xlu1 %4097  ;;  %v6258_v42 = vsel %vm1924_vm2, %v9673_v3, %v3860_v0  ;;  %v3975_v3 = vunpack.i.h.bf16 %v6063_v50  ;;  %v9680_v35 = vpack.i.bf16 %v9618_v27, %v9617_v17  ;;  %v3979_v50 = vunpack.i.l.bf16 %v6061_v43 }
  0xff   : > { %9672 = vst [vmem:[#allocation38_spill] sm:$0xff] %v6254_v7  ;;  %v6264_v54 = vpop.permute.xlu0 %4092  ;;  %v9679_v7 = vld [vmem:[#allocation124_spill] sm:$0xff]  ;;  %v3985_v17 = vunpack.i.h.bf16 %v6073_v56  ;;  %v3984_v27 = vunpack.i.l.bf16 %v6073_v56  ;;  %v1998_v28 = vsel %vm1979_vm3, %v1943_v63, %v3974_v41  ;;  %v9689_v51 = vpack.i.bf16 %v9624_v57, %v9623_v36 }
 0x100   : > { %9675 = vst [vmem:[#allocation40_spill] sm:$0xff] %v6264_v54  ;;  %v6276_v0 = vsel %vm1924_vm2, %v9679_v7, %v3854_v10  ;;  %4387 = vrot.lane.b32.xlu1 %v4386_v20, %s4942_s25  ;;  %v3970_v54 = vunpack.i.h.bf16 %v6051_v37  ;;  %v9684_v7 = vld [vmem:[#allocation6_spill] sm:$0xff]  ;;  %v1999_v34 = vsel %vm1979_vm3, %v1944_v52, %v3975_v3  ;;  %v1996_v9 = vsel %vm1979_vm3, %v1941_v16, %v3969_v46 }
 0x101   : > { %4382 = vrot.lane.b32.xlu0 %v9680_v35, %s4942_s25  ;;  %v9687_v37 = vld [vmem:[#allocation110_spill] sm:$0xff]  ;;  %v9690_v63 = vpack.i.bf16 %v9622_v53, %v9621_v33  ;;  %v2001_v52 = vsel %vm1979_vm3, %v1946_v12, %v3980_v8  ;;  %v2000_v36 = vsel %vm1979_vm3, %v1945_v11, %v3979_v50  ;;  %v3995_v33 = vunpack.i.h.bf16 %v6083_v62 }
 0x102   : > { %v4108_v20 = vpop.permute.xlu1 %4107  ;;  %v1997_v15 = vsel %vm1979_vm3, %v1942_v1, %v3970_v54  ;;  %v2003_v1 = vsel %vm1979_vm3, %v1948_v23, %v3985_v17  ;;  %v3994_v53 = vunpack.i.l.bf16 %v6083_v62  ;;  %v3989_v23 = vunpack.i.l.bf16 %v6071_v45 }
 0x103   : > { %v4103_v35 = vpop.permute.xlu0 %4102  ;;  %v4110_v22 = vunpack.i.h.bf16 %v4108_v20  ;;  %v4109_v55 = vunpack.i.l.bf16 %v4108_v20  ;;  %v9692_v62 = vpack.i.bf16 %v9626_v32, %v9625_v31  ;;  %v3890_v46 = vunpack.i.h.bf16 %v5965_v14 }
 0x104   : > { %v4105_v10 = vunpack.i.h.bf16 %v4103_v35  ;;  %v4104_v43 = vunpack.i.l.bf16 %v4103_v35  ;;  %4397 = vrot.lane.b32.xlu1 %v9689_v51, %s4942_s25  ;;  %v3885_v41 = vunpack.i.h.bf16 %v5973_v58  ;;  %v2007_v32 = vsel %vm1979_vm3, %v6258_v42, %v3995_v33 }
 0x105   : > { %v6308_v56 = vsel %vm2034_vm4, %v1999_v34, %v4110_v22  ;;  %v6311_v20 = vsel %vm2034_vm4, %v1998_v28, %v4109_v55  ;;  %4392 = vrot.lane.b32.xlu0 %v9690_v63, %s4942_s25  ;;  %v2002_v28 = vsel %vm1979_vm3, %v1947_v48, %v3984_v27  ;;  %v3884_v55 = vunpack.i.l.bf16 %v5973_v58 }
 0x106   : > { %v6320_v57 = vsel %vm2034_vm4, %v1996_v9, %v4104_v43  ;;  %v6323_v16 = vsel %vm2034_vm4, %v1997_v15, %v4105_v10  ;;  %v4118_v34 = vpop.permute.xlu1 %4117  ;;  %v9691_v9 = vpack.i.bf16 %v9629_v26, %v9628_v60  ;;  %v3990_v15 = vunpack.i.h.bf16 %v6071_v45 }
 0x107   : > { %v4113_v22 = vpop.permute.xlu0 %4112  ;;  %v4120_v3 = vunpack.i.h.bf16 %v4118_v34  ;;  %v4119_v54 = vunpack.i.l.bf16 %v4118_v34  ;;  %v3889_v26 = vunpack.i.l.bf16 %v5965_v14  ;;  %v2006_v14 = vsel %vm1979_vm3, %v6262_v19, %v3994_v53 }
 0x108   : > { %v4115_v8 = vunpack.i.h.bf16 %v4113_v22  ;;  %v4114_v12 = vunpack.i.l.bf16 %v4113_v22  ;;  %4407 = vrot.lane.b32.xlu1 %v9691_v9, %s4942_s25  ;;  %v9693_v35 = vpack.i.bf16 %v9633_v13, %v9632_v49  ;;  %v2005_v43 = vsel %vm1979_vm3, %v6272_v40, %v3990_v15  ;;  %v9703_v9 = vld [vmem:[#allocation139_spill] sm:$0xff] }
 0x109   : > { %v6336_v48 = vsel %vm2034_vm4, %v2003_v1, %v4120_v3  ;;  %v6339_v11 = vsel %vm2034_vm4, %v2002_v28, %v4119_v54  ;;  %4402 = vrot.lane.b32.xlu0 %v9692_v62, %s4942_s25  ;;  %v2004_v58 = vsel %vm1979_vm3, %v6276_v0, %v3989_v23  ;;  %v9696_v19 = vpack.i.bf16 %v9631_v44, %v9630_v25  ;;  %v9699_v1 = vld [vmem:[#allocation141_spill] sm:$0xff] }
 0x10a   : > { %v6348_v60 = vsel %vm2034_vm4, %v2000_v36, %v4114_v12  ;;  %v6351_v45 = vsel %vm2034_vm4, %v2001_v52, %v4115_v8  ;;  %v4128_v51 = vpop.permute.xlu1 %4127  ;;  %v3900_v13 = vunpack.i.h.bf16 %v5981_v21  ;;  %v3899_v49 = vunpack.i.l.bf16 %v5981_v21  ;;  %v9698_v36 = vld [vmem:[#allocation144_spill] sm:$0xff] }
 0x10b   : > { %v4123_v10 = vpop.permute.xlu0 %4122  ;;  %v4130_v50 = vunpack.i.h.bf16 %v4128_v51  ;;  %v4129_v17 = vunpack.i.l.bf16 %v4128_v51  ;;  %v1964_v34 = vsel %vm1924_vm2, %v9698_v36, %v3890_v46  ;;  %v1963_v28 = vsel %vm1924_vm2, %v9699_v1, %v3889_v26  ;;  %v9702_v8 = vld [vmem:[#allocation140_spill] sm:$0xff]  ;;  %v9707_v51 = vld [vmem:[#allocation146_spill] sm:$0xff] }
 0x10c   : > { %v4125_v31 = vunpack.i.h.bf16 %v4123_v10  ;;  %v4124_v27 = vunpack.i.l.bf16 %v4123_v10  ;;  %4417 = vrot.lane.b32.xlu1 %v9693_v35, %s4942_s25  ;;  %v3895_v25 = vunpack.i.h.bf16 %v5983_v30  ;;  %v3894_v44 = vunpack.i.l.bf16 %v5983_v30  ;;  %v9714_v35 = vld [vmem:[#allocation153_spill] sm:$0xff] }
 0x10d   : > { %v6368_v63 = vsel %vm2034_vm4, %v2007_v32, %v4130_v50  ;;  %v6371_v42 = vsel %vm2034_vm4, %v2006_v14, %v4129_v17  ;;  %4412 = vrot.lane.b32.xlu0 %v9696_v19, %s4942_s25  ;;  %v3910_v21 = vunpack.i.h.bf16 %v5991_v18  ;;  %v3909_v3 = vunpack.i.l.bf16 %v5991_v18  ;;  %v9711_v17 = vld [vmem:[#allocation158_spill] sm:$0xff]  ;;  %v9712_v14 = vld [vmem:[#allocation151_spill] sm:$0xff]  ;;  %v9716_v19 = vld [vmem:[#allocation89_spill] sm:$0xff] }
 0x10e   : > { %9694 = vst [vmem:[#allocation41_spill] sm:$0xff] %v6368_v63  ;;  %9695 = vst [vmem:[#allocation43_spill] sm:$0xff] %v6371_v42  ;;  %v6380_v40 = vsel %vm2034_vm4, %v2004_v58, %v4124_v27  ;;  %v6383_v0 = vsel %vm2034_vm4, %v2005_v43, %v4125_v31  ;;  %v6385_v52 = vpop.permute.xlu1 %4137  ;;  %v3905_v54 = vunpack.i.h.bf16 %v5993_v24  ;;  %v3904_v33 = vunpack.i.l.bf16 %v5993_v24  ;;  %v9713_v31 = vld [vmem:[#allocation150_spill] sm:$0xff]  ;;  %v9715_v58 = vld [vmem:[#allocation92_spill] sm:$0xff] }
 0x10f   : > { %9697 = vst [vmem:[#allocation45_spill] sm:$0xff] %v6385_v52  ;;  %v6393_v22 = vpop.permute.xlu0 %4132  ;;  %v9701_v53 = vpack.i.bf16 %v9639_v61, %v9638_v29  ;;  %v1962_v12 = vsel %vm1924_vm2, %v9702_v8, %v3885_v41  ;;  %v1961_v30 = vsel %vm1924_vm2, %v9703_v9, %v3884_v55  ;;  %v3920_v15 = vunpack.i.h.bf16 %v6001_v5  ;;  %v9705_v61 = vld [vmem:[#allocation147_spill] sm:$0xff]  ;;  %v9708_v41 = vld [vmem:[#allocation145_spill] sm:$0xff] }
 0x110   : > { %9700 = vst [vmem:[#allocation46_spill] sm:$0xff] %v6393_v22  ;;  %v3919_v23 = vunpack.i.l.bf16 %v6001_v5  ;;  %v9704_v18 = vpack.i.bf16 %v9635_v47, %v9634_v38  ;;  %v1968_v24 = vsel %vm1924_vm2, %v5922_v4, %v3900_v13  ;;  %v1967_v29 = vsel %vm1924_vm2, %v9705_v61, %v3899_v49  ;;  %v9709_v47 = vld [vmem:[#allocation171_spill] sm:$0xff]  ;;  %v9718_v49 = vld [vmem:[#allocation162_spill] sm:$0xff] }
 0x111   : > { %4427 = vrot.lane.b32.xlu1 %v9701_v53, %s4942_s25  ;;  %v3915_v62 = vunpack.i.h.bf16 %v6003_v39  ;;  %v3914_v46 = vunpack.i.l.bf16 %v6003_v39  ;;  %v1966_v5 = vsel %vm1924_vm2, %v9707_v51, %v3895_v25  ;;  %v1965_v55 = vsel %vm1924_vm2, %v9708_v41, %v3894_v44  ;;  %v9719_v44 = vld [vmem:[#allocation156_spill] sm:$0xff] }
 0x112   : > { %4422 = vrot.lane.b32.xlu0 %v9704_v18, %s4942_s25  ;;  %v6419_v26 = vpop.permute.xlu1 %4147  ;;  %v4025_v38 = vunpack.i.h.bf16 %v9709_v47  ;;  %v4024_v10 = vunpack.i.l.bf16 %v9709_v47  ;;  %v1972_v32 = vsel %vm1924_vm2, %v9711_v17, %v3910_v21  ;;  %v1971_v39 = vsel %vm1924_vm2, %v9712_v14, %v3909_v3  ;;  %v9720_v3 = vld [vmem:[#allocation15_spill] sm:$0xff]  ;;  %v9722_v18 = vld [vmem:[#allocation20_spill] sm:$0xff] }
 0x113   : > { %9706 = vst [vmem:[#allocation47_spill] sm:$0xff] %v6419_v26  ;;  %v6427_v50 = vpop.permute.xlu0 %4142  ;;  %v6435_v27 = vsel %vm1924_vm2, %v9713_v31, %v3905_v54  ;;  %v6439_v43 = vsel %vm1924_vm2, %v9714_v35, %v3904_v33  ;;  %v9717_v13 = vpack.i.bf16 %v9715_v58, %v9716_v19  ;;  %v6447_v25 = vsel %vm1924_vm2, %v9718_v49, %v3920_v15  ;;  %v9721_v33 = vld [vmem:[#allocation88_spill] sm:$0xff]  ;;  %v9725_v19 = vld [vmem:[#allocation159_spill] sm:$0xff] }
 0x114   : > { %9710 = vst [vmem:[#allocation52_spill] sm:$0xff] %v6427_v50  ;;  %v6451_v21 = vsel %vm1924_vm2, %v9719_v44, %v3919_v23  ;;  %v4020_v54 = vunpack.i.h.bf16 %v9720_v3  ;;  %v4019_v53 = vunpack.i.l.bf16 %v9720_v3  ;;  %v9723_v47 = vpack.i.bf16 %v9721_v33, %v9722_v18  ;;  %v9724_v50 = vld [vmem:[#allocation155_spill] sm:$0xff] }
 0x115   : > { %4437 = vrot.lane.b32.xlu1 %v9717_v13, %s4942_s25  ;;  %v6461_v58 = vsel %vm1924_vm2, %v9724_v50, %v3915_v62  ;;  %v6465_v15 = vsel %vm1924_vm2, %v9725_v19, %v3914_v46  ;;  %v9726_v13 = vld [vmem:[#allocation170_spill] sm:$0xff]  ;;  %v2019_v3 = vsel %vm1979_vm3, %v1964_v34, %v4025_v38  ;;  %v2018_v22 = vsel %vm1979_vm3, %v1963_v28, %v4024_v10  ;;  %v9728_v46 = vld [vmem:[#allocation97_spill] sm:$0xff] }
 0x116   : > { %4432 = vrot.lane.b32.xlu0 %v9723_v47, %s4942_s25  ;;  %v4030_v23 = vunpack.i.h.bf16 %v9726_v13  ;;  %v4029_v26 = vunpack.i.l.bf16 %v9726_v13  ;;  %v4158_v52 = vpop.permute.xlu1 %4157  ;;  %v9727_v47 = vld [vmem:[#allocation51_spill] sm:$0xff]  ;;  %v9729_v19 = vld [vmem:[#allocation94_spill] sm:$0xff]  ;;  %v2017_v13 = vsel %vm1979_vm3, %v1962_v12, %v4020_v54  ;;  %v2016_v34 = vsel %vm1979_vm3, %v1961_v30, %v4019_v53  ;;  %v9732_v10 = vld [vmem:[#allocation93_spill] sm:$0xff] }
 0x117   : > { %v4153_v49 = vpop.permute.xlu0 %4152  ;;  %v4160_v33 = vunpack.i.h.bf16 %v4158_v52  ;;  %v4159_v18 = vunpack.i.l.bf16 %v4158_v52  ;;  %v4035_v44 = vunpack.i.h.bf16 %v9727_v47  ;;  %v4034_v62 = vunpack.i.l.bf16 %v9727_v47  ;;  %v9731_v38 = vld [vmem:[#allocation22_spill] sm:$0xff]  ;;  %v9734_v54 = vld [vmem:[#allocation25_spill] sm:$0xff] }
 0x118   : > { %v4155_v50 = vunpack.i.h.bf16 %v4153_v49  ;;  %v4154_v63 = vunpack.i.l.bf16 %v4153_v49  ;;  %v9730_v42 = vpack.i.bf16 %v9728_v46, %v9729_v19  ;;  %v9733_v47 = vpack.i.bf16 %v9731_v38, %v9732_v10 }
 0x119   : > { %v6480_v28 = vsel %vm2034_vm4, %v2019_v3, %v4160_v33  ;;  %v6483_v52 = vsel %vm2034_vm4, %v2018_v22, %v4159_v18  ;;  %v2021_v49 = vsel %vm1979_vm3, %v1966_v5, %v4030_v23  ;;  %v2020_v19 = vsel %vm1979_vm3, %v1965_v55, %v4029_v26 }
 0x11a   : > { %4447 = vrot.lane.b32.xlu1 %v9730_v42, %s4942_s25  ;;  %4442 = vrot.lane.b32.xlu0 %v9733_v47, %s4942_s25  ;;  %v6492_v42 = vsel %vm2034_vm4, %v2016_v34, %v4154_v63  ;;  %v6495_v12 = vsel %vm2034_vm4, %v2017_v13, %v4155_v50  ;;  %v4168_v30 = vpop.permute.xlu1 %4167  ;;  %v4045_v53 = vunpack.i.h.bf16 %v9734_v54  ;;  %v4044_v22 = vunpack.i.l.bf16 %v9734_v54  ;;  %v9735_v63 = vld [vmem:[#allocation99_spill] sm:$0xff]  ;;  %v9737_v50 = vld [vmem:[#allocation50_spill] sm:$0xff] }
 0x11b   : > { %v4163_v3 = vpop.permute.xlu0 %4162  ;;  %v4170_v33 = vunpack.i.h.bf16 %v4168_v30  ;;  %v4169_v18 = vunpack.i.l.bf16 %v4168_v30  ;;  %v2023_v46 = vsel %vm1979_vm3, %v1968_v24, %v4035_v44  ;;  %v2022_v5 = vsel %vm1979_vm3, %v1967_v29, %v4034_v62  ;;  %v9738_v24 = vld [vmem:[#allocation2_spill] sm:$0xff]  ;;  %v9741_v62 = vld [vmem:[#allocation55_spill] sm:$0xff] }
 0x11c   : > { %v4165_v23 = vunpack.i.h.bf16 %v4163_v3  ;;  %v4164_v26 = vunpack.i.l.bf16 %v4163_v3  ;;  %v9736_v55 = vpack.i.bf16 %v6210_v6, %v9735_v63  ;;  %v4040_v13 = vunpack.i.h.bf16 %v9737_v50  ;;  %v9739_v29 = vld [vmem:[#allocation98_spill] sm:$0xff] }
 0x11d   : > { %v4039_v34 = vunpack.i.l.bf16 %v9737_v50  ;;  %v6508_v38 = vsel %vm2034_vm4, %v2023_v46, %v4170_v33  ;;  %v6511_v10 = vsel %vm2034_vm4, %v2022_v5, %v4169_v18  ;;  %v9740_v44 = vpack.i.bf16 %v9738_v24, %v9739_v29  ;;  %v9742_v50 = vld [vmem:[#allocation27_spill] sm:$0xff] }
 0x11e   : > { %4457 = vrot.lane.b32.xlu1 %v9736_v55, %s4942_s25  ;;  %v4050_v47 = vunpack.i.h.bf16 %v9741_v62  ;;  %v4049_v30 = vunpack.i.l.bf16 %v9741_v62  ;;  %v6520_v54 = vsel %vm2034_vm4, %v2020_v19, %v4164_v26  ;;  %v6523_v3 = vsel %vm2034_vm4, %v2021_v49, %v4165_v23  ;;  %v4178_v33 = vpop.permute.xlu1 %4177  ;;  %v9743_v19 = vld [vmem:[#allocation5_spill] sm:$0xff]  ;;  %v9744_v26 = vld [vmem:[#allocation104_spill] sm:$0xff]  ;;  %v9746_v23 = vld [vmem:[#allocation31_spill] sm:$0xff] }
 0x11f   : > { %4452 = vrot.lane.b32.xlu0 %v9740_v44, %s4942_s25  ;;  %v2027_v46 = vsel %vm1979_vm3, %v1972_v32, %v4045_v53  ;;  %v2026_v18 = vsel %vm1979_vm3, %v1971_v39, %v4044_v22  ;;  %v4173_v5 = vpop.permute.xlu0 %4172  ;;  %v4180_v63 = vunpack.i.h.bf16 %v4178_v33  ;;  %v4179_v55 = vunpack.i.l.bf16 %v4178_v33  ;;  %v9747_v33 = vld [vmem:[#allocation35_spill] sm:$0xff] }
 0x120   : > { %v4055_v24 = vunpack.i.h.bf16 %v9742_v50  ;;  %v4054_v29 = vunpack.i.l.bf16 %v9742_v50  ;;  %v4175_v44 = vunpack.i.h.bf16 %v4173_v5  ;;  %v4174_v62 = vunpack.i.l.bf16 %v4173_v5  ;;  %v9749_v50 = vld [vmem:[#allocation165_spill] sm:$0xff] }
 0x121   : > { %v9745_v49 = vpack.i.bf16 %v9743_v19, %v9744_v26  ;;  %v2025_v32 = vsel %vm1979_vm3, %v6435_v27, %v4040_v13  ;;  %v2024_v39 = vsel %vm1979_vm3, %v6439_v43, %v4039_v34  ;;  %v6538_v53 = vsel %vm2034_vm4, %v2027_v46, %v4180_v63 }
 0x122   : > { %v6541_v22 = vsel %vm2034_vm4, %v2026_v18, %v4179_v55  ;;  %v9748_v5 = vpack.i.bf16 %v9746_v23, %v9747_v33  ;;  %v3925_v6 = vunpack.i.h.bf16 %v9749_v50  ;;  %v6550_v27 = vsel %vm2034_vm4, %v2024_v39, %v4174_v62  ;;  %v4188_v13 = vpop.permute.xlu1 %4187  ;;  %v9757_v23 = vld [vmem:[#allocation114_spill] sm:$0xff]  ;;  %v9759_v33 = vld [vmem:[#allocation161_spill] sm:$0xff] }
 0x123   : > { %4467 = vrot.lane.b32.xlu1 %v9745_v49, %s4943_s26  ;;  %v3924_v49 = vunpack.i.l.bf16 %v9749_v50  ;;  %v6553_v43 = vsel %vm2034_vm4, %v2025_v32, %v4175_v44  ;;  %v2029_v34 = vsel %vm1979_vm3, %v6461_v58, %v4050_v47  ;;  %v2028_v46 = vsel %vm1979_vm3, %v6465_v15, %v4049_v30  ;;  %v4183_v18 = vpop.permute.xlu0 %4182  ;;  %v9750_v44 = vld [vmem:[#allocation107_spill] sm:$0xff]  ;;  %v9752_v58 = vld [vmem:[#allocation28_spill] sm:$0xff] }
 0x124   : > { %4462 = vrot.lane.b32.xlu0 %v9748_v5, %s4942_s25  ;;  %v4190_v63 = vunpack.i.h.bf16 %v4188_v13  ;;  %v4189_v55 = vunpack.i.l.bf16 %v4188_v13  ;;  %v2031_v5 = vsel %vm1979_vm3, %v6447_v25, %v4055_v24  ;;  %v2030_v62 = vsel %vm1979_vm3, %v6451_v21, %v4054_v29  ;;  %v9753_v25 = vld [vmem:[#allocation106_spill] sm:$0xff]  ;;  %v9754_v21 = vld [vmem:[#allocation105_spill] sm:$0xff] }
 0x125   : > { %v4185_v39 = vunpack.i.h.bf16 %v4183_v18  ;;  %v4184_v50 = vunpack.i.l.bf16 %v4183_v18  ;;  %v9751_v32 = vpack.i.bf16 %v9684_v7, %v9750_v44  ;;  %v4060_v47 = vunpack.i.h.bf16 %v9752_v58 }
 0x126   : > { %v4059_v15 = vunpack.i.l.bf16 %v9752_v58  ;;  %v6570_v30 = vsel %vm2034_vm4, %v2031_v5, %v4190_v63  ;;  %v6573_v13 = vsel %vm2034_vm4, %v2030_v62, %v4189_v55  ;;  %v9755_v24 = vpack.i.bf16 %v9753_v25, %v9754_v21  ;;  %v9758_v63 = vld [vmem:[#allocation117_spill] sm:$0xff]  ;;  %v9760_v62 = vld [vmem:[#allocation163_spill] sm:$0xff] }
 0x127   : > { %4477 = vrot.lane.b32.xlu1 %v9751_v32, %s4943_s26  ;;  %v6580_v29 = vsel %vm2034_vm4, %v2028_v46, %v4184_v50  ;;  %v6583_v18 = vsel %vm2034_vm4, %v2029_v34, %v4185_v39  ;;  %v6585_v32 = vpop.permute.xlu1 %4197  ;;  %v4193_v58 = vpop.permute.xlu0 %4192  ;;  %v4496_v5 = vpack.i.bf16 %v9758_v63, %v9757_v23  ;;  %v1978_v55 = vsel %vm1924_vm2, %v9759_v33, %v3925_v6  ;;  %v9762_v23 = vld [vmem:[#allocation108_spill] sm:$0xff]  ;;  %v9765_v63 = vld [vmem:[#allocation113_spill] sm:$0xff] }
 0x128   : > { %4472 = vrot.lane.b32.xlu0 %v9755_v24, %s4943_s26  ;;  %9756 = vst [vmem:[#allocation56_spill] sm:$0xff] %v6585_v32  ;;  %v1977_v44 = vsel %vm1924_vm2, %v9760_v62, %v3924_v49  ;;  %v4195_v21 = vunpack.i.h.bf16 %v4193_v58  ;;  %v4194_v24 = vunpack.i.l.bf16 %v4193_v58  ;;  %v9761_v46 = vpack.i.bf16 %v9688_v59, %v9687_v37  ;;  %v9764_v6 = vld [vmem:[#allocation112_spill] sm:$0xff] }
 0x129   : > { %v2033_v34 = vsel %vm1979_vm3, %v1978_v55, %v4060_v47  ;;  %v2032_v39 = vsel %vm1979_vm3, %v1977_v44, %v4059_v15  ;;  %v9763_v50 = vpack.i.bf16 %v9686_v2, %v9762_v23  ;;  %v4491_v32 = vpack.i.bf16 %v9765_v63, %v9764_v6  ;;  %v9768_v44 = vld [vmem:[#allocation120_spill] sm:$0xff]  ;;  %v9769_v47 = vld [vmem:[#allocation123_spill] sm:$0xff]  ;;  %v9770_v55 = vld [vmem:[#allocation118_spill] sm:$0xff] }
 0x12a   : > { %v6606_v49 = vsel %vm2034_vm4, %v2032_v39, %v4194_v24  ;;  %v6609_v58 = vsel %vm2034_vm4, %v2033_v34, %v4195_v21  ;;  %v4506_v15 = vpack.i.bf16 %v9769_v47, %v9768_v44  ;;  %v9774_v21 = vld [vmem:[#allocation126_spill] sm:$0xff]  ;;  %v9775_v34 = vld [vmem:[#allocation16_spill] sm:$0xff] }
 0x12b   : > { %4487 = vrot.lane.b32.xlu1 %v9761_v46, %s4943_s26  ;;  %v6611_v37 = vpop.permute.xlu1 %4207  ;;  %v6613_v46 = vpop.permute.xlu0 %4202  ;;  %v4516_v39 = vpack.i.bf16 %v9775_v34, %v9774_v21  ;;  %v9780_v47 = vld [vmem:[#allocation130_spill] sm:$0xff] }
 0x12c   : > { %4482 = vrot.lane.b32.xlu0 %v9763_v50, %s4943_s26  ;;  %9766 = vst [vmem:[#allocation53_spill] sm:$0xff] %v6611_v37  ;;  %9767 = vst [vmem:[#allocation54_spill] sm:$0xff] %v6613_v46  ;;  %v9771_v50 = vld [vmem:[#allocation119_spill] sm:$0xff]  ;;  %v9777_v46 = vld [vmem:[#allocation125_spill] sm:$0xff] }
 0x12d   : > { %v4501_v6 = vpack.i.bf16 %v9771_v50, %v9770_v55  ;;  %v9781_v55 = vld [vmem:[#allocation132_spill] sm:$0xff] }
 0x12e   : > { %v4526_v50 = vpack.i.bf16 %v9781_v55, %v9780_v47 }
 0x12f   : > { %4497 = vrot.lane.b32.xlu1 %v4496_v5, %s4943_s26  ;;  %v6621_v63 = vpop.permute.xlu1 %4217  ;;  %v6623_v24 = vpop.permute.xlu0 %4212  ;;  %v9776_v5 = vld [vmem:[#allocation124_spill] sm:$0xff] }
 0x130   : > { %4492 = vrot.lane.b32.xlu0 %v4491_v32, %s4943_s26  ;;  %9772 = vst [vmem:[#allocation62_spill] sm:$0xff] %v6621_v63  ;;  %9773 = vst [vmem:[#allocation63_spill] sm:$0xff] %v6623_v24  ;;  %v4511_v37 = vpack.i.bf16 %v9777_v46, %v9776_v5  ;;  %v9783_v24 = vld [vmem:[#allocation129_spill] sm:$0xff]  ;;  %v9785_v46 = vld [vmem:[#allocation135_spill] sm:$0xff] }
 0x131   : > { %v9786_v5 = vld [vmem:[#allocation138_spill] sm:$0xff] }
 0x133   : > { %4507 = vrot.lane.b32.xlu1 %v4506_v15, %s4943_s26  ;;  %v6631_v44 = vpop.permute.xlu1 %4227  ;;  %v6633_v32 = vpop.permute.xlu0 %4222  ;;  %v9782_v15 = vld [vmem:[#allocation128_spill] sm:$0xff] }
 0x134   : > { %4502 = vrot.lane.b32.xlu0 %v4501_v6, %s4943_s26  ;;  %9778 = vst [vmem:[#allocation57_spill] sm:$0xff] %v6631_v44  ;;  %9779 = vst [vmem:[#allocation58_spill] sm:$0xff] %v6633_v32  ;;  %v4521_v63 = vpack.i.bf16 %v9783_v24, %v9782_v15  ;;  %v4536_v32 = vpack.i.bf16 %v9786_v5, %v9785_v46  ;;  %v9787_v44 = vld [vmem:[#allocation133_spill] sm:$0xff] }
 0x137   : > { %4517 = vrot.lane.b32.xlu1 %v4516_v39, %s4943_s26  ;;  %v4238_v21 = vpop.permute.xlu1 %4237  ;;  %v6641_v34 = vpop.permute.xlu0 %4232 }
 0x138   : > { %4512 = vrot.lane.b32.xlu0 %v4511_v37, %s4943_s26  ;;  %9784 = vst [vmem:[#allocation72_spill] sm:$0xff] %v6641_v34  ;;  %v4240_v6 = vunpack.i.h.bf16 %v4238_v21  ;;  %v4239_v23 = vunpack.i.l.bf16 %v4238_v21  ;;  %v9788_v34 = vld [vmem:[#allocation134_spill] sm:$0xff] }
 0x139   : > { %v4531_v15 = vpack.i.bf16 %v9788_v34, %v9787_v44 }
 0x13a   : > { %v6648_v39 = vsel %vm2089_vm5, %v6320_v57, %v4239_v23  ;;  %v6652_v37 = vsel %vm2089_vm5, %v6323_v16, %v4240_v6  ;;  %v4541_v57 = vpack.i.bf16 %v9702_v8, %v9703_v9  ;;  %v4546_v16 = vpack.i.bf16 %v9698_v36, %v9699_v1  ;;  %v4873_v23 = vld [vmem:[%s9018_s2 + $0x20] ss:$0 sps:$4 sm:$0xff]  }
 0x13b   : > { %4527 = vrot.lane.b32.xlu1 %v4526_v50, %s4943_s26  ;;  %v4248_v21 = vpop.permute.xlu1 %4247  ;;  %v4243_v24 = vpop.permute.xlu0 %4242  ;;  %v9340_v9 = vmov 0.0  }
 0x13c   : > { %4522 = vrot.lane.b32.xlu0 %v4521_v63, %s4943_s26  ;;  %v4250_v47 = vunpack.i.h.bf16 %v4248_v21  ;;  %v4249_v50 = vunpack.i.l.bf16 %v4248_v21  ;;  %v4245_v55 = vunpack.i.h.bf16 %v4243_v24  ;;  %v4244_v2 = vunpack.i.l.bf16 %v4243_v24  ;;  %3643 = vmatprep.subr.bf16.mxu0 %v9340_v9 }
 0x13d   : > { %3761 = vmatprep.subr.bf16.mxu1 %v9340_v9  ;;  %3653 = vmatprep.mubr.msk.bf16.mxu0 %vm4945_vm7, %v9340_v9 }
 0x13e   : > { %v6667_v63 = vsel %vm2089_vm5, %v6348_v60, %v4249_v50  ;;  %v6671_v6 = vsel %vm2089_vm5, %v6351_v45, %v4250_v47  ;;  %v6676_v8 = vsel %vm2089_vm5, %v6311_v20, %v4244_v2  ;;  %v6680_v36 = vsel %vm2089_vm5, %v6308_v56, %v4245_v55  ;;  %3709 = vmatprep.mubr.msk.bf16.mxu1 %vm4945_vm7, %v9340_v9 }
 0x13f   : > { %4537 = vrot.lane.b32.xlu1 %v4536_v32, %s4943_s26  ;;  %v4258_v1 = vpop.permute.xlu1 %4257  ;;  %v2511_v60 = vsel %vm2509_vm6, %v4873_v23, 0  ;;  %v4253_v45 = vpop.permute.xlu0 %4252  ;;  %v4556_v2 = vpack.i.bf16 %v5922_v4, %v9705_v61  ;;  %v4551_v55 = vpack.i.bf16 %v9707_v51, %v9708_v41  ;;  %v4874_v4 = vld [vmem:[%s9018_s2 + $0x18] sm:$0xff]   ;;  %v4566_v50 = vpack.i.bf16 %v9711_v17, %v9712_v14 }
 0x140   : > { %4532 = vrot.lane.b32.xlu0 %v4531_v15, %s4943_s26  ;;  %v4260_v24 = vunpack.i.h.bf16 %v4258_v1  ;;  %v4259_v32 = vunpack.i.l.bf16 %v4258_v1  ;;  %3644 = vmatpush3.bf16.msra.mxu0 %v2511_v60  ;;  %v4255_v47 = vunpack.i.h.bf16 %v4253_v45  ;;  %v4254_v15 = vunpack.i.l.bf16 %v4253_v45  ;;  %v9792_v17 = vld [vmem:[#allocation41_spill] sm:$0xff]  ;;  %v9797_v45 = vld [vmem:[#allocation162_spill] sm:$0xff] }
 0x141   : > { %3766 = vmatpush3.bf16.msra.mxu1 %v2511_v60  ;;  %3645 = vmatprep.subr.bf16.mxu0 %v9340_v9  ;;  %v6738_v60 = vld [vmem:[%s4990_s20 + $0x1d8] sm:$0xff] }
 0x142   : > { %v6690_v56 = vsel %vm2089_vm5, %v6380_v40, %v4259_v32  ;;  %v6694_v20 = vsel %vm2089_vm5, %v6383_v0, %v4260_v24  ;;  %3762 = vmatprep.subr.bf16.mxu1 %v9340_v9  ;;  %v6705_v40 = vsel %vm2089_vm5, %v6339_v11, %v4254_v15  ;;  %v6709_v0 = vsel %vm2089_vm5, %v6336_v48, %v4255_v47  ;;  %v6721_v11 = vld [vmem:[%s4990_s20 + $0x1d0] sm:$0xff]  ;;  %v9798_v47 = vld [vmem:[#allocation159_spill] sm:$0xff] }
 0x143   : > { %4547 = vrot.lane.b32.xlu1 %v4546_v16, %s4943_s26  ;;  %v6711_v61 = vpop.permute.xlu1 %4267  ;;  %v4263_v21 = vpop.permute.xlu0 %4262  ;;  %v4561_v48 = vpack.i.bf16 %v9713_v31, %v9714_v35  ;;  %9790 = vst [vmem:[#allocation69_spill] sm:$0xff] %v6721_v11  ;;  %v9791_v16 = vld [vmem:[#allocation43_spill] sm:$0xff]  ;;  %9794 = vst [vmem:[#allocation78_spill] sm:$0xff] %v6738_v60  ;;  %v9796_v35 = vld [vmem:[#allocation156_spill] sm:$0xff]  ;;  %v446_v32 = vrot.slane %v6721_v11, 7 }
 0x144   : > { %4542 = vrot.lane.b32.xlu0 %v4541_v57, %s4943_s26  ;;  %9789 = vst [vmem:[#allocation73_spill] sm:$0xff] %v6711_v61  ;;  %3646 = vmatpush3.bf16.msra.mxu0 %v4874_v4  ;;  %v4265_v51 = vunpack.i.h.bf16 %v4263_v21  ;;  %v4264_v41 = vunpack.i.l.bf16 %v4263_v21  ;;  %v4875_v57 = vld [vmem:[%s9018_s2 + $0x10] sm:$0xff]   ;;  %v4576_v24 = vpack.i.bf16 %v9797_v45, %v9796_v35  ;;  %v9799_v15 = vld [vmem:[#allocation155_spill] sm:$0xff] }
 0x145   : > { %3767 = vmatpush3.bf16.msra.mxu1 %v4874_v4  ;;  %3647 = vmatprep.subr.bf16.mxu0 %v9340_v9  ;;  %v4876_v4 = vld [vmem:[%s9018_s2 + $0x8] sm:$0xff]  }
 0x146   : > { %3763 = vmatprep.subr.bf16.mxu1 %v9340_v9  ;;  %v6729_v23 = vsel %vm2089_vm5, %v9791_v16, %v4264_v41  ;;  %v6733_v14 = vsel %vm2089_vm5, %v9792_v17, %v4265_v51  ;;  %v9856_v11 = vld [vmem:[#allocation59_spill] sm:$0xff] }
 0x147   : > { %4557 = vrot.lane.b32.xlu1 %v4556_v2, %s4943_s26  ;;  %v6735_v1 = vpop.permute.xlu1 %4277  ;;  %v6740_v31 = vpop.permute.xlu0 %4272  ;;  %v4571_v2 = vpack.i.bf16 %v9799_v15, %v9798_v47 }
 0x148   : > { %4552 = vrot.lane.b32.xlu0 %v4551_v55, %s4943_s26  ;;  %9793 = vst [vmem:[#allocation70_spill] sm:$0xff] %v6735_v1  ;;  %9795 = vst [vmem:[#allocation79_spill] sm:$0xff] %v6740_v31  ;;  %3648 = vmatpush3.bf16.msra.mxu0 %v4875_v57  ;;  %v448_v55 = vrot.slane %v6738_v60, 7  ;;  %v9838_v31 = vld [vmem:[#allocation18_spill] sm:$0xff]  ;;  %v9842_v60 = vld [vmem:[#allocation103_spill] sm:$0xff] }
 0x149   : > { %3768 = vmatpush3.bf16.msra.mxu1 %v4875_v57  ;;  %3649 = vmatprep.subr.bf16.mxu0 %v9340_v9  ;;  %v9801_v57 = vld [vmem:[#allocation60_spill] sm:$0xff] }
 0x14a   : > { %3764 = vmatprep.subr.bf16.mxu1 %v9340_v9  ;;  %v9802_v16 = vrot.slane %v9801_v57, 7 }
 0x14b   : > { %4567 = vrot.lane.b32.xlu1 %v4566_v50, %s4943_s26  ;;  %v4288_v21 = vpop.permute.xlu1 %4287  ;;  %v6755_v51 = vpop.permute.xlu0 %4282 }
 0x14c   : > { %4562 = vrot.lane.b32.xlu0 %v4561_v48, %s4943_s26  ;;  %9800 = vst [vmem:[#allocation75_spill] sm:$0xff] %v6755_v51  ;;  %v4290_v41 = vunpack.i.h.bf16 %v4288_v21  ;;  %v4289_v50 = vunpack.i.l.bf16 %v4288_v21  ;;  %3650 = vmatpush3.bf16.msra.mxu0 %v4876_v4  ;;  %v4581_v48 = vpack.i.bf16 %v9759_v33, %v9760_v62  ;;  %v447_v17 = vsel %vm330_vm1, %v9802_v16, %v446_v32  ;;  %v4877_v33 = vld [vmem:[%s9018_s2] sm:$0xff]  }
 0x14d   : > { %3769 = vmatpush3.bf16.msra.mxu1 %v4876_v4  ;;  %3651 = vmatprep.subr.bf16.mxu0 %v9340_v9 }
 0x14e   : > { %v6766_v35 = vsel %vm2089_vm5, %v6492_v42, %v4289_v50  ;;  %v6770_v45 = vsel %vm2089_vm5, %v6495_v12, %v4290_v41  ;;  %3765 = vmatprep.subr.bf16.mxu1 %v9340_v9  ;;  %v9803_v12 = vld [vmem:[#allocation66_spill] sm:$0xff]  ;;  %v9804_v41 = vld [vmem:[#allocation65_spill] sm:$0xff] }
 0x14f   : > { %4577 = vrot.lane.b32.xlu1 %v4576_v24, %s4943_s26  ;;  %v449_v24 = vsel %vm330_vm1, %v446_v32, %v448_v55  ;;  %v4298_v62 = vpop.permute.xlu1 %4297  ;;  %v4293_v47 = vpop.permute.xlu0 %4292 }
 0x150   : > { %4572 = vrot.lane.b32.xlu0 %v4571_v2, %s4943_s26  ;;  %v4300_v15 = vunpack.i.h.bf16 %v4298_v62  ;;  %v4299_v4 = vunpack.i.l.bf16 %v4298_v62  ;;  %3652 = vmatpush3.bf16.msra.mxu0 %v4877_v33  ;;  %v4295_v42 = vunpack.i.h.bf16 %v4293_v47  ;;  %v4294_v21 = vunpack.i.l.bf16 %v4293_v47 }
 0x151   : > { %3770 = vmatpush3.bf16.msra.mxu1 %v4877_v33  ;;  %v9805_v2 = vpack.i.bf16 %v9803_v12, %v9804_v41  ;;  %v4596_v32 = vpack.i.bf16 %v449_v24, %v447_v17 }
 0x152   : > { %v6784_v55 = vsel %vm2089_vm5, %v6520_v54, %v4299_v4  ;;  %v6788_v50 = vsel %vm2089_vm5, %v6523_v3, %v4300_v15  ;;  %v6795_v16 = vsel %vm2089_vm5, %v6483_v52, %v4294_v21  ;;  %v6799_v54 = vsel %vm2089_vm5, %v6480_v28, %v4295_v42  ;;  %v9806_v28 = vld [vmem:[#allocation68_spill] sm:$0xff]  ;;  %v9807_v15 = vld [vmem:[#allocation67_spill] sm:$0xff]  ;;  %v4879_v21 = vld [vmem:[%s4990_s20 + $0x38] sm:$0xff] }
 0x153   : > { %4587 = vrot.lane.b32.xlu1 %v9805_v2, %s4943_s26  ;;  %v4308_v17 = vpop.permute.xlu1 %4307  ;;  %v4303_v3 = vpop.permute.xlu0 %4302  ;;  %v9808_v4 = vpack.i.bf16 %v9806_v28, %v9807_v15  ;;  %v4878_v42 = vld [vmem:[%s4990_s20 + $0x30] sm:$0xff] }
 0x154   : > { %4582 = vrot.lane.b32.xlu0 %v4581_v48, %s4943_s26  ;;  %v4310_v48 = vunpack.i.h.bf16 %v4308_v17  ;;  %v4309_v24 = vunpack.i.l.bf16 %v4308_v17  ;;  %v4305_v33 = vunpack.i.h.bf16 %v4303_v3  ;;  %v4304_v62 = vunpack.i.l.bf16 %v4303_v3 }
 0x155   : > { %v4601_v12 = vpack.i.bf16 %v4879_v21, %v4878_v42 }
 0x156   : > { %v6806_v47 = vsel %vm2089_vm5, %v6550_v27, %v4309_v24  ;;  %v6810_v52 = vsel %vm2089_vm5, %v6553_v43, %v4310_v48  ;;  %v6820_v41 = vsel %vm2089_vm5, %v6511_v10, %v4304_v62  ;;  %v6824_v27 = vsel %vm2089_vm5, %v6508_v38, %v4305_v33  ;;  %v9809_v24 = vld [vmem:[#allocation33_spill] sm:$0xff]  ;;  %v4880_v38 = vld [vmem:[%s4990_s20 + $0x40] sm:$0xff]  ;;  %v4881_v33 = vld [vmem:[%s4990_s20 + $0x48] sm:$0xff] }
 0x157   : > { %4597 = vrot.lane.b32.xlu1 %v4596_v32, %s4943_s26  ;;  %v4318_v43 = vpop.permute.xlu1 %4317  ;;  %v4313_v2 = vpop.permute.xlu0 %4312  ;;  %v4611_v62 = vpack.i.bf16 %v4881_v33, %v4880_v38  ;;  %v4884_v33 = vld [vmem:[%s4990_s20 + $0x60] sm:$0xff] }
 0x158   : > { %4592 = vrot.lane.b32.xlu0 %v9808_v4, %s4943_s26  ;;  %v4320_v32 = vunpack.i.h.bf16 %v4318_v43  ;;  %v4319_v17 = vunpack.i.l.bf16 %v4318_v43  ;;  %v4315_v3 = vunpack.i.h.bf16 %v4313_v2  ;;  %v4314_v48 = vunpack.i.l.bf16 %v4313_v2  ;;  %v9810_v2 = vld [vmem:[#allocation30_spill] sm:$0xff] }
 0x15a   : > { %v6830_v28 = vsel %vm2089_vm5, %v6580_v29, %v4319_v17  ;;  %v6834_v10 = vsel %vm2089_vm5, %v6583_v18, %v4320_v32  ;;  %v6841_v15 = vsel %vm2089_vm5, %v6541_v22, %v4314_v48  ;;  %v6845_v29 = vsel %vm2089_vm5, %v6538_v53, %v4315_v3  ;;  %v4882_v53 = vld [vmem:[%s4990_s20 + $0x50] sm:$0xff]  ;;  %v4883_v17 = vld [vmem:[%s4990_s20 + $0x58] sm:$0xff] }
 0x15b   : > { %4607 = vrot.lane.b32.xlu1 %v9809_v24, %s4946_s11  ;;  %v4328_v4 = vpop.permute.xlu1 %4327  ;;  %v4323_v42 = vpop.permute.xlu0 %4322  ;;  %v4621_v3 = vpack.i.bf16 %v4883_v17, %v4882_v53  ;;  %v9819_v17 = vld [vmem:[#allocation42_spill] sm:$0xff] }
 0x15c   : > { %4602 = vrot.lane.b32.xlu0 %v4601_v12, %s4947_s12  ;;  %v4330_v18 = vunpack.i.h.bf16 %v4328_v4  ;;  %v4329_v21 = vunpack.i.l.bf16 %v4328_v4  ;;  %v4325_v43 = vunpack.i.h.bf16 %v4323_v42  ;;  %v4324_v12 = vunpack.i.l.bf16 %v4323_v42 }
 0x15e   : > { %v6851_v32 = vsel %vm2089_vm5, %v6606_v49, %v4329_v21  ;;  %v6855_v22 = vsel %vm2089_vm5, %v6609_v58, %v4330_v18  ;;  %v6862_v48 = vsel %vm2089_vm5, %v6573_v13, %v4324_v12  ;;  %v6866_v24 = vsel %vm2089_vm5, %v6570_v30, %v4325_v43  ;;  %v9813_v58 = vld [vmem:[#allocation39_spill] sm:$0xff]  ;;  %v9816_v30 = vld [vmem:[#allocation36_spill] sm:$0xff]  ;;  %v4887_v43 = vld [vmem:[%s4990_s20 + $0x78] sm:$0xff] }
 0x15f   : > { %4617 = vrot.lane.b32.xlu1 %v9810_v2, %s4946_s11  ;;  %v6868_v49 = vpop.permute.xlu1 %4337  ;;  %v6870_v38 = vpop.permute.xlu0 %4332  ;;  %v4948_v18 = vmov 0   ;;  %v4886_v21 = vld [vmem:[%s4990_s20 + $0x70] sm:$0xff] }
 0x160   : > { %4612 = vrot.lane.b32.xlu0 %v4611_v62, %s4947_s12  ;;  %9811 = vst [vmem:[#allocation76_spill] sm:$0xff] %v6868_v49  ;;  %9812 = vst [vmem:[#allocation84_spill] sm:$0xff] %v6870_v38  ;;  %v4885_v62 = vld [vmem:[%s4990_s20 + $0x68] sm:$0xff]  ;;  %v4641_v12 = vpack.i.bf16 %v4887_v43, %v4886_v21  ;;  %4872 = vset.pattern.permute.xlu1 %v4948_v18  ;;  %v4891_v21 = vld [vmem:[%s4990_s20 + $0x98] sm:$0xff] }
 0x161   : > { %v4631_v4 = vpack.i.bf16 %v4885_v62, %v4884_v33  ;;  %4871 = vset.pattern.permute.xlu0 %v4948_v18  ;;  %v4890_v18 = vld [vmem:[%s4990_s20 + $0x90] sm:$0xff]  ;;  %v9841_v38 = vld [vmem:[#allocation127_spill] sm:$0xff] }
 0x162   : > { %v4661_v43 = vpack.i.bf16 %v4891_v21, %v4890_v18  ;;  %v4892_v18 = vld [vmem:[%s4990_s20 + $0xa0] sm:$0xff]  ;;  %v4893_v21 = vld [vmem:[%s4990_s20 + $0xa8] sm:$0xff]  ;;  %v3815_v1 = vunpack.i.h.bf16 %v9841_v38  ;;  %v3814_v57 = vunpack.i.l.bf16 %v9841_v38 }
 0x163   : > { %4627 = vrot.lane.b32.xlu1 %v9813_v58, %s4946_s11  ;;  %v6877_v13 = vpop.permute.xlu1 %4347  ;;  %v6879_v42 = vpop.permute.xlu0 %4342  ;;  %v4889_v58 = vld [vmem:[%s4990_s20 + $0x88] sm:$0xff] }
 0x164   : > { %4622 = vrot.lane.b32.xlu0 %v4621_v3, %s4947_s12  ;;  %9814 = vst [vmem:[#allocation85_spill] sm:$0xff] %v6877_v13  ;;  %9815 = vst [vmem:[#allocation81_spill] sm:$0xff] %v6879_v42  ;;  %v4888_v3 = vld [vmem:[%s4990_s20 + $0x80] sm:$0xff]  ;;  %v9828_v13 = vld [vmem:[#allocation115_spill] sm:$0xff] }
 0x165   : > { %v4651_v33 = vpack.i.bf16 %v4889_v58, %v4888_v3  ;;  %v3804_v42 = vunpack.i.l.bf16 %v9828_v13 }
 0x167   : > { %4637 = vrot.lane.b32.xlu1 %v9816_v30, %s4946_s11  ;;  %v6886_v2 = vpop.permute.xlu1 %4357  ;;  %v6888_v53 = vpop.permute.xlu0 %4352  ;;  %v9822_v30 = vld [vmem:[#allocation44_spill] sm:$0xff] }
 0x168   : > { %4632 = vrot.lane.b32.xlu0 %v4631_v4, %s4947_s12  ;;  %9817 = vst [vmem:[#allocation136_spill] sm:$0xff] %v6886_v2  ;;  %9818 = vst [vmem:[#allocation82_spill] sm:$0xff] %v6888_v53 }
 0x16b   : > { %4647 = vrot.lane.b32.xlu1 %v9819_v17, %s4946_s11  ;;  %v6895_v62 = vpop.permute.xlu1 %4367  ;;  %v6897_v4 = vpop.permute.xlu0 %4362 }
 0x16c   : > { %4642 = vrot.lane.b32.xlu0 %v4641_v12, %s4947_s12  ;;  %9820 = vst [vmem:[#allocation87_spill] sm:$0xff] %v6895_v62  ;;  %9821 = vst [vmem:[#allocation137_spill] sm:$0xff] %v6897_v4  ;;  %v9823_v62 = vld [vmem:[#allocation48_spill] sm:$0xff] }
 0x16f   : > { %4657 = vrot.lane.b32.xlu1 %v9822_v30, %s4946_s11  ;;  %v4378_v17 = vpop.permute.xlu1 %4377  ;;  %v4373_v9 = vpop.permute.xlu0 %4372 }
 0x170   : > { %4652 = vrot.lane.b32.xlu0 %v4651_v33, %s4947_s12  ;;  %v4380_v12 = vunpack.i.h.bf16 %v4378_v17  ;;  %v4379_v53 = vunpack.i.l.bf16 %v4378_v17  ;;  %v4375_v3 = vunpack.i.h.bf16 %v4373_v9  ;;  %v4374_v58 = vunpack.i.l.bf16 %v4373_v9 }
 0x171   : > { %v4671_v17 = vpack.i.bf16 %v4893_v21, %v4892_v18 }
 0x172   : > { %v6908_v30 = vsel %vm2144_vm8, %v6676_v8, %v4379_v53  ;;  %v6912_v33 = vsel %vm2144_vm8, %v6680_v36, %v4380_v12  ;;  %v6919_v9 = vsel %vm2144_vm8, %v6648_v39, %v4374_v58 }
 0x173   : > { %4667 = vrot.lane.b32.xlu1 %v9823_v62, %s4946_s11  ;;  %v6923_v62 = vsel %vm2144_vm8, %v6652_v37, %v4375_v3  ;;  %v4388_v8 = vpop.permute.xlu1 %4387  ;;  %v4383_v53 = vpop.permute.xlu0 %4382  ;;  %v4894_v37 = vld [vmem:[%s4990_s20 + $0x110] sm:$0xff]  ;;  %v4895_v3 = vld [vmem:[%s4990_s20 + $0x118] sm:$0xff] }
 0x174   : > { %4662 = vrot.lane.b32.xlu0 %v4661_v43, %s4947_s12  ;;  %v4390_v4 = vunpack.i.h.bf16 %v4388_v8  ;;  %v4389_v36 = vunpack.i.l.bf16 %v4388_v8  ;;  %v4385_v12 = vunpack.i.h.bf16 %v4383_v53  ;;  %v4384_v2 = vunpack.i.l.bf16 %v4383_v53  ;;  %v9824_v43 = vld [vmem:[#allocation49_spill] sm:$0xff] }
 0x175   : > { %v4681_v58 = vpack.i.bf16 %v4895_v3, %v4894_v37  ;;  %v9831_v3 = vld [vmem:[#allocation3_spill] sm:$0xff] }
 0x176   : > { %v6929_v18 = vsel %vm2144_vm8, %v6705_v40, %v4389_v36  ;;  %v6933_v39 = vsel %vm2144_vm8, %v6709_v0, %v4390_v4  ;;  %v6940_v21 = vsel %vm2144_vm8, %v6667_v63, %v4384_v2  ;;  %v6944_v8 = vsel %vm2144_vm8, %v6671_v6, %v4385_v12  ;;  %v4896_v6 = vld [vmem:[%s4990_s20 + $0xb0] sm:$0xff]  ;;  %v4897_v2 = vld [vmem:[%s4990_s20 + $0xb8] sm:$0xff] }
 0x177   : > { %4677 = vrot.lane.b32.xlu1 %v9824_v43, %s4946_s11  ;;  %9825 = vst [vmem:[#allocation142_spill] sm:$0xff] %v6929_v18  ;;  %9826 = vst [vmem:[#allocation143_spill] sm:$0xff] %v6933_v39  ;;  %v4398_v40 = vpop.permute.xlu1 %4397  ;;  %v4393_v53 = vpop.permute.xlu0 %4392  ;;  %v4691_v12 = vpack.i.bf16 %v4897_v2, %v4896_v6  ;;  %v9835_v6 = vld [vmem:[#allocation121_spill] sm:$0xff]  ;;  %v9860_v18 = vld [vmem:[#allocation108_spill] sm:$0xff] }
 0x178   : > { %4672 = vrot.lane.b32.xlu0 %v4671_v17, %s4947_s12  ;;  %v4400_v36 = vunpack.i.h.bf16 %v4398_v40  ;;  %v4399_v0 = vunpack.i.l.bf16 %v4398_v40  ;;  %v4395_v4 = vunpack.i.h.bf16 %v4393_v53  ;;  %v4394_v43 = vunpack.i.l.bf16 %v4393_v53  ;;  %v9827_v17 = vld [vmem:[#allocation83_spill] sm:$0xff]  ;;  %v4903_v39 = vld [vmem:[%s4990_s20 + $0x138] sm:$0xff] }
 0x179   : > { %v9832_v40 = vrot.slane %v9831_v3, 7  ;;  %v3810_v2 = vunpack.i.h.bf16 %v9835_v6 }
 0x17a   : > { %v6951_v37 = vsel %vm2144_vm8, %v6729_v23, %v4399_v0  ;;  %v6955_v63 = vsel %vm2144_vm8, %v6733_v14, %v4400_v36  ;;  %v6966_v51 = vsel %vm2144_vm8, %v6690_v56, %v4394_v43  ;;  %v6970_v23 = vsel %vm2144_vm8, %v6694_v20, %v4395_v4  ;;  %v9837_v56 = vld [vmem:[#allocation122_spill] sm:$0xff]  ;;  %v9839_v4 = vld [vmem:[#allocation61_spill] sm:$0xff] }
 0x17b   : > { %4687 = vrot.lane.b32.xlu1 %v9827_v17, %s4946_s11  ;;  %9829 = vst [vmem:[#allocation148_spill] sm:$0xff] %v6951_v37  ;;  %9830 = vst [vmem:[#allocation149_spill] sm:$0xff] %v6955_v63  ;;  %v504_v53 = vsel %vm330_vm1, 0.0, %v9832_v40  ;;  %v3805_v17 = vunpack.i.h.bf16 %v9828_v13  ;;  %v6972_v14 = vpop.permute.xlu1 %4407  ;;  %v3809_v13 = vunpack.i.l.bf16 %v9835_v6  ;;  %v6978_v3 = vpop.permute.xlu0 %4402  ;;  %v3800_v43 = vunpack.i.h.bf16 %v9837_v56  ;;  %v4898_v6 = vld [vmem:[%s4990_s20 + $0x120] sm:$0xff] }
 0x17c   : > { %4682 = vrot.lane.b32.xlu0 %v4681_v58, %s4947_s12  ;;  %9833 = vst [vmem:[#allocation6_spill] sm:$0xff] %v6972_v14  ;;  %v9834_v58 = vld [vmem:[#allocation116_spill] sm:$0xff]  ;;  %9836 = vst [vmem:[#allocation111_spill] sm:$0xff] %v6978_v3  ;;  %v3799_v40 = vunpack.i.l.bf16 %v9837_v56  ;;  %v3820_v20 = vunpack.i.h.bf16 %v9838_v31  ;;  %v9840_v14 = vld [vmem:[#allocation102_spill] sm:$0xff] }
 0x17d   : > { %v3795_v36 = vunpack.i.h.bf16 %v9834_v58  ;;  %v3794_v0 = vunpack.i.l.bf16 %v9834_v58  ;;  %v6987_v49 = vsel %vm1924_vm2, %v9840_v14, %v3804_v42  ;;  %v3819_v58 = vunpack.i.l.bf16 %v9838_v31  ;;  %v4899_v3 = vld [vmem:[%s4990_s20 + $0x128] sm:$0xff] }
 0x17e   : > { %v4701_v61 = vpack.i.bf16 %v4899_v3, %v4898_v6  ;;  %v6996_v56 = vsel %vm1924_vm2, %v9842_v60, %v3805_v17  ;;  %v7012_v60 = vsel %vm1924_vm2, %v9743_v19, %v3810_v2  ;;  %v7016_v38 = vsel %vm1924_vm2, %v9744_v26, %v3809_v13  ;;  %v9847_v6 = vld [vmem:[#allocation101_spill] sm:$0xff]  ;;  %v9849_v19 = vld [vmem:[#allocation80_spill] sm:$0xff]  ;;  %v9850_v2 = vld [vmem:[#allocation107_spill] sm:$0xff] }
 0x17f   : > { %4697 = vrot.lane.b32.xlu1 %v9839_v4, %s4946_s11  ;;  %v9843_v4 = vld [vmem:[#allocation19_spill] sm:$0xff]  ;;  %v7001_v31 = vpop.permute.xlu1 %4417  ;;  %v7004_v14 = vsel %vm1924_vm2, %v504_v53, %v3794_v0  ;;  %v7018_v17 = vpop.permute.xlu0 %4412  ;;  %v9848_v53 = vld [vmem:[#allocation24_spill] sm:$0xff]  ;;  %v7036_v26 = vsel %vm1924_vm2, %v9850_v2, %v3819_v58  ;;  %v7040_v13 = vsel %vm1924_vm2, %v9753_v25, %v3815_v1  ;;  %v9853_v58 = vld [vmem:[#allocation110_spill] sm:$0xff] }
 0x180   : > { %4692 = vrot.lane.b32.xlu0 %v4691_v12, %s4947_s12  ;;  %v3830_v63 = vunpack.i.h.bf16 %v9843_v4  ;;  %v3829_v42 = vunpack.i.l.bf16 %v9843_v4  ;;  %9844 = vst [vmem:[#allocation144_spill] sm:$0xff] %v7001_v31  ;;  %v9845_v12 = vld [vmem:[#allocation23_spill] sm:$0xff]  ;;  %9846 = vst [vmem:[#allocation141_spill] sm:$0xff] %v7018_v17  ;;  %v7022_v4 = vsel %vm1924_vm2, %v9847_v6, %v3800_v43  ;;  %v7026_v0 = vsel %vm1924_vm2, %v9848_v53, %v3799_v40  ;;  %v4900_v40 = vld [vmem:[%s4990_s20 + $0xc0] sm:$0xff] }
 0x181   : > { %v7008_v3 = vsel %vm1924_vm2, %v9845_v12, %v3795_v36  ;;  %v7030_v36 = vsel %vm1924_vm2, %v9684_v7, %v3820_v20  ;;  %v9851_v43 = vld [vmem:[#allocation131_spill] sm:$0xff]  ;;  %v9852_v7 = vld [vmem:[#allocation105_spill] sm:$0xff]  ;;  %v9854_v1 = vld [vmem:[#allocation152_spill] sm:$0xff] }
 0x182   : > { %v3825_v12 = vunpack.i.h.bf16 %v9851_v43  ;;  %v4901_v6 = vld [vmem:[%s4990_s20 + $0xc8] sm:$0xff]  ;;  %v7048_v20 = vsel %vm1924_vm2, %v9852_v7, %v3814_v57  ;;  %v7056_v2 = vsel %vm1924_vm2, %v9853_v58, %v3829_v42  ;;  %v3824_v25 = vunpack.i.l.bf16 %v9851_v43  ;;  %v9855_v17 = vld [vmem:[#allocation154_spill] sm:$0xff]  ;;  %v9857_v42 = vld [vmem:[#allocation109_spill] sm:$0xff] }
 0x183   : > { %4707 = vrot.lane.b32.xlu1 %v9849_v19, %s4946_s11  ;;  %v4711_v53 = vpack.i.bf16 %v4901_v6, %v4900_v40  ;;  %v7052_v19 = vsel %vm1924_vm2, %v9688_v59, %v3830_v63  ;;  %v3870_v31 = vunpack.i.h.bf16 %v9854_v1  ;;  %v3869_v40 = vunpack.i.l.bf16 %v9854_v1 }
 0x184   : > { %4702 = vrot.lane.b32.xlu0 %v4701_v61, %s4947_s12  ;;  %v4428_v61 = vpop.permute.xlu1 %4427  ;;  %v4423_v6 = vpop.permute.xlu0 %4422  ;;  %v3865_v37 = vunpack.i.h.bf16 %v9855_v17  ;;  %v7066_v58 = vsel %vm1924_vm2, %v9857_v42, %v3825_v12  ;;  %v3864_v12 = vunpack.i.l.bf16 %v9855_v17 }
 0x185   : > { %v4430_v57 = vunpack.i.h.bf16 %v4428_v61  ;;  %v4429_v7 = vunpack.i.l.bf16 %v4428_v61  ;;  %v4425_v59 = vunpack.i.h.bf16 %v4423_v6  ;;  %v4424_v63 = vunpack.i.l.bf16 %v4423_v6  ;;  %v4902_v61 = vld [vmem:[%s4990_s20 + $0x130] sm:$0xff] }
 0x186   : > { %v4721_v6 = vpack.i.bf16 %v4903_v39, %v4902_v61 }
 0x187   : > { %4717 = vrot.lane.b32.xlu1 %v9856_v11, %s4946_s11  ;;  %v7070_v43 = vsel %vm2144_vm8, %v6795_v16, %v4429_v7  ;;  %v7074_v1 = vsel %vm2144_vm8, %v6799_v54, %v4430_v57  ;;  %v7081_v11 = vsel %vm1924_vm2, %v9860_v18, %v3824_v25  ;;  %v7086_v42 = vsel %vm2144_vm8, %v6766_v35, %v4424_v63  ;;  %v9862_v57 = vld [vmem:[#allocation130_spill] sm:$0xff]  ;;  %v9863_v35 = vld [vmem:[#allocation129_spill] sm:$0xff] }
 0x188   : > { %9858 = vst [vmem:[#allocation140_spill] sm:$0xff] %v7070_v43  ;;  %9859 = vst [vmem:[#allocation139_spill] sm:$0xff] %v7074_v1  ;;  %4712 = vrot.lane.b32.xlu0 %v4711_v53, %s4947_s12  ;;  %v7090_v16 = vsel %vm2144_vm8, %v6770_v45, %v4425_v59  ;;  %v4438_v54 = vpop.permute.xlu1 %4437  ;;  %v9861_v53 = vld [vmem:[#allocation132_spill] sm:$0xff]  ;;  %v7098_v18 = vsel %vm1924_vm2, %v9862_v57, %v3869_v40  ;;  %v4433_v17 = vpop.permute.xlu0 %4432  ;;  %v7102_v63 = vsel %vm1924_vm2, %v9863_v35, %v3865_v37  ;;  %v9864_v59 = vld [vmem:[#allocation90_spill] sm:$0xff] }
 0x189   : > { %v7094_v39 = vsel %vm1924_vm2, %v9861_v53, %v3870_v31  ;;  %v4440_v25 = vunpack.i.h.bf16 %v4438_v54  ;;  %v4439_v7 = vunpack.i.l.bf16 %v4438_v54  ;;  %v4435_v61 = vunpack.i.h.bf16 %v4433_v17  ;;  %v9865_v1 = vld [vmem:[#allocation157_spill] sm:$0xff]  ;;  %v4904_v54 = vld [vmem:[%s4990_s20 + $0xd0] sm:$0xff] }
 0x18a   : > { %v4434_v45 = vunpack.i.l.bf16 %v4433_v17  ;;  %v3880_v43 = vunpack.i.h.bf16 %v9865_v1  ;;  %v4905_v37 = vld [vmem:[%s4990_s20 + $0xd8] sm:$0xff]  ;;  %v9868_v57 = vld [vmem:[#allocation128_spill] sm:$0xff]  ;;  %v3879_v35 = vunpack.i.l.bf16 %v9865_v1 }
 0x18b   : > { %4727 = vrot.lane.b32.xlu1 %v9864_v59, %s4946_s11  ;;  %v7109_v31 = vsel %vm2144_vm8, %v6820_v41, %v4439_v7  ;;  %v7113_v40 = vsel %vm2144_vm8, %v6824_v27, %v4440_v25  ;;  %v4731_v53 = vpack.i.bf16 %v4905_v37, %v4904_v54  ;;  %v7120_v17 = vsel %vm1924_vm2, %v9868_v57, %v3864_v12  ;;  %v9870_v57 = vld [vmem:[#allocation164_spill] sm:$0xff] }
 0x18c   : > { %9866 = vst [vmem:[#allocation147_spill] sm:$0xff] %v7109_v31  ;;  %9867 = vst [vmem:[#allocation146_spill] sm:$0xff] %v7113_v40  ;;  %4722 = vrot.lane.b32.xlu0 %v4721_v6, %s4947_s12  ;;  %v7125_v59 = vsel %vm2144_vm8, %v6784_v55, %v4434_v45  ;;  %v7129_v41 = vsel %vm2144_vm8, %v6788_v50, %v4435_v61  ;;  %v4448_v27 = vpop.permute.xlu1 %4447  ;;  %v9869_v6 = vld [vmem:[#allocation160_spill] sm:$0xff]  ;;  %v4443_v54 = vpop.permute.xlu0 %4442  ;;  %v3929_v1 = vunpack.i.l.bf16 %v9870_v57  ;;  %v9871_v55 = vld [vmem:[#allocation71_spill] sm:$0xff] }
 0x18d   : > { %v3875_v25 = vunpack.i.h.bf16 %v9869_v6  ;;  %v3874_v7 = vunpack.i.l.bf16 %v9869_v6  ;;  %v4450_v12 = vunpack.i.h.bf16 %v4448_v27  ;;  %v4449_v37 = vunpack.i.l.bf16 %v4448_v27  ;;  %v4906_v27 = vld [vmem:[%s4990_s20 + $0x140] sm:$0xff]  ;;  %v4907_v6 = vld [vmem:[%s4990_s20 + $0x148] sm:$0xff] }
 0x18e   : > { %v4445_v40 = vunpack.i.h.bf16 %v4443_v54  ;;  %v4444_v31 = vunpack.i.l.bf16 %v4443_v54  ;;  %v7138_v50 = vsel %vm1924_vm2, %v9786_v5, %v3880_v43  ;;  %v4741_v54 = vpack.i.bf16 %v4907_v6, %v4906_v27 }
 0x18f   : > { %4737 = vrot.lane.b32.xlu1 %v9871_v55, %s4946_s11  ;;  %v7142_v61 = vsel %vm2144_vm8, %v6841_v15, %v4449_v37  ;;  %v7146_v45 = vsel %vm2144_vm8, %v6845_v29, %v4450_v12  ;;  %v7153_v55 = vsel %vm1924_vm2, %v9785_v46, %v3879_v35  ;;  %v3930_v5 = vunpack.i.h.bf16 %v9870_v57  ;;  %v9874_v57 = vld [vmem:[#allocation166_spill] sm:$0xff] }
 0x190   : > { %9872 = vst [vmem:[#allocation145_spill] sm:$0xff] %v7146_v45  ;;  %4732 = vrot.lane.b32.xlu0 %v4731_v53, %s4947_s12  ;;  %v7158_v43 = vsel %vm2144_vm8, %v6806_v47, %v4444_v31  ;;  %v7162_v15 = vsel %vm2144_vm8, %v6810_v52, %v4445_v40  ;;  %v4458_v29 = vpop.permute.xlu1 %4457  ;;  %v7166_v53 = vsel %vm1924_vm2, %v9788_v34, %v3875_v25  ;;  %v9873_v40 = vld [vmem:[#allocation86_spill] sm:$0xff]  ;;  %v3940_v27 = vunpack.i.h.bf16 %v9874_v57 }
 0x191   : > { %v7170_v46 = vsel %vm1924_vm2, %v9787_v44, %v3874_v7  ;;  %v4453_v35 = vpop.permute.xlu0 %4452  ;;  %v4460_v12 = vunpack.i.h.bf16 %v4458_v29  ;;  %v4459_v37 = vunpack.i.l.bf16 %v4458_v29  ;;  %v7174_v47 = vsel %vm1979_vm3, %v7004_v14, %v3929_v1  ;;  %v4908_v25 = vld [vmem:[%s4990_s20 + $0xe0] sm:$0xff]  ;;  %v4909_v14 = vld [vmem:[%s4990_s20 + $0xe8] sm:$0xff] }
 0x192   : > { %v4455_v31 = vunpack.i.h.bf16 %v4453_v35  ;;  %v4454_v52 = vunpack.i.l.bf16 %v4453_v35  ;;  %v4751_v7 = vpack.i.bf16 %v4909_v14, %v4908_v25  ;;  %v7192_v1 = vsel %vm1979_vm3, %v7008_v3, %v3930_v5  ;;  %v9879_v3 = vld [vmem:[#allocation9_spill] sm:$0xff]  ;;  %v9881_v14 = vld [vmem:[#allocation64_spill] sm:$0xff] }
 0x193   : > { %4747 = vrot.lane.b32.xlu1 %v9873_v40, %s4946_s11  ;;  %v7181_v34 = vsel %vm2144_vm8, %v6862_v48, %v4459_v37  ;;  %v7185_v44 = vsel %vm2144_vm8, %v6866_v24, %v4460_v12  ;;  %v3939_v6 = vunpack.i.l.bf16 %v9874_v57  ;;  %v3950_v5 = vunpack.i.h.bf16 %v9879_v3  ;;  %v9880_v57 = vld [vmem:[#allocation168_spill] sm:$0xff] }
 0x194   : > { %9875 = vst [vmem:[#allocation171_spill] sm:$0xff] %v7181_v34  ;;  %9876 = vst [vmem:[#allocation158_spill] sm:$0xff] %v7185_v44  ;;  %4742 = vrot.lane.b32.xlu0 %v4741_v54, %s4947_s12  ;;  %v7197_v29 = vsel %vm2144_vm8, %v6830_v28, %v4454_v52  ;;  %v7201_v48 = vsel %vm2144_vm8, %v6834_v10, %v4455_v31  ;;  %v9878_v54 = vld [vmem:[#allocation167_spill] sm:$0xff]  ;;  %v3949_v37 = vunpack.i.l.bf16 %v9879_v3  ;;  %v3945_v28 = vunpack.i.h.bf16 %v9880_v57  ;;  %v4910_v34 = vld [vmem:[%s4990_s20 + $0x150] sm:$0xff] }
 0x195   : > { %v7203_v24 = vpop.permute.xlu1 %4467  ;;  %v3935_v35 = vunpack.i.h.bf16 %v9878_v54  ;;  %v3934_v12 = vunpack.i.l.bf16 %v9878_v54  ;;  %v7214_v10 = vsel %vm1979_vm3, %v6996_v56, %v3940_v27  ;;  %v3944_v31 = vunpack.i.l.bf16 %v9880_v57  ;;  %v9882_v44 = vld [vmem:[#allocation11_spill] sm:$0xff]  ;;  %v4911_v3 = vld [vmem:[%s4990_s20 + $0x158] sm:$0xff] }
 0x196   : > { %9877 = vst [vmem:[#allocation151_spill] sm:$0xff] %v7203_v24  ;;  %v4463_v40 = vpop.permute.xlu0 %4462  ;;  %v3960_v54 = vunpack.i.h.bf16 %v9882_v44  ;;  %v4761_v24 = vpack.i.bf16 %v4911_v3, %v4910_v34  ;;  %v7223_v45 = vsel %vm1979_vm3, %v6987_v49, %v3939_v6  ;;  %v7253_v57 = vsel %vm1979_vm3, %v7048_v20, %v3949_v37  ;;  %v4913_v20 = vld [vmem:[%s4990_s20 + $0xf8] sm:$0xff] }
 0x197   : > { %v4465_v52 = vunpack.i.h.bf16 %v4463_v40  ;;  %v4464_v25 = vunpack.i.l.bf16 %v4463_v40  ;;  %4757 = vrot.lane.b32.xlu1 %v9881_v14, %s4946_s11  ;;  %v3959_v40 = vunpack.i.l.bf16 %v9882_v44  ;;  %v1982_v34 = vsel %vm1979_vm3, %v7026_v0, %v3934_v12  ;;  %v9886_v12 = vld [vmem:[#allocation13_spill] sm:$0xff] }
 0x198   : > { %4752 = vrot.lane.b32.xlu0 %v4751_v7, %s4947_s12  ;;  %v1983_v49 = vsel %vm1979_vm3, %v7022_v4, %v3935_v35  ;;  %v7242_v44 = vsel %vm1979_vm3, %v7040_v13, %v3950_v5  ;;  %v9885_v4 = vld [vmem:[#allocation21_spill] sm:$0xff]  ;;  %v7260_v13 = vsel %vm1979_vm3, %v7016_v38, %v3944_v31  ;;  %v7264_v35 = vsel %vm1979_vm3, %v7066_v58, %v3960_v54  ;;  %v4912_v5 = vld [vmem:[%s4990_s20 + $0xf0] sm:$0xff] }
 0x199   : > { %v7228_v14 = vsel %vm2144_vm8, %v6851_v32, %v4464_v25  ;;  %v7232_v56 = vsel %vm2144_vm8, %v6855_v22, %v4465_v52  ;;  %v7234_v27 = vpop.permute.xlu1 %4477  ;;  %v9884_v32 = vld [vmem:[#allocation10_spill] sm:$0xff]  ;;  %v7249_v22 = vsel %vm1979_vm3, %v7012_v60, %v3945_v28  ;;  %v3965_v60 = vunpack.i.h.bf16 %v9886_v12  ;;  %v9887_v25 = vld [vmem:[#allocation17_spill] sm:$0xff]  ;;  %v9889_v54 = vld [vmem:[#allocation12_spill] sm:$0xff] }
 0x19a   : > { %9883 = vst [vmem:[#allocation150_spill] sm:$0xff] %v7234_v27  ;;  %v3955_v7 = vunpack.i.h.bf16 %v9884_v32  ;;  %v7245_v6 = vpop.permute.xlu0 %4472  ;;  %v3954_v0 = vunpack.i.l.bf16 %v9884_v32  ;;  %v4771_v37 = vpack.i.bf16 %v4913_v20, %v4912_v5  ;;  %v7272_v28 = vsel %vm1979_vm3, %v7081_v11, %v3959_v40  ;;  %v9890_v32 = vld [vmem:[#allocation14_spill] sm:$0xff]  ;;  %v9892_v20 = vld [vmem:[#allocation169_spill] sm:$0xff] }
 0x19b   : > { %4767 = vrot.lane.b32.xlu1 %v9885_v4, %s4946_s11  ;;  %v3964_v52 = vunpack.i.l.bf16 %v9886_v12  ;;  %v4000_v38 = vunpack.i.h.bf16 %v9887_v25  ;;  %v3999_v31 = vunpack.i.l.bf16 %v9887_v25  ;;  %v4005_v3 = vunpack.i.h.bf16 %v9889_v54 }
 0x19c   : > { %4762 = vrot.lane.b32.xlu0 %v4761_v24, %s4947_s12  ;;  %v7281_v24 = vsel %vm1979_vm3, %v7030_v36, %v3955_v7  ;;  %v4010_v4 = vunpack.i.h.bf16 %v9890_v32  ;;  %v4009_v11 = vunpack.i.l.bf16 %v9890_v32  ;;  %v7290_v12 = vsel %vm1979_vm3, %v7036_v26, %v3954_v0  ;;  %v9894_v32 = vld [vmem:[#allocation34_spill] sm:$0xff]  ;;  %v4915_v26 = vld [vmem:[%s4990_s20 + $0x168] sm:$0xff] }
 0x19d   : > { %v7277_v58 = vpop.permute.xlu1 %4487  ;;  %v4004_v5 = vunpack.i.l.bf16 %v9889_v54  ;;  %v4015_v25 = vunpack.i.h.bf16 %v9892_v20  ;;  %v7298_v36 = vsel %vm1979_vm3, %v7052_v19, %v3965_v60  ;;  %v4014_v7 = vunpack.i.l.bf16 %v9892_v20 }
 0x19e   : > { %9888 = vst [vmem:[#allocation153_spill] sm:$0xff] %v7277_v58  ;;  %v7286_v40 = vpop.permute.xlu0 %4482  ;;  %v9893_v58 = vld [vmem:[#allocation77_spill] sm:$0xff]  ;;  %v4070_v27 = vunpack.i.h.bf16 %v9894_v32  ;;  %v7307_v54 = vsel %vm1979_vm3, %v7056_v2, %v3964_v52  ;;  %v7315_v19 = vsel %vm1979_vm3, %v7120_v17, %v3999_v31  ;;  %v4069_v60 = vunpack.i.l.bf16 %v9894_v32  ;;  %v9895_v17 = vld [vmem:[#allocation8_spill] sm:$0xff] }
 0x19f   : > { %9891 = vst [vmem:[#allocation92_spill] sm:$0xff] %v7286_v40  ;;  %4777 = vrot.lane.b32.xlu1 %v9893_v58, %s4946_s11  ;;  %v4914_v40 = vld [vmem:[%s4990_s20 + $0x160] sm:$0xff]  ;;  %v7311_v58 = vsel %vm1979_vm3, %v7102_v63, %v4000_v38  ;;  %v7326_v2 = vsel %vm1979_vm3, %v7166_v53, %v4010_v4  ;;  %v7330_v63 = vsel %vm1979_vm3, %v7170_v46, %v4009_v11  ;;  %v4064_v52 = vunpack.i.l.bf16 %v9895_v17  ;;  %v9896_v53 = vld [vmem:[#allocation91_spill] sm:$0xff]  ;;  %v9898_v32 = vld [vmem:[#allocation29_spill] sm:$0xff] }
 0x1a0   : > { %4772 = vrot.lane.b32.xlu0 %v4771_v37, %s4947_s12  ;;  %v4781_v0 = vpack.i.bf16 %v4915_v26, %v4914_v40  ;;  %v7322_v40 = vsel %vm1979_vm3, %v7094_v39, %v4005_v3  ;;  %v7337_v31 = vsel %vm1979_vm3, %v7098_v18, %v4004_v5  ;;  %v7341_v39 = vsel %vm1979_vm3, %v7138_v50, %v4015_v25  ;;  %v9897_v11 = vld [vmem:[#allocation7_spill] sm:$0xff]  ;;  %v4916_v18 = vld [vmem:[%s4990_s20 + $0x100] sm:$0xff] }
 0x1a1   : > { %v7318_v37 = vpop.permute.xlu1 %4497  ;;  %v4065_v3 = vunpack.i.h.bf16 %v9895_v17  ;;  %v7348_v46 = vsel %vm1979_vm3, %v7153_v55, %v4014_v7  ;;  %v7351_v4 = vsel %vm2034_vm4, %v1983_v49, %v4070_v27  ;;  %v4080_v20 = vunpack.i.h.bf16 %v9897_v11  ;;  %v4917_v5 = vld [vmem:[%s4990_s20 + $0x108] sm:$0xff]  ;;  %v9899_v7 = vld [vmem:[#allocation32_spill] sm:$0xff] }
 0x1a2   : > { %v7333_v38 = vpop.permute.xlu0 %4492  ;;  %v4791_v50 = vpack.i.bf16 %v4917_v5, %v4916_v18  ;;  %v7358_v25 = vsel %vm2034_vm4, %v1982_v34, %v4069_v60  ;;  %v4075_v26 = vunpack.i.h.bf16 %v9898_v32  ;;  %v4074_v17 = vunpack.i.l.bf16 %v9898_v32 }
 0x1a3   : > { %4787 = vrot.lane.b32.xlu1 %v9896_v53, %s4946_s11  ;;  %v4079_v55 = vunpack.i.l.bf16 %v9897_v11  ;;  %v7365_v49 = vsel %vm2034_vm4, %v7174_v47, %v4064_v52  ;;  %v7372_v60 = vsel %vm2034_vm4, %v7192_v1, %v4065_v3  ;;  %v4089_v5 = vunpack.i.l.bf16 %v9899_v7  ;;  %v9900_v11 = vld [vmem:[#allocation74_spill] sm:$0xff]  ;;  %v4918_v1 = vld [vmem:[%s4990_s20 + $0x170] sm:$0xff]  ;;  %v4919_v3 = vld [vmem:[%s4990_s20 + $0x178] sm:$0xff] }
 0x1a4   : > { %4782 = vrot.lane.b32.xlu0 %v4781_v0, %s4947_s12  ;;  %v4090_v0 = vunpack.i.h.bf16 %v9899_v7  ;;  %v7379_v47 = vsel %vm2034_vm4, %v7249_v22, %v4080_v20  ;;  %v7394_v7 = vsel %vm2034_vm4, %v7223_v45, %v4074_v17  ;;  %v7398_v22 = vsel %vm2034_vm4, %v7214_v10, %v4075_v26  ;;  %v9903_v20 = vld [vmem:[#allocation37_spill] sm:$0xff] }
 0x1a5   : > { %v4508_v27 = vpop.permute.xlu1 %4507  ;;  %v7412_v10 = vsel %vm2034_vm4, %v7290_v12, %v4089_v5  ;;  %v4921_v12 = vld [vmem:[%s4990_s20 + $0x188] sm:$0xff] }
 0x1a6   : > { %v7368_v53 = vpop.permute.xlu0 %4502  ;;  %v4510_v18 = vunpack.i.h.bf16 %v4508_v27  ;;  %v4509_v34 = vunpack.i.l.bf16 %v4508_v27  ;;  %v4801_v27 = vpack.i.bf16 %v4919_v3, %v4918_v1  ;;  %v9905_v1 = vld [vmem:[#allocation38_spill] sm:$0xff] }
 0x1a7   : > { %4797 = vrot.lane.b32.xlu1 %v9900_v11, %s4946_s11  ;;  %v4100_v3 = vunpack.i.h.bf16 %v9905_v1 }
 0x1a8   : > { %v7383_v52 = vsel %vm2199_vm9, %v6919_v9, %v4509_v34  ;;  %v7387_v32 = vsel %vm2199_vm9, %v6923_v62, %v4510_v18  ;;  %4792 = vrot.lane.b32.xlu0 %v4791_v50, %s4947_s12  ;;  %v7402_v9 = vsel %vm2034_vm4, %v7260_v13, %v4079_v55  ;;  %v4085_v62 = vunpack.i.h.bf16 %v9903_v20  ;;  %v9904_v55 = vld [vmem:[#allocation95_spill] sm:$0xff] }
 0x1a9   : > { %9901 = vst [vmem:[#allocation89_spill] sm:$0xff] %v7383_v52  ;;  %9902 = vst [vmem:[#allocation15_spill] sm:$0xff] %v7387_v32  ;;  %v4518_v50 = vpop.permute.xlu1 %4517  ;;  %v4084_v18 = vunpack.i.l.bf16 %v9903_v20  ;;  %v7408_v34 = vsel %vm2034_vm4, %v7281_v24, %v4090_v0  ;;  %v4920_v0 = vld [vmem:[%s4990_s20 + $0x180] sm:$0xff]  ;;  %v4099_v32 = vunpack.i.l.bf16 %v9905_v1 }
 0x1aa   : > { %v4513_v45 = vpop.permute.xlu0 %4512  ;;  %v4520_v17 = vunpack.i.h.bf16 %v4518_v50  ;;  %v4519_v11 = vunpack.i.l.bf16 %v4518_v50  ;;  %v4811_v5 = vpack.i.bf16 %v4921_v12, %v4920_v0  ;;  %v9908_v50 = vld [vmem:[#allocation40_spill] sm:$0xff] }
 0x1ab   : > { %v4515_v13 = vunpack.i.h.bf16 %v4513_v45  ;;  %v4514_v26 = vunpack.i.l.bf16 %v4513_v45  ;;  %4807 = vrot.lane.b32.xlu1 %v9904_v55, %s4946_s11  ;;  %v4094_v45 = vunpack.i.l.bf16 %v9908_v50 }
 0x1ac   : > { %v7419_v20 = vsel %vm2199_vm9, %v6940_v21, %v4519_v11  ;;  %v7423_v24 = vsel %vm2199_vm9, %v6944_v8, %v4520_v17  ;;  %4802 = vrot.lane.b32.xlu0 %v4801_v27, %s4947_s12  ;;  %v7440_v27 = vsel %vm2034_vm4, %v7253_v57, %v4084_v18  ;;  %v7444_v17 = vsel %vm2034_vm4, %v7242_v44, %v4085_v62  ;;  %v4922_v62 = vld [vmem:[%s4990_s20 + $0x190] sm:$0xff]  ;;  %v4923_v18 = vld [vmem:[%s4990_s20 + $0x198] sm:$0xff] }
 0x1ad   : > { %9906 = vst [vmem:[#allocation88_spill] sm:$0xff] %v7419_v20  ;;  %9907 = vst [vmem:[#allocation20_spill] sm:$0xff] %v7423_v24  ;;  %v7432_v55 = vsel %vm2199_vm9, %v6908_v30, %v4514_v26  ;;  %v7436_v21 = vsel %vm2199_vm9, %v6912_v33, %v4515_v13  ;;  %v4528_v8 = vpop.permute.xlu1 %4527  ;;  %v4095_v30 = vunpack.i.h.bf16 %v9908_v50  ;;  %v9911_v33 = vld [vmem:[#allocation96_spill] sm:$0xff]  ;;  %v7451_v13 = vsel %vm2034_vm4, %v7298_v36, %v4100_v3  ;;  %v9914_v3 = vld [vmem:[#allocation142_spill] sm:$0xff] }
 0x1ae   : > { %9909 = vst [vmem:[#allocation170_spill] sm:$0xff] %v7432_v55  ;;  %9910 = vst [vmem:[#allocation51_spill] sm:$0xff] %v7436_v21  ;;  %v4523_v11 = vpop.permute.xlu0 %4522  ;;  %v4530_v1 = vunpack.i.h.bf16 %v4528_v8  ;;  %v4529_v0 = vunpack.i.l.bf16 %v4528_v8  ;;  %v4821_v50 = vpack.i.bf16 %v4923_v18, %v4922_v62  ;;  %v7466_v8 = vsel %vm2034_vm4, %v7272_v28, %v4094_v45  ;;  %v9920_v45 = vld [vmem:[#allocation45_spill] sm:$0xff]  ;;  %v9921_v62 = vld [vmem:[#allocation47_spill] sm:$0xff] }
 0x1af   : > { %v4525_v26 = vunpack.i.h.bf16 %v4523_v11  ;;  %v4524_v12 = vunpack.i.l.bf16 %v4523_v11  ;;  %4817 = vrot.lane.b32.xlu1 %v9911_v33, %s4946_s11  ;;  %v7470_v36 = vsel %vm2034_vm4, %v7307_v54, %v4099_v32  ;;  %v4140_v33 = vunpack.i.h.bf16 %v9920_v45  ;;  %v9924_v24 = vld [vmem:[#allocation52_spill] sm:$0xff] }
 0x1b0   : > { %v7455_v57 = vsel %vm2199_vm9, %v6966_v51, %v4529_v0  ;;  %v7459_v44 = vsel %vm2199_vm9, %v6970_v23, %v4530_v1  ;;  %4812 = vrot.lane.b32.xlu0 %v4811_v5, %s4947_s12  ;;  %v9916_v23 = vld [vmem:[#allocation143_spill] sm:$0xff]  ;;  %v9919_v1 = vld [vmem:[#allocation46_spill] sm:$0xff]  ;;  %v4139_v54 = vunpack.i.l.bf16 %v9920_v45  ;;  %v4150_v18 = vunpack.i.h.bf16 %v9921_v62  ;;  %v9923_v45 = vld [vmem:[#allocation69_spill] sm:$0xff] }
 0x1b1   : > { %9912 = vst [vmem:[#allocation97_spill] sm:$0xff] %v7455_v57  ;;  %9913 = vst [vmem:[#allocation94_spill] sm:$0xff] %v7459_v44  ;;  %v7474_v51 = vsel %vm2199_vm9, %v9914_v3, %v4524_v12  ;;  %v7478_v5 = vsel %vm2199_vm9, %v9916_v23, %v4525_v26  ;;  %v7480_v11 = vpop.permute.xlu1 %4537  ;;  %v4135_v0 = vunpack.i.h.bf16 %v9919_v1  ;;  %v4134_v28 = vunpack.i.l.bf16 %v9919_v1  ;;  %v9922_v44 = vld [vmem:[#allocation4_spill] sm:$0xff]  ;;  %v4924_v1 = vld [vmem:[%s4990_s20 + $0x1a0] sm:$0xff] }
 0x1b2   : > { %9915 = vst [vmem:[#allocation22_spill] sm:$0xff] %v7474_v51  ;;  %9917 = vst [vmem:[#allocation93_spill] sm:$0xff] %v7478_v5  ;;  %v4533_v32 = vpop.permute.xlu0 %4532  ;;  %v7491_v26 = vsel %vm2034_vm4, %v7264_v35, %v4095_v30  ;;  %v4149_v23 = vunpack.i.l.bf16 %v9921_v62  ;;  %v4925_v57 = vld [vmem:[%s4990_s20 + $0x1a8] sm:$0xff]  ;;  %v621_v51 = vrot.slane %v9923_v45, 1  ;;  %v4145_v20 = vunpack.i.h.bf16 %v9924_v24  ;;  %v9925_v21 = vld [vmem:[#allocation148_spill] sm:$0xff] }
 0x1b3   : > { %9918 = vst [vmem:[#allocation25_spill] sm:$0xff] %v7480_v11  ;;  %v4535_v12 = vunpack.i.h.bf16 %v4533_v32  ;;  %v4534_v3 = vunpack.i.l.bf16 %v4533_v32  ;;  %4827 = vrot.lane.b32.xlu1 %v9922_v44, %s4946_s11  ;;  %v4831_v5 = vpack.i.bf16 %v4925_v57, %v4924_v1  ;;  %v4144_v32 = vunpack.i.l.bf16 %v9924_v24  ;;  %v9927_v35 = vld [vmem:[#allocation149_spill] sm:$0xff] }
 0x1b4   : > { %4822 = vrot.lane.b32.xlu0 %v4821_v50, %s4947_s12  ;;  %v7512_v57 = vsel %vm2034_vm4, %v7315_v19, %v4134_v28  ;;  %v7516_v62 = vsel %vm2034_vm4, %v7311_v58, %v4135_v0  ;;  %v7520_v24 = vsel %vm2034_vm4, %v7322_v40, %v4140_v33  ;;  %v9931_v19 = vld [vmem:[#allocation56_spill] sm:$0xff]  ;;  %v9933_v0 = vld [vmem:[#allocation26_spill] sm:$0xff]  ;;  %v9934_v40 = vld [vmem:[#allocation35_spill] sm:$0xff] }
 0x1b5   : > { %v7502_v44 = vsel %vm2199_vm9, %v9925_v21, %v4534_v3  ;;  %v7506_v30 = vsel %vm2199_vm9, %v9927_v35, %v4535_v12  ;;  %v7508_v50 = vpop.permute.xlu1 %4547  ;;  %v7524_v21 = vsel %vm2034_vm4, %v7337_v31, %v4139_v54  ;;  %v7530_v3 = vsel %vm2034_vm4, %v7341_v39, %v4150_v18  ;;  %v9932_v58 = vld [vmem:[#allocation100_spill] sm:$0xff]  ;;  %v4926_v54 = vld [vmem:[%s4990_s20 + $0x1b8] sm:$0xff] }
 0x1b6   : > { %9926 = vst [vmem:[#allocation99_spill] sm:$0xff] %v7502_v44  ;;  %9928 = vst [vmem:[#allocation50_spill] sm:$0xff] %v7506_v30  ;;  %v7526_v12 = vpop.permute.xlu0 %4542  ;;  %v4200_v28 = vunpack.i.h.bf16 %v9931_v19  ;;  %v4199_v1 = vunpack.i.l.bf16 %v9931_v19  ;;  %v4846_v33 = vpack.i.bf16 %v9934_v40, %v9933_v0  ;;  %v7540_v31 = vsel %vm2034_vm4, %v7348_v46, %v4149_v23  ;;  %v4927_v35 = vld [vmem:[%s4990_s20 + $0x1b0] sm:$0xff]  ;;  %v9937_v44 = vld [vmem:[#allocation78_spill] sm:$0xff] }
 0x1b7   : > { %9929 = vst [vmem:[#allocation2_spill] sm:$0xff] %v7508_v50  ;;  %9930 = vst [vmem:[#allocation98_spill] sm:$0xff] %v7526_v12  ;;  %4837 = vrot.lane.b32.xlu1 %v9932_v58, %s4946_s11  ;;  %v4841_v39 = vpack.i.bf16 %v4926_v54, %v4927_v35  ;;  %v9935_v18 = vld [vmem:[#allocation60_spill] sm:$0xff]  ;;  %v623_v58 = vrot.slane %v9937_v44, 1  ;;  %v7551_v0 = vsel %vm2034_vm4, %v7330_v63, %v4144_v32  ;;  %v9939_v35 = vld [vmem:[#allocation54_spill] sm:$0xff] }
 0x1b8   : > { %4832 = vrot.lane.b32.xlu0 %v4831_v5, %s4947_s12  ;;  %v9936_v30 = vrot.slane %v9935_v18, 1  ;;  %v7555_v46 = vsel %vm2034_vm4, %v7326_v2, %v4145_v20  ;;  %v9938_v5 = vld [vmem:[#allocation53_spill] sm:$0xff]  ;;  %v4205_v18 = vunpack.i.h.bf16 %v9939_v35  ;;  %v7565_v63 = vsel %vm2089_vm5, %v7365_v49, %v4199_v1  ;;  %v4928_v20 = vld [vmem:[%s4990_s20 + $0x1c0] sm:$0xff]  ;;  %v4929_v32 = vld [vmem:[%s4990_s20 + $0x1c8] sm:$0xff]  ;;  %s8059_s20 = scalar_lea.vmem %s9019_s3, %s3771_s17 }
 0x1b9   : > { %v4210_v23 = vunpack.i.h.bf16 %v9938_v5  ;;  %v4209_v40 = vunpack.i.l.bf16 %v9938_v5  ;;  %v4558_v54 = vpop.permute.xlu1 %4557  ;;  %v7569_v2 = vsel %vm2089_vm5, %v7372_v60, %v4200_v28  ;;  %v4851_v5 = vpack.i.bf16 %v4929_v32, %v4928_v20  ;;  %v9940_v12 = vld [vmem:[#allocation31_spill] sm:$0xff]  ;;  %v9943_v32 = vld [vmem:[#allocation140_spill] sm:$0xff] }
 0x1ba   : > { %v622_v19 = vsel %vm505_vm0, %v9936_v30, %v621_v51  ;;  %v4204_v30 = vunpack.i.l.bf16 %v9939_v35  ;;  %v7561_v55 = vpop.permute.xlu0 %4552  ;;  %v4560_v50 = vunpack.i.h.bf16 %v4558_v54  ;;  %v4559_v52 = vunpack.i.l.bf16 %v4558_v54 }
 0x1bb   : > { %4847 = vrot.lane.b32.xlu1 %v4846_v33, %s4946_s11  ;;  %v4856_v11 = vpack.i.bf16 %v622_v19, %v9940_v12  ;;  %v624_v49 = vsel %vm505_vm0, %v621_v51, %v623_v58  ;;  %v626_v60 = vsel %vm505_vm0, %v623_v58, 0.0  ;;  %v7588_v28 = vsel %vm2089_vm5, %v7394_v7, %v4209_v40  ;;  %v9942_v19 = vld [vmem:[#allocation63_spill] sm:$0xff] }
 0x1bc   : > { %v7577_v35 = vsel %vm2199_vm9, %v7086_v42, %v4559_v52  ;;  %v7581_v54 = vsel %vm2199_vm9, %v7090_v16, %v4560_v50  ;;  %4842 = vrot.lane.b32.xlu0 %v4841_v39, %s4947_s12  ;;  %v7592_v12 = vsel %vm2089_vm5, %v7398_v22, %v4210_v23  ;;  %v9941_v42 = vld [vmem:[#allocation62_spill] sm:$0xff]  ;;  %v7598_v50 = vsel %vm2089_vm5, %v7358_v25, %v4204_v30 }
 0x1bd   : > { %v4220_v52 = vunpack.i.h.bf16 %v9941_v42  ;;  %v4219_v1 = vunpack.i.l.bf16 %v9941_v42  ;;  %v4568_v16 = vpop.permute.xlu1 %4567  ;;  %v7602_v51 = vsel %vm2089_vm5, %v7351_v4, %v4205_v18  ;;  %v4215_v58 = vunpack.i.h.bf16 %v9942_v19 }
 0x1be   : > { %v4563_v33 = vpop.permute.xlu0 %4562  ;;  %v4570_v7 = vunpack.i.h.bf16 %v4568_v16  ;;  %v4569_v39 = vunpack.i.l.bf16 %v4568_v16  ;;  %v4866_v40 = vpack.i.bf16 %v626_v60, %v624_v49  ;;  %v4214_v20 = vunpack.i.l.bf16 %v9942_v19  ;;  %v9944_v49 = vld [vmem:[#allocation139_spill] sm:$0xff]  ;;  %v9945_v60 = vld [vmem:[#allocation57_spill] sm:$0xff]  ;;  %v9946_v16 = vld [vmem:[#allocation58_spill] sm:$0xff] }
 0x1bf   : > { %v4565_v22 = vunpack.i.h.bf16 %v4563_v33  ;;  %v4564_v23 = vunpack.i.l.bf16 %v4563_v33  ;;  %4857 = vrot.lane.b32.xlu1 %v4856_v11, %s4946_s11  ;;  %v4861_v18 = vpack.i.bf16 %v9937_v44, %v9923_v45  ;;  %v7620_v30 = vsel %vm2089_vm5, %v7440_v27, %v4219_v1 }
 0x1c0   : > { %v7609_v25 = vsel %vm2199_vm9, %v7125_v59, %v4569_v39  ;;  %v7613_v4 = vsel %vm2199_vm9, %v7129_v41, %v4570_v7  ;;  %4852 = vrot.lane.b32.xlu0 %v4851_v5, %s4947_s12  ;;  %v7624_v11 = vsel %vm2089_vm5, %v7444_v17, %v4220_v52  ;;  %v4230_v42 = vunpack.i.h.bf16 %v9945_v60  ;;  %v9947_v39 = vld [vmem:[#allocation72_spill] sm:$0xff] }
 0x1c1   : > { %v7628_v59 = vsel %vm2199_vm9, %v9943_v32, %v4564_v23  ;;  %v7632_v41 = vsel %vm2199_vm9, %v9944_v49, %v4565_v22  ;;  %v4578_v5 = vpop.permute.xlu1 %4577  ;;  %v4229_v45 = vunpack.i.l.bf16 %v9945_v60  ;;  %v4225_v33 = vunpack.i.h.bf16 %v9946_v16  ;;  %v2823_v49 = vld [vmem:[%s9017_s1 + $0x20] sm:$0xff] }
 0x1c2   : > { %v4573_v44 = vpop.permute.xlu0 %4572  ;;  %v4580_v27 = vunpack.i.h.bf16 %v4578_v5  ;;  %v4579_v1 = vunpack.i.l.bf16 %v4578_v5  ;;  %v4224_v17 = vunpack.i.l.bf16 %v9946_v16  ;;  %v4235_v19 = vunpack.i.h.bf16 %v9947_v39 }
 0x1c3   : > { %v4575_v52 = vunpack.i.h.bf16 %v4573_v44  ;;  %v4574_v7 = vunpack.i.l.bf16 %v4573_v44  ;;  %4867 = vrot.lane.b32.xlu1 %v4866_v40, %s4946_s11  ;;  %v4234_v22 = vunpack.i.l.bf16 %v9947_v39  ;;  %v7655_v40 = vsel %vm2089_vm5, %v7402_v9, %v4214_v20 }
 0x1c4   : > { %v7643_v23 = vsel %vm2199_vm9, %v7158_v43, %v4579_v1  ;;  %v7647_v32 = vsel %vm2199_vm9, %v7162_v15, %v4580_v27  ;;  %4862 = vrot.lane.b32.xlu0 %v4861_v18, %s4947_s12  ;;  %v7659_v5 = vsel %vm2089_vm5, %v7379_v47, %v4215_v58  ;;  %v9948_v43 = vld [vmem:[#allocation147_spill] sm:$0xff]  ;;  %v9949_v15 = vld [vmem:[#allocation146_spill] sm:$0xff]  ;;  %v2822_v27 = vld [vmem:[%s9017_s1 + $0x18] sm:$0xff]  ;;  %v7674_v9 = vsel %vm2089_vm5, %v7466_v8, %v4229_v45 }
 0x1c5   : > { %v7663_v60 = vsel %vm2199_vm9, %v9948_v43, %v4574_v7  ;;  %v7667_v44 = vsel %vm2199_vm9, %v9949_v15, %v4575_v52  ;;  %v4588_v18 = vpop.permute.xlu1 %4587  ;;  %v7678_v47 = vsel %vm2089_vm5, %v7491_v26, %v4230_v42  ;;  %v7682_v16 = vsel %vm2089_vm5, %v7412_v10, %v4224_v17  ;;  %v9952_v45 = vld [vmem:[#allocation73_spill] sm:$0xff] }
 0x1c6   : > { %v4583_v58 = vpop.permute.xlu0 %4582  ;;  %v4590_v20 = vunpack.i.h.bf16 %v4588_v18  ;;  %v4589_v1 = vunpack.i.l.bf16 %v4588_v18  ;;  %v7686_v52 = vsel %vm2089_vm5, %v7408_v34, %v4225_v33  ;;  %v7690_v8 = vsel %vm2089_vm5, %v7470_v36, %v4234_v22  ;;  %v2824_v34 = vld [vmem:[%s9017_s1 + $0x28] sm:$0xff]  ;;  %v9953_v17 = vld [vmem:[#allocation145_spill] sm:$0xff]  ;;  %v9955_v22 = vld [vmem:[#allocation70_spill] sm:$0xff] }
 0x1c7   : > { %v4585_v7 = vunpack.i.h.bf16 %v4583_v58  ;;  %v4584_v39 = vunpack.i.l.bf16 %v4583_v58  ;;  %2883 = vperm.xlu1 %4872, %v2823_v49   ;;  %v7694_v26 = vsel %vm2089_vm5, %v7451_v13, %v4235_v19  ;;  %v9956_v58 = vld [vmem:[#allocation84_spill] sm:$0xff] }
 0x1c8   : > { %v7698_v42 = vsel %vm2199_vm9, %v7197_v29, %v4589_v1  ;;  %v7702_v10 = vsel %vm2199_vm9, %v7201_v48, %v4590_v20  ;;  %2878 = vperm.xlu0 %4871, %v2822_v27   ;;  %v2825_v48 = vld [vmem:[%s9017_s1 + $0x30] sm:$0xff]  ;;  %v4335_v20 = vunpack.i.h.bf16 %v9956_v58 }
 0x1c9   : > { %9950 = vst [vmem:[#allocation55_spill] sm:$0xff] %v7698_v42  ;;  %9951 = vst [vmem:[#allocation27_spill] sm:$0xff] %v7702_v10  ;;  %v7711_v13 = vsel %vm2199_vm9, %v7142_v61, %v4584_v39  ;;  %v7715_v29 = vsel %vm2199_vm9, %v9953_v17, %v4585_v7  ;;  %v4598_v19 = vpop.permute.xlu1 %4597  ;;  %v4334_v61 = vunpack.i.l.bf16 %v9956_v58  ;;  %v9957_v7 = vld [vmem:[#allocation151_spill] sm:$0xff]  ;;  %v4475_v10 = vunpack.i.h.bf16 %v7245_v6 }
 0x1ca   : > { %9954 = vst [vmem:[#allocation5_spill] sm:$0xff] %v7715_v29  ;;  %v4593_v15 = vpop.permute.xlu0 %4592  ;;  %v4600_v18 = vunpack.i.h.bf16 %v4598_v19  ;;  %v4599_v27 = vunpack.i.l.bf16 %v4598_v19  ;;  %v4470_v17 = vunpack.i.h.bf16 %v9957_v7  ;;  %v4469_v36 = vunpack.i.l.bf16 %v9957_v7  ;;  %v2826_v19 = vld [vmem:[%s9017_s1 + $0x38] sm:$0xff]  ;;  %v9960_v58 = vld [vmem:[#allocation171_spill] sm:$0xff] }
 0x1cb   : > { %v4595_v1 = vunpack.i.h.bf16 %v4593_v15  ;;  %v4594_v39 = vunpack.i.l.bf16 %v4593_v15  ;;  %2888 = vperm.xlu1 %4872, %v2824_v34   ;;  %v9962_v15 = vld [vmem:[#allocation158_spill] sm:$0xff] }
 0x1cc   : > { %v7728_v33 = vsel %vm2199_vm9, %v7228_v14, %v4599_v27  ;;  %v7732_v49 = vsel %vm2199_vm9, %v7232_v56, %v4600_v18  ;;  %2893 = vperm.xlu0 %4871, %v2825_v48   ;;  %v2827_v56 = vld [vmem:[%s9017_s1 + $0x40] sm:$0xff]  ;;  %v9964_v48 = vld [vmem:[#allocation76_spill] sm:$0xff] }
 0x1cd   : > { %9958 = vst [vmem:[#allocation104_spill] sm:$0xff] %v7728_v33  ;;  %9959 = vst [vmem:[#allocation165_spill] sm:$0xff] %v7732_v49  ;;  %v7739_v34 = vsel %vm2199_vm9, %v9960_v58, %v4594_v39  ;;  %v7743_v7 = vsel %vm2199_vm9, %v9962_v15, %v4595_v1  ;;  %v4608_v14 = vpop.permute.xlu1 %4607  ;;  %v4340_v18 = vunpack.i.h.bf16 %v9964_v48  ;;  %v4339_v27 = vunpack.i.l.bf16 %v9964_v48 }
 0x1ce   : > { %9961 = vst [vmem:[#allocation28_spill] sm:$0xff] %v7739_v34  ;;  %9963 = vst [vmem:[#allocation106_spill] sm:$0xff] %v7743_v7  ;;  %v4603_v43 = vpop.permute.xlu0 %4602  ;;  %v4610_v49 = vunpack.i.h.bf16 %v4608_v14  ;;  %v4609_v33 = vunpack.i.l.bf16 %v4608_v14  ;;  %v2145_v39 = vsel %vm2144_vm8, %v7565_v63, %v4334_v61  ;;  %v2146_v1 = vsel %vm2144_vm8, %v7569_v2, %v4335_v20  ;;  %v2828_v14 = vld [vmem:[%s9017_s1 + $0x48] sm:$0xff] }
 0x1cf   : > { %v4605_v58 = vunpack.i.h.bf16 %v4603_v43  ;;  %v4604_v15 = vunpack.i.l.bf16 %v4603_v43  ;;  %2898 = vperm.xlu1 %4872, %v2826_v19   ;;  %v2200_v7 = vsel %vm2199_vm9, %v2145_v39, %v4469_v36  ;;  %v2201_v34 = vsel %vm2199_vm9, %v2146_v1, %v4470_v17  ;;  %v9965_v63 = vld [vmem:[#allocation79_spill] sm:$0xff]  ;;  %v2829_v17 = vld [vmem:[%s9017_s1 + $0x50] sm:$0xff] }
 0x1d0   : > { %v4474_v48 = vunpack.i.l.bf16 %v7245_v6  ;;  %2903 = vperm.xlu0 %4871, %v2827_v56   ;;  %v4275_v61 = vunpack.i.h.bf16 %v9965_v63  ;;  %v4274_v2 = vunpack.i.l.bf16 %v9965_v63  ;;  %v2147_v6 = vsel %vm2144_vm8, %v7598_v50, %v4339_v27  ;;  %v2830_v50 = vld [vmem:[%s9017_s1 + $0x58] sm:$0xff] }
 0x1d1   : > { %v2255_v43 = vsel %vm2254_vm10, %v2200_v7, %v4604_v15  ;;  %v2256_v20 = vsel %vm2254_vm10, %v2201_v34, %v4605_v58  ;;  %v4618_v36 = vpop.permute.xlu1 %4617  ;;  %v2148_v1 = vsel %vm2144_vm8, %v7602_v51, %v4340_v18 }
 0x1d2   : > { %v2310_v19 = vsel %vm2309_vm11, %v2255_v43, %v4609_v33  ;;  %v2311_v56 = vsel %vm2309_vm11, %v2256_v20, %v4610_v49  ;;  %v4613_v39 = vpop.permute.xlu0 %4612  ;;  %v2202_v58 = vsel %vm2199_vm9, %v2147_v6, %v4474_v48  ;;  %v2203_v63 = vsel %vm2199_vm9, %v2148_v1, %v4475_v10  ;;  %v9967_v49 = vld [vmem:[#allocation75_spill] sm:$0xff] }
 0x1d3   : > { %v4615_v7 = vunpack.i.h.bf16 %v4613_v39  ;;  %v4614_v15 = vunpack.i.l.bf16 %v4613_v39  ;;  %v2364_v34 = vpack.c.bf16 %v2311_v56, %v2310_v19  ;;  %2908 = vperm.xlu1 %4872, %v2828_v14   ;;  %v4620_v42 = vunpack.i.h.bf16 %v4618_v36  ;;  %v2831_v14 = vld [vmem:[%s9017_s1 + $0x60] sm:$0xff] }
 0x1d4   : > { %v4619_v29 = vunpack.i.l.bf16 %v4618_v36  ;;  %2913 = vperm.xlu0 %4871, %v2829_v17   ;;  %v9966_v33 = vunpack.i.l.bf16 %v9952_v45  ;;  %v4284_v18 = vunpack.i.l.bf16 %v9967_v49  ;;  %v9968_v43 = vunpack.i.h.bf16 %v9952_v45  ;;  %v9970_v17 = vld [vmem:[#allocation81_spill] sm:$0xff] }
 0x1d5   : > { %v2257_v27 = vsel %vm2254_vm10, %v2202_v58, %v4614_v15  ;;  %v2258_v48 = vsel %vm2254_vm10, %v2203_v63, %v4615_v7  ;;  %3654 = vmatmul.mubr.msk.bf16.vlgmr.msra.gmra.mxu0 %vm2427_vm12, %v2364_v34  ;;  %v7789_v10 = vpop.permute.xlu1 %4627  ;;  %v9969_v20 = vunpack.i.l.bf16 %v9955_v22  ;;  %v4345_v6 = vunpack.i.h.bf16 %v9970_v17  ;;  %v9973_v15 = vld [vmem:[#allocation150_spill] sm:$0xff] }
 0x1d6   : > { %v7783_v51 = vsel %vm2089_vm5, %v7512_v57, %v9966_v33  ;;  %v7798_v57 = vsel %vm2089_vm5, %v7516_v62, %v9968_v43  ;;  %v4344_v19 = vunpack.i.l.bf16 %v9970_v17  ;;  %v4623_v56 = vpop.permute.xlu0 %4622  ;;  %v9971_v39 = vmov 0.0  }
 0x1d7   : > { %v7804_v36 = vsel %vm2089_vm5, %v7551_v0, %v9969_v20  ;;  %3657 = vmatprep.mubr.msk.bf16.mxu0 %vm4945_vm7, %v9971_v39  ;;  %v7812_v45 = vsel %vm2089_vm5, %v7524_v21, %v4274_v2  ;;  %v7816_v62 = vsel %vm2089_vm5, %v7520_v24, %v4275_v61  ;;  %v9972_v1 = vunpack.i.h.bf16 %v9955_v22  ;;  %2918 = vperm.xlu1 %4872, %v2830_v50   ;;  %v2832_v24 = vld [vmem:[%s9017_s1 + $0x68] sm:$0xff]  ;;  %v9974_v22 = vld [vmem:[#allocation85_spill] sm:$0xff] }
 0x1d8   : > { %v4285_v7 = vunpack.i.h.bf16 %v9967_v49  ;;  %v4480_v34 = vunpack.i.h.bf16 %v9973_v15  ;;  %v4479_v58 = vunpack.i.l.bf16 %v9973_v15  ;;  %v2312_v21 = vsel %vm2309_vm11, %v2257_v27, %v4619_v29  ;;  %2923 = vperm.xlu0 %4871, %v2831_v14   ;;  %v2833_v29 = vld [vmem:[%s9017_s1 + $0x70] sm:$0xff]  ;;  %v9976_v14 = vld [vmem:[#allocation82_spill] sm:$0xff]  ;;  %2762 = vst.msk [vmem:[%s8059_s20] sm:$0xff] %vm1924_vm2, %v9971_v39  ;;  %2763 = vst.msk [vmem:[%s8059_s20 + $0x8] sm:$0xff] %vm1924_vm2, %v9971_v39 }
 0x1d9   : > { %v7822_v0 = vsel %vm2089_vm5, %v7555_v46, %v9972_v1  ;;  %v2313_v2 = vsel %vm2309_vm11, %v2258_v48, %v4620_v42  ;;  %v7834_v46 = vsel %vm2089_vm5, %v7540_v31, %v4284_v18  ;;  %v4350_v61 = vunpack.i.h.bf16 %v9974_v22  ;;  %v7837_v33 = vpop.permute.xlu1 %4637  ;;  %v9975_v31 = vld [vmem:[#allocation136_spill] sm:$0xff]  ;;  %2764 = vst.msk [vmem:[%s8059_s20 + $0x10] sm:$0xff] %vm1924_vm2, %v9971_v39  ;;  %2819 = vst.msk [vmem:[%s8059_s20 + $0x1c8] sm:$0xff] %vm1924_vm2, %v9971_v39 }
 0x1da   : > { %v4625_v63 = vunpack.i.h.bf16 %v4623_v56  ;;  %v4624_v50 = vunpack.i.l.bf16 %v4623_v56  ;;  %v2149_v42 = vsel %vm2144_vm8, %v7588_v28, %v4344_v19  ;;  %v2150_v49 = vsel %vm2144_vm8, %v7592_v12, %v4345_v6  ;;  %v7848_v48 = vpop.permute.xlu0 %4632  ;;  %v2834_v19 = vld [vmem:[%s9017_s1 + $0x78] sm:$0xff]  ;;  %2820 = vst.msk [vmem:[%s8059_s20 + $0x1d0] sm:$0xff] %vm1924_vm2, %v9971_v39  ;;  %2821 = vst.msk [vmem:[%s8059_s20 + $0x1d8] sm:$0xff] %vm1924_vm2, %v9971_v39 }
 0x1db   : > { %v4349_v27 = vunpack.i.l.bf16 %v9974_v22  ;;  %v4359_v18 = vunpack.i.l.bf16 %v9975_v31  ;;  %v4355_v43 = vunpack.i.h.bf16 %v9976_v14  ;;  %v4354_v20 = vunpack.i.l.bf16 %v9976_v14  ;;  %2928 = vperm.xlu1 %4872, %v2832_v24   ;;  %v9977_v22 = vld [vmem:[#allocation87_spill] sm:$0xff] }
 0x1dc   : > { %v4360_v17 = vunpack.i.h.bf16 %v9975_v31  ;;  %v2365_v56 = vpack.c.bf16 %v2313_v2, %v2312_v21  ;;  %v2204_v1 = vsel %vm2199_vm9, %v2149_v42, %v4479_v58  ;;  %v2205_v28 = vsel %vm2199_vm9, %v2150_v49, %v4480_v34  ;;  %2933 = vperm.xlu0 %4871, %v2833_v29   ;;  %v9979_v42 = vld [vmem:[#allocation92_spill] sm:$0xff] }
 0x1dd   : > { %v4630_v12 = vunpack.i.h.bf16 %v7789_v10  ;;  %v4629_v6 = vunpack.i.l.bf16 %v7789_v10  ;;  %v7862_v15 = vsel %vm2089_vm5, %v7530_v3, %v4285_v7  ;;  %v4369_v21 = vunpack.i.l.bf16 %v9977_v22  ;;  %v7868_v34 = vpop.permute.xlu1 %4647  ;;  %v2835_v10 = vld [vmem:[%s9017_s1 + $0x80] sm:$0xff] }
 0x1de   : > { %v2259_v2 = vsel %vm2254_vm10, %v2204_v1, %v4624_v50  ;;  %v2260_v58 = vsel %vm2254_vm10, %v2205_v28, %v4625_v63  ;;  %3658 = vmatmul.mubr.msk.bf16.gmra.mxu0 %vm2427_vm12, %v2365_v56  ;;  %v2151_v24 = vsel %vm2144_vm8, %v7655_v40, %v4349_v27  ;;  %v2152_v3 = vsel %vm2144_vm8, %v7659_v5, %v4350_v61  ;;  %v7882_v50 = vpop.permute.xlu0 %4642  ;;  %v9980_v1 = vld [vmem:[#allocation111_spill] sm:$0xff] }
 0x1df   : > { %v7879_v7 = vsel %vm2144_vm8, %v7682_v16, %v4359_v18  ;;  %v4370_v63 = vunpack.i.h.bf16 %v9977_v22  ;;  %3661 = vmatprep.mubr.msk.bf16.mxu0 %vm4945_vm7, %v9971_v39  ;;  %v7888_v29 = vsel %vm2144_vm8, %v7620_v30, %v4354_v20  ;;  %v7892_v40 = vsel %vm2144_vm8, %v7624_v11, %v4355_v43  ;;  %v9978_v16 = vld [vmem:[#allocation137_spill] sm:$0xff]  ;;  %2938 = vperm.xlu1 %4872, %v2834_v19   ;;  %v2836_v11 = vld [vmem:[%s9017_s1 + $0x88] sm:$0xff] }
 0x1e0   : > { %v7896_v5 = vsel %vm2144_vm8, %v7686_v52, %v4360_v17  ;;  %v4365_v61 = vunpack.i.h.bf16 %v9978_v16  ;;  %v4485_v49 = vunpack.i.h.bf16 %v9979_v42  ;;  %v4484_v27 = vunpack.i.l.bf16 %v9979_v42  ;;  %2943 = vperm.xlu0 %4871, %v2835_v10   ;;  %v2837_v17 = vld [vmem:[%s9017_s1 + $0x90] sm:$0xff]  ;;  %v9982_v22 = vld [vmem:[#allocation141_spill] sm:$0xff] }
 0x1e1   : > { %v2314_v31 = vsel %vm2309_vm11, %v2259_v2, %v4629_v6  ;;  %v2315_v30 = vsel %vm2309_vm11, %v2260_v58, %v4630_v12  ;;  %v4364_v18 = vunpack.i.l.bf16 %v9978_v16  ;;  %v7909_v52 = vsel %vm2144_vm8, %v7690_v8, %v4369_v21  ;;  %v7913_v20 = vpop.permute.xlu1 %4657  ;;  %v9981_v12 = vld [vmem:[#allocation6_spill] sm:$0xff]  ;;  %v9983_v2 = vld [vmem:[#allocation144_spill] sm:$0xff] }
 0x1e2   : > { %v4635_v14 = vunpack.i.h.bf16 %v7848_v48  ;;  %v4634_v43 = vunpack.i.l.bf16 %v7848_v48  ;;  %v7920_v56 = vsel %vm2144_vm8, %v7694_v26, %v4370_v63  ;;  %v4405_v28 = vunpack.i.h.bf16 %v9980_v1  ;;  %v7925_v19 = vpop.permute.xlu0 %4652 }
 0x1e3   : > { %v4410_v6 = vunpack.i.h.bf16 %v9981_v12  ;;  %v4409_v8 = vunpack.i.l.bf16 %v9981_v12  ;;  %v4404_v48 = vunpack.i.l.bf16 %v9980_v1  ;;  %v4414_v21 = vunpack.i.l.bf16 %v9982_v22  ;;  %2948 = vperm.xlu1 %4872, %v2836_v11   ;;  %v2838_v12 = vld [vmem:[%s9017_s1 + $0x98] sm:$0xff] }
 0x1e4   : > { %v4419_v58 = vunpack.i.l.bf16 %v9983_v2  ;;  %v2366_v10 = vpack.c.bf16 %v2315_v30, %v2314_v31  ;;  %v2206_v16 = vsel %vm2199_vm9, %v2151_v24, %v4484_v27  ;;  %v2207_v26 = vsel %vm2199_vm9, %v2152_v3, %v4485_v49  ;;  %2953 = vperm.xlu0 %4871, %v2837_v17  }
 0x1e5   : > { %v4640_v63 = vunpack.i.h.bf16 %v7837_v33  ;;  %v4639_v42 = vunpack.i.l.bf16 %v7837_v33  ;;  %v2157_v1 = vsel %vm2144_vm8, %v7674_v9, %v4364_v18  ;;  %v2158_v31 = vsel %vm2144_vm8, %v7678_v47, %v4365_v61  ;;  %v7944_v3 = vpop.permute.xlu1 %4667  ;;  %v2839_v33 = vld [vmem:[%s9017_s1 + $0xa0] sm:$0xff]  ;;  %v9984_v61 = vld [vmem:[#allocation153_spill] sm:$0xff] }
 0x1e6   : > { %v2261_v30 = vsel %vm2254_vm10, %v2206_v16, %v4634_v43  ;;  %v2262_v24 = vsel %vm2254_vm10, %v2207_v26, %v4635_v14  ;;  %3662 = vmatmul.mubr.msk.bf16.gmra.mxu0 %vm2427_vm12, %v2366_v10  ;;  %v7951_v49 = vsel %vm2144_vm8, %v7812_v45, %v4409_v8  ;;  %v7955_v9 = vsel %vm2144_vm8, %v7816_v62, %v4410_v6  ;;  %v7959_v11 = vpop.permute.xlu0 %4662 }
 0x1e7   : > { %v4415_v47 = vunpack.i.h.bf16 %v9982_v22  ;;  %v4489_v27 = vunpack.i.l.bf16 %v9984_v61  ;;  %3665 = vmatprep.mubr.msk.bf16.mxu0 %vm4945_vm7, %v9971_v39  ;;  %v2173_v18 = vsel %vm2144_vm8, %v7783_v51, %v4404_v48  ;;  %v2174_v45 = vsel %vm2144_vm8, %v7798_v57, %v4405_v28  ;;  %2958 = vperm.xlu1 %4872, %v2838_v12   ;;  %v2840_v57 = vld [vmem:[%s9017_s1 + $0xa8] sm:$0xff]  ;;  %v2841_v22 = vld [vmem:[%s9017_s1 + $0xb0] sm:$0xff] }
 0x1e8   : > { %v7969_v14 = vsel %vm2144_vm8, %v7834_v46, %v4419_v58  ;;  %v4490_v62 = vunpack.i.h.bf16 %v9984_v61  ;;  %v7974_v43 = vsel %vm2144_vm8, %v7804_v36, %v4414_v21  ;;  %v4499_v17 = vunpack.i.l.bf16 %v7318_v37  ;;  %2963 = vperm.xlu0 %4871, %v2839_v33  }
 0x1e9   : > { %v2316_v6 = vsel %vm2309_vm11, %v2261_v30, %v4639_v42  ;;  %v2317_v51 = vsel %vm2309_vm11, %v2262_v24, %v4640_v63  ;;  %v4494_v46 = vunpack.i.l.bf16 %v7333_v38  ;;  %v4500_v28 = vunpack.i.h.bf16 %v7318_v37  ;;  %v7986_v48 = vpop.permute.xlu1 %4677  ;;  %v9985_v63 = vld [vmem:[#allocation25_spill] sm:$0xff] }
 0x1ea   : > { %v4645_v8 = vunpack.i.h.bf16 %v7882_v50  ;;  %v4644_v36 = vunpack.i.l.bf16 %v7882_v50  ;;  %v7993_v21 = vsel %vm2144_vm8, %v7822_v0, %v4415_v47  ;;  %v2208_v58 = vsel %vm2199_vm9, %v7888_v29, %v4489_v27  ;;  %v7999_v16 = vpop.permute.xlu0 %4672 }
 0x1eb   : > { %v4495_v10 = vunpack.i.h.bf16 %v7333_v38  ;;  %v4504_v37 = vunpack.i.l.bf16 %v7368_v53  ;;  %v2209_v50 = vsel %vm2199_vm9, %v7892_v40, %v4490_v62  ;;  %v4505_v26 = vunpack.i.h.bf16 %v7368_v53  ;;  %2968 = vperm.xlu1 %4872, %v2840_v57   ;;  %v2842_v40 = vld [vmem:[%s9017_s1 + $0xb8] sm:$0xff] }
 0x1ec   : > { %v4539_v42 = vunpack.i.l.bf16 %v9985_v63  ;;  %v2367_v12 = vpack.c.bf16 %v2317_v51, %v2316_v6  ;;  %v8006_v0 = vsel %vm2199_vm9, %v2157_v1, %v4499_v17  ;;  %v4540_v29 = vunpack.i.h.bf16 %v9985_v63  ;;  %2973 = vperm.xlu0 %4871, %v2841_v22  }
 0x1ed   : > { %v4650_v38 = vunpack.i.h.bf16 %v7868_v34  ;;  %v4649_v30 = vunpack.i.l.bf16 %v7868_v34  ;;  %v2210_v53 = vsel %vm2199_vm9, %v7879_v7, %v4494_v46  ;;  %v8017_v24 = vsel %vm2199_vm9, %v2158_v31, %v4500_v28  ;;  %v4688_v47 = vpop.permute.xlu1 %4687  ;;  %v2843_v34 = vld [vmem:[%s9017_s1 + $0xc0] sm:$0xff] }
 0x1ee   : > { %v2263_v1 = vsel %vm2254_vm10, %v2208_v58, %v4644_v36  ;;  %v2264_v33 = vsel %vm2254_vm10, %v2209_v50, %v4645_v8  ;;  %3666 = vmatmul.mubr.msk.bf16.gmra.mxu0 %vm2427_vm12, %v2367_v12  ;;  %v2211_v61 = vsel %vm2199_vm9, %v7896_v5, %v4495_v10  ;;  %v8029_v7 = vsel %vm2199_vm9, %v7909_v52, %v4504_v37  ;;  %v4683_v31 = vpop.permute.xlu0 %4682  ;;  %v2844_v8 = vld [vmem:[%s9017_s1 + $0xc8] sm:$0xff]  ;;  %v2845_v10 = vld [vmem:[%s9017_s1 + $0xd0] sm:$0xff] }
 0x1ef   : > { %v4690_v27 = vunpack.i.h.bf16 %v4688_v47  ;;  %v4689_v62 = vunpack.i.l.bf16 %v4688_v47  ;;  %3669 = vmatprep.mubr.msk.bf16.mxu0 %vm4945_vm7, %v9971_v39  ;;  %v8035_v17 = vsel %vm2199_vm9, %v7920_v56, %v4505_v26  ;;  %v2228_v6 = vsel %vm2199_vm9, %v2173_v18, %v4539_v42  ;;  %2978 = vperm.xlu1 %4872, %v2842_v40   ;;  %v9986_v56 = vld [vmem:[#allocation98_spill] sm:$0xff]  ;;  %v2846_v47 = vld [vmem:[%s9017_s1 + $0xd8] sm:$0xff] }
 0x1f0   : > { %v4685_v51 = vunpack.i.h.bf16 %v4683_v31  ;;  %v4684_v57 = vunpack.i.l.bf16 %v4683_v31  ;;  %v2229_v5 = vsel %vm2199_vm9, %v2174_v45, %v4540_v29  ;;  %v2318_v52 = vsel %vm2309_vm11, %v2263_v1, %v4649_v30  ;;  %2983 = vperm.xlu0 %4871, %v2843_v34   ;;  %v9988_v31 = vld [vmem:[#allocation15_spill] sm:$0xff] }
 0x1f1   : > { %v2319_v46 = vsel %vm2309_vm11, %v2264_v33, %v4650_v38  ;;  %v4654_v28 = vunpack.i.l.bf16 %v7925_v19  ;;  %v4544_v36 = vunpack.i.l.bf16 %v9986_v56  ;;  %v4655_v18 = vunpack.i.h.bf16 %v7925_v19  ;;  %v4698_v58 = vpop.permute.xlu1 %4697 }
 0x1f2   : > { %v2283_v22 = vsel %vm2254_vm10, %v2228_v6, %v4684_v57  ;;  %v2284_v45 = vsel %vm2254_vm10, %v2229_v5, %v4685_v51  ;;  %v4693_v26 = vpop.permute.xlu0 %4692  ;;  %v4700_v63 = vunpack.i.h.bf16 %v4698_v58  ;;  %v4699_v42 = vunpack.i.l.bf16 %v4698_v58  ;;  %v2847_v6 = vld [vmem:[%s9017_s1 + $0xe0] sm:$0xff] }
 0x1f3   : > { %v2338_v37 = vsel %vm2309_vm11, %v2283_v22, %v4689_v62  ;;  %v2339_v50 = vsel %vm2309_vm11, %v2284_v45, %v4690_v27  ;;  %v4695_v29 = vunpack.i.h.bf16 %v4693_v26  ;;  %v4694_v38 = vunpack.i.l.bf16 %v4693_v26  ;;  %2988 = vperm.xlu1 %4872, %v2844_v8  }
 0x1f4   : > { %v2378_v12 = vpack.c.bf16 %v2339_v50, %v2338_v37  ;;  %v2368_v19 = vpack.c.bf16 %v2319_v46, %v2318_v52  ;;  %v4545_v30 = vunpack.i.h.bf16 %v9986_v56  ;;  %v2265_v40 = vsel %vm2254_vm10, %v2210_v53, %v4654_v28  ;;  %2993 = vperm.xlu0 %4871, %v2845_v10   ;;  %v9987_v53 = vld [vmem:[#allocation89_spill] sm:$0xff] }
 0x1f5   : > { %v4660_v1 = vunpack.i.h.bf16 %v7913_v20  ;;  %v4659_v33 = vunpack.i.l.bf16 %v7913_v20  ;;  %v2266_v20 = vsel %vm2254_vm10, %v2211_v61, %v4655_v18  ;;  %v2271_v34 = vsel %vm2254_vm10, %v9987_v53, %v4694_v38  ;;  %v4708_v62 = vpop.permute.xlu1 %4707 }
 0x1f6   : > { %v2272_v27 = vsel %vm2254_vm10, %v9988_v31, %v4695_v29  ;;  %3670 = vmatmul.mubr.msk.bf16.gmra.mxu0 %vm2427_vm12, %v2368_v19  ;;  %3710 = vmatmul.mubr.msk.bf16.vlgmr.msra.gmra.mxu1 %vm2427_vm12, %v2378_v12  ;;  %v8097_v51 = vsel %vm2309_vm11, %v2271_v34, %v4699_v42  ;;  %v4703_v57 = vpop.permute.xlu0 %4702  ;;  %v4710_v5 = vunpack.i.h.bf16 %v4708_v62  ;;  %v4709_v52 = vunpack.i.l.bf16 %v4708_v62  ;;  %v2850_v34 = vld [vmem:[%s9017_s1 + $0xf8] sm:$0xff]  ;;  %v9990_v62 = vld [vmem:[#allocation170_spill] sm:$0xff] }
 0x1f7   : > { %v8100_v61 = vsel %vm2309_vm11, %v2272_v27, %v4700_v63  ;;  %3673 = vmatprep.mubr.msk.bf16.mxu0 %vm4945_vm7, %v9971_v39  ;;  %3713 = vmatprep.mubr.msk.bf16.mxu1 %vm4945_vm7, %v9971_v39  ;;  %v2230_v46 = vsel %vm2199_vm9, %v7951_v49, %v4544_v36  ;;  %v4705_v8 = vunpack.i.h.bf16 %v4703_v57  ;;  %v4704_v56 = vunpack.i.l.bf16 %v4703_v57  ;;  %v2848_v49 = vld [vmem:[%s9017_s1 + $0xe8] sm:$0xff]  ;;  %v9989_v36 = vld [vmem:[#allocation2_spill] sm:$0xff]  ;;  %v2849_v63 = vld [vmem:[%s9017_s1 + $0xf0] sm:$0xff] }
 0x1f8   : > { %v2372_v28 = vpack.c.bf16 %v8100_v61, %v8097_v51  ;;  %2998 = vperm.xlu1 %4872, %v2846_v47   ;;  %v2231_v18 = vsel %vm2199_vm9, %v7955_v9, %v4545_v30  ;;  %v2320_v22 = vsel %vm2309_vm11, %v2265_v40, %v4659_v33  ;;  %v2321_v45 = vsel %vm2309_vm11, %v2266_v20, %v4660_v1  ;;  %v9991_v57 = vld [vmem:[#allocation51_spill] sm:$0xff] }
 0x1f9   : > { %v4664_v58 = vunpack.i.l.bf16 %v7959_v11  ;;  %3003 = vperm.xlu0 %4871, %v2847_v6   ;;  %v4549_v10 = vunpack.i.l.bf16 %v9989_v36  ;;  %v4665_v37 = vunpack.i.h.bf16 %v7959_v11  ;;  %v2285_v50 = vsel %vm2254_vm10, %v2230_v46, %v4704_v56  ;;  %v4718_v9 = vpop.permute.xlu1 %4717 }
 0x1fa   : > { %v2286_v26 = vsel %vm2254_vm10, %v2231_v18, %v4705_v8  ;;  %v2340_v42 = vsel %vm2309_vm11, %v2285_v50, %v4709_v52  ;;  %v4713_v29 = vpop.permute.xlu0 %4712  ;;  %v4720_v38 = vunpack.i.h.bf16 %v4718_v9  ;;  %v4719_v19 = vunpack.i.l.bf16 %v4718_v9 }
 0x1fb   : > { %v2341_v12 = vsel %vm2309_vm11, %v2286_v26, %v4710_v5  ;;  %v2369_v30 = vpack.c.bf16 %v2321_v45, %v2320_v22  ;;  %v4715_v1 = vunpack.i.h.bf16 %v4713_v29  ;;  %v4714_v11 = vunpack.i.l.bf16 %v4713_v29  ;;  %v2851_v5 = vld [vmem:[%s9017_s1 + $0x100] sm:$0xff] }
 0x1fc   : > { %v2379_v40 = vpack.c.bf16 %v2341_v12, %v2340_v42  ;;  %3008 = vperm.xlu1 %4872, %v2848_v49   ;;  %v4550_v33 = vunpack.i.h.bf16 %v9989_v36  ;;  %v2267_v47 = vsel %vm2254_vm10, %v8006_v0, %v4664_v58  ;;  %v4670_v20 = vunpack.i.h.bf16 %v7944_v3  ;;  %v2853_v42 = vld [vmem:[%s9017_s1 + $0x110] sm:$0xff] }
 0x1fd   : > { %v4669_v53 = vunpack.i.l.bf16 %v7944_v3  ;;  %3013 = vperm.xlu0 %4871, %v2849_v63   ;;  %v4420_v31 = vunpack.i.h.bf16 %v9983_v2  ;;  %v2268_v27 = vsel %vm2254_vm10, %v8017_v24, %v4665_v37  ;;  %v2273_v6 = vsel %vm2254_vm10, %v9990_v62, %v4714_v11  ;;  %v4728_v3 = vpop.permute.xlu1 %4727  ;;  %v9992_v62 = vld [vmem:[#allocation88_spill] sm:$0xff] }
 0x1fe   : > { %v2274_v0 = vsel %vm2254_vm10, %v9991_v57, %v4715_v1  ;;  %3674 = vmatmul.mubr.msk.bf16.gmra.mxu0 %vm2427_vm12, %v2369_v30  ;;  %3714 = vmatmul.mubr.msk.bf16.gmra.mxu1 %vm2427_vm12, %v2379_v40  ;;  %v8148_v52 = vsel %vm2309_vm11, %v2273_v6, %v4719_v19  ;;  %v4723_v46 = vpop.permute.xlu0 %4722  ;;  %v4730_v8 = vunpack.i.h.bf16 %v4728_v3  ;;  %v4729_v56 = vunpack.i.l.bf16 %v4728_v3  ;;  %v9993_v57 = vld [vmem:[#allocation20_spill] sm:$0xff] }
 0x1ff   : > { %v8151_v24 = vsel %vm2309_vm11, %v2274_v0, %v4720_v38  ;;  %3677 = vmatprep.mubr.msk.bf16.mxu0 %vm4945_vm7, %v9971_v39  ;;  %3717 = vmatprep.mubr.msk.bf16.mxu1 %vm4945_vm7, %v9971_v39  ;;  %v2232_v18 = vsel %vm2199_vm9, %v7974_v43, %v4549_v10  ;;  %v4725_v45 = vunpack.i.h.bf16 %v4723_v46  ;;  %v4724_v58 = vunpack.i.l.bf16 %v4723_v46  ;;  %v2852_v43 = vld [vmem:[%s9017_s1 + $0x108] sm:$0xff] }
 0x200   : > { %v2373_v22 = vpack.c.bf16 %v8151_v24, %v8148_v52  ;;  %3018 = vperm.xlu1 %4872, %v2850_v34   ;;  %v2233_v49 = vsel %vm2199_vm9, %v7993_v21, %v4550_v33  ;;  %v2322_v36 = vsel %vm2309_vm11, %v2267_v47, %v4669_v53  ;;  %v2323_v37 = vsel %vm2309_vm11, %v2268_v27, %v4670_v20  ;;  %v2854_v34 = vld [vmem:[%s9017_s1 + $0x118] sm:$0xff] }
 0x201   : > { %v4674_v50 = vunpack.i.l.bf16 %v7999_v16  ;;  %3023 = vperm.xlu0 %4871, %v2851_v5   ;;  %v4555_v10 = vunpack.i.h.bf16 %v7561_v55  ;;  %v4675_v26 = vunpack.i.h.bf16 %v7999_v16  ;;  %v2287_v9 = vsel %vm2254_vm10, %v2232_v18, %v4724_v58  ;;  %v4738_v21 = vpop.permute.xlu1 %4737 }
 0x202   : > { %v2288_v63 = vsel %vm2254_vm10, %v2233_v49, %v4725_v45  ;;  %v2342_v12 = vsel %vm2309_vm11, %v2287_v9, %v4729_v56  ;;  %v4733_v38 = vpop.permute.xlu0 %4732  ;;  %v4740_v19 = vunpack.i.h.bf16 %v4738_v21  ;;  %v4739_v30 = vunpack.i.l.bf16 %v4738_v21 }
 0x203   : > { %v2343_v29 = vsel %vm2309_vm11, %v2288_v63, %v4730_v8  ;;  %v2370_v40 = vpack.c.bf16 %v2323_v37, %v2322_v36  ;;  %v4735_v11 = vunpack.i.h.bf16 %v4733_v38  ;;  %v4734_v16 = vunpack.i.l.bf16 %v4733_v38  ;;  %v2858_v38 = vld [vmem:[%s9017_s1 + $0x138] sm:$0xff] }
 0x204   : > { %v2380_v1 = vpack.c.bf16 %v2343_v29, %v2342_v12  ;;  %3028 = vperm.xlu1 %4872, %v2852_v43   ;;  %v4554_v33 = vunpack.i.l.bf16 %v7561_v55  ;;  %v2269_v47 = vsel %vm2254_vm10, %v8029_v7, %v4674_v50  ;;  %v4680_v20 = vunpack.i.h.bf16 %v7986_v48 }
 0x205   : > { %v4679_v53 = vunpack.i.l.bf16 %v7986_v48  ;;  %3033 = vperm.xlu0 %4871, %v2853_v42   ;;  %v2270_v27 = vsel %vm2254_vm10, %v8035_v17, %v4675_v26  ;;  %v2275_v6 = vsel %vm2254_vm10, %v9992_v62, %v4734_v16  ;;  %v2276_v55 = vsel %vm2254_vm10, %v9993_v57, %v4735_v11  ;;  %v4748_v7 = vpop.permute.xlu1 %4747  ;;  %v2855_v48 = vld [vmem:[%s9017_s1 + $0x120] sm:$0xff]  ;;  %v2860_v57 = vld [vmem:[%s9017_s1 + $0x148] sm:$0xff] }
 0x206   : > { %3678 = vmatmul.mubr.msk.bf16.gmra.mxu0 %vm2427_vm12, %v2370_v40  ;;  %3718 = vmatmul.mubr.msk.bf16.gmra.mxu1 %vm2427_vm12, %v2380_v1  ;;  %v8198_v0 = vsel %vm2309_vm11, %v2275_v6, %v4739_v30  ;;  %v8201_v17 = vsel %vm2309_vm11, %v2276_v55, %v4740_v19  ;;  %v4743_v3 = vpop.permute.xlu0 %4742  ;;  %v4750_v5 = vunpack.i.h.bf16 %v4748_v7  ;;  %v4749_v46 = vunpack.i.l.bf16 %v4748_v7  ;;  %v9994_v19 = vld [vmem:[#allocation22_spill] sm:$0xff]  ;;  %v9995_v40 = vld [vmem:[#allocation93_spill] sm:$0xff] }
 0x207   : > { %3681 = vmatprep.mubr.msk.bf16.mxu0 %vm4945_vm7, %v9971_v39  ;;  %3721 = vmatprep.mubr.msk.bf16.mxu1 %vm4945_vm7, %v9971_v39  ;;  %v2180_v8 = vsel %vm2144_vm8, %v7862_v15, %v4420_v31  ;;  %v2374_v56 = vpack.c.bf16 %v8201_v17, %v8198_v0  ;;  %v4745_v18 = vunpack.i.h.bf16 %v4743_v3  ;;  %v4744_v45 = vunpack.i.l.bf16 %v4743_v3  ;;  %v2856_v15 = vld [vmem:[%s9017_s1 + $0x128] sm:$0xff]  ;;  %v2859_v16 = vld [vmem:[%s9017_s1 + $0x140] sm:$0xff]  ;;  %v2861_v3 = vld [vmem:[%s9017_s1 + $0x150] sm:$0xff] }
 0x208   : > { %3038 = vperm.xlu1 %4872, %v2854_v34   ;;  %v2234_v58 = vsel %vm2199_vm9, %v7969_v14, %v4554_v33  ;;  %v2235_v49 = vsel %vm2199_vm9, %v2180_v8, %v4555_v10  ;;  %v2324_v36 = vsel %vm2309_vm11, %v2269_v47, %v4679_v53  ;;  %v2325_v37 = vsel %vm2309_vm11, %v2270_v27, %v4680_v20  ;;  %v2857_v14 = vld [vmem:[%s9017_s1 + $0x130] sm:$0xff] }
 0x209   : > { %3043 = vperm.xlu0 %4871, %v2855_v48   ;;  %v2289_v2 = vsel %vm2254_vm10, %v2234_v58, %v4744_v45  ;;  %v2290_v31 = vsel %vm2254_vm10, %v2235_v49, %v4745_v18  ;;  %v4758_v50 = vpop.permute.xlu1 %4757  ;;  %v2371_v21 = vpack.c.bf16 %v2325_v37, %v2324_v36 }
 0x20a   : > { %v2344_v43 = vsel %vm2309_vm11, %v2289_v2, %v4749_v46  ;;  %v2345_v10 = vsel %vm2309_vm11, %v2290_v31, %v4750_v5  ;;  %v4753_v26 = vpop.permute.xlu0 %4752  ;;  %v4760_v9 = vunpack.i.h.bf16 %v4758_v50  ;;  %v4759_v63 = vunpack.i.l.bf16 %v4758_v50  ;;  %v2863_v50 = vld [vmem:[%s9017_s1 + $0x160] sm:$0xff] }
 0x20b   : > { %v2381_v42 = vpack.c.bf16 %v2345_v10, %v2344_v43  ;;  %v4755_v12 = vunpack.i.h.bf16 %v4753_v26  ;;  %v4754_v29 = vunpack.i.l.bf16 %v4753_v26 }
 0x20c   : > { %3048 = vperm.xlu1 %4872, %v2856_v15   ;;  %v9997_v15 = vld [vmem:[#allocation94_spill] sm:$0xff] }
 0x20d   : > { %3053 = vperm.xlu0 %4871, %v2857_v14   ;;  %v2277_v30 = vsel %vm2254_vm10, %v9994_v19, %v4754_v29  ;;  %v2278_v1 = vsel %vm2254_vm10, %v9995_v40, %v4755_v12  ;;  %v4768_v11 = vpop.permute.xlu1 %4767  ;;  %v2865_v29 = vld [vmem:[%s9017_s1 + $0x170] sm:$0xff] }
 0x20e   : > { %3682 = vmatmul.mubr.msk.bf16.gmra.mxu0 %vm2427_vm12, %v2371_v21  ;;  %3722 = vmatmul.mubr.msk.bf16.gmra.mxu1 %vm2427_vm12, %v2381_v42  ;;  %v8241_v33 = vsel %vm2309_vm11, %v2277_v30, %v4759_v63  ;;  %v8244_v47 = vsel %vm2309_vm11, %v2278_v1, %v4760_v9  ;;  %v4763_v20 = vpop.permute.xlu0 %4762  ;;  %v4770_v53 = vunpack.i.h.bf16 %v4768_v11  ;;  %v4769_v34 = vunpack.i.l.bf16 %v4768_v11  ;;  %v2864_v63 = vld [vmem:[%s9017_s1 + $0x168] sm:$0xff] }
 0x20f   : > { %3685 = vmatprep.mubr.msk.bf16.mxu0 %vm4945_vm7, %v9971_v39  ;;  %3725 = vmatprep.mubr.msk.bf16.mxu1 %vm4945_vm7, %v9971_v39  ;;  %v2375_v27 = vpack.c.bf16 %v8244_v47, %v8241_v33  ;;  %v4765_v62 = vunpack.i.h.bf16 %v4763_v20  ;;  %v4764_v6 = vunpack.i.l.bf16 %v4763_v20 }
 0x210   : > { %3058 = vperm.xlu1 %4872, %v2858_v38  }
 0x211   : > { %3063 = vperm.xlu0 %4871, %v2859_v16   ;;  %v2291_v55 = vsel %vm2254_vm10, %v7577_v35, %v4764_v6  ;;  %v2292_v7 = vsel %vm2254_vm10, %v7581_v54, %v4765_v62  ;;  %v4778_v48 = vpop.permute.xlu1 %4777  ;;  %v2862_v35 = vld [vmem:[%s9017_s1 + $0x158] sm:$0xff] }
 0x212   : > { %v2346_v5 = vsel %vm2309_vm11, %v2291_v55, %v4769_v34  ;;  %v2347_v46 = vsel %vm2309_vm11, %v2292_v7, %v4770_v53  ;;  %v4773_v8 = vpop.permute.xlu0 %4772  ;;  %v4780_v18 = vunpack.i.h.bf16 %v4778_v48  ;;  %v4779_v45 = vunpack.i.l.bf16 %v4778_v48  ;;  %v9996_v54 = vld [vmem:[#allocation97_spill] sm:$0xff]  ;;  %v9999_v34 = vld [vmem:[#allocation50_spill] sm:$0xff] }
 0x213   : > { %v2382_v58 = vpack.c.bf16 %v2347_v46, %v2346_v5  ;;  %v4775_v49 = vunpack.i.h.bf16 %v4773_v8  ;;  %v4774_v36 = vunpack.i.l.bf16 %v4773_v8  ;;  %v2868_v46 = vld [vmem:[%s9017_s1 + $0x188] sm:$0xff] }
 0x214   : > { %3068 = vperm.xlu1 %4872, %v2860_v57   ;;  %v2867_v57 = vld [vmem:[%s9017_s1 + $0x180] sm:$0xff] }
 0x215   : > { %3073 = vperm.xlu0 %4871, %v2861_v3   ;;  %v2279_v37 = vsel %vm2254_vm10, %v9996_v54, %v4774_v36  ;;  %v2280_v2 = vsel %vm2254_vm10, %v9997_v15, %v4775_v49  ;;  %v4788_v31 = vpop.permute.xlu1 %4787 }
 0x216   : > { %3686 = vmatmul.mubr.msk.bf16.gmra.mxu0 %vm2427_vm12, %v2372_v28  ;;  %3726 = vmatmul.mubr.msk.bf16.gmra.mxu1 %vm2427_vm12, %v2382_v58  ;;  %v8280_v14 = vsel %vm2309_vm11, %v2279_v37, %v4779_v45  ;;  %v8283_v43 = vsel %vm2309_vm11, %v2280_v2, %v4780_v18  ;;  %v4783_v10 = vpop.permute.xlu0 %4782  ;;  %v4790_v26 = vunpack.i.h.bf16 %v4788_v31  ;;  %v4789_v9 = vunpack.i.l.bf16 %v4788_v31  ;;  %v2869_v58 = vld [vmem:[%s9017_s1 + $0x190] sm:$0xff] }
 0x217   : > { %3689 = vmatprep.mubr.msk.bf16.mxu0 %vm4945_vm7, %v9971_v39  ;;  %3729 = vmatprep.mubr.msk.bf16.mxu1 %vm4945_vm7, %v9971_v39  ;;  %v2376_v51 = vpack.c.bf16 %v8283_v43, %v8280_v14  ;;  %v4785_v61 = vunpack.i.h.bf16 %v4783_v10  ;;  %v4784_v28 = vunpack.i.l.bf16 %v4783_v10 }
 0x218   : > { %3078 = vperm.xlu1 %4872, %v2862_v35  }
 0x219   : > { %3083 = vperm.xlu0 %4871, %v2863_v50   ;;  %v2293_v21 = vsel %vm2254_vm10, %v7628_v59, %v4784_v28  ;;  %v2294_v42 = vsel %vm2254_vm10, %v7632_v41, %v4785_v61  ;;  %v4798_v12 = vpop.permute.xlu1 %4797  ;;  %v2866_v59 = vld [vmem:[%s9017_s1 + $0x178] sm:$0xff]  ;;  %v9998_v41 = vld [vmem:[#allocation99_spill] sm:$0xff] }
 0x21a   : > { %v2348_v38 = vsel %vm2309_vm11, %v2293_v21, %v4789_v9  ;;  %v2349_v19 = vsel %vm2309_vm11, %v2294_v42, %v4790_v26  ;;  %v4793_v30 = vpop.permute.xlu0 %4792  ;;  %v4800_v40 = vunpack.i.h.bf16 %v4798_v12  ;;  %v4799_v1 = vunpack.i.l.bf16 %v4798_v12  ;;  %v2871_v26 = vld [vmem:[%s9017_s1 + $0x1a0] sm:$0xff] }
 0x21b   : > { %v2383_v11 = vpack.c.bf16 %v2349_v19, %v2348_v38  ;;  %v4795_v16 = vunpack.i.h.bf16 %v4793_v30  ;;  %v4794_v20 = vunpack.i.l.bf16 %v4793_v30 }
 0x21c   : > { %3088 = vperm.xlu1 %4872, %v2864_v63  }
 0x21d   : > { %3093 = vperm.xlu0 %4871, %v2865_v29   ;;  %v2281_v53 = vsel %vm2254_vm10, %v9998_v41, %v4794_v20  ;;  %v2282_v62 = vsel %vm2254_vm10, %v9999_v34, %v4795_v16  ;;  %v4808_v6 = vpop.permute.xlu1 %4807  ;;  %v2873_v29 = vld [vmem:[%s9017_s1 + $0x1b0] sm:$0xff]  ;;  %v2875_v34 = vld [vmem:[%s9017_s1 + $0x1c0] sm:$0xff] }
 0x21e   : > { %3690 = vmatmul.mubr.msk.bf16.gmra.mxu0 %vm2427_vm12, %v2373_v22  ;;  %3730 = vmatmul.mubr.msk.bf16.gmra.mxu1 %vm2427_vm12, %v2383_v11  ;;  %v8319_v55 = vsel %vm2309_vm11, %v2281_v53, %v4799_v1  ;;  %v8322_v7 = vsel %vm2309_vm11, %v2282_v62, %v4800_v40  ;;  %v4803_v48 = vpop.permute.xlu0 %4802  ;;  %v4810_v3 = vunpack.i.h.bf16 %v4808_v6  ;;  %v4809_v5 = vunpack.i.l.bf16 %v4808_v6 }
 0x21f   : > { %3693 = vmatprep.mubr.msk.bf16.mxu0 %vm4945_vm7, %v9971_v39  ;;  %3733 = vmatprep.mubr.msk.bf16.mxu1 %vm4945_vm7, %v9971_v39  ;;  %v2377_v52 = vpack.c.bf16 %v8322_v7, %v8319_v55  ;;  %v4805_v24 = vunpack.i.h.bf16 %v4803_v48  ;;  %v4804_v22 = vunpack.i.l.bf16 %v4803_v48 }
 0x220   : > { %3098 = vperm.xlu1 %4872, %v2866_v59   ;;  %v10000_v59 = vld [vmem:[#allocation5_spill] sm:$0xff] }
 0x221   : > { %3103 = vperm.xlu0 %4871, %v2867_v57   ;;  %v2295_v8 = vsel %vm2254_vm10, %v7609_v25, %v4804_v22  ;;  %v2296_v18 = vsel %vm2254_vm10, %v7613_v4, %v4805_v24  ;;  %v4818_v45 = vpop.permute.xlu1 %4817  ;;  %v2870_v25 = vld [vmem:[%s9017_s1 + $0x198] sm:$0xff]  ;;  %v10002_v24 = vld [vmem:[#allocation27_spill] sm:$0xff] }
 0x222   : > { %v2350_v49 = vsel %vm2309_vm11, %v2295_v8, %v4809_v5  ;;  %v2351_v36 = vsel %vm2309_vm11, %v2296_v18, %v4810_v3  ;;  %v4813_v35 = vpop.permute.xlu0 %4812  ;;  %v4820_v54 = vunpack.i.h.bf16 %v4818_v45  ;;  %v4819_v37 = vunpack.i.l.bf16 %v4818_v45  ;;  %v10001_v3 = vld [vmem:[#allocation55_spill] sm:$0xff] }
 0x223   : > { %v2384_v15 = vpack.c.bf16 %v2351_v36, %v2350_v49  ;;  %v4815_v2 = vunpack.i.h.bf16 %v4813_v35  ;;  %v4814_v31 = vunpack.i.l.bf16 %v4813_v35 }
 0x224   : > { %3108 = vperm.xlu1 %4872, %v2868_v46  }
 0x225   : > { %3113 = vperm.xlu0 %4871, %v2869_v58   ;;  %v2297_v4 = vsel %vm2254_vm10, %v7663_v60, %v4814_v31  ;;  %v2298_v50 = vsel %vm2254_vm10, %v7667_v44, %v4815_v2  ;;  %v4828_v10 = vpop.permute.xlu1 %4827  ;;  %v10004_v2 = vld [vmem:[#allocation106_spill] sm:$0xff] }
 0x226   : > { %3694 = vmatmul.mubr.msk.bf16.gmra.mxu0 %vm2427_vm12, %v2374_v56  ;;  %3734 = vmatmul.mubr.msk.bf16.gmra.mxu1 %vm2427_vm12, %v2384_v15  ;;  %v2352_v9 = vsel %vm2309_vm11, %v2297_v4, %v4819_v37  ;;  %v2353_v61 = vsel %vm2309_vm11, %v2298_v50, %v4820_v54  ;;  %v4823_v60 = vpop.permute.xlu0 %4822  ;;  %v4830_v28 = vunpack.i.h.bf16 %v4828_v10  ;;  %v4829_v63 = vunpack.i.l.bf16 %v4828_v10  ;;  %v2872_v56 = vld [vmem:[%s9017_s1 + $0x1a8] sm:$0xff]  ;;  %v10003_v37 = vld [vmem:[#allocation28_spill] sm:$0xff] }
 0x227   : > { %3697 = vmatprep.mubr.msk.bf16.mxu0 %vm4945_vm7, %v9971_v39  ;;  %3737 = vmatprep.mubr.msk.bf16.mxu1 %vm4945_vm7, %v9971_v39  ;;  %v2385_v44 = vpack.c.bf16 %v2353_v61, %v2352_v9  ;;  %v4825_v0 = vunpack.i.h.bf16 %v4823_v60  ;;  %v4824_v17 = vunpack.i.l.bf16 %v4823_v60 }
 0x228   : > { %3118 = vperm.xlu1 %4872, %v2870_v25  }
 0x229   : > { %3123 = vperm.xlu0 %4871, %v2871_v26   ;;  %v2299_v21 = vsel %vm2254_vm10, %v7643_v23, %v4824_v17  ;;  %v2300_v42 = vsel %vm2254_vm10, %v7647_v32, %v4825_v0  ;;  %v4838_v12 = vpop.permute.xlu1 %4837  ;;  %v2874_v23 = vld [vmem:[%s9017_s1 + $0x1b8] sm:$0xff] }
 0x22a   : > { %v2354_v38 = vsel %vm2309_vm11, %v2299_v21, %v4829_v63  ;;  %v2355_v19 = vsel %vm2309_vm11, %v2300_v42, %v4830_v28  ;;  %v4833_v30 = vpop.permute.xlu0 %4832  ;;  %v4840_v40 = vunpack.i.h.bf16 %v4838_v12  ;;  %v4839_v1 = vunpack.i.l.bf16 %v4838_v12  ;;  %v10006_v28 = vld [vmem:[#allocation165_spill] sm:$0xff] }
 0x22b   : > { %v2386_v11 = vpack.c.bf16 %v2355_v19, %v2354_v38  ;;  %v4835_v16 = vunpack.i.h.bf16 %v4833_v30  ;;  %v4834_v20 = vunpack.i.l.bf16 %v4833_v30 }
 0x22c   : > { %3128 = vperm.xlu1 %4872, %v2872_v56  }
 0x22d   : > { %3133 = vperm.xlu0 %4871, %v2873_v29   ;;  %v2301_v32 = vsel %vm2254_vm10, %v7711_v13, %v4834_v20  ;;  %v2302_v41 = vsel %vm2254_vm10, %v10000_v59, %v4835_v16  ;;  %v4848_v53 = vpop.permute.xlu1 %4847 }
 0x22e   : > { %3698 = vmatmul.mubr.msk.bf16.gmra.mxu0 %vm2427_vm12, %v2375_v27  ;;  %3738 = vmatmul.mubr.msk.bf16.gmra.mxu1 %vm2427_vm12, %v2385_v44  ;;  %v2356_v62 = vsel %vm2309_vm11, %v2301_v32, %v4839_v1  ;;  %v2357_v6 = vsel %vm2309_vm11, %v2302_v41, %v4840_v40  ;;  %v4843_v13 = vpop.permute.xlu0 %4842  ;;  %v4850_v57 = vunpack.i.h.bf16 %v4848_v53  ;;  %v4849_v48 = vunpack.i.l.bf16 %v4848_v53 }
 0x22f   : > { %3701 = vmatprep.mubr.msk.bf16.mxu0 %vm4945_vm7, %v9971_v39  ;;  %3741 = vmatprep.mubr.msk.bf16.mxu1 %vm4945_vm7, %v9971_v39  ;;  %v2387_v33 = vpack.c.bf16 %v2357_v6, %v2356_v62  ;;  %v4845_v47 = vunpack.i.h.bf16 %v4843_v13  ;;  %v4844_v27 = vunpack.i.l.bf16 %v4843_v13 }
 0x230   : > { %3138 = vperm.xlu1 %4872, %v2874_v23  }
 0x231   : > { %3143 = vperm.xlu0 %4871, %v2875_v34   ;;  %v2303_v5 = vsel %vm2254_vm10, %v10001_v3, %v4844_v27  ;;  %v2304_v22 = vsel %vm2254_vm10, %v10002_v24, %v4845_v47  ;;  %v4858_v46 = vpop.permute.xlu1 %4857 }
 0x232   : > { %v2358_v8 = vsel %vm2309_vm11, %v2303_v5, %v4849_v48  ;;  %v2359_v18 = vsel %vm2309_vm11, %v2304_v22, %v4850_v57  ;;  %v4853_v45 = vpop.permute.xlu0 %4852  ;;  %v4860_v58 = vunpack.i.h.bf16 %v4858_v46  ;;  %v4859_v49 = vunpack.i.l.bf16 %v4858_v46 }
 0x233   : > { %v2388_v36 = vpack.c.bf16 %v2359_v18, %v2358_v8  ;;  %v4855_v35 = vunpack.i.h.bf16 %v4853_v45  ;;  %v4854_v54 = vunpack.i.l.bf16 %v4853_v45 }
 0x235   : > { %v2305_v15 = vsel %vm2254_vm10, %v10003_v37, %v4854_v54  ;;  %v2306_v31 = vsel %vm2254_vm10, %v10004_v2, %v4855_v35  ;;  %v4868_v25 = vpop.permute.xlu1 %4867 }
 0x236   : > { %3702 = vmatmul.mubr.msk.bf16.gmra.mxu0 %vm2427_vm12, %v2376_v51  ;;  %3742 = vmatmul.mubr.msk.bf16.gmra.mxu1 %vm2427_vm12, %v2386_v11  ;;  %v2360_v4 = vsel %vm2309_vm11, %v2305_v15, %v4859_v49  ;;  %v2361_v50 = vsel %vm2309_vm11, %v2306_v31, %v4860_v58  ;;  %v4863_v10 = vpop.permute.xlu0 %4862  ;;  %v4870_v26 = vunpack.i.h.bf16 %v4868_v25  ;;  %v4869_v9 = vunpack.i.l.bf16 %v4868_v25  ;;  %v10005_v51 = vld [vmem:[#allocation104_spill] sm:$0xff] }
 0x237   : > { %3705 = vmatprep.mubr.msk.bf16.mxu0 %vm4945_vm7, %v9971_v39  ;;  %3745 = vmatprep.mubr.msk.bf16.mxu1 %vm4945_vm7, %v9971_v39  ;;  %v2389_v61 = vpack.c.bf16 %v2361_v50, %v2360_v4  ;;  %v4865_v14 = vunpack.i.h.bf16 %v4863_v10  ;;  %v4864_v43 = vunpack.i.l.bf16 %v4863_v10 }
 0x239   : > { %v2307_v60 = vsel %vm2254_vm10, %v10005_v51, %v4864_v43  ;;  %v2308_v63 = vsel %vm2254_vm10, %v10006_v28, %v4865_v14 }
 0x23a   : > { %v2362_v44 = vsel %vm2309_vm11, %v2307_v60, %v4869_v9  ;;  %v2363_v0 = vsel %vm2309_vm11, %v2308_v63, %v4870_v26 }
 0x23b   : > { %v2390_v17 = vpack.c.bf16 %v2363_v0, %v2362_v44 }
 0x23e   : > { %3706 = vmatmul.mubr.msk.bf16.gmra.mxu0 %vm2427_vm12, %v2377_v52  ;;  %3746 = vmatmul.mubr.msk.bf16.gmra.mxu1 %vm2427_vm12, %v2387_v33 }
 0x23f   : > { %3749 = vmatprep.mubr.msk.bf16.mxu1 %vm4945_vm7, %v9971_v39 }
 0x242   : > { %v8437_v55 = vpop.permute.xlu1 %2883 }
 0x243   : > { %v8439_v7 = vpop.permute.xlu0 %2878 }
 0x246   : > { %3750 = vmatmul.mubr.msk.bf16.gmra.mxu1 %vm2427_vm12, %v2388_v36  ;;  %v8446_v21 = vpop.permute.xlu1 %2888 }
 0x247   : > { %3753 = vmatprep.mubr.msk.bf16.mxu1 %vm4945_vm7, %v9971_v39  ;;  %v8450_v12 = vpop.permute.xlu0 %2893 }
 0x24a   : > { %v8457_v38 = vpop.permute.xlu1 %2898 }
 0x24b   : > { %v8462_v30 = vpop.permute.xlu0 %2903 }
 0x24e   : > { %3754 = vmatmul.mubr.msk.bf16.gmra.mxu1 %vm2427_vm12, %v2389_v61  ;;  %v8469_v11 = vpop.permute.xlu1 %2908 }
 0x24f   : > { %3757 = vmatprep.mubr.msk.bf16.mxu1 %vm4945_vm7, %v9971_v39  ;;  %v8473_v20 = vpop.permute.xlu0 %2913 }
 0x252   : > { %v8480_v59 = vpop.permute.xlu1 %2918 }
 0x253   : > { %v8485_v53 = vpop.permute.xlu0 %2923 }
 0x256   : > { %3758 = vmatmul.mubr.msk.bf16.gmra.mxu1 %vm2427_vm12, %v2390_v17  ;;  %v8492_v6 = vpop.permute.xlu1 %2928 }
 0x257   : > { %v8496_v57 = vpop.permute.xlu0 %2933 }
 0x25a   : > { %v8505_v27 = vpop.permute.xlu1 %2938 }
 0x25b   : > { %v8513_v24 = vpop.permute.xlu0 %2943 }
 0x25e   : > { %v8525_v45 = vpop.permute.xlu1 %2948 }
 0x25f   : > { %v8531_v36 = vpop.permute.xlu0 %2953 }
 0x262   : > { %v8543_v2 = vpop.permute.xlu1 %2958 }
 0x263   : > { %v8551_v4 = vpop.permute.xlu0 %2963 }
 0x266   : > { %v8563_v61 = vpop.permute.xlu1 %2968 }
 0x267   : > { %v8573_v28 = vpop.permute.xlu0 %2973 }
 0x295   : > { %v8441_v52 = vpop.f32.mrf.mxu0 }
 0x296   : > { %2765 = vst.msk [vmem:[%s8059_s20 + $0x18] sm:$0xff] %vm1924_vm2, %v8441_v52  ;;  %v3146_v43 = vmul.f32 %v8439_v7, %v8441_v52 }
 0x297   : > { %v3655_v56 = vpop.f32.mrf.mxu0 }
 0x298   : > { %v3313_v7 = vmul.f32 %v3146_v43, %v8441_v52  ;;  %v3200_v52 = vsel %vm1924_vm2, %v3146_v43, 0.0 }
 0x299   : > { %v8448_v42 = vpop.f32.mrf.mxu0 }
 0x29a   : > { %2766 = vst.msk [vmem:[%s8059_s20 + $0x20] sm:$0xff] %vm1924_vm2, %v8448_v42  ;;  %v3147_v14 = vmul.f32 %v8437_v55, %v8448_v42 }
 0x29b   : > { %v3656_v39 = vpop.f32.mrf.mxu0 }
 0x29c   : > { %v3314_v17 = vmul.f32 %v3147_v14, %v8448_v42 }
 0x29e   : > { %v8455_v29 = vpop.f32.mrf.mxu0 }
 0x29f   : > { %2767 = vst.msk [vmem:[%s8059_s20 + $0x28] sm:$0xff] %vm1924_vm2, %v8455_v29  ;;  %v3148_v63 = vmul.f32 %v8446_v21, %v8455_v29  ;;  %v8591_v21 = vpop.permute.xlu1 %2978 }
 0x2a0   : > { %v3659_v19 = vpop.f32.mrf.mxu0 }
 0x2a1   : > { %v3201_v19 = vsel %vm1924_vm2, %v3147_v14, 0.0 }
 0x2a2   : > { %v8464_v40 = vpop.f32.mrf.mxu0 }
 0x2a3   : > { %2768 = vst.msk [vmem:[%s8059_s20 + $0x30] sm:$0xff] %vm1924_vm2, %v8464_v40  ;;  %v3149_v55 = vmul.f32 %v8450_v12, %v8464_v40  ;;  %v8627_v14 = vpop.permute.xlu1 %2988 }
 0x2a4   : > { %v3660_v1 = vpop.f32.mrf.mxu0 }
 0x2a5   : > { %v3315_v1 = vmul.f32 %v3148_v63, %v8455_v29  ;;  %v3203_v29 = vsel %vm1924_vm2, %v3148_v63, 0.0 }
 0x2a6   : > { %v8471_v16 = vpop.f32.mrf.mxu0 }
 0x2a7   : > { %2769 = vst.msk [vmem:[%s8059_s20 + $0x38] sm:$0xff] %vm1924_vm2, %v8471_v16 }
 0x2a8   : > { %v3663_v23 = vpop.f32.mrf.mxu0 }
 0x2a9   : > { %v3150_v23 = vmul.f32 %v8457_v38, %v8471_v16  ;;  %v3316_v38 = vmul.f32 %v3149_v55, %v8464_v40 }
 0x2aa   : > { %v8478_v32 = vpop.f32.mrf.mxu0 }
 0x2ab   : > { %2770 = vst.msk [vmem:[%s8059_s20 + $0x40] sm:$0xff] %vm1924_vm2, %v8478_v32  ;;  %v3372_v43 = vsel %vm1924_vm2, %v3316_v38, 0.0 }
 0x2ac   : > { %v3664_v41 = vpop.f32.mrf.mxu0 }
 0x2ad   : > { %v8604_v41 = vpop.permute.xlu0 %2983 }
 0x2ae   : > { %v8487_v34 = vpop.f32.mrf.mxu0 }
 0x2af   : > { %2771 = vst.msk [vmem:[%s8059_s20 + $0x48] sm:$0xff] %vm1924_vm2, %v8487_v34 }
 0x2b0   : > { %v3667_v62 = vpop.f32.mrf.mxu0 }
 0x2b1   : > { %v3368_v62 = vsel %vm1924_vm2, %v3314_v17, 0.0 }
 0x2b2   : > { %v8494_v13 = vpop.f32.mrf.mxu0 }
 0x2b3   : > { %2772 = vst.msk [vmem:[%s8059_s20 + $0x50] sm:$0xff] %vm1924_vm2, %v8494_v13  ;;  %v3153_v63 = vmul.f32 %v8473_v20, %v8494_v13 }
 0x2b4   : > { %v3668_v48 = vpop.f32.mrf.mxu0 }
 0x2b5   : > { %v3151_v48 = vmul.f32 %v8462_v30, %v8478_v32 }
 0x2b6   : > { %v8501_v33 = vpop.f32.mrf.mxu0  ;;  %v8503_v47 = vpop.f32.mrf.mxu1 }
 0x2b7   : > { %2773 = vst.msk [vmem:[%s8059_s20 + $0x58] sm:$0xff] %vm1924_vm2, %v8501_v33  ;;  %2793 = vst.msk [vmem:[%s8059_s20 + $0xf8] sm:$0xff] %vm1924_vm2, %v8503_v47 }
 0x2b8   : > { %v3671_v3 = vpop.f32.mrf.mxu0  ;;  %v3711_v5 = vpop.f32.mrf.mxu1 }
 0x2b9   : > { %v3367_v3 = vsel %vm1924_vm2, %v3313_v7, 0.0  ;;  %v3202_v5 = vadd.f32 %v3201_v19, %v3200_v52  ;;  %v8638_v7 = vpop.permute.xlu0 %2993 }
 0x2ba   : > { %v8515_v22 = vpop.f32.mrf.mxu0  ;;  %v8517_v46 = vpop.f32.mrf.mxu1  ;;  %v3369_v30 = vadd.f32 %v3368_v62, %v3367_v3 }
 0x2bb   : > { %2774 = vst.msk [vmem:[%s8059_s20 + $0x60] sm:$0xff] %vm1924_vm2, %v8515_v22  ;;  %2794 = vst.msk [vmem:[%s8059_s20 + $0x100] sm:$0xff] %vm1924_vm2, %v8517_v46  ;;  %v3204_v40 = vadd.f32 %v3203_v29, %v3202_v5 }
 0x2bc   : > { %v3672_v8 = vpop.f32.mrf.mxu0  ;;  %v3712_v18 = vpop.f32.mrf.mxu1 }
 0x2be   : > { %v8527_v58 = vpop.f32.mrf.mxu0  ;;  %v8529_v49 = vpop.f32.mrf.mxu1 }
 0x2bf   : > { %2775 = vst.msk [vmem:[%s8059_s20 + $0x68] sm:$0xff] %vm1924_vm2, %v8527_v58  ;;  %2795 = vst.msk [vmem:[%s8059_s20 + $0x108] sm:$0xff] %vm1924_vm2, %v8529_v49 }
 0x2c0   : > { %v3675_v35 = vpop.f32.mrf.mxu0  ;;  %v3715_v54 = vpop.f32.mrf.mxu1 }
 0x2c1   : > { %v3370_v35 = vsel %vm1924_vm2, %v3315_v1, 0.0  ;;  %v3205_v54 = vsel %vm1924_vm2, %v3149_v55, 0.0  ;;  %v3209_v1 = vsel %vm1924_vm2, %v3151_v48, 0.0 }
 0x2c2   : > { %v8539_v37 = vpop.f32.mrf.mxu0  ;;  %v8541_v15 = vpop.f32.mrf.mxu1 }
 0x2c3   : > { %2776 = vst.msk [vmem:[%s8059_s20 + $0x70] sm:$0xff] %vm1924_vm2, %v8539_v37  ;;  %2796 = vst.msk [vmem:[%s8059_s20 + $0x110] sm:$0xff] %vm1924_vm2, %v8541_v15 }
 0x2c4   : > { %v3676_v31 = vpop.f32.mrf.mxu0  ;;  %v3716_v25 = vpop.f32.mrf.mxu1 }
 0x2c5   : > { %v3317_v31 = vmul.f32 %v3150_v23, %v8471_v16  ;;  %v3152_v25 = vmul.f32 %v8469_v11, %v8487_v34  ;;  %v3207_v16 = vsel %vm1924_vm2, %v3150_v23, 0.0  ;;  %v3318_v11 = vmul.f32 %v3151_v48, %v8478_v32 }
 0x2c6   : > { %v8553_v50 = vpop.f32.mrf.mxu0  ;;  %v8555_v10 = vpop.f32.mrf.mxu1  ;;  %v3154_v32 = vmul.f32 %v8480_v59, %v8501_v33  ;;  %v3155_v59 = vmul.f32 %v8485_v53, %v8515_v22 }
 0x2c7   : > { %2777 = vst.msk [vmem:[%s8059_s20 + $0x78] sm:$0xff] %vm1924_vm2, %v8553_v50  ;;  %2797 = vst.msk [vmem:[%s8059_s20 + $0x118] sm:$0xff] %vm1924_vm2, %v8555_v10  ;;  %v3374_v19 = vsel %vm1924_vm2, %v3317_v31, 0.0  ;;  %v3319_v52 = vmul.f32 %v3152_v25, %v8487_v34  ;;  %v3376_v62 = vsel %vm1924_vm2, %v3318_v11, 0.0  ;;  %v3211_v29 = vsel %vm1924_vm2, %v3152_v25, 0.0 }
 0x2c8   : > { %v3679_v26 = vpop.f32.mrf.mxu0  ;;  %v3719_v9 = vpop.f32.mrf.mxu1  ;;  %v3320_v34 = vmul.f32 %v3153_v63, %v8494_v13  ;;  %v3213_v31 = vsel %vm1924_vm2, %v3153_v63, 0.0  ;;  %v3156_v13 = vmul.f32 %v8492_v6, %v8527_v58  ;;  %v3322_v6 = vmul.f32 %v3155_v59, %v8515_v22 }
 0x2ca   : > { %v8569_v51 = vpop.f32.mrf.mxu0  ;;  %v8571_v60 = vpop.f32.mrf.mxu1 }
 0x2cb   : > { %2778 = vst.msk [vmem:[%s8059_s20 + $0x80] sm:$0xff] %vm1924_vm2, %v8569_v51  ;;  %2798 = vst.msk [vmem:[%s8059_s20 + $0x120] sm:$0xff] %vm1924_vm2, %v8571_v60 }
 0x2cc   : > { %v3680_v44 = vpop.f32.mrf.mxu0  ;;  %v3720_v0 = vpop.f32.mrf.mxu1 }
 0x2cd   : > { %v3371_v44 = vadd.f32 %v3370_v35, %v3369_v30  ;;  %v3206_v0 = vadd.f32 %v3205_v54, %v3204_v40  ;;  %v8660_v35 = vpop.permute.xlu1 %2998  ;;  %v3378_v54 = vsel %vm1924_vm2, %v3319_v52, 0.0  ;;  %v3321_v30 = vmul.f32 %v3154_v32, %v8501_v33 }
 0x2ce   : > { %v8587_v56 = vpop.f32.mrf.mxu0  ;;  %v8589_v39 = vpop.f32.mrf.mxu1  ;;  %v3215_v33 = vsel %vm1924_vm2, %v3154_v32, 0.0  ;;  %v3323_v52 = vmul.f32 %v3156_v13, %v8527_v58  ;;  %v3158_v32 = vmul.f32 %v8505_v27, %v8553_v50  ;;  %v3219_v58 = vsel %vm1924_vm2, %v3156_v13, 0.0 }
 0x2cf   : > { %2779 = vst.msk [vmem:[%s8059_s20 + $0x88] sm:$0xff] %vm1924_vm2, %v8587_v56  ;;  %2799 = vst.msk [vmem:[%s8059_s20 + $0x128] sm:$0xff] %vm1924_vm2, %v8589_v39  ;;  %v3373_v20 = vadd.f32 %v3372_v43, %v3371_v44  ;;  %v3208_v23 = vadd.f32 %v3207_v16, %v3206_v0  ;;  %v3380_v43 = vsel %vm1924_vm2, %v3320_v34, 0.0  ;;  %v3157_v16 = vmul.f32 %v8496_v57, %v8539_v37 }
 0x2d0   : > { %v3683_v42 = vpop.f32.mrf.mxu0  ;;  %v3723_v12 = vpop.f32.mrf.mxu1 }
 0x2d1   : > { %v3375_v38 = vadd.f32 %v3374_v19, %v3373_v20  ;;  %v3210_v48 = vadd.f32 %v3209_v1, %v3208_v23  ;;  %v3382_v19 = vsel %vm1924_vm2, %v3321_v30, 0.0  ;;  %v3217_v1 = vsel %vm1924_vm2, %v3155_v59, 0.0 }
 0x2d2   : > { %v8612_v8 = vpop.f32.mrf.mxu0  ;;  %v8614_v18 = vpop.f32.mrf.mxu1  ;;  %v3324_v27 = vmul.f32 %v3157_v16, %v8539_v37  ;;  %v3325_v30 = vmul.f32 %v3158_v32, %v8553_v50  ;;  %v3160_v37 = vmul.f32 %v8525_v45, %v8587_v56 }
 0x2d3   : > { %2780 = vst.msk [vmem:[%s8059_s20 + $0x90] sm:$0xff] %vm1924_vm2, %v8612_v8  ;;  %2800 = vst.msk [vmem:[%s8059_s20 + $0x130] sm:$0xff] %vm1924_vm2, %v8614_v18  ;;  %v3377_v53 = vadd.f32 %v3376_v62, %v3375_v38  ;;  %v3212_v25 = vadd.f32 %v3211_v29, %v3210_v48  ;;  %v3159_v62 = vmul.f32 %v8513_v24, %v8569_v51 }
 0x2d4   : > { %v3684_v26 = vpop.f32.mrf.mxu0  ;;  %v3724_v9 = vpop.f32.mrf.mxu1  ;;  %v3161_v45 = vmul.f32 %v8531_v36, %v8612_v8 }
 0x2d5   : > { %v8673_v9 = vpop.permute.xlu0 %3003  ;;  %v3379_v11 = vadd.f32 %v3378_v54, %v3377_v53  ;;  %v3214_v63 = vadd.f32 %v3213_v31, %v3212_v25  ;;  %v3386_v54 = vsel %vm1924_vm2, %v3323_v52, 0.0  ;;  %v3221_v31 = vsel %vm1924_vm2, %v3157_v16, 0.0 }
 0x2d6   : > { %v8634_v17 = vpop.f32.mrf.mxu0  ;;  %v8636_v55 = vpop.f32.mrf.mxu1  ;;  %v3326_v50 = vmul.f32 %v3159_v62, %v8569_v51 }
 0x2d7   : > { %2781 = vst.msk [vmem:[%s8059_s20 + $0x98] sm:$0xff] %vm1924_vm2, %v8634_v17  ;;  %2801 = vst.msk [vmem:[%s8059_s20 + $0x138] sm:$0xff] %vm1924_vm2, %v8636_v55  ;;  %v3381_v57 = vadd.f32 %v3380_v43, %v3379_v11  ;;  %v3216_v22 = vadd.f32 %v3215_v33, %v3214_v63  ;;  %v3390_v63 = vsel %vm1924_vm2, %v3325_v30, 0.0  ;;  %v3162_v51 = vmul.f32 %v8543_v2, %v8634_v17 }
 0x2d8   : > { %v3687_v42 = vpop.f32.mrf.mxu0  ;;  %v3727_v12 = vpop.f32.mrf.mxu1  ;;  %v3328_v2 = vmul.f32 %v3161_v45, %v8612_v8 }
 0x2d9   : > { %v8695_v42 = vpop.permute.xlu1 %3008  ;;  %v3384_v12 = vsel %vm1924_vm2, %v3322_v6, 0.0  ;;  %v3383_v29 = vadd.f32 %v3382_v19, %v3381_v57  ;;  %v3218_v34 = vadd.f32 %v3217_v1, %v3216_v22  ;;  %v8706_v48 = vpop.permute.xlu0 %3013  ;;  %v3225_v19 = vsel %vm1924_vm2, %v3159_v62, 0.0 }
 0x2da   : > { %v8656_v3 = vpop.f32.mrf.mxu0  ;;  %v8658_v5 = vpop.f32.mrf.mxu1  ;;  %v3327_v1 = vmul.f32 %v3160_v37, %v8587_v56  ;;  %v3227_v56 = vsel %vm1924_vm2, %v3160_v37, 0.0 }
 0x2db   : > { %2782 = vst.msk [vmem:[%s8059_s20 + $0xa0] sm:$0xff] %vm1924_vm2, %v8656_v3  ;;  %2802 = vst.msk [vmem:[%s8059_s20 + $0x140] sm:$0xff] %vm1924_vm2, %v8658_v5  ;;  %v3385_v24 = vadd.f32 %v3384_v12, %v3383_v29  ;;  %v3220_v13 = vadd.f32 %v3219_v58, %v3218_v34  ;;  %v3229_v34 = vsel %vm1924_vm2, %v3161_v45, 0.0 }
 0x2dc   : > { %v3688_v40 = vpop.f32.mrf.mxu0  ;;  %v3728_v26 = vpop.f32.mrf.mxu1  ;;  %v3394_v29 = vsel %vm1924_vm2, %v3327_v1, 0.0 }
 0x2dd   : > { %v3388_v40 = vsel %vm1924_vm2, %v3324_v27, 0.0  ;;  %v3223_v26 = vsel %vm1924_vm2, %v3158_v32, 0.0  ;;  %v3387_v43 = vadd.f32 %v3386_v54, %v3385_v24  ;;  %v3222_v33 = vadd.f32 %v3221_v31, %v3220_v13  ;;  %v8728_v11 = vpop.permute.xlu1 %3018  ;;  %v8741_v22 = vpop.permute.xlu0 %3023 }
 0x2de   : > { %v8680_v44 = vpop.f32.mrf.mxu0  ;;  %v8682_v0 = vpop.f32.mrf.mxu1  ;;  %v3329_v54 = vmul.f32 %v3162_v51, %v8634_v17  ;;  %v3396_v13 = vsel %vm1924_vm2, %v3328_v2, 0.0  ;;  %v3231_v17 = vsel %vm1924_vm2, %v3162_v51, 0.0 }
 0x2df   : > { %2783 = vst.msk [vmem:[%s8059_s20 + $0xa8] sm:$0xff] %vm1924_vm2, %v8680_v44  ;;  %2803 = vst.msk [vmem:[%s8059_s20 + $0x148] sm:$0xff] %vm1924_vm2, %v8682_v0  ;;  %v3389_v36 = vadd.f32 %v3388_v40, %v3387_v43  ;;  %v3224_v52 = vadd.f32 %v3223_v26, %v3222_v33  ;;  %v3164_v31 = vmul.f32 %v8563_v61, %v8680_v44 }
 0x2e0   : > { %v3691_v20 = vpop.f32.mrf.mxu0  ;;  %v3731_v23 = vpop.f32.mrf.mxu1  ;;  %v3398_v43 = vsel %vm1924_vm2, %v3329_v54, 0.0 }
 0x2e1   : > { %v3392_v20 = vsel %vm1924_vm2, %v3326_v50, 0.0  ;;  %v3163_v23 = vmul.f32 %v8551_v4, %v8656_v3  ;;  %v3391_v12 = vadd.f32 %v3390_v63, %v3389_v36  ;;  %v3226_v58 = vadd.f32 %v3225_v19, %v3224_v52  ;;  %v8760_v24 = vpop.permute.xlu1 %3028  ;;  %v8769_v45 = vpop.permute.xlu0 %3033 }
 0x2e2   : > { %v8702_v59 = vpop.f32.mrf.mxu0  ;;  %v8704_v38 = vpop.f32.mrf.mxu1  ;;  %v3331_v63 = vmul.f32 %v3164_v31, %v8680_v44  ;;  %v3235_v52 = vsel %vm1924_vm2, %v3164_v31, 0.0 }
 0x2e3   : > { %2784 = vst.msk [vmem:[%s8059_s20 + $0xb0] sm:$0xff] %vm1924_vm2, %v8702_v59  ;;  %2804 = vst.msk [vmem:[%s8059_s20 + $0x150] sm:$0xff] %vm1924_vm2, %v8704_v38  ;;  %v3393_v4 = vadd.f32 %v3392_v20, %v3391_v12  ;;  %v3228_v8 = vadd.f32 %v3227_v56, %v3226_v58  ;;  %v3165_v61 = vmul.f32 %v8573_v28, %v8702_v59  ;;  %v3233_v33 = vsel %vm1924_vm2, %v3163_v23, 0.0 }
 0x2e4   : > { %v3692_v53 = vpop.f32.mrf.mxu0  ;;  %v3732_v25 = vpop.f32.mrf.mxu1 }
 0x2e5   : > { %v3330_v53 = vmul.f32 %v3163_v23, %v8656_v3  ;;  %v3395_v25 = vadd.f32 %v3394_v29, %v3393_v4  ;;  %v3230_v40 = vadd.f32 %v3229_v34, %v3228_v8  ;;  %v3332_v44 = vmul.f32 %v3165_v61, %v8702_v59  ;;  %v8787_v2 = vpop.permute.xlu1 %3038  ;;  %v8798_v31 = vpop.permute.xlu0 %3043 }
 0x2e6   : > { %v8724_v6 = vpop.f32.mrf.mxu0  ;;  %v8726_v16 = vpop.f32.mrf.mxu1  ;;  %v3402_v23 = vsel %vm1924_vm2, %v3331_v63, 0.0  ;;  %v3237_v12 = vsel %vm1924_vm2, %v3165_v61, 0.0 }
 0x2e7   : > { %2785 = vst.msk [vmem:[%s8059_s20 + $0xb8] sm:$0xff] %vm1924_vm2, %v8724_v6  ;;  %2805 = vst.msk [vmem:[%s8059_s20 + $0x158] sm:$0xff] %vm1924_vm2, %v8726_v16  ;;  %v3166_v19 = vmul.f32 %v8591_v21, %v8724_v6  ;;  %v3397_v28 = vadd.f32 %v3396_v13, %v3395_v25  ;;  %v3232_v3 = vadd.f32 %v3231_v17, %v3230_v40  ;;  %v3400_v36 = vsel %vm1924_vm2, %v3330_v53, 0.0 }
 0x2e8   : > { %v3695_v32 = vpop.f32.mrf.mxu0  ;;  %v3735_v57 = vpop.f32.mrf.mxu1  ;;  %v3404_v4 = vsel %vm1924_vm2, %v3332_v44, 0.0 }
 0x2e9   : > { %v3399_v21 = vadd.f32 %v3398_v43, %v3397_v28  ;;  %v3234_v57 = vadd.f32 %v3233_v33, %v3232_v3  ;;  %v3333_v58 = vmul.f32 %v3166_v19, %v8724_v6  ;;  %v3239_v8 = vsel %vm1924_vm2, %v3166_v19, 0.0  ;;  %v8813_v63 = vpop.permute.xlu1 %3048 }
 0x2ea   : > { %v2630_v27 = vpop.f32.mrf.mxu0  ;;  %v8748_v62 = vpop.f32.mrf.mxu1 }
 0x2eb   : > { %2786 = vst.msk [vmem:[%s8059_s20 + $0xc0] sm:$0xff] %vm1924_vm2, %v2630_v27  ;;  %2806 = vst.msk [vmem:[%s8059_s20 + $0x160] sm:$0xff] %vm1924_vm2, %v8748_v62  ;;  %v3167_v32 = vmul.f32 %v8604_v41, %v2630_v27  ;;  %v3401_v41 = vadd.f32 %v3400_v36, %v3399_v21  ;;  %v3236_v59 = vadd.f32 %v3235_v52, %v3234_v57  ;;  %v3406_v53 = vsel %vm1924_vm2, %v3333_v58, 0.0  ;;  %v8819_v36 = vpop.permute.xlu0 %3053 }
 0x2ec   : > { %v3696_v30 = vpop.f32.mrf.mxu0  ;;  %v3736_v37 = vpop.f32.mrf.mxu1 }
 0x2ed   : > { %v3334_v6 = vmul.f32 %v3167_v32, %v2630_v27  ;;  %v3403_v30 = vadd.f32 %v3402_v23, %v3401_v41  ;;  %v3238_v37 = vadd.f32 %v3237_v12, %v3236_v59  ;;  %v3241_v61 = vsel %vm1924_vm2, %v3167_v32, 0.0 }
 0x2ee   : > { %v2635_v26 = vpop.f32.mrf.mxu0  ;;  %v8767_v50 = vpop.f32.mrf.mxu1 }
 0x2ef   : > { %2787 = vst.msk [vmem:[%s8059_s20 + $0xc8] sm:$0xff] %vm1924_vm2, %v2635_v26  ;;  %2807 = vst.msk [vmem:[%s8059_s20 + $0x168] sm:$0xff] %vm1924_vm2, %v8767_v50  ;;  %v3168_v29 = vmul.f32 %v8627_v14, %v2635_v26  ;;  %v3405_v27 = vadd.f32 %v3404_v4, %v3403_v30  ;;  %v3408_v19 = vsel %vm1924_vm2, %v3334_v6, 0.0 }
 0x2f0   : > { %v3699_v1 = vpop.f32.mrf.mxu0  ;;  %v3739_v51 = vpop.f32.mrf.mxu1 }
 0x2f1   : > { %v3335_v25 = vmul.f32 %v3168_v29, %v2635_v26  ;;  %v3243_v28 = vsel %vm1924_vm2, %v3168_v29, 0.0  ;;  %v3407_v3 = vadd.f32 %v3406_v53, %v3405_v27 }
 0x2f2   : > { %v2638_v20 = vpop.f32.mrf.mxu0  ;;  %v8785_v56 = vpop.f32.mrf.mxu1 }
 0x2f3   : > { %2788 = vst.msk [vmem:[%s8059_s20 + $0xd0] sm:$0xff] %vm1924_vm2, %v2638_v20  ;;  %2808 = vst.msk [vmem:[%s8059_s20 + $0x170] sm:$0xff] %vm1924_vm2, %v8785_v56  ;;  %v3169_v14 = vmul.f32 %v8638_v7, %v2638_v20  ;;  %v3240_v7 = vadd.f32 %v3239_v8, %v3238_v37  ;;  %v3410_v52 = vsel %vm1924_vm2, %v3335_v25, 0.0  ;;  %v3409_v57 = vadd.f32 %v3408_v19, %v3407_v3 }
 0x2f4   : > { %v3700_v34 = vpop.f32.mrf.mxu0  ;;  %v3740_v54 = vpop.f32.mrf.mxu1  ;;  %v3174_v25 = vmul.f32 %v8728_v11, %v8503_v47 }
 0x2f5   : > { %v3336_v26 = vmul.f32 %v3169_v14, %v2638_v20  ;;  %v3242_v1 = vadd.f32 %v3241_v61, %v3240_v7  ;;  %v3245_v44 = vsel %vm1924_vm2, %v3169_v14, 0.0  ;;  %v3411_v59 = vadd.f32 %v3410_v52, %v3409_v57  ;;  %v8843_v61 = vpop.permute.xlu0 %3063 }
 0x2f6   : > { %v2643_v13 = vpop.f32.mrf.mxu0  ;;  %v8803_v17 = vpop.f32.mrf.mxu1 }
 0x2f7   : > { %2789 = vst.msk [vmem:[%s8059_s20 + $0xd8] sm:$0xff] %vm1924_vm2, %v2643_v13  ;;  %v3170_v40 = vmul.f32 %v8660_v35, %v2643_v13  ;;  %2809 = vst.msk [vmem:[%s8059_s20 + $0x178] sm:$0xff] %vm1924_vm2, %v8803_v17  ;;  %v3244_v20 = vadd.f32 %v3243_v28, %v3242_v1  ;;  %v3412_v58 = vsel %vm1924_vm2, %v3336_v26, 0.0  ;;  %v3175_v28 = vmul.f32 %v8741_v22, %v8517_v46 }
 0x2f8   : > { %v3703_v43 = vpop.f32.mrf.mxu0  ;;  %v3743_v33 = vpop.f32.mrf.mxu1  ;;  %v3413_v30 = vadd.f32 %v3412_v58, %v3411_v59 }
 0x2f9   : > { %v3337_v32 = vmul.f32 %v3170_v40, %v2643_v13  ;;  %v3247_v29 = vsel %vm1924_vm2, %v3170_v40, 0.0  ;;  %v3246_v34 = vadd.f32 %v3245_v44, %v3244_v20  ;;  %v3341_v44 = vmul.f32 %v3174_v25, %v8503_v47 }
 0x2fa   : > { %v2646_v51 = vpop.f32.mrf.mxu0  ;;  %v8817_v35 = vpop.f32.mrf.mxu1  ;;  %v3342_v58 = vmul.f32 %v3175_v28, %v8517_v46 }
 0x2fb   : > { %2790 = vst.msk [vmem:[%s8059_s20 + $0xe0] sm:$0xff] %vm1924_vm2, %v2646_v51  ;;  %v3171_v21 = vmul.f32 %v8673_v9, %v2646_v51  ;;  %2810 = vst.msk [vmem:[%s8059_s20 + $0x180] sm:$0xff] %vm1924_vm2, %v8817_v35  ;;  %v8833_v9 = vpop.permute.xlu1 %3058  ;;  %v3414_v8 = vsel %vm1924_vm2, %v3337_v32, 0.0  ;;  %v3248_v37 = vadd.f32 %v3247_v29, %v3246_v34  ;;  %v3176_v32 = vmul.f32 %v8760_v24, %v8529_v49  ;;  %v8876_v24 = vpop.permute.xlu0 %3073 }
 0x2fc   : > { %v3704_v23 = vpop.f32.mrf.mxu0  ;;  %v3744_v12 = vpop.f32.mrf.mxu1  ;;  %v3177_v29 = vmul.f32 %v8769_v45, %v8541_v15  ;;  %v3178_v45 = vmul.f32 %v8787_v2, %v8555_v10 }
 0x2fd   : > { %v3338_v41 = vmul.f32 %v3171_v21, %v2646_v51  ;;  %v3249_v6 = vsel %vm1924_vm2, %v3171_v21, 0.0  ;;  %v3255_v12 = vsel %vm1924_vm2, %v3174_v25, 0.0  ;;  %v3343_v46 = vmul.f32 %v3176_v32, %v8529_v49 }
 0x2fe   : > { %v2651_v54 = vpop.f32.mrf.mxu0  ;;  %v8831_v4 = vpop.f32.mrf.mxu1  ;;  %v3250_v43 = vadd.f32 %v3249_v6, %v3248_v37  ;;  %v3424_v37 = vsel %vm1924_vm2, %v3342_v58, 0.0  ;;  %v3179_v25 = vmul.f32 %v8798_v31, %v8571_v60 }
 0x2ff   : > { %2791 = vst.msk [vmem:[%s8059_s20 + $0xe8] sm:$0xff] %vm1924_vm2, %v2651_v54  ;;  %v3172_v14 = vmul.f32 %v8695_v42, %v2651_v54  ;;  %2811 = vst.msk [vmem:[%s8059_s20 + $0x188] sm:$0xff] %vm1924_vm2, %v8831_v4  ;;  %v3416_v40 = vsel %vm1924_vm2, %v3338_v41, 0.0  ;;  %v3415_v42 = vadd.f32 %v3414_v8, %v3413_v30  ;;  %v8864_v57 = vpop.permute.xlu1 %3068  ;;  %v3257_v8 = vsel %vm1924_vm2, %v3175_v28, 0.0 }
 0x300   : > { %v3707_v13 = vpop.f32.mrf.mxu0  ;;  %v3747_v53 = vpop.f32.mrf.mxu1 }
 0x301   : > { %v3251_v27 = vsel %vm1924_vm2, %v3172_v14, 0.0  ;;  %v3339_v7 = vmul.f32 %v3172_v14, %v2651_v54  ;;  %v3417_v11 = vadd.f32 %v3416_v40, %v3415_v42  ;;  %v3422_v54 = vsel %vm1924_vm2, %v3341_v44, 0.0 }
 0x302   : > { %v2654_v33 = vpop.f32.mrf.mxu0  ;;  %v8849_v19 = vpop.f32.mrf.mxu1  ;;  %v3252_v1 = vadd.f32 %v3251_v27, %v3250_v43  ;;  %v3259_v13 = vsel %vm1924_vm2, %v3176_v32, 0.0  ;;  %v3344_v53 = vmul.f32 %v3177_v29, %v8541_v15  ;;  %v3261_v42 = vsel %vm1924_vm2, %v3177_v29, 0.0 }
 0x303   : > { %v3418_v26 = vsel %vm1924_vm2, %v3339_v7, 0.0  ;;  %2792 = vst.msk [vmem:[%s8059_s20 + $0xf0] sm:$0xff] %vm1924_vm2, %v2654_v33  ;;  %v3173_v3 = vmul.f32 %v8706_v48, %v2654_v33  ;;  %2812 = vst.msk [vmem:[%s8059_s20 + $0x190] sm:$0xff] %vm1924_vm2, %v8849_v19  ;;  %v3079_v49 = vpop.permute.xlu1 %3078  ;;  %v3426_v7 = vsel %vm1924_vm2, %v3343_v46, 0.0  ;;  %v3345_v43 = vmul.f32 %v3178_v45, %v8555_v10 }
 0x304   : > { %v3708_v51 = vpop.f32.mrf.mxu0  ;;  %v3748_v52 = vpop.f32.mrf.mxu1  ;;  %v3419_v20 = vadd.f32 %v3418_v26, %v3417_v11  ;;  %v3180_v15 = vmul.f32 %v8813_v63, %v8589_v39  ;;  %v3263_v11 = vsel %vm1924_vm2, %v3178_v45, 0.0  ;;  %v3265_v32 = vsel %vm1924_vm2, %v3179_v25, 0.0 }
 0x305   : > { %v3253_v22 = vsel %vm1924_vm2, %v3173_v3, 0.0  ;;  %v3340_v21 = vmul.f32 %v3173_v3, %v2654_v33  ;;  %v3084_v33 = vpop.permute.xlu0 %3083  ;;  %v3428_v3 = vsel %vm1924_vm2, %v3344_v53, 0.0  ;;  %v3181_v51 = vmul.f32 %v8819_v36, %v8614_v18 }
 0x306   : > { %v3254_v48 = vadd.f32 %v3253_v22, %v3252_v1  ;;  %v8866_v23 = vpop.f32.mrf.mxu1  ;;  %v3346_v1 = vmul.f32 %v3179_v25, %v8571_v60  ;;  %v3430_v44 = vsel %vm1924_vm2, %v3345_v43, 0.0  ;;  %v3347_v22 = vmul.f32 %v3180_v15, %v8589_v39 }
 0x307   : > { %v3420_v47 = vsel %vm1924_vm2, %v3340_v21, 0.0  ;;  %2813 = vst.msk [vmem:[%s8059_s20 + $0x198] sm:$0xff] %vm1924_vm2, %v8866_v23  ;;  %v3182_v21 = vmul.f32 %v8833_v9, %v8636_v55  ;;  %v3089_v60 = vpop.permute.xlu1 %3088  ;;  %v3267_v58 = vsel %vm1924_vm2, %v3180_v15, 0.0  ;;  %v3348_v29 = vmul.f32 %v3181_v51, %v8614_v18 }
 0x308   : > { %v3256_v41 = vadd.f32 %v3255_v12, %v3254_v48  ;;  %v3421_v59 = vadd.f32 %v3420_v47, %v3419_v20  ;;  %v3751_v34 = vpop.f32.mrf.mxu1  ;;  %v3432_v12 = vsel %vm1924_vm2, %v3346_v1, 0.0  ;;  %v3183_v47 = vmul.f32 %v8843_v61, %v8658_v5 }
 0x309   : > { %v3094_v39 = vpop.permute.xlu0 %3093  ;;  %v3434_v34 = vsel %vm1924_vm2, %v3347_v22, 0.0  ;;  %v3184_v18 = vmul.f32 %v8864_v57, %v8682_v0 }
 0x30a   : > { %v3258_v6 = vadd.f32 %v3257_v8, %v3256_v41  ;;  %v3423_v14 = vadd.f32 %v3422_v54, %v3421_v59  ;;  %v8883_v30 = vpop.f32.mrf.mxu1  ;;  %v3269_v54 = vsel %vm1924_vm2, %v3181_v51, 0.0  ;;  %v3349_v8 = vmul.f32 %v3182_v21, %v8636_v55 }
 0x30b   : > { %2814 = vst.msk [vmem:[%s8059_s20 + $0x1a0] sm:$0xff] %vm1924_vm2, %v8883_v30  ;;  %v3099_v55 = vpop.permute.xlu1 %3098 }
 0x30c   : > { %v3260_v40 = vadd.f32 %v3259_v13, %v3258_v6  ;;  %v3425_v2 = vadd.f32 %v3424_v37, %v3423_v14  ;;  %v3752_v27 = vpop.f32.mrf.mxu1  ;;  %v3436_v6 = vsel %vm1924_vm2, %v3348_v29, 0.0  ;;  %v3271_v14 = vsel %vm1924_vm2, %v3182_v21, 0.0 }
 0x30d   : > { %v3350_v37 = vmul.f32 %v3183_v47, %v8658_v5  ;;  %v3185_v13 = vmul.f32 %v8876_v24, %v8704_v38  ;;  %v3351_v27 = vmul.f32 %v3184_v18, %v8682_v0  ;;  %v3104_v5 = vpop.permute.xlu0 %3103  ;;  %v3189_v21 = vmul.f32 %v3094_v39, %v8785_v56 }
 0x30e   : > { %v3262_v28 = vadd.f32 %v3261_v42, %v3260_v40  ;;  %v3427_v31 = vadd.f32 %v3426_v7, %v3425_v2  ;;  %v8898_v26 = vpop.f32.mrf.mxu1  ;;  %v3438_v40 = vsel %vm1924_vm2, %v3349_v8, 0.0  ;;  %v3273_v2 = vsel %vm1924_vm2, %v3183_v47, 0.0 }
 0x30f   : > { %2815 = vst.msk [vmem:[%s8059_s20 + $0x1a8] sm:$0xff] %vm1924_vm2, %v8898_v26  ;;  %v3186_v7 = vmul.f32 %v3079_v49, %v8726_v16  ;;  %v3440_v15 = vsel %vm1924_vm2, %v3350_v37, 0.0  ;;  %v3442_v49 = vsel %vm1924_vm2, %v3351_v27, 0.0  ;;  %v3277_v51 = vsel %vm1924_vm2, %v3185_v13, 0.0 }
 0x310   : > { %v3264_v10 = vadd.f32 %v3263_v11, %v3262_v28  ;;  %v3429_v63 = vadd.f32 %v3428_v3, %v3427_v31  ;;  %v3755_v52 = vpop.f32.mrf.mxu1  ;;  %v3275_v28 = vsel %vm1924_vm2, %v3184_v18, 0.0  ;;  %v3352_v31 = vmul.f32 %v3185_v13, %v8704_v38 }
 0x311   : > { %v3187_v3 = vmul.f32 %v3084_v33, %v8748_v62  ;;  %v3109_v52 = vpop.permute.xlu1 %3108  ;;  %v3279_v33 = vsel %vm1924_vm2, %v3186_v7, 0.0  ;;  %v3190_v29 = vmul.f32 %v3099_v55, %v8803_v17  ;;  %v3191_v39 = vmul.f32 %v3104_v5, %v8817_v35 }
 0x312   : > { %v3266_v20 = vadd.f32 %v3265_v32, %v3264_v10  ;;  %v3431_v48 = vadd.f32 %v3430_v44, %v3429_v63  ;;  %v8913_v36 = vpop.f32.mrf.mxu1  ;;  %v3353_v10 = vmul.f32 %v3186_v7, %v8726_v16  ;;  %v3188_v63 = vmul.f32 %v3089_v60, %v8767_v50 }
 0x313   : > { %2816 = vst.msk [vmem:[%s8059_s20 + $0x1b0] sm:$0xff] %vm1924_vm2, %v8913_v36  ;;  %v3444_v38 = vsel %vm1924_vm2, %v3352_v31, 0.0  ;;  %v3354_v22 = vmul.f32 %v3187_v3, %v8748_v62  ;;  %v3281_v16 = vsel %vm1924_vm2, %v3187_v3, 0.0  ;;  %v3356_v62 = vmul.f32 %v3189_v21, %v8785_v56 }
 0x314   : > { %v3268_v9 = vadd.f32 %v3267_v58, %v3266_v20  ;;  %v3433_v41 = vadd.f32 %v3432_v12, %v3431_v48  ;;  %v3756_v59 = vpop.f32.mrf.mxu1  ;;  %v3114_v20 = vpop.permute.xlu0 %3113  ;;  %v3446_v58 = vsel %vm1924_vm2, %v3353_v10, 0.0  ;;  %v3355_v60 = vmul.f32 %v3188_v63, %v8767_v50 }
 0x315   : > { %v3283_v59 = vsel %vm1924_vm2, %v3188_v63, 0.0  ;;  %v3357_v50 = vmul.f32 %v3190_v29, %v8803_v17  ;;  %v3452_v13 = vsel %vm1924_vm2, %v3356_v62, 0.0  ;;  %v3287_v56 = vsel %vm1924_vm2, %v3190_v29, 0.0 }
 0x316   : > { %v3270_v46 = vadd.f32 %v3269_v54, %v3268_v9  ;;  %v3435_v45 = vadd.f32 %v3434_v34, %v3433_v41  ;;  %v8928_v61 = vpop.f32.mrf.mxu1  ;;  %v3448_v41 = vsel %vm1924_vm2, %v3354_v22, 0.0  ;;  %v3119_v34 = vpop.permute.xlu1 %3118  ;;  %v3450_v18 = vsel %vm1924_vm2, %v3355_v60, 0.0 }
 0x317   : > { %2817 = vst.msk [vmem:[%s8059_s20 + $0x1b8] sm:$0xff] %vm1924_vm2, %v8928_v61  ;;  %v3358_v55 = vmul.f32 %v3191_v39, %v8817_v35  ;;  %v3194_v27 = vmul.f32 %v3119_v34, %v8866_v23 }
 0x318   : > { %v3272_v53 = vadd.f32 %v3271_v14, %v3270_v46  ;;  %v3437_v57 = vadd.f32 %v3436_v6, %v3435_v45  ;;  %v3759_v25 = vpop.f32.mrf.mxu1  ;;  %v3285_v46 = vsel %vm1924_vm2, %v3189_v21, 0.0  ;;  %v3192_v45 = vmul.f32 %v3109_v52, %v8831_v4  ;;  %v3124_v6 = vpop.permute.xlu0 %3123 }
 0x319   : > { %v3295_v52 = vsel %vm1924_vm2, %v3194_v27, 0.0 }
 0x31a   : > { %v3439_v42 = vadd.f32 %v3438_v40, %v3437_v57  ;;  %v3274_v43 = vadd.f32 %v3273_v2, %v3272_v53  ;;  %v8942_v24 = vpop.f32.mrf.mxu1  ;;  %v3193_v53 = vmul.f32 %v3114_v20, %v8849_v19  ;;  %v3454_v40 = vsel %vm1924_vm2, %v3357_v50, 0.0  ;;  %v3129_v7 = vpop.permute.xlu1 %3128 }
 0x31b   : > { %2818 = vst.msk [vmem:[%s8059_s20 + $0x1c0] sm:$0xff] %vm1924_vm2, %v8942_v24  ;;  %v3289_v2 = vsel %vm1924_vm2, %v3191_v39, 0.0  ;;  %v3359_v17 = vmul.f32 %v3192_v45, %v8831_v4  ;;  %s3576_s20 = sshll.u32 %s10008_s16, 1 }
 0x31c   : > { %v3276_v11 = vadd.f32 %v3275_v28, %v3274_v43  ;;  %v3441_v0 = vadd.f32 %v3440_v15, %v3439_v42  ;;  %v3760_v1 = vpop.f32.mrf.mxu1  ;;  %v3456_v43 = vsel %vm1924_vm2, %v3358_v55, 0.0  ;;  %v3291_v15 = vsel %vm1924_vm2, %v3192_v45, 0.0  ;;  %v3134_v31 = vpop.permute.xlu0 %3133  ;;  %s208_s10 = scalar_lea.vmem %s9020_s4, %s3576_s20 }
 0x31d   : > { %v3360_v35 = vmul.f32 %v3193_v53, %v8849_v19  ;;  %v3195_v28 = vmul.f32 %v3124_v6, %v8883_v30  ;;  %v3293_v4 = vsel %vm1924_vm2, %v3193_v53, 0.0  ;;  %v3361_v1 = vmul.f32 %v3194_v27, %v8866_v23 }
 0x31e   : > { %v3278_v44 = vadd.f32 %v3277_v51, %v3276_v11  ;;  %v3443_v32 = vadd.f32 %v3442_v49, %v3441_v0  ;;  %v3458_v0 = vsel %vm1924_vm2, %v3359_v17, 0.0  ;;  %v3196_v49 = vmul.f32 %v3129_v7, %v8898_v26 }
 0x31f   : > { %v3460_v63 = vsel %vm1924_vm2, %v3360_v35, 0.0  ;;  %v3362_v19 = vmul.f32 %v3195_v28, %v8883_v30  ;;  %v3462_v22 = vsel %vm1924_vm2, %v3361_v1, 0.0  ;;  %v3297_v21 = vsel %vm1924_vm2, %v3195_v28, 0.0 }
 0x320   : > { %v3280_v48 = vadd.f32 %v3279_v33, %v3278_v44  ;;  %v3445_v12 = vadd.f32 %v3444_v38, %v3443_v32  ;;  %v3197_v44 = vmul.f32 %v3134_v31, %v8913_v36  ;;  %v3139_v32 = vpop.permute.xlu1 %3138  ;;  %v3363_v23 = vmul.f32 %v3196_v49, %v8898_v26 }
 0x321   : > { %v3198_v20 = vmul.f32 %v3139_v32, %v8928_v61  ;;  %v3299_v30 = vsel %vm1924_vm2, %v3196_v49, 0.0 }
 0x322   : > { %v3282_v47 = vadd.f32 %v3281_v16, %v3280_v48  ;;  %v3447_v9 = vadd.f32 %v3446_v58, %v3445_v12  ;;  %v3144_v48 = vpop.permute.xlu0 %3143  ;;  %v3464_v16 = vsel %vm1924_vm2, %v3362_v19, 0.0  ;;  %v3364_v60 = vmul.f32 %v3197_v44, %v8913_v36 }
 0x323   : > { %v3199_v29 = vmul.f32 %v3144_v48, %v8942_v24  ;;  %v3365_v26 = vmul.f32 %v3198_v20, %v8928_v61 }
 0x324   : > { %v3284_v54 = vadd.f32 %v3283_v59, %v3282_v47  ;;  %v3449_v8 = vadd.f32 %v3448_v41, %v3447_v9  ;;  %v3466_v41 = vsel %vm1924_vm2, %v3363_v23, 0.0  ;;  %v3301_v59 = vsel %vm1924_vm2, %v3197_v44, 0.0 }
 0x325   : > { %v3468_v34 = vsel %vm1924_vm2, %v3364_v60, 0.0  ;;  %v3305_v50 = vsel %vm1924_vm2, %v3199_v29, 0.0 }
 0x326   : > { %v3286_v14 = vadd.f32 %v3285_v46, %v3284_v54  ;;  %v3451_v37 = vadd.f32 %v3450_v18, %v3449_v8  ;;  %v3303_v54 = vsel %vm1924_vm2, %v3198_v20, 0.0  ;;  %v3366_v8 = vmul.f32 %v3199_v29, %v8942_v24 }
 0x327   : > { %v3470_v46 = vsel %vm1924_vm2, %v3365_v26, 0.0 }
 0x328   : > { %v3288_v57 = vadd.f32 %v3287_v56, %v3286_v14  ;;  %v3453_v25 = vadd.f32 %v3452_v13, %v3451_v37  ;;  %v3472_v14 = vsel %vm1924_vm2, %v3366_v8, 0.0 }
 0x32a   : > { %v3290_v5 = vadd.f32 %v3289_v2, %v3288_v57  ;;  %v3455_v42 = vadd.f32 %v3454_v40, %v3453_v25 }
 0x32c   : > { %v3292_v3 = vadd.f32 %v3291_v15, %v3290_v5  ;;  %v3457_v11 = vadd.f32 %v3456_v43, %v3455_v42 }
 0x32e   : > { %v3294_v51 = vadd.f32 %v3293_v4, %v3292_v3  ;;  %v3459_v10 = vadd.f32 %v3458_v0, %v3457_v11 }
 0x330   : > { %v3461_v38 = vadd.f32 %v3460_v63, %v3459_v10  ;;  %v3296_v33 = vadd.f32 %v3295_v52, %v3294_v51 }
 0x332   : > { %v3463_v12 = vadd.f32 %v3462_v22, %v3461_v38  ;;  %v3298_v58 = vadd.f32 %v3297_v21, %v3296_v33 }
 0x334   : > { %v3465_v47 = vadd.f32 %v3464_v16, %v3463_v12  ;;  %v3300_v9 = vadd.f32 %v3299_v30, %v3298_v58 }
 0x336   : > { %v3467_v62 = vadd.f32 %v3466_v41, %v3465_v47  ;;  %v3302_v39 = vadd.f32 %v3301_v59, %v3300_v9 }
 0x338   : > { %v3469_v18 = vadd.f32 %v3468_v34, %v3467_v62  ;;  %v3304_v36 = vadd.f32 %v3303_v54, %v3302_v39 }
 0x33a   : > { %v3471_v45 = vadd.f32 %v3470_v46, %v3469_v18  ;;  %v3306_v6 = vadd.f32 %v3305_v50, %v3304_v36 }
 0x33c   : > { %v3307_v61 = vrot.slane %v3306_v6, 4  ;;  %v3473_v37 = vadd.f32 %v3472_v14, %v3471_v45 }
 0x33e   : > { %v3308_v13 = vadd.f32 %v3307_v61, %v3306_v6  ;;  %v3474_v56 = vrot.slane %v3473_v37, 4 }
 0x340   : > { %v3309_v55 = vrot.slane %v3308_v13, 2  ;;  %v3475_v53 = vadd.f32 %v3474_v56, %v3473_v37 }
 0x342   : > { %v3310_v57 = vadd.f32 %v3309_v55, %v3308_v13  ;;  %v3476_v25 = vrot.slane %v3475_v53, 2 }
 0x344   : > { %v3311_v24 = vrot.slane %v3310_v57, 1  ;;  %v3477_v40 = vadd.f32 %v3476_v25, %v3475_v53 }
 0x346   : > { %v3478_v2 = vrot.slane %v3477_v40, 1  ;;  %v3312_v17 = vadd.f32 %v3311_v24, %v3310_v57 }
 0x348   : > { %v3479_v27 = vadd.f32 %v3478_v2, %v3477_v40 }
 0x34a   : > { %v3480_v7 = vsel %vm330_vm1, %v3312_v17, %v3479_v27 }
 0x34b   : > { %3482 = vst.msk [vmem:[%s208_s10] sm:$0x3] %vm3481_vm13, %v3480_v7 }
 0x34c PF: > { %s15_s15 = sadd.s32 1, %s4936_s15  }
 0x34d   : > { %p12_p4 = scmp.ge.s32.totalorder %s15_s15, 4  }
 0x34f   :  { %14 = sbr.rel (!%p12_p4) target bundleno = 1 (0x1), region = 74 }

// kernel: residual_block.4
= control target key start
LH: loop header
LB: loop body
LE: loop exit
PB: predicated region body
PF: predicated region fallthrough
CT: control target
= control target key end

     0   :  { %s5277_s21 = smov 0   ;;  %s9179_s0 = inlined_call_operand.vmem [shape: f32[2,480,8], index: 0, kind: input, shape index: {}]   ;;  %s9180_s1 = inlined_call_operand.vmem [shape: f32[480,1], index: 1, kind: input, shape index: {}]   ;;  %s9181_s2 = inlined_call_operand.vmem [shape: bf16[72,8], index: 2, kind: input, shape index: {}]   ;;  %s9182_s3 = inlined_call_operand.vmem [shape: f32[1,8], index: 3, kind: input, shape index: {}]   ;;  %s9183_s4 = inlined_call_operand.vmem [shape: f32[1,8], index: 4, kind: input, shape index: {}]   ;;  %s9184_s5 = inlined_call_operand.vmem [shape: f32[2,432,8], index: 5, kind: output, shape index: {0}]   ;;  %s9185_s6 = inlined_call_operand.vmem [shape: f32[2,2,8], index: 6, kind: output, shape index: {1}]  }
   0x1 LB: > { %s3907_s22 = sadd.s32 4294967295, %s5229_s21   ;;  %p3911_p0 = scmp.ge.s32.totalorder %s5229_s21, 1  ;;  %s5229_s21 = sphi %s5277_s21, %s17_s21  }
   0x2   : > { %p215_p1 = scmp.lt.s32.totalorder %s5229_s21, 3 }
   0x4   : > { %p216_p2 = pnand %p3911_p0, %p215_p1 }
   0x6   : > { %219 = sbr.rel (%p216_p2) target bundleno = 981 (0x3d5), region = 40 }
   0xb   : > { %v326_v0 = vld [vmem:[%s9180_s1 + $0x10] sm:$0xff]  ;;  %v324_v1 = vld [vmem:[%s9180_s1] sm:$0xff]  ;;  %v5231_v2 = vmov 0   ;;  %v327_v3 = vld [vmem:[%s9180_s1 + $0x18] sm:$0xff]  ;;  %p249_p3 = scmp.lt.s32.totalorder %s3907_s22, 1  ;;  %vm1173_vm0 = vcmask 1046528  }
   0xc   : > { %4133 = vset.pattern.permute.xlu1 %v5231_v2  ;;  %4132 = vset.pattern.permute.xlu0 %v5231_v2  ;;  %v325_v4 = vld [vmem:[%s9180_s1 + $0x8] sm:$0xff]  ;;  %v328_v6 = vld [vmem:[%s9180_s1 + $0x20] sm:$0xff]  ;;  %v331_v7 = vld [vmem:[%s9180_s1 + $0x38] sm:$0xff]  ;;  %vm998_vm1 = vcmask 1040384   ;;  %s5232_s18 = smov 8   ;;  %s5233_s25 = smov 16  }
   0xd   : > { %590 = vperm.xlu1 %4133, %v326_v0   ;;  %580 = vperm.xlu0 %4132, %v324_v1   ;;  %v329_v5 = vld [vmem:[%s9180_s1 + $0x28] sm:$0xff]  ;;  %v330_v8 = vld [vmem:[%s9180_s1 + $0x30] sm:$0xff]  ;;  %v332_v10 = vld [vmem:[%s9180_s1 + $0x40] sm:$0xff]  ;;  %s10399_s22 = smov (!%p249_p3, %s3907_s22), 1  ;;  %s5234_s26 = smov 24   ;;  %vm3177_vm2 = vcmask 1043456  }
   0xe   : > { %v333_v9 = vld [vmem:[%s9180_s1 + $0x48] sm:$0xff]  ;;  %v335_v11 = vld [vmem:[%s9180_s1 + $0x58] sm:$0xff]  ;;  %v334_v12 = vld [vmem:[%s9180_s1 + $0x50] sm:$0xff]  ;;  %s4111_s27 = smul.u32 480, %s10399_s22  ;;  %s5237_s15 = smov 40   ;;  %vm5238_vm3 = vmmov 0  }
   0xf   : > { %v337_v13 = vld [vmem:[%s9180_s1 + $0x68] sm:$0xff]  ;;  %v336_v14 = vld [vmem:[%s9180_s1 + $0x60] sm:$0xff]  ;;  %v339_v15 = vld [vmem:[%s9180_s1 + $0x78] sm:$0xff]  ;;  %s5239_s16 = smov 48   ;;  %s5240_s17 = smov 56   ;;  %vm2592_vm4 = vcmask 64512  }
  0x10   : > { %v338_v16 = vld [vmem:[%s9180_s1 + $0x70] sm:$0xff]  ;;  %v341_v17 = vld [vmem:[%s9180_s1 + $0x88] sm:$0xff]  ;;  %v340_v18 = vld [vmem:[%s9180_s1 + $0x80] sm:$0xff]  ;;  %s5439_s10 = scalar_lea.vmem %s9179_s0, %s4111_s27  ;;  %s5235_s27 = smov 32   ;;  %vm2647_vm5 = vcmask 130048   ;;  %vm2702_vm6 = vcmask 195584  }
  0x11   : > { %595 = vperm.xlu1 %4133, %v327_v3   ;;  %585 = vperm.xlu0 %4132, %v325_v4   ;;  %v343_v19 = vld [vmem:[%s9180_s1 + $0x98] sm:$0xff]  ;;  %v342_v20 = vld [vmem:[%s9180_s1 + $0x90] sm:$0xff]  ;;  %v345_v21 = vld [vmem:[%s9180_s1 + $0xa8] sm:$0xff]  ;;  %vm2757_vm7 = vcmask 261120   ;;  %vm2812_vm8 = vcmask 326656   ;;  %vm2867_vm9 = vcmask 392192  }
  0x12   : > { %v344_v22 = vld [vmem:[%s9180_s1 + $0xa0] sm:$0xff]  ;;  %v347_v23 = vld [vmem:[%s9180_s1 + $0xb8] sm:$0xff]  ;;  %v346_v24 = vld [vmem:[%s9180_s1 + $0xb0] sm:$0xff]  ;;  %vm2922_vm10 = vcmask 457728   ;;  %vm2977_vm11 = vcmask 523264   ;;  %vm3095_vm12 = vcmask 588800  }
  0x13   : > { %v349_v25 = vld [vmem:[%s9180_s1 + $0xc8] sm:$0xff]  ;;  %v348_v26 = vld [vmem:[%s9180_s1 + $0xc0] sm:$0xff]  ;;  %v351_v27 = vld [vmem:[%s9180_s1 + $0xd8] sm:$0xff]  ;;  %s4112_s24 = smul.u32 432, %s10399_s22  ;;  %s3914_s28 = sshll.u32 %s10399_s22, 1  ;;  %vm3819_vm13 = vcmask 58368  }
  0x14   : > { %v350_v28 = vld [vmem:[%s9180_s1 + $0xd0] sm:$0xff]  ;;  %v353_v29 = vld [vmem:[%s9180_s1 + $0xe8] sm:$0xff]  ;;  %v352_v30 = vld [vmem:[%s9180_s1 + $0xe0] sm:$0xff]  ;;  %s262_s7 = scalar_lea.vmem %s9185_s6, %s3914_s28 }
  0x15   : > { %605 = vperm.xlu1 %4133, %v329_v5   ;;  %600 = vperm.xlu0 %4132, %v328_v6   ;;  %v355_v31 = vld [vmem:[%s9180_s1 + $0xf8] sm:$0xff]  ;;  %v354_v32 = vld [vmem:[%s9180_s1 + $0xf0] sm:$0xff]  ;;  %v357_v33 = vld [vmem:[%s9180_s1 + $0x108] sm:$0xff] }
  0x16   : > { %v356_v34 = vld [vmem:[%s9180_s1 + $0x100] sm:$0xff]  ;;  %v359_v35 = vld [vmem:[%s9180_s1 + $0x118] sm:$0xff]  ;;  %v358_v36 = vld [vmem:[%s9180_s1 + $0x110] sm:$0xff] }
  0x17   : > { %v361_v37 = vld [vmem:[%s9180_s1 + $0x128] sm:$0xff]  ;;  %v360_v38 = vld [vmem:[%s9180_s1 + $0x120] sm:$0xff]  ;;  %v363_v39 = vld [vmem:[%s9180_s1 + $0x138] sm:$0xff] }
  0x18   : > { %v362_v40 = vld [vmem:[%s9180_s1 + $0x130] sm:$0xff]  ;;  %v365_v41 = vld [vmem:[%s9180_s1 + $0x148] sm:$0xff]  ;;  %v364_v42 = vld [vmem:[%s9180_s1 + $0x140] sm:$0xff] }
  0x19   : > { %615 = vperm.xlu1 %4133, %v331_v7   ;;  %610 = vperm.xlu0 %4132, %v330_v8   ;;  %v367_v43 = vld [vmem:[%s9180_s1 + $0x158] sm:$0xff]  ;;  %v366_v44 = vld [vmem:[%s9180_s1 + $0x150] sm:$0xff]  ;;  %v369_v45 = vld [vmem:[%s9180_s1 + $0x168] sm:$0xff] }
  0x1a   : > { %v368_v46 = vld [vmem:[%s9180_s1 + $0x160] sm:$0xff]  ;;  %v371_v47 = vld [vmem:[%s9180_s1 + $0x178] sm:$0xff]  ;;  %v370_v48 = vld [vmem:[%s9180_s1 + $0x170] sm:$0xff] }
  0x1b   : > { %v373_v49 = vld [vmem:[%s9180_s1 + $0x188] sm:$0xff]  ;;  %v372_v50 = vld [vmem:[%s9180_s1 + $0x180] sm:$0xff]  ;;  %v266_v52 = vld [vmem:[%s5439_s10 + $0x10] sm:$0xff] }
  0x1c   : > { %v5450_v51 = vld [vmem:[%s9182_s3] ss:$0 sm:$0xff]  ;;  %v267_v54 = vld [vmem:[%s5439_s10 + $0x18] sm:$0xff]  ;;  %v265_v55 = vld [vmem:[%s5439_s10 + $0x8] sm:$0xff] }
  0x1d   : > { %625 = vperm.xlu1 %4133, %v333_v9   ;;  %620 = vperm.xlu0 %4132, %v332_v10   ;;  %v264_v53 = vld [vmem:[%s5439_s10] sm:$0xff]  ;;  %v375_v56 = vld [vmem:[%s9180_s1 + $0x198] sm:$0xff]  ;;  %v374_v57 = vld [vmem:[%s9180_s1 + $0x190] sm:$0xff]  ;;  %v393_v58 = vmul.f32 %v5450_v51, %v266_v52  ;;  %v394_v62 = vmul.f32 %v5450_v51, %v267_v54  ;;  %v392_v1 = vmul.f32 %v5450_v51, %v265_v55 }
  0x1e   : > { %v269_v59 = vld [vmem:[%s5439_s10 + $0x28] sm:$0xff]  ;;  %v5467_v60 = vld [vmem:[%s9183_s4] ss:$0 sm:$0xff]  ;;  %v391_v61 = vmul.f32 %v5450_v51, %v264_v53  ;;  %v271_v0 = vld [vmem:[%s5439_s10 + $0x38] sm:$0xff] }
  0x1f   : > { %v268_v63 = vld [vmem:[%s5439_s10 + $0x20] sm:$0xff]  ;;  %v396_v2 = vmul.f32 %v5450_v51, %v269_v59  ;;  %v5476_v3 = vadd.f32 %v5467_v60, %v393_v58  ;;  %v398_v5 = vmul.f32 %v5450_v51, %v271_v0  ;;  %v270_v6 = vld [vmem:[%s5439_s10 + $0x30] sm:$0xff]  ;;  %v377_v7 = vld [vmem:[%s9180_s1 + $0x1a8] sm:$0xff]  ;;  %v5491_v10 = vadd.f32 %v5467_v60, %v394_v62 }
  0x20   : > { %v395_v4 = vmul.f32 %v5450_v51, %v268_v63  ;;  %v376_v8 = vld [vmem:[%s9180_s1 + $0x1a0] sm:$0xff]  ;;  %v5488_v9 = vadd.f32 %v5467_v60, %v391_v61 }
  0x21   : > { %635 = vperm.xlu1 %4133, %v335_v11   ;;  %630 = vperm.xlu0 %4132, %v334_v12   ;;  %v273_v11 = vld [vmem:[%s5439_s10 + $0x48] sm:$0xff]  ;;  %v5495_v12 = vadd.f32 %v5467_v60, %v392_v1 }
  0x25   : > { %645 = vperm.xlu1 %4133, %v337_v13   ;;  %640 = vperm.xlu0 %4132, %v336_v14   ;;  %v272_v13 = vld [vmem:[%s5439_s10 + $0x40] sm:$0xff]  ;;  %v275_v14 = vld [vmem:[%s5439_s10 + $0x58] sm:$0xff] }
  0x29   : > { %655 = vperm.xlu1 %4133, %v339_v15   ;;  %650 = vperm.xlu0 %4132, %v338_v16   ;;  %v5500_v15 = vadd.f32 %v5467_v60, %v396_v2  ;;  %v397_v16 = vmul.f32 %v5450_v51, %v270_v6  ;;  %v383_v2 = vld [vmem:[%s9180_s1 + $0x1d8] sm:$0xff] }
  0x2d   : > { %665 = vperm.xlu1 %4133, %v341_v17   ;;  %660 = vperm.xlu0 %4132, %v340_v18   ;;  %v274_v17 = vld [vmem:[%s5439_s10 + $0x50] sm:$0xff]  ;;  %v277_v18 = vld [vmem:[%s5439_s10 + $0x68] sm:$0xff] }
  0x31   : > { %675 = vperm.xlu1 %4133, %v343_v19   ;;  %670 = vperm.xlu0 %4132, %v342_v20   ;;  %v276_v19 = vld [vmem:[%s5439_s10 + $0x60] sm:$0xff]  ;;  %v520_v20 = vmax.f32 %v5476_v3, 0.0 }
  0x35   : > { %685 = vperm.xlu1 %4133, %v345_v21   ;;  %680 = vperm.xlu0 %4132, %v344_v22   ;;  %v5508_v21 = vadd.f32 %v5467_v60, %v395_v4  ;;  %v5511_v22 = vadd.f32 %v5467_v60, %v398_v5  ;;  %v382_v4 = vld [vmem:[%s9180_s1 + $0x1d0] sm:$0xff] }
  0x39   : > { %695 = vperm.xlu1 %4133, %v347_v23   ;;  %690 = vperm.xlu0 %4132, %v346_v24   ;;  %v400_v23 = vmul.f32 %v5450_v51, %v273_v11  ;;  %v279_v24 = vld [vmem:[%s5439_s10 + $0x78] sm:$0xff] }
  0x3d   : > { %705 = vperm.xlu1 %4133, %v349_v25   ;;  %700 = vperm.xlu0 %4132, %v348_v26   ;;  %v278_v25 = vld [vmem:[%s5439_s10 + $0x70] sm:$0xff]  ;;  %v281_v26 = vld [vmem:[%s5439_s10 + $0x88] sm:$0xff] }
  0x41   : > { %715 = vperm.xlu1 %4133, %v351_v27   ;;  %710 = vperm.xlu0 %4132, %v350_v28   ;;  %v379_v27 = vld [vmem:[%s9180_s1 + $0x1b8] sm:$0xff]  ;;  %v378_v28 = vld [vmem:[%s9180_s1 + $0x1b0] sm:$0xff] }
  0x45   : > { %725 = vperm.xlu1 %4133, %v353_v29   ;;  %720 = vperm.xlu0 %4132, %v352_v30   ;;  %v518_v29 = vmax.f32 %v5488_v9, 0.0  ;;  %v521_v30 = vmax.f32 %v5491_v10, 0.0 }
  0x49   : > { %735 = vperm.xlu1 %4133, %v355_v31   ;;  %730 = vperm.xlu0 %4132, %v354_v32   ;;  %v399_v31 = vmul.f32 %v5450_v51, %v272_v13  ;;  %v402_v32 = vmul.f32 %v5450_v51, %v275_v14 }
  0x4b   : > { %v5554_v52 = vadd.f32 %v5467_v60, %v399_v31  ;;  %v5557_v53 = vadd.f32 %v5467_v60, %v402_v32  ;;  %v301_v32 = vld [vmem:[%s5439_s10 + $0x128] sm:$0xff]  ;;  %v300_v31 = vld [vmem:[%s5439_s10 + $0x120] sm:$0xff] }
  0x4d   : > { %745 = vperm.xlu1 %4133, %v357_v33   ;;  %740 = vperm.xlu0 %4132, %v356_v34   ;;  %v280_v33 = vld [vmem:[%s5439_s10 + $0x80] sm:$0xff]  ;;  %v519_v34 = vmax.f32 %v5495_v12, 0.0 }
  0x51   : > { %755 = vperm.xlu1 %4133, %v359_v35   ;;  %750 = vperm.xlu0 %4132, %v358_v36   ;;  %v401_v35 = vmul.f32 %v5450_v51, %v274_v17  ;;  %v404_v36 = vmul.f32 %v5450_v51, %v277_v18  ;;  %v287_v17 = vld [vmem:[%s5439_s10 + $0xb8] sm:$0xff]  ;;  %v286_v18 = vld [vmem:[%s5439_s10 + $0xb0] sm:$0xff] }
  0x53   : > { %v5564_v58 = vadd.f32 %v5467_v60, %v401_v35  ;;  %v5567_v59 = vadd.f32 %v5467_v60, %v404_v36  ;;  %v293_v36 = vld [vmem:[%s5439_s10 + $0xe8] sm:$0xff] }
  0x55   : > { %765 = vperm.xlu1 %4133, %v361_v37   ;;  %760 = vperm.xlu0 %4132, %v360_v38   ;;  %v403_v37 = vmul.f32 %v5450_v51, %v276_v19  ;;  %v283_v38 = vld [vmem:[%s5439_s10 + $0x98] sm:$0xff]  ;;  %v289_v19 = vld [vmem:[%s5439_s10 + $0xc8] sm:$0xff] }
  0x56   : > { %v410_v54 = vmul.f32 %v5450_v51, %v283_v38  ;;  %v295_v38 = vld [vmem:[%s5439_s10 + $0xf8] sm:$0xff] }
  0x57   : > { %v5570_v61 = vadd.f32 %v5467_v60, %v403_v37  ;;  %v292_v37 = vld [vmem:[%s5439_s10 + $0xe0] sm:$0xff] }
  0x58   : > { %v5597_v14 = vadd.f32 %v5467_v60, %v410_v54 }
  0x59   : > { %775 = vperm.xlu1 %4133, %v363_v39   ;;  %770 = vperm.xlu0 %4132, %v362_v40   ;;  %v282_v39 = vld [vmem:[%s5439_s10 + $0x90] sm:$0xff]  ;;  %v5535_v40 = vadd.f32 %v5467_v60, %v397_v16 }
  0x5a   : > { %v409_v55 = vmul.f32 %v5450_v51, %v282_v39  ;;  %v422_v39 = vmul.f32 %v5450_v51, %v295_v38 }
  0x5b   : > { %v524_v5 = vmax.f32 %v5535_v40, 0.0 }
  0x5c   : > { %v5600_v16 = vadd.f32 %v5467_v60, %v409_v55  ;;  %v416_v55 = vmul.f32 %v5450_v51, %v289_v19 }
  0x5d   : > { %785 = vperm.xlu1 %4133, %v365_v41   ;;  %780 = vperm.xlu0 %4132, %v364_v42   ;;  %v406_v41 = vmul.f32 %v5450_v51, %v279_v24  ;;  %v405_v42 = vmul.f32 %v5450_v51, %v278_v25 }
  0x5e   : > { %v5654_v38 = vadd.f32 %v5467_v60, %v416_v55  ;;  %v5672_v55 = vadd.f32 %v5467_v60, %v422_v39 }
  0x5f   : > { %v5573_v62 = vadd.f32 %v5467_v60, %v406_v41  ;;  %v5576_v63 = vadd.f32 %v5467_v60, %v405_v42  ;;  %v414_v42 = vmul.f32 %v5450_v51, %v287_v17  ;;  %v420_v17 = vmul.f32 %v5450_v51, %v293_v36 }
  0x61   : > { %795 = vperm.xlu1 %4133, %v367_v43   ;;  %790 = vperm.xlu0 %4132, %v366_v44   ;;  %v408_v43 = vmul.f32 %v5450_v51, %v281_v26  ;;  %v523_v44 = vmax.f32 %v5500_v15, 0.0  ;;  %v288_v26 = vld [vmem:[%s5439_s10 + $0xc0] sm:$0xff] }
  0x63   : > { %v5579_v0 = vadd.f32 %v5467_v60, %v408_v43  ;;  %v413_v43 = vmul.f32 %v5450_v51, %v286_v18  ;;  %v419_v18 = vmul.f32 %v5450_v51, %v292_v37 }
  0x65   : > { %805 = vperm.xlu1 %4133, %v369_v45   ;;  %800 = vperm.xlu0 %4132, %v368_v46   ;;  %v522_v45 = vmax.f32 %v5508_v21, 0.0  ;;  %v5543_v46 = vadd.f32 %v5467_v60, %v400_v23 }
  0x69   : > { %815 = vperm.xlu1 %4133, %v371_v47   ;;  %810 = vperm.xlu0 %4132, %v370_v48   ;;  %v407_v47 = vmul.f32 %v5450_v51, %v280_v33  ;;  %v285_v48 = vld [vmem:[%s5439_s10 + $0xa8] sm:$0xff]  ;;  %v5647_v33 = vadd.f32 %v5467_v60, %v413_v43 }
  0x6a   : > { %v412_v1 = vmul.f32 %v5450_v51, %v285_v48  ;;  %v297_v48 = vld [vmem:[%s5439_s10 + $0x108] sm:$0xff] }
  0x6b   : > { %v424_v54 = vmul.f32 %v5450_v51, %v297_v48  ;;  %v5666_v48 = vadd.f32 %v5467_v60, %v420_v17 }
  0x6c   : > { %v5615_v35 = vadd.f32 %v5467_v60, %v412_v1  ;;  %v299_v1 = vld [vmem:[%s5439_s10 + $0x118] sm:$0xff] }
  0x6d   : > { %825 = vperm.xlu1 %4133, %v373_v49   ;;  %820 = vperm.xlu0 %4132, %v372_v50   ;;  %v381_v49 = vld [vmem:[%s9180_s1 + $0x1c8] sm:$0xff]  ;;  %v380_v50 = vld [vmem:[%s9180_s1 + $0x1c0] sm:$0xff] }
  0x71   : > { %835 = vperm.xlu1 %4133, %v375_v56   ;;  %830 = vperm.xlu0 %4132, %v374_v57   ;;  %v284_v56 = vld [vmem:[%s5439_s10 + $0xa0] sm:$0xff]  ;;  %v525_v57 = vmax.f32 %v5511_v22, 0.0  ;;  %v9535_v22 = vmax.f32 %v5543_v46, 0.0 }
  0x75   : > { %845 = vperm.xlu1 %4133, %v377_v7   ;;  %840 = vperm.xlu0 %4132, %v376_v8   ;;  %v5591_v7 = vadd.f32 %v5467_v60, %v407_v47  ;;  %v411_v8 = vmul.f32 %v5450_v51, %v284_v56  ;;  %v294_v47 = vld [vmem:[%s5439_s10 + $0xf0] sm:$0xff]  ;;  %v415_v56 = vmul.f32 %v5450_v51, %v288_v26 }
  0x76   : > { %v5644_v26 = vadd.f32 %v5467_v60, %v414_v42 }
  0x77   : > { %v5622_v41 = vadd.f32 %v5467_v60, %v411_v8 }
  0x79   : > { %855 = vperm.xlu1 %4133, %v379_v27   ;;  %850 = vperm.xlu0 %4132, %v378_v28   ;;  %v291_v27 = vld [vmem:[%s5439_s10 + $0xd8] sm:$0xff]  ;;  %v290_v28 = vld [vmem:[%s5439_s10 + $0xd0] sm:$0xff] }
  0x7a   : > { %v417_v8 = vmul.f32 %v5450_v51, %v290_v28 }
  0x7c   : > { %v5663_v43 = vadd.f32 %v5467_v60, %v417_v8 }
  0x7d   : > { %865 = vperm.xlu1 %4133, %v381_v49   ;;  %860 = vperm.xlu0 %4132, %v380_v50   ;;  %v296_v49 = vld [vmem:[%s5439_s10 + $0x100] sm:$0xff]  ;;  %v421_v50 = vmul.f32 %v5450_v51, %v294_v47  ;;  %v5657_v47 = vadd.f32 %v5467_v60, %v415_v56 }
  0x7e   : > { %v423_v19 = vmul.f32 %v5450_v51, %v296_v49  ;;  %v5669_v49 = vadd.f32 %v5467_v60, %v419_v18 }
  0x7f   : > { %v5675_v56 = vadd.f32 %v5467_v60, %v421_v50 }
  0x80   : > { %v5681_v8 = vadd.f32 %v5467_v60, %v423_v19 }
  0x81   : > { %875 = vperm.xlu1 %4133, %v383_v2   ;;  %870 = vperm.xlu0 %4132, %v382_v4   ;;  %v298_v2 = vld [vmem:[%s5439_s10 + $0x110] sm:$0xff]  ;;  %v418_v4 = vmul.f32 %v5450_v51, %v291_v27  ;;  %v426_v27 = vmul.f32 %v5450_v51, %v299_v1 }
  0x82   : > { %v425_v28 = vmul.f32 %v5450_v51, %v298_v2 }
  0x83   : > { %v5660_v42 = vadd.f32 %v5467_v60, %v418_v4  ;;  %v5678_v4 = vadd.f32 %v5467_v60, %v424_v54  ;;  %v5686_v37 = vadd.f32 %v5467_v60, %v426_v27 }
  0x84   : > { %v5689_v39 = vadd.f32 %v5467_v60, %v425_v28 }
  0x88   : > { %v591_v1 = vpop.permute.xlu1 %590  ;;  %v581_v2 = vpop.permute.xlu0 %580 }
  0x89   : > { %v880_v50 = vmul.f32 %v591_v1, %v520_v20  ;;  %v5695_v54 = vmul.f32 %v581_v2, %v518_v29  ;;  %v428_v29 = vmul.f32 %v5450_v51, %v301_v32  ;;  %v427_v1 = vmul.f32 %v5450_v51, %v300_v31 }
  0x8b   : > { %9515 = vst [vmem:[#allocation2_spill] sm:$0xff] %v5695_v54  ;;  %v1177_v36 = vrot.slane %v880_v50, 1  ;;  %v1174_v9 = vrot.slane %v5695_v54, 1  ;;  %v1002_v25 = vrot.slane %v880_v50, 7  ;;  %v9187_v12 = vrot.slane %v5695_v54, 7 }
  0x8c   : > { %v5705_v3 = vpop.permute.xlu1 %595  ;;  %v586_v20 = vpop.permute.xlu0 %585 }
  0x8d   : > { %9516 = vst [vmem:[#allocation3_spill] sm:$0xff] %v5705_v3  ;;  %v5714_v18 = vmul.f32 %v5705_v3, %v521_v30  ;;  %v879_v28 = vmul.f32 %v586_v20, %v519_v34 }
  0x8f   : > { %9517 = vst [vmem:[#allocation4_spill] sm:$0xff] %v5714_v18  ;;  %v1004_v2 = vrot.slane %v5714_v18, 7  ;;  %v1000_v10 = vrot.slane %v879_v28, 7  ;;  %v1175_v19 = vrot.slane %v879_v28, 1  ;;  %v4139_v30 = vpack.i.bf16 %v5714_v18, %v880_v50 }
  0x90   : > { %v5726_v34 = vpop.permute.xlu1 %605  ;;  %v5728_v20 = vpop.permute.xlu0 %600  ;;  %v4134_v17 = vpack.i.bf16 %v879_v28, %v5695_v54  ;;  %v1179_v27 = vrot.slane %v5714_v18, 1 }
  0x91   : > { %9518 = vst [vmem:[#allocation5_spill] sm:$0xff] %v5726_v34  ;;  %9519 = vst [vmem:[#allocation6_spill] sm:$0xff] %v5728_v20  ;;  %v5735_v31 = vmul.f32 %v5726_v34, %v523_v44  ;;  %v5740_v32 = vmul.f32 %v5728_v20, %v522_v45  ;;  %4140 = vrot.lane.b32.xlu1 %v4139_v30, %s5232_s18  ;;  %v5744_v50 = vsel %vm1173_vm0, %v1174_v9, %v1175_v19 }
  0x92   : > { %v5747_v28 = vsel %vm1173_vm0, %v1175_v19, %v1177_v36  ;;  %4135 = vrot.lane.b32.xlu0 %v4134_v17, %s5232_s18  ;;  %v5753_v44 = vsel %vm1173_vm0, %v1177_v36, %v1179_v27  ;;  %v5756_v21 = vsel %vm998_vm1, %v1000_v10, %v1002_v25  ;;  %v5759_v45 = vsel %vm998_vm1, %v1002_v25, %v1004_v2 }
  0x93   : > { %9520 = vst [vmem:[#allocation7_spill] sm:$0xff] %v5735_v31  ;;  %9521 = vst [vmem:[#allocation8_spill] sm:$0xff] %v5740_v32  ;;  %v1008_v9 = vrot.slane %v5735_v31, 7  ;;  %v1006_v30 = vrot.slane %v5740_v32, 7  ;;  %v4144_v19 = vpack.i.bf16 %v5735_v31, %v5740_v32  ;;  %v1181_v17 = vrot.slane %v5740_v32, 1 }
  0x94   : > { %9522 = vst [vmem:[#allocation9_spill] sm:$0xff] %v5756_v21  ;;  %9523 = vst [vmem:[#allocation10_spill] sm:$0xff] %v5759_v45  ;;  %v5766_v24 = vpop.permute.xlu1 %615  ;;  %v5768_v15 = vpop.permute.xlu0 %610  ;;  %v5771_v36 = vadd.f32 %v5467_v60, %v428_v29  ;;  %v1183_v23 = vrot.slane %v5735_v31, 1  ;;  %v5777_v25 = vsel %vm998_vm1, %v9187_v12, %v1000_v10  ;;  %v5799_v10 = vadd.f32 %v5467_v60, %v427_v1  ;;  %v308_v45 = vld [vmem:[%s5439_s10 + $0x160] sm:$0xff] }
  0x95   : > { %9524 = vst [vmem:[#allocation11_spill] sm:$0xff] %v5766_v24  ;;  %9525 = vst [vmem:[#allocation12_spill] sm:$0xff] %v5768_v15  ;;  %v5784_v11 = vmul.f32 %v5766_v24, %v525_v57  ;;  %v5789_v29 = vmul.f32 %v5768_v15, %v524_v5  ;;  %v5792_v6 = vsel %vm1173_vm0, %v1179_v27, %v1181_v17  ;;  %v9537_v15 = vmax.f32 %v5554_v52, 0.0 }
  0x96   : > { %9526 = vst [vmem:[#allocation13_spill] sm:$0xff] %v5777_v25  ;;  %9529 = vst [vmem:[#allocation16_spill] sm:$0xff] %v5792_v6  ;;  %v5795_v34 = vsel %vm998_vm1, %v1004_v2, %v1006_v30  ;;  %4145 = vrot.lane.b32.xlu0 %v4144_v19, %s5232_s18  ;;  %v5804_v57 = vsel %vm1173_vm0, %v1181_v17, %v1183_v23  ;;  %v5807_v40 = vsel %vm998_vm1, %v1006_v30, %v1008_v9 }
  0x97   : > { %9527 = vst [vmem:[#allocation14_spill] sm:$0xff] %v5784_v11  ;;  %9528 = vst [vmem:[#allocation15_spill] sm:$0xff] %v5789_v29  ;;  %v5811_v5 = vpack.i.bf16 %v5784_v11, %v5789_v29  ;;  %v1185_v27 = vrot.slane %v5789_v29, 1  ;;  %v1187_v2 = vrot.slane %v5784_v11, 1  ;;  %v1010_v17 = vrot.slane %v5789_v29, 7 }
  0x98   : > { %9530 = vst [vmem:[#allocation17_spill] sm:$0xff] %v5795_v34  ;;  %9531 = vst [vmem:[#allocation18_spill] sm:$0xff] %v5807_v40  ;;  %v5817_v19 = vpop.permute.xlu1 %625  ;;  %v5819_v12 = vpop.permute.xlu0 %620  ;;  %v1012_v30 = vrot.slane %v5784_v11, 7  ;;  %v9546_v21 = vmax.f32 %v5557_v53, 0.0  ;;  %v9560_v32 = vmax.f32 %v5570_v61, 0.0 }
  0x99   : > { %9532 = vst [vmem:[#allocation19_spill] sm:$0xff] %v5811_v5  ;;  %9533 = vst [vmem:[#allocation20_spill] sm:$0xff] %v5817_v19  ;;  %v5828_v24 = vmul.f32 %v5817_v19, %v9535_v22  ;;  %v5833_v1 = vmul.f32 %v5819_v12, %v9537_v15  ;;  %4150 = vrot.lane.b32.xlu1 %v5811_v5, %s5232_s18  ;;  %v5838_v20 = vsel %vm1173_vm0, %v1183_v23, %v1185_v27 }
  0x9a   : > { %9534 = vst [vmem:[#allocation21_spill] sm:$0xff] %v5819_v12  ;;  %9539 = vst [vmem:[#allocation24_spill] sm:$0xff] %v5838_v20  ;;  %v5841_v3 = vsel %vm1173_vm0, %v1185_v27, %v1187_v2  ;;  %v5848_v52 = vsel %vm998_vm1, %v1008_v9, %v1010_v17  ;;  %v5851_v15 = vsel %vm998_vm1, %v1010_v17, %v1012_v30  ;;  %v9548_v5 = vmax.f32 %v5564_v58, 0.0  ;;  %v303_v9 = vld [vmem:[%s5439_s10 + $0x138] sm:$0xff]  ;;  %v302_v12 = vld [vmem:[%s5439_s10 + $0x130] sm:$0xff] }
  0x9b   : > { %9536 = vst [vmem:[#allocation22_spill] sm:$0xff] %v5828_v24  ;;  %9538 = vst [vmem:[#allocation23_spill] sm:$0xff] %v5833_v1  ;;  %v5855_v23 = vpack.i.bf16 %v5828_v24, %v5833_v1  ;;  %v1189_v27 = vrot.slane %v5833_v1, 1  ;;  %v1191_v13 = vrot.slane %v5828_v24, 1  ;;  %v1014_v46 = vrot.slane %v5833_v1, 7 }
  0x9c   : > { %9540 = vst [vmem:[#allocation25_spill] sm:$0xff] %v5841_v3  ;;  %9541 = vst [vmem:[#allocation26_spill] sm:$0xff] %v5848_v52  ;;  %v5860_v19 = vpop.permute.xlu1 %635  ;;  %v5862_v22 = vpop.permute.xlu0 %630  ;;  %v1016_v17 = vrot.slane %v5828_v24, 7  ;;  %v9558_v1 = vmax.f32 %v5567_v59, 0.0  ;;  %v9570_v24 = vmax.f32 %v5573_v62, 0.0 }
  0x9d   : > { %9542 = vst [vmem:[#allocation27_spill] sm:$0xff] %v5851_v15  ;;  %9543 = vst [vmem:[#allocation28_spill] sm:$0xff] %v5855_v23  ;;  %v5872_v54 = vmul.f32 %v5860_v19, %v9546_v21  ;;  %v5877_v31 = vmul.f32 %v5862_v22, %v9548_v5  ;;  %4155 = vrot.lane.b32.xlu0 %v5855_v23, %s5232_s18  ;;  %v5884_v29 = vsel %vm1173_vm0, %v1187_v2, %v1189_v27 }
  0x9e   : > { %9544 = vst [vmem:[#allocation29_spill] sm:$0xff] %v5860_v19  ;;  %9545 = vst [vmem:[#allocation30_spill] sm:$0xff] %v5862_v22  ;;  %v5887_v25 = vsel %vm1173_vm0, %v1189_v27, %v1191_v13  ;;  %v5891_v53 = vpack.i.bf16 %v5884_v29, %v5841_v3  ;;  %v5894_v58 = vsel %vm998_vm1, %v1012_v30, %v1014_v46 }
  0x9f   : > { %9547 = vst [vmem:[#allocation31_spill] sm:$0xff] %v5872_v54  ;;  %9549 = vst [vmem:[#allocation32_spill] sm:$0xff] %v5877_v31  ;;  %v5897_v21 = vsel %vm998_vm1, %v1014_v46, %v1016_v17  ;;  %v5901_v5 = vpack.i.bf16 %v5872_v54, %v5877_v31  ;;  %v1193_v2 = vrot.slane %v5877_v31, 1  ;;  %v1195_v19 = vrot.slane %v5872_v54, 1 }
  0xa0   : > { %9550 = vst [vmem:[#allocation33_spill] sm:$0xff] %v5884_v29  ;;  %9551 = vst [vmem:[#allocation34_spill] sm:$0xff] %v5887_v25  ;;  %v1018_v27 = vrot.slane %v5877_v31, 7  ;;  %v5906_v22 = vpop.permute.xlu1 %645  ;;  %v5908_v23 = vpop.permute.xlu0 %640  ;;  %v430_v30 = vmul.f32 %v5450_v51, %v303_v9  ;;  %v429_v3 = vmul.f32 %v5450_v51, %v302_v12  ;;  %v1020_v46 = vrot.slane %v5872_v54, 7 }
  0xa1   : > { %9552 = vst [vmem:[#allocation35_spill] sm:$0xff] %v5891_v53  ;;  %9553 = vst [vmem:[#allocation36_spill] sm:$0xff] %v5894_v58  ;;  %v5918_v18 = vmul.f32 %v5906_v22, %v9558_v1  ;;  %4160 = vrot.lane.b32.xlu1 %v5901_v5, %s5232_s18  ;;  %v5928_v12 = vsel %vm1173_vm0, %v1191_v13, %v1193_v2  ;;  %v5931_v9 = vsel %vm1173_vm0, %v1193_v2, %v1195_v19 }
  0xa2   : > { %9554 = vst [vmem:[#allocation37_spill] sm:$0xff] %v5897_v21  ;;  %9555 = vst [vmem:[#allocation38_spill] sm:$0xff] %v5901_v5  ;;  %v5923_v21 = vmul.f32 %v5908_v23, %v9560_v32  ;;  %v5935_v59 = vpack.i.bf16 %v5928_v12, %v5887_v25  ;;  %v5938_v1 = vsel %vm998_vm1, %v1016_v17, %v1018_v27  ;;  %v9582_v25 = vmax.f32 %v5579_v0, 0.0 }
  0xa3   : > { %9556 = vst [vmem:[#allocation39_spill] sm:$0xff] %v5906_v22  ;;  %9557 = vst [vmem:[#allocation40_spill] sm:$0xff] %v5908_v23  ;;  %v5941_v61 = vsel %vm998_vm1, %v1018_v27, %v1020_v46  ;;  %v1199_v11 = vrot.slane %v5918_v18, 1  ;;  %v5955_v17 = vadd.f32 %v5467_v60, %v430_v30  ;;  %v1024_v27 = vrot.slane %v5918_v18, 7 }
  0xa4   : > { %9559 = vst [vmem:[#allocation41_spill] sm:$0xff] %v5918_v18  ;;  %9561 = vst [vmem:[#allocation42_spill] sm:$0xff] %v5923_v21  ;;  %v5945_v32 = vpack.i.bf16 %v5918_v18, %v5923_v21  ;;  %v1197_v13 = vrot.slane %v5923_v21, 1  ;;  %v1022_v2 = vrot.slane %v5923_v21, 7  ;;  %v5950_v22 = vpop.permute.xlu1 %655  ;;  %v5952_v23 = vpop.permute.xlu0 %650  ;;  %v9584_v21 = vmax.f32 %v5591_v7, 0.0 }
  0xa5   : > { %9562 = vst [vmem:[#allocation43_spill] sm:$0xff] %v5928_v12  ;;  %9563 = vst [vmem:[#allocation44_spill] sm:$0xff] %v5931_v9  ;;  %v5963_v31 = vmul.f32 %v5950_v22, %v9570_v24  ;;  %v9594_v18 = vmax.f32 %v5597_v14, 0.0 }
  0xa6   : > { %9564 = vst [vmem:[#allocation45_spill] sm:$0xff] %v5935_v59  ;;  %9565 = vst [vmem:[#allocation46_spill] sm:$0xff] %v5938_v1  ;;  %4165 = vrot.lane.b32.xlu0 %v5945_v32, %s5232_s18  ;;  %v5973_v30 = vsel %vm1173_vm0, %v1195_v19, %v1197_v13  ;;  %v5976_v58 = vsel %vm1173_vm0, %v1197_v13, %v1199_v11  ;;  %v5983_v24 = vsel %vm998_vm1, %v1020_v46, %v1022_v2 }
  0xa7   : > { %9566 = vst [vmem:[#allocation47_spill] sm:$0xff] %v5941_v61  ;;  %9567 = vst [vmem:[#allocation48_spill] sm:$0xff] %v5945_v32  ;;  %v9572_v61 = vmax.f32 %v5576_v63, 0.0  ;;  %v5980_v62 = vpack.i.bf16 %v5973_v30, %v5931_v9  ;;  %v5986_v63 = vsel %vm998_vm1, %v1022_v2, %v1024_v27  ;;  %v1203_v5 = vrot.slane %v5963_v31, 1 }
  0xa8   : > { %9568 = vst [vmem:[#allocation49_spill] sm:$0xff] %v5950_v22  ;;  %9569 = vst [vmem:[#allocation50_spill] sm:$0xff] %v5952_v23  ;;  %v5999_v46 = vpop.permute.xlu0 %660  ;;  %v6003_v32 = vadd.f32 %v5467_v60, %v429_v3  ;;  %v9606_v9 = vmax.f32 %v5615_v35, 0.0 }
  0xa9   : > { %9571 = vst [vmem:[#allocation51_spill] sm:$0xff] %v5963_v31  ;;  %v5968_v1 = vmul.f32 %v5952_v23, %v9572_v61  ;;  %9574 = vst [vmem:[#allocation53_spill] sm:$0xff] %v5973_v30  ;;  %v5997_v23 = vpop.permute.xlu1 %665  ;;  %v1028_v61 = vrot.slane %v5963_v31, 7 }
  0xaa   : > { %9575 = vst [vmem:[#allocation54_spill] sm:$0xff] %v5976_v58  ;;  %9576 = vst [vmem:[#allocation55_spill] sm:$0xff] %v5980_v62  ;;  %v6011_v54 = vmul.f32 %v5997_v23, %v9582_v25 }
  0xab   : > { %9573 = vst [vmem:[#allocation52_spill] sm:$0xff] %v5968_v1  ;;  %9577 = vst [vmem:[#allocation56_spill] sm:$0xff] %v5983_v24  ;;  %v5992_v19 = vpack.i.bf16 %v5963_v31, %v5968_v1  ;;  %v1201_v13 = vrot.slane %v5968_v1, 1  ;;  %v1026_v22 = vrot.slane %v5968_v1, 7  ;;  %v305_v24 = vld [vmem:[%s5439_s10 + $0x148] sm:$0xff] }
  0xac   : > { %9578 = vst [vmem:[#allocation57_spill] sm:$0xff] %v5986_v63  ;;  %9580 = vst [vmem:[#allocation59_spill] sm:$0xff] %v5997_v23  ;;  %v6016_v63 = vmul.f32 %v5999_v46, %v9584_v21 }
  0xad   : > { %9579 = vst [vmem:[#allocation58_spill] sm:$0xff] %v5992_v19  ;;  %9581 = vst [vmem:[#allocation60_spill] sm:$0xff] %v5999_v46  ;;  %4170 = vrot.lane.b32.xlu1 %v5992_v19, %s5232_s18  ;;  %v6021_v3 = vsel %vm1173_vm0, %v1199_v11, %v1201_v13  ;;  %v6024_v2 = vsel %vm1173_vm0, %v1201_v13, %v1203_v5  ;;  %v6031_v7 = vsel %vm998_vm1, %v1024_v27, %v1026_v22  ;;  %v6043_v23 = vpop.permute.xlu1 %675  ;;  %v6045_v46 = vpop.permute.xlu0 %670  ;;  %v304_v27 = vld [vmem:[%s5439_s10 + $0x140] sm:$0xff] }
  0xae   : > { %9583 = vst [vmem:[#allocation61_spill] sm:$0xff] %v6011_v54  ;;  %9585 = vst [vmem:[#allocation62_spill] sm:$0xff] %v6016_v63  ;;  %v6028_v0 = vpack.i.bf16 %v6021_v3, %v5976_v58  ;;  %v6034_v25 = vsel %vm998_vm1, %v1026_v22, %v1028_v61  ;;  %v6038_v21 = vpack.i.bf16 %v6011_v54, %v6016_v63  ;;  %v1205_v11 = vrot.slane %v6016_v63, 1 }
  0xaf   : > { %9586 = vst [vmem:[#allocation63_spill] sm:$0xff] %v6021_v3  ;;  %9587 = vst [vmem:[#allocation64_spill] sm:$0xff] %v6024_v2  ;;  %v1207_v13 = vrot.slane %v6011_v54, 1  ;;  %v1030_v29 = vrot.slane %v6016_v63, 7  ;;  %v1032_v19 = vrot.slane %v6011_v54, 7  ;;  %v6054_v1 = vmul.f32 %v6043_v23, %v9594_v18 }
  0xb0   : > { %9588 = vst [vmem:[#allocation65_spill] sm:$0xff] %v6028_v0  ;;  %9589 = vst [vmem:[#allocation66_spill] sm:$0xff] %v6031_v7  ;;  %4175 = vrot.lane.b32.xlu0 %v6038_v21, %s5232_s18  ;;  %v6066_v15 = vsel %vm1173_vm0, %v1203_v5, %v1205_v11  ;;  %v431_v31 = vmul.f32 %v5450_v51, %v304_v27  ;;  %v9618_v54 = vmax.f32 %v5644_v26, 0.0  ;;  %v9630_v58 = vmax.f32 %v5654_v38, 0.0 }
  0xb1   : > { %9590 = vst [vmem:[#allocation67_spill] sm:$0xff] %v6034_v25  ;;  %9591 = vst [vmem:[#allocation68_spill] sm:$0xff] %v6038_v21  ;;  %v9596_v25 = vmax.f32 %v5600_v16, 0.0  ;;  %v6069_v22 = vsel %vm1173_vm0, %v1205_v11, %v1207_v13  ;;  %v6073_v14 = vpack.i.bf16 %v6066_v15, %v6024_v2  ;;  %v6076_v16 = vsel %vm998_vm1, %v1028_v61, %v1030_v29  ;;  %v6090_v21 = vpop.permute.xlu1 %685  ;;  %v6092_v61 = vpop.permute.xlu0 %680 }
  0xb2   : > { %9592 = vst [vmem:[#allocation69_spill] sm:$0xff] %v6043_v23  ;;  %9593 = vst [vmem:[#allocation70_spill] sm:$0xff] %v6045_v46  ;;  %v6079_v18 = vsel %vm998_vm1, %v1030_v29, %v1032_v19  ;;  %v1211_v23 = vrot.slane %v6054_v1, 1  ;;  %v432_v29 = vmul.f32 %v5450_v51, %v305_v24  ;;  %v6102_v63 = vmul.f32 %v6090_v21, %v9606_v9 }
  0xb3   : > { %9595 = vst [vmem:[#allocation71_spill] sm:$0xff] %v6054_v1  ;;  %v6059_v7 = vmul.f32 %v6045_v46, %v9596_v25  ;;  %9598 = vst [vmem:[#allocation73_spill] sm:$0xff] %v6066_v15  ;;  %v1036_v25 = vrot.slane %v6054_v1, 7  ;;  %v9654_v2 = vmax.f32 %v5666_v48, 0.0 }
  0xb4   : > { %9599 = vst [vmem:[#allocation74_spill] sm:$0xff] %v6069_v22  ;;  %9600 = vst [vmem:[#allocation75_spill] sm:$0xff] %v6073_v14  ;;  %v1215_v12 = vrot.slane %v6102_v63, 1 }
  0xb5   : > { %9597 = vst [vmem:[#allocation72_spill] sm:$0xff] %v6059_v7  ;;  %9601 = vst [vmem:[#allocation76_spill] sm:$0xff] %v6076_v16  ;;  %v6085_v5 = vpack.i.bf16 %v6054_v1, %v6059_v7  ;;  %v1209_v11 = vrot.slane %v6059_v7, 1  ;;  %v1034_v46 = vrot.slane %v6059_v7, 7 }
  0xb6   : > { %9602 = vst [vmem:[#allocation77_spill] sm:$0xff] %v6079_v18  ;;  %9604 = vst [vmem:[#allocation79_spill] sm:$0xff] %v6090_v21  ;;  %v9608_v18 = vmax.f32 %v5622_v41, 0.0  ;;  %v6134_v21 = vpop.permute.xlu1 %695 }
  0xb7   : > { %9603 = vst [vmem:[#allocation78_spill] sm:$0xff] %v6085_v5  ;;  %9605 = vst [vmem:[#allocation80_spill] sm:$0xff] %v6092_v61  ;;  %4180 = vrot.lane.b32.xlu1 %v6085_v5, %s5232_s18  ;;  %v6112_v24 = vsel %vm1173_vm0, %v1207_v13, %v1209_v11  ;;  %v6115_v27 = vsel %vm1173_vm0, %v1209_v11, %v1211_v23  ;;  %v6122_v9 = vsel %vm998_vm1, %v1032_v19, %v1034_v46 }
  0xb8   : > { %9607 = vst [vmem:[#allocation81_spill] sm:$0xff] %v6102_v63  ;;  %v6107_v16 = vmul.f32 %v6092_v61, %v9608_v18  ;;  %9610 = vst [vmem:[#allocation83_spill] sm:$0xff] %v6112_v24  ;;  %v6119_v35 = vpack.i.bf16 %v6112_v24, %v6069_v22  ;;  %v6125_v41 = vsel %vm998_vm1, %v1034_v46, %v1036_v25  ;;  %v6136_v61 = vpop.permute.xlu0 %690  ;;  %v1040_v46 = vrot.slane %v6102_v63, 7 }
  0xb9   : > { %9611 = vst [vmem:[#allocation84_spill] sm:$0xff] %v6115_v27  ;;  %9613 = vst [vmem:[#allocation86_spill] sm:$0xff] %v6122_v9  ;;  %v6139_v19 = vadd.f32 %v5467_v60, %v432_v29  ;;  %v6147_v7 = vmul.f32 %v6134_v21, %v9618_v54  ;;  %v9678_v22 = vmax.f32 %v5678_v4, 0.0 }
  0xba   : > { %9609 = vst [vmem:[#allocation82_spill] sm:$0xff] %v6107_v16  ;;  %9612 = vst [vmem:[#allocation85_spill] sm:$0xff] %v6119_v35  ;;  %v6129_v18 = vpack.i.bf16 %v6102_v63, %v6107_v16  ;;  %v1213_v13 = vrot.slane %v6107_v16, 1  ;;  %v1038_v11 = vrot.slane %v6107_v16, 7  ;;  %v9632_v16 = vmax.f32 %v5657_v47, 0.0 }
  0xbb   : > { %9614 = vst [vmem:[#allocation87_spill] sm:$0xff] %v6125_v41  ;;  %9616 = vst [vmem:[#allocation89_spill] sm:$0xff] %v6134_v21  ;;  %v9620_v41 = vmax.f32 %v5647_v33, 0.0  ;;  %v1219_v5 = vrot.slane %v6147_v7, 1  ;;  %v9642_v63 = vmax.f32 %v5660_v42, 0.0 }
  0xbc   : > { %9615 = vst [vmem:[#allocation88_spill] sm:$0xff] %v6129_v18  ;;  %9617 = vst [vmem:[#allocation90_spill] sm:$0xff] %v6136_v61  ;;  %4185 = vrot.lane.b32.xlu0 %v6129_v18, %s5232_s18  ;;  %v6157_v29 = vsel %vm1173_vm0, %v1211_v23, %v1213_v13  ;;  %v6160_v52 = vsel %vm1173_vm0, %v1213_v13, %v1215_v12  ;;  %v6167_v54 = vsel %vm998_vm1, %v1036_v25, %v1038_v11  ;;  %v6183_v25 = vpop.permute.xlu0 %700 }
  0xbd   : > { %9619 = vst [vmem:[#allocation91_spill] sm:$0xff] %v6147_v7  ;;  %v6152_v9 = vmul.f32 %v6136_v61, %v9620_v41  ;;  %9622 = vst [vmem:[#allocation93_spill] sm:$0xff] %v6157_v29  ;;  %v6164_v26 = vpack.i.bf16 %v6157_v29, %v6115_v27  ;;  %v6170_v33 = vsel %vm998_vm1, %v1038_v11, %v1040_v46  ;;  %v6181_v61 = vpop.permute.xlu1 %705  ;;  %v1044_v41 = vrot.slane %v6147_v7, 7 }
  0xbe   : > { %9623 = vst [vmem:[#allocation94_spill] sm:$0xff] %v6160_v52  ;;  %9625 = vst [vmem:[#allocation96_spill] sm:$0xff] %v6167_v54  ;;  %v6187_v18 = vadd.f32 %v5467_v60, %v431_v31  ;;  %v6195_v1 = vmul.f32 %v6181_v61, %v9630_v58  ;;  %v307_v54 = vld [vmem:[%s5439_s10 + $0x158] sm:$0xff]  ;;  %v9702_v27 = vmax.f32 %v5771_v36, 0.0 }
  0xbf   : > { %9621 = vst [vmem:[#allocation92_spill] sm:$0xff] %v6152_v9  ;;  %9624 = vst [vmem:[#allocation95_spill] sm:$0xff] %v6164_v26  ;;  %v6176_v23 = vpack.i.bf16 %v6147_v7, %v6152_v9  ;;  %v1217_v13 = vrot.slane %v6152_v9, 1  ;;  %v1042_v21 = vrot.slane %v6152_v9, 7 }
  0xc0   : > { %9626 = vst [vmem:[#allocation97_spill] sm:$0xff] %v6170_v33  ;;  %9628 = vst [vmem:[#allocation99_spill] sm:$0xff] %v6181_v61  ;;  %v6200_v33 = vmul.f32 %v6183_v25, %v9632_v16 }
  0xc1   : > { %9627 = vst [vmem:[#allocation98_spill] sm:$0xff] %v6176_v23  ;;  %9629 = vst [vmem:[#allocation100_spill] sm:$0xff] %v6183_v25  ;;  %4190 = vrot.lane.b32.xlu1 %v6176_v23, %s5232_s18  ;;  %v6205_v31 = vsel %vm1173_vm0, %v1215_v12, %v1217_v13  ;;  %v6208_v11 = vsel %vm1173_vm0, %v1217_v13, %v1219_v5  ;;  %v6215_v47 = vsel %vm998_vm1, %v1040_v46, %v1042_v21  ;;  %v6227_v61 = vpop.permute.xlu1 %715  ;;  %v6229_v25 = vpop.permute.xlu0 %710  ;;  %v306_v46 = vld [vmem:[%s5439_s10 + $0x150] sm:$0xff] }
  0xc2   : > { %9631 = vst [vmem:[#allocation101_spill] sm:$0xff] %v6195_v1  ;;  %9633 = vst [vmem:[#allocation102_spill] sm:$0xff] %v6200_v33  ;;  %v6212_v38 = vpack.i.bf16 %v6205_v31, %v6160_v52  ;;  %v6218_v58 = vsel %vm998_vm1, %v1042_v21, %v1044_v41  ;;  %v6222_v16 = vpack.i.bf16 %v6195_v1, %v6200_v33  ;;  %v1221_v12 = vrot.slane %v6200_v33, 1 }
  0xc3   : > { %9634 = vst [vmem:[#allocation103_spill] sm:$0xff] %v6205_v31  ;;  %9635 = vst [vmem:[#allocation104_spill] sm:$0xff] %v6208_v11  ;;  %v1223_v13 = vrot.slane %v6195_v1, 1  ;;  %v1046_v30 = vrot.slane %v6200_v33, 7  ;;  %v1048_v23 = vrot.slane %v6195_v1, 7  ;;  %v6238_v9 = vmul.f32 %v6227_v61, %v9642_v63 }
  0xc4   : > { %9636 = vst [vmem:[#allocation105_spill] sm:$0xff] %v6212_v38  ;;  %9637 = vst [vmem:[#allocation106_spill] sm:$0xff] %v6215_v47  ;;  %4195 = vrot.lane.b32.xlu0 %v6222_v16, %s5232_s18  ;;  %v6250_v40 = vsel %vm1173_vm0, %v1219_v5, %v1221_v12  ;;  %v433_v7 = vmul.f32 %v5450_v51, %v306_v46  ;;  %v9666_v1 = vmax.f32 %v5672_v55, 0.0 }
  0xc5   : > { %9638 = vst [vmem:[#allocation107_spill] sm:$0xff] %v6218_v58  ;;  %9639 = vst [vmem:[#allocation108_spill] sm:$0xff] %v6222_v16  ;;  %v9644_v58 = vmax.f32 %v5663_v43, 0.0  ;;  %v6253_v21 = vsel %vm1173_vm0, %v1221_v12, %v1223_v13  ;;  %v6257_v42 = vpack.i.bf16 %v6250_v40, %v6208_v11  ;;  %v6260_v43 = vsel %vm998_vm1, %v1044_v41, %v1046_v30  ;;  %v6274_v16 = vpop.permute.xlu1 %725  ;;  %v6276_v41 = vpop.permute.xlu0 %720 }
  0xc6   : > { %9640 = vst [vmem:[#allocation109_spill] sm:$0xff] %v6227_v61  ;;  %9641 = vst [vmem:[#allocation110_spill] sm:$0xff] %v6229_v25  ;;  %v6263_v63 = vsel %vm998_vm1, %v1046_v30, %v1048_v23  ;;  %v1227_v61 = vrot.slane %v6238_v9, 1  ;;  %v434_v30 = vmul.f32 %v5450_v51, %v307_v54  ;;  %v6286_v33 = vmul.f32 %v6274_v16, %v9654_v2 }
  0xc7   : > { %9643 = vst [vmem:[#allocation111_spill] sm:$0xff] %v6238_v9  ;;  %v6243_v47 = vmul.f32 %v6229_v25, %v9644_v58  ;;  %9646 = vst [vmem:[#allocation113_spill] sm:$0xff] %v6250_v40  ;;  %v1052_v58 = vrot.slane %v6238_v9, 7 }
  0xc8   : > { %9647 = vst [vmem:[#allocation114_spill] sm:$0xff] %v6253_v21  ;;  %9648 = vst [vmem:[#allocation115_spill] sm:$0xff] %v6257_v42  ;;  %v1231_v3 = vrot.slane %v6286_v33, 1 }
  0xc9   : > { %9645 = vst [vmem:[#allocation112_spill] sm:$0xff] %v6243_v47  ;;  %9649 = vst [vmem:[#allocation116_spill] sm:$0xff] %v6260_v43  ;;  %v6269_v5 = vpack.i.bf16 %v6238_v9, %v6243_v47  ;;  %v1225_v12 = vrot.slane %v6243_v47, 1  ;;  %v1050_v25 = vrot.slane %v6243_v47, 7 }
  0xca   : > { %9650 = vst [vmem:[#allocation117_spill] sm:$0xff] %v6263_v63  ;;  %9652 = vst [vmem:[#allocation119_spill] sm:$0xff] %v6274_v16  ;;  %v9656_v63 = vmax.f32 %v5669_v49, 0.0  ;;  %v6318_v16 = vpop.permute.xlu1 %735 }
  0xcb   : > { %9651 = vst [vmem:[#allocation118_spill] sm:$0xff] %v6269_v5  ;;  %9653 = vst [vmem:[#allocation120_spill] sm:$0xff] %v6276_v41  ;;  %4200 = vrot.lane.b32.xlu1 %v6269_v5, %s5232_s18  ;;  %v6296_v54 = vsel %vm1173_vm0, %v1223_v13, %v1225_v12  ;;  %v6299_v46 = vsel %vm1173_vm0, %v1225_v12, %v1227_v61  ;;  %v6306_v2 = vsel %vm998_vm1, %v1048_v23, %v1050_v25 }
  0xcc   : > { %9655 = vst [vmem:[#allocation121_spill] sm:$0xff] %v6286_v33  ;;  %v6291_v43 = vmul.f32 %v6276_v41, %v9656_v63  ;;  %9658 = vst [vmem:[#allocation123_spill] sm:$0xff] %v6296_v54  ;;  %v6303_v48 = vpack.i.bf16 %v6296_v54, %v6253_v21  ;;  %v6309_v49 = vsel %vm998_vm1, %v1050_v25, %v1052_v58  ;;  %v6320_v41 = vpop.permute.xlu0 %730  ;;  %v1056_v25 = vrot.slane %v6286_v33, 7 }
  0xcd   : > { %9659 = vst [vmem:[#allocation124_spill] sm:$0xff] %v6299_v46  ;;  %9661 = vst [vmem:[#allocation126_spill] sm:$0xff] %v6306_v2  ;;  %v6323_v23 = vadd.f32 %v5467_v60, %v434_v30  ;;  %v6331_v47 = vmul.f32 %v6318_v16, %v9666_v1 }
  0xce   : > { %9657 = vst [vmem:[#allocation122_spill] sm:$0xff] %v6291_v43  ;;  %9660 = vst [vmem:[#allocation125_spill] sm:$0xff] %v6303_v48  ;;  %v6313_v63 = vpack.i.bf16 %v6286_v33, %v6291_v43  ;;  %v1229_v13 = vrot.slane %v6291_v43, 1  ;;  %v1054_v12 = vrot.slane %v6291_v43, 7  ;;  %v9680_v43 = vmax.f32 %v5681_v8, 0.0 }
  0xcf   : > { %9662 = vst [vmem:[#allocation127_spill] sm:$0xff] %v6309_v49  ;;  %9664 = vst [vmem:[#allocation129_spill] sm:$0xff] %v6318_v16  ;;  %v9668_v49 = vmax.f32 %v5675_v56, 0.0  ;;  %v1235_v5 = vrot.slane %v6331_v47, 1  ;;  %v6365_v16 = vpop.permute.xlu1 %745  ;;  %v9690_v33 = vmax.f32 %v5686_v37, 0.0 }
  0xd0   : > { %9663 = vst [vmem:[#allocation128_spill] sm:$0xff] %v6313_v63  ;;  %9665 = vst [vmem:[#allocation130_spill] sm:$0xff] %v6320_v41  ;;  %4205 = vrot.lane.b32.xlu0 %v6313_v63, %s5232_s18  ;;  %v6341_v30 = vsel %vm1173_vm0, %v1227_v61, %v1229_v13  ;;  %v6344_v34 = vsel %vm1173_vm0, %v1229_v13, %v1231_v3  ;;  %v6351_v1 = vsel %vm998_vm1, %v1052_v58, %v1054_v12  ;;  %v6367_v58 = vpop.permute.xlu0 %740 }
  0xd1   : > { %9667 = vst [vmem:[#allocation131_spill] sm:$0xff] %v6331_v47  ;;  %v6336_v2 = vmul.f32 %v6320_v41, %v9668_v49  ;;  %9670 = vst [vmem:[#allocation133_spill] sm:$0xff] %v6341_v30  ;;  %v6348_v55 = vpack.i.bf16 %v6341_v30, %v6299_v46  ;;  %v6354_v56 = vsel %vm998_vm1, %v1054_v12, %v1056_v25  ;;  %v1060_v49 = vrot.slane %v6331_v47, 7 }
  0xd2   : > { %9671 = vst [vmem:[#allocation134_spill] sm:$0xff] %v6344_v34  ;;  %9673 = vst [vmem:[#allocation136_spill] sm:$0xff] %v6351_v1  ;;  %v6371_v63 = vadd.f32 %v5467_v60, %v433_v7  ;;  %v6379_v9 = vmul.f32 %v6365_v16, %v9678_v22  ;;  %v309_v7 = vld [vmem:[%s5439_s10 + $0x168] sm:$0xff] }
  0xd3   : > { %9669 = vst [vmem:[#allocation132_spill] sm:$0xff] %v6336_v2  ;;  %9672 = vst [vmem:[#allocation135_spill] sm:$0xff] %v6348_v55  ;;  %v6360_v61 = vpack.i.bf16 %v6331_v47, %v6336_v2  ;;  %v1233_v13 = vrot.slane %v6336_v2, 1  ;;  %v1058_v41 = vrot.slane %v6336_v2, 7 }
  0xd4   : > { %9674 = vst [vmem:[#allocation137_spill] sm:$0xff] %v6354_v56  ;;  %9676 = vst [vmem:[#allocation139_spill] sm:$0xff] %v6365_v16  ;;  %v6384_v56 = vmul.f32 %v6367_v58, %v9680_v43  ;;  %v6412_v16 = vpop.permute.xlu1 %755 }
  0xd5   : > { %9675 = vst [vmem:[#allocation138_spill] sm:$0xff] %v6360_v61  ;;  %9677 = vst [vmem:[#allocation140_spill] sm:$0xff] %v6367_v58  ;;  %4210 = vrot.lane.b32.xlu1 %v6360_v61, %s5232_s18  ;;  %v6390_v12 = vsel %vm1173_vm0, %v1231_v3, %v1233_v13  ;;  %v6393_v1 = vsel %vm1173_vm0, %v1233_v13, %v1235_v5  ;;  %v6400_v8 = vsel %vm998_vm1, %v1056_v25, %v1058_v41  ;;  %v6414_v58 = vpop.permute.xlu0 %750 }
  0xd6   : > { %9679 = vst [vmem:[#allocation141_spill] sm:$0xff] %v6379_v9  ;;  %9681 = vst [vmem:[#allocation142_spill] sm:$0xff] %v6384_v56  ;;  %v6397_v4 = vpack.i.bf16 %v6390_v12, %v6344_v34  ;;  %v6403_v22 = vsel %vm998_vm1, %v1058_v41, %v1060_v49  ;;  %v6407_v43 = vpack.i.bf16 %v6379_v9, %v6384_v56  ;;  %v1237_v3 = vrot.slane %v6384_v56, 1 }
  0xd7   : > { %9682 = vst [vmem:[#allocation143_spill] sm:$0xff] %v6390_v12  ;;  %9683 = vst [vmem:[#allocation144_spill] sm:$0xff] %v6393_v1  ;;  %v1239_v13 = vrot.slane %v6379_v9, 1  ;;  %v1062_v15 = vrot.slane %v6384_v56, 7  ;;  %v436_v25 = vmul.f32 %v5450_v51, %v309_v7  ;;  %v1064_v61 = vrot.slane %v6379_v9, 7 }
  0xd8   : > { %9684 = vst [vmem:[#allocation145_spill] sm:$0xff] %v6397_v4  ;;  %9685 = vst [vmem:[#allocation146_spill] sm:$0xff] %v6400_v8  ;;  %v6423_v2 = vmul.f32 %v6412_v16, %v9690_v33  ;;  %4215 = vrot.lane.b32.xlu0 %v6407_v43, %s5232_s18  ;;  %v6434_v7 = vsel %vm1173_vm0, %v1235_v5, %v1237_v3  ;;  %v9704_v56 = vmax.f32 %v5799_v10, 0.0  ;;  %v9714_v9 = vmax.f32 %v5955_v17, 0.0 }
  0xd9   : > { %9686 = vst [vmem:[#allocation147_spill] sm:$0xff] %v6403_v22  ;;  %9687 = vst [vmem:[#allocation148_spill] sm:$0xff] %v6407_v43  ;;  %v9692_v22 = vmax.f32 %v5689_v39, 0.0  ;;  %v6437_v4 = vsel %vm1173_vm0, %v1237_v3, %v1239_v13  ;;  %v6441_v37 = vpack.i.bf16 %v6434_v7, %v6393_v1  ;;  %v6444_v33 = vsel %vm998_vm1, %v1060_v49, %v1062_v15  ;;  %v6460_v49 = vpop.permute.xlu0 %760 }
  0xda   : > { %9688 = vst [vmem:[#allocation149_spill] sm:$0xff] %v6412_v16  ;;  %9689 = vst [vmem:[#allocation150_spill] sm:$0xff] %v6414_v58  ;;  %v6447_v39 = vsel %vm998_vm1, %v1062_v15, %v1064_v61  ;;  %v1243_v41 = vrot.slane %v6423_v2, 1  ;;  %v6463_v15 = vadd.f32 %v5467_v60, %v436_v25  ;;  %v435_v43 = vmul.f32 %v5450_v51, %v308_v45 }
  0xdb   : > { %9691 = vst [vmem:[#allocation151_spill] sm:$0xff] %v6423_v2  ;;  %v6428_v8 = vmul.f32 %v6414_v58, %v9692_v22  ;;  %9694 = vst [vmem:[#allocation153_spill] sm:$0xff] %v6434_v7  ;;  %v6458_v58 = vpop.permute.xlu1 %765  ;;  %v1068_v22 = vrot.slane %v6423_v2, 7 }
  0xdc   : > { %9695 = vst [vmem:[#allocation154_spill] sm:$0xff] %v6437_v4  ;;  %9696 = vst [vmem:[#allocation155_spill] sm:$0xff] %v6441_v37  ;;  %v6472_v47 = vmul.f32 %v6458_v58, %v9702_v27 }
  0xdd   : > { %9693 = vst [vmem:[#allocation152_spill] sm:$0xff] %v6428_v8  ;;  %9697 = vst [vmem:[#allocation156_spill] sm:$0xff] %v6444_v33  ;;  %v6453_v5 = vpack.i.bf16 %v6423_v2, %v6428_v8  ;;  %v1241_v3 = vrot.slane %v6428_v8, 1  ;;  %v1066_v16 = vrot.slane %v6428_v8, 7  ;;  %v6506_v24 = vpop.permute.xlu0 %770 }
  0xde   : > { %9698 = vst [vmem:[#allocation157_spill] sm:$0xff] %v6447_v39  ;;  %9700 = vst [vmem:[#allocation159_spill] sm:$0xff] %v6458_v58  ;;  %v6477_v39 = vmul.f32 %v6460_v49, %v9704_v56  ;;  %v311_v58 = vld [vmem:[%s5439_s10 + $0x178] sm:$0xff] }
  0xdf   : > { %9699 = vst [vmem:[#allocation158_spill] sm:$0xff] %v6453_v5  ;;  %9701 = vst [vmem:[#allocation160_spill] sm:$0xff] %v6460_v49  ;;  %4220 = vrot.lane.b32.xlu1 %v6453_v5, %s5232_s18  ;;  %v6482_v51 = vsel %vm1173_vm0, %v1239_v13, %v1241_v3  ;;  %v6485_v60 = vsel %vm1173_vm0, %v1241_v3, %v1243_v41  ;;  %v6492_v36 = vsel %vm998_vm1, %v1064_v61, %v1066_v16  ;;  %v6504_v3 = vpop.permute.xlu1 %775  ;;  %v313_v5 = vld [vmem:[%s5439_s10 + $0x188] sm:$0xff] }
  0xe0   : > { %9703 = vst [vmem:[#allocation161_spill] sm:$0xff] %v6472_v47  ;;  %9705 = vst [vmem:[#allocation162_spill] sm:$0xff] %v6477_v39  ;;  %v6489_v45 = vpack.i.bf16 %v6482_v51, %v6437_v4  ;;  %v6495_v10 = vsel %vm998_vm1, %v1066_v16, %v1068_v22  ;;  %v6499_v27 = vpack.i.bf16 %v6472_v47, %v6477_v39  ;;  %v1245_v56 = vrot.slane %v6477_v39, 1  ;;  %v6511_v16 = vld [vmem:[%s9183_s4] ss:$0 sm:$0xff] }
  0xe1   : > { %9706 = vst [vmem:[#allocation163_spill] sm:$0xff] %v6482_v51  ;;  %9707 = vst [vmem:[#allocation164_spill] sm:$0xff] %v6485_v60  ;;  %v1247_v13 = vrot.slane %v6472_v47, 1  ;;  %v1070_v25 = vrot.slane %v6477_v39, 7  ;;  %v6514_v61 = vadd.f32 %v6511_v16, %v435_v43  ;;  %v1072_v49 = vrot.slane %v6472_v47, 7  ;;  %v310_v43 = vld [vmem:[%s5439_s10 + $0x170] sm:$0xff] }
  0xe2   : > { %9708 = vst [vmem:[#allocation165_spill] sm:$0xff] %v6489_v45  ;;  %9709 = vst [vmem:[#allocation166_spill] sm:$0xff] %v6492_v36  ;;  %v6523_v8 = vmul.f32 %v6504_v3, %v9714_v9  ;;  %4225 = vrot.lane.b32.xlu0 %v6499_v27, %s5232_s18  ;;  %v6534_v33 = vsel %vm1173_vm0, %v1243_v41, %v1245_v56  ;;  %v9724_v39 = vmax.f32 %v6139_v19, 0.0  ;;  %v312_v19 = vld [vmem:[%s5439_s10 + $0x180] sm:$0xff]  ;;  %v315_v47 = vld [vmem:[%s5439_s10 + $0x198] sm:$0xff] }
  0xe3   : > { %9710 = vst [vmem:[#allocation167_spill] sm:$0xff] %v6495_v10  ;;  %9711 = vst [vmem:[#allocation168_spill] sm:$0xff] %v6499_v27  ;;  %v9715_v10 = vmax.f32 %v6003_v32, 0.0  ;;  %v6537_v45 = vsel %vm1173_vm0, %v1245_v56, %v1247_v13  ;;  %v6542_v17 = vpack.i.bf16 %v6534_v33, %v6485_v60  ;;  %v6545_v32 = vsel %vm998_vm1, %v1068_v22, %v1070_v25  ;;  %v6559_v56 = vld [vmem:[%s9182_s3] ss:$0 sm:$0xff]  ;;  %v6566_v27 = vpop.permute.xlu0 %780 }
  0xe4   : > { %9712 = vst [vmem:[#allocation169_spill] sm:$0xff] %v6504_v3  ;;  %9713 = vst [vmem:[#allocation170_spill] sm:$0xff] %v6506_v24  ;;  %v6548_v9 = vsel %vm998_vm1, %v1070_v25, %v1072_v49  ;;  %v438_v3 = vmul.f32 %v6559_v56, %v311_v58  ;;  %v437_v7 = vmul.f32 %v6559_v56, %v310_v43  ;;  %v1076_v4 = vrot.slane %v6523_v8, 7 }
  0xe5   : > { %v6528_v36 = vmul.f32 %v6506_v24, %v9715_v10  ;;  %9716 = vst [vmem:[#allocation171_spill] sm:$0xff] %v6534_v33  ;;  %9717 = vst [vmem:[#allocation172_spill] sm:$0xff] %v6537_v45  ;;  %v6564_v24 = vpop.permute.xlu1 %785  ;;  %v560_v10 = vmax.f32 %v6371_v63, 0.0  ;;  %v9725_v22 = vmax.f32 %v6187_v18, 0.0  ;;  %v440_v63 = vmul.f32 %v6559_v56, %v313_v5 }
  0xe6   : > { %9718 = vst [vmem:[#allocation173_spill] sm:$0xff] %v6542_v17  ;;  %9719 = vst [vmem:[#allocation174_spill] sm:$0xff] %v6545_v32  ;;  %v6576_v58 = vmul.f32 %v6564_v24, %v9724_v39  ;;  %v563_v5 = vmax.f32 %v6463_v15, 0.0  ;;  %v9734_v32 = vmax.f32 %v6323_v23, 0.0 }
  0xe7   : > { %9720 = vst [vmem:[#allocation175_spill] sm:$0xff] %v6548_v9  ;;  %v6554_v41 = vpack.i.bf16 %v6523_v8, %v6528_v36  ;;  %v1074_v25 = vrot.slane %v6528_v36, 7  ;;  %9722 = vst [vmem:[#allocation177_spill] sm:$0xff] %v6564_v24  ;;  %v6581_v9 = vmul.f32 %v6566_v27, %v9725_v22  ;;  %v9726_v43 = vrot.slane %v6528_v36, 1 }
  0xe8   : > { %9723 = vst [vmem:[#allocation178_spill] sm:$0xff] %v6566_v27  ;;  %v507_v17 = vadd.f32 %v6511_v16, %v440_v63 }
  0xe9   : > { %9721 = vst [vmem:[#allocation176_spill] sm:$0xff] %v6554_v41  ;;  %4230 = vrot.lane.b32.xlu1 %v6554_v41, %s5232_s18  ;;  %v6589_v2 = vsel %vm1173_vm0, %v1247_v13, %v9726_v43  ;;  %v6597_v18 = vsel %vm998_vm1, %v1072_v49, %v1074_v25  ;;  %v6600_v22 = vsel %vm998_vm1, %v1074_v25, %v1076_v4  ;;  %v562_v13 = vmax.f32 %v6514_v61, 0.0  ;;  %v6609_v27 = vpop.permute.xlu1 %795  ;;  %v6611_v41 = vpop.permute.xlu0 %790  ;;  %v314_v49 = vld [vmem:[%s5439_s10 + $0x190] sm:$0xff] }
  0xea   : > { %9727 = vst [vmem:[#allocation179_spill] sm:$0xff] %v6589_v2  ;;  %v6594_v39 = vpack.i.bf16 %v6589_v2, %v6537_v45  ;;  %9729 = vst [vmem:[#allocation181_spill] sm:$0xff] %v6597_v18  ;;  %v6604_v24 = vpack.i.bf16 %v6576_v58, %v6581_v9  ;;  %v505_v43 = vadd.f32 %v6511_v16, %v438_v3  ;;  %v1078_v18 = vrot.slane %v6581_v9, 7 }
  0xeb   : > { %9730 = vst [vmem:[#allocation182_spill] sm:$0xff] %v6600_v22  ;;  %9732 = vst [vmem:[#allocation184_spill] sm:$0xff] %v6609_v27  ;;  %v1080_v25 = vrot.slane %v6576_v58, 7  ;;  %v6622_v15 = vmul.f32 %v6609_v27, %v9734_v32  ;;  %v6625_v3 = vmul.f32 %v6611_v41, %v560_v10  ;;  %v504_v61 = vadd.f32 %v6511_v16, %v437_v7 }
  0xec   : > { %9728 = vst [vmem:[#allocation180_spill] sm:$0xff] %v6594_v39  ;;  %9731 = vst [vmem:[#allocation183_spill] sm:$0xff] %v6604_v24  ;;  %4235 = vrot.lane.b32.xlu0 %v6604_v24, %s5232_s18  ;;  %v439_v39 = vmul.f32 %v6559_v56, %v312_v19  ;;  %v6633_v22 = vsel %vm998_vm1, %v1076_v4, %v1078_v18  ;;  %v442_v7 = vmul.f32 %v6559_v56, %v315_v47 }
  0xed   : > { %9733 = vst [vmem:[#allocation185_spill] sm:$0xff] %v6611_v41  ;;  %9735 = vst [vmem:[#allocation186_spill] sm:$0xff] %v6633_v22  ;;  %v6636_v23 = vsel %vm998_vm1, %v1078_v18, %v1080_v25  ;;  %v6642_v10 = vpack.i.bf16 %v6622_v15, %v6625_v3  ;;  %v441_v19 = vmul.f32 %v6559_v56, %v314_v49  ;;  %v6646_v27 = vpop.permute.xlu1 %805  ;;  %v6648_v63 = vpop.permute.xlu0 %800  ;;  %v565_v4 = vmax.f32 %v505_v43, 0.0  ;;  %v317_v41 = vld [vmem:[%s5439_s10 + $0x1a8] sm:$0xff] }
  0xee   : > { %9736 = vst [vmem:[#allocation187_spill] sm:$0xff] %v6636_v23  ;;  %9738 = vst [vmem:[#allocation189_spill] sm:$0xff] %v6646_v27  ;;  %v1082_v18 = vrot.slane %v6625_v3, 7  ;;  %v1084_v24 = vrot.slane %v6622_v15, 7  ;;  %v6656_v29 = vmul.f32 %v6646_v27, %v563_v5  ;;  %v6659_v47 = vmul.f32 %v6648_v63, %v562_v13  ;;  %v316_v23 = vld [vmem:[%s5439_s10 + $0x1a0] sm:$0xff] }
  0xef   : > { %9737 = vst [vmem:[#allocation188_spill] sm:$0xff] %v6642_v10  ;;  %9739 = vst [vmem:[#allocation190_spill] sm:$0xff] %v6648_v63  ;;  %4240 = vrot.lane.b32.xlu1 %v6642_v10, %s5232_s18  ;;  %v564_v49 = vmax.f32 %v504_v61, 0.0  ;;  %v506_v43 = vadd.f32 %v6511_v16, %v439_v39  ;;  %v567_v52 = vmax.f32 %v507_v17, 0.0  ;;  %v509_v13 = vadd.f32 %v6511_v16, %v442_v7 }
  0xf0   : > { %v6666_v22 = vsel %vm998_vm1, %v1080_v25, %v1082_v18  ;;  %v6669_v32 = vsel %vm998_vm1, %v1082_v18, %v1084_v24  ;;  %v6673_v5 = vpack.i.bf16 %v6656_v29, %v6659_v47  ;;  %v508_v27 = vadd.f32 %v6511_v16, %v441_v19 }
  0xf1   : > { %9740 = vst [vmem:[#allocation191_spill] sm:$0xff] %v6666_v22  ;;  %9741 = vst [vmem:[#allocation192_spill] sm:$0xff] %v6669_v32  ;;  %v444_v61 = vmul.f32 %v6559_v56, %v317_v41  ;;  %v6678_v39 = vpop.permute.xlu1 %815  ;;  %v6680_v17 = vpop.permute.xlu0 %810  ;;  %v1086_v25 = vrot.slane %v6659_v47, 7  ;;  %v1088_v63 = vrot.slane %v6656_v29, 7  ;;  %v566_v41 = vmax.f32 %v506_v43, 0.0  ;;  %v318_v32 = vld [vmem:[%s5439_s10 + $0x1b0] sm:$0xff] }
  0xf2   : > { %9742 = vst [vmem:[#allocation193_spill] sm:$0xff] %v6673_v5  ;;  %9743 = vst [vmem:[#allocation194_spill] sm:$0xff] %v6678_v39  ;;  %v6687_v10 = vmul.f32 %v6678_v39, %v565_v4  ;;  %v6690_v7 = vmul.f32 %v6680_v17, %v564_v49  ;;  %4245 = vrot.lane.b32.xlu0 %v6673_v5, %s5232_s18  ;;  %v443_v19 = vmul.f32 %v6559_v56, %v316_v23 }
  0xf3   : > { %9744 = vst [vmem:[#allocation195_spill] sm:$0xff] %v6680_v17  ;;  %v6697_v22 = vsel %vm998_vm1, %v1084_v24, %v1086_v25  ;;  %v6700_v37 = vsel %vm998_vm1, %v1086_v25, %v1088_v63  ;;  %v569_v18 = vmax.f32 %v509_v13, 0.0  ;;  %v511_v39 = vadd.f32 %v6511_v16, %v444_v61 }
  0xf4   : > { %9745 = vst [vmem:[#allocation196_spill] sm:$0xff] %v6697_v22  ;;  %9746 = vst [vmem:[#allocation197_spill] sm:$0xff] %v6700_v37  ;;  %v6706_v49 = vpack.i.bf16 %v6687_v10, %v6690_v7  ;;  %v568_v17 = vmax.f32 %v508_v27, 0.0  ;;  %v1090_v24 = vrot.slane %v6690_v7, 7  ;;  %v1092_v25 = vrot.slane %v6687_v10, 7 }
  0xf5   : > { %v6709_v43 = vpop.permute.xlu1 %825  ;;  %v6711_v23 = vpop.permute.xlu0 %820  ;;  %v510_v13 = vadd.f32 %v6511_v16, %v443_v19  ;;  %v445_v27 = vmul.f32 %v6559_v56, %v318_v32  ;;  %v571_v5 = vmax.f32 %v511_v39, 0.0 }
  0xf6   : > { %9747 = vst [vmem:[#allocation198_spill] sm:$0xff] %v6706_v49  ;;  %9748 = vst [vmem:[#allocation199_spill] sm:$0xff] %v6709_v43  ;;  %v6718_v4 = vmul.f32 %v6709_v43, %v567_v52  ;;  %v6721_v51 = vmul.f32 %v6711_v23, %v566_v41  ;;  %4250 = vrot.lane.b32.xlu1 %v6706_v49, %s5232_s18  ;;  %v6728_v61 = vsel %vm998_vm1, %v1088_v63, %v1090_v24 }
  0xf7   : > { %9749 = vst [vmem:[#allocation200_spill] sm:$0xff] %v6711_v23  ;;  %9750 = vst [vmem:[#allocation201_spill] sm:$0xff] %v6728_v61  ;;  %v6731_v60 = vsel %vm998_vm1, %v1090_v24, %v1092_v25  ;;  %v570_v39 = vmax.f32 %v510_v13, 0.0  ;;  %v512_v49 = vadd.f32 %v6511_v16, %v445_v27 }
  0xf8   : > { %9751 = vst [vmem:[#allocation202_spill] sm:$0xff] %v6731_v60  ;;  %v6735_v52 = vpack.i.bf16 %v6718_v4, %v6721_v51  ;;  %v1094_v19 = vrot.slane %v6721_v51, 7  ;;  %v1096_v32 = vrot.slane %v6718_v4, 7 }
  0xf9   : > { %v6737_v41 = vpop.permute.xlu1 %835  ;;  %v6739_v43 = vpop.permute.xlu0 %830 }
  0xfa   : > { %9752 = vst [vmem:[#allocation203_spill] sm:$0xff] %v6735_v52  ;;  %9753 = vst [vmem:[#allocation204_spill] sm:$0xff] %v6737_v41  ;;  %v6746_v24 = vmul.f32 %v6737_v41, %v569_v18  ;;  %v6749_v23 = vmul.f32 %v6739_v43, %v568_v17  ;;  %4255 = vrot.lane.b32.xlu0 %v6735_v52, %s5232_s18  ;;  %v6755_v60 = vsel %vm998_vm1, %v1092_v25, %v1094_v19  ;;  %v319_v41 = vld [vmem:[%s5439_s10 + $0x1b8] sm:$0xff] }
  0xfb   : > { %9754 = vst [vmem:[#allocation205_spill] sm:$0xff] %v6739_v43  ;;  %9755 = vst [vmem:[#allocation206_spill] sm:$0xff] %v6755_v60  ;;  %v6758_v61 = vsel %vm998_vm1, %v1094_v19, %v1096_v32  ;;  %v320_v60 = vld [vmem:[%s5439_s10 + $0x1c0] sm:$0xff]  ;;  %v446_v27 = vmul.f32 %v6559_v56, %v319_v41  ;;  %v9765_v41 = vpack.i.bf16 %v5747_v28, %v5744_v50  ;;  %v1267_v28 = vrot.slane %v6687_v10, 1 }
  0xfc   : > { %9756 = vst [vmem:[#allocation207_spill] sm:$0xff] %v6758_v61  ;;  %v6762_v18 = vpack.i.bf16 %v6746_v24, %v6749_v23  ;;  %v1098_v13 = vrot.slane %v6749_v23, 7  ;;  %v1100_v43 = vrot.slane %v6746_v24, 7  ;;  %v572_v61 = vmax.f32 %v512_v49, 0.0 }
  0xfd   : > { %v6764_v63 = vpop.permute.xlu1 %845  ;;  %v6766_v17 = vpop.permute.xlu0 %840 }
  0xfe   : > { %9757 = vst [vmem:[#allocation208_spill] sm:$0xff] %v6762_v18  ;;  %9758 = vst [vmem:[#allocation209_spill] sm:$0xff] %v6764_v63  ;;  %v6776_v19 = vmul.f32 %v6764_v63, %v571_v5  ;;  %v6779_v52 = vmul.f32 %v6766_v17, %v570_v39  ;;  %4260 = vrot.lane.b32.xlu1 %v6762_v18, %s5232_s18  ;;  %v6785_v37 = vsel %vm998_vm1, %v1096_v32, %v1098_v13 }
  0xff   : > { %9759 = vst [vmem:[#allocation210_spill] sm:$0xff] %v6766_v17  ;;  %9760 = vst [vmem:[#allocation211_spill] sm:$0xff] %v6785_v37  ;;  %v6788_v25 = vsel %vm998_vm1, %v1098_v13, %v1100_v43  ;;  %v321_v13 = vld [vmem:[%s5439_s10 + $0x1c8] sm:$0xff]  ;;  %v447_v18 = vmul.f32 %v6559_v56, %v320_v60  ;;  %v1253_v17 = vrot.slane %v6581_v9, 1  ;;  %v9772_v60 = vrot.slane %v6528_v36, 1 }
 0x100   : > { %9761 = vst [vmem:[#allocation212_spill] sm:$0xff] %v6788_v25  ;;  %v6793_v5 = vpack.i.bf16 %v6776_v19, %v6779_v52  ;;  %v1102_v63 = vrot.slane %v6779_v52, 7  ;;  %v448_v50 = vmul.f32 %v6559_v56, %v321_v13  ;;  %v1257_v13 = vrot.slane %v6625_v3, 1 }
 0x101   : > { %v6795_v39 = vpop.permute.xlu0 %850  ;;  %v6885_v40 = vpop.permute.xlu1 %855  ;;  %v9799_v12 = vrot.slane %v6776_v19, 7 }
 0x102   : > { %9762 = vst [vmem:[#allocation213_spill] sm:$0xff] %v6793_v5  ;;  %9763 = vst [vmem:[#allocation214_spill] sm:$0xff] %v6795_v39  ;;  %v6802_v32 = vmul.f32 %v6795_v39, %v572_v61  ;;  %4265 = vrot.lane.b32.xlu0 %v6793_v5, %s5232_s18  ;;  %4270 = vrot.lane.b32.xlu1 %v9765_v41, %s5233_s25  ;;  %v6814_v31 = vsel %vm998_vm1, %v1100_v43, %v1102_v63  ;;  %v9767_v61 = vrot.slane %v6776_v19, 7  ;;  %s5241_s18 = smov 64  }
 0x103   : > { %9766 = vst [vmem:[#allocation216_spill] sm:$0xff] %v6814_v31  ;;  %v513_v39 = vadd.f32 %v6511_v16, %v446_v27  ;;  %v1251_v5 = vrot.slane %v6523_v8, 1  ;;  %v514_v43 = vadd.f32 %v6511_v16, %v447_v18  ;;  %v9769_v41 = vpack.i.bf16 %v5792_v6, %v5753_v44  ;;  %9782 = vst [vmem:[#allocation228_spill] sm:$0xff] %v6885_v40 }
 0x104   : > { %9764 = vst [vmem:[#allocation215_spill] sm:$0xff] %v6802_v32  ;;  %v6819_v49 = vsel %vm998_vm1, %v1102_v63, %v9767_v61  ;;  %v9770_v63 = vpack.i.bf16 %v5838_v20, %v5804_v57  ;;  %v1255_v27 = vrot.slane %v6576_v58, 1  ;;  %v1259_v61 = vrot.slane %v6622_v15, 1 }
 0x105   : > { %9768 = vst [vmem:[#allocation217_spill] sm:$0xff] %v6819_v49  ;;  %v6838_v56 = vsel %vm1173_vm0, %v1251_v5, %v1253_v17  ;;  %v1261_v18 = vrot.slane %v6659_v47, 1  ;;  %v6847_v44 = vsel %vm1173_vm0, %v9772_v60, %v1251_v5  ;;  %v573_v33 = vmax.f32 %v513_v39, 0.0 }
 0x106   : > { %4275 = vrot.lane.b32.xlu0 %v9769_v41, %s5233_s25  ;;  %4280 = vrot.lane.b32.xlu1 %v9770_v63, %s5233_s25  ;;  %9771 = vst [vmem:[#allocation218_spill] sm:$0xff] %v6838_v56  ;;  %9773 = vst [vmem:[#allocation219_spill] sm:$0xff] %v6847_v44  ;;  %v1263_v41 = vrot.slane %v6656_v29, 1  ;;  %v1265_v63 = vrot.slane %v6690_v7, 1  ;;  %v6854_v45 = vpack.i.bf16 %v6838_v56, %v6847_v44  ;;  %v574_v6 = vmax.f32 %v514_v43, 0.0  ;;  %v6909_v44 = vpop.permute.xlu0 %860 }
 0x107   : > { %v515_v20 = vadd.f32 %v6511_v16, %v448_v50  ;;  %v6864_v5 = vsel %vm1173_vm0, %v1253_v17, %v1255_v27  ;;  %v6867_v39 = vsel %vm1173_vm0, %v1255_v27, %v1257_v13  ;;  %v6870_v60 = vsel %vm1173_vm0, %v1257_v13, %v1259_v61  ;;  %9785 = vst [vmem:[#allocation231_spill] sm:$0xff] %v6909_v44 }
 0x108   : > { %9774 = vst [vmem:[#allocation220_spill] sm:$0xff] %v6854_v45  ;;  %9775 = vst [vmem:[#allocation221_spill] sm:$0xff] %v6864_v5  ;;  %v6873_v11 = vsel %vm1173_vm0, %v1259_v61, %v1261_v18  ;;  %v6876_v16 = vsel %vm1173_vm0, %v1261_v18, %v1263_v41  ;;  %v6879_v50 = vsel %vm1173_vm0, %v1263_v41, %v1265_v63  ;;  %v1269_v17 = vrot.slane %v6721_v51, 1 }
 0x109   : > { %9776 = vst [vmem:[#allocation222_spill] sm:$0xff] %v6867_v39  ;;  %9777 = vst [vmem:[#allocation223_spill] sm:$0xff] %v6870_v60  ;;  %v6882_v43 = vsel %vm1173_vm0, %v1265_v63, %v1267_v28  ;;  %v1271_v27 = vrot.slane %v6718_v4, 1  ;;  %v1273_v13 = vrot.slane %v6749_v23, 1  ;;  %v1275_v18 = vrot.slane %v6746_v24, 1 }
 0x10a   : > { %4285 = vrot.lane.b32.xlu0 %v5891_v53, %s5233_s25  ;;  %4290 = vrot.lane.b32.xlu1 %v5935_v59, %s5233_s25  ;;  %9778 = vst [vmem:[#allocation224_spill] sm:$0xff] %v6873_v11  ;;  %9779 = vst [vmem:[#allocation225_spill] sm:$0xff] %v6876_v16  ;;  %v1277_v41 = vrot.slane %v6779_v52, 1  ;;  %v6899_v63 = vpack.i.bf16 %v6867_v39, %v6864_v5  ;;  %v1279_v59 = vrot.slane %v6776_v19, 1  ;;  %v575_v54 = vmax.f32 %v515_v20, 0.0 }
 0x10b   : > { %9780 = vst [vmem:[#allocation226_spill] sm:$0xff] %v6879_v50  ;;  %9781 = vst [vmem:[#allocation227_spill] sm:$0xff] %v6882_v43  ;;  %v6907_v2 = vmul.f32 %v6885_v40, %v573_v33  ;;  %v6918_v53 = vsel %vm1173_vm0, %v1267_v28, %v1269_v17  ;;  %v6921_v21 = vsel %vm1173_vm0, %v1269_v17, %v1271_v27  ;;  %v1281_v30 = vrot.slane %v6802_v32, 1 }
 0x10c   : > { %9783 = vst [vmem:[#allocation229_spill] sm:$0xff] %v6899_v63  ;;  %9787 = vst [vmem:[#allocation233_spill] sm:$0xff] %v6918_v53  ;;  %v6928_v33 = vsel %vm1173_vm0, %v1271_v27, %v1273_v13  ;;  %v6931_v61 = vsel %vm1173_vm0, %v1273_v13, %v1275_v18  ;;  %v6936_v17 = vmul.f32 %v6909_v44, %v574_v6  ;;  %v1106_v6 = vrot.slane %v6802_v32, 7 }
 0x10d   : > { %9784 = vst [vmem:[#allocation230_spill] sm:$0xff] %v6907_v2  ;;  %9788 = vst [vmem:[#allocation234_spill] sm:$0xff] %v6921_v21  ;;  %v6939_v20 = vsel %vm1173_vm0, %v1275_v18, %v1277_v41  ;;  %v6943_v40 = vpack.i.bf16 %v6879_v50, %v6876_v16  ;;  %v1108_v27 = vrot.slane %v6907_v2, 7  ;;  %v6948_v13 = vsel %vm1173_vm0, %v1277_v41, %v1279_v59 }
 0x10e   : > { %4295 = vrot.lane.b32.xlu0 %v5980_v62, %s5233_s25  ;;  %4300 = vrot.lane.b32.xlu1 %v6028_v0, %s5233_s25  ;;  %v6913_v0 = vpack.i.bf16 %v6873_v11, %v6870_v60  ;;  %9789 = vst [vmem:[#allocation235_spill] sm:$0xff] %v6928_v33  ;;  %9790 = vst [vmem:[#allocation236_spill] sm:$0xff] %v6931_v61  ;;  %v866_v62 = vpop.permute.xlu1 %865  ;;  %v6963_v41 = vpack.i.bf16 %v6918_v53, %v6882_v43  ;;  %v1110_v39 = vrot.slane %v6936_v17, 7 }
 0x10f   : > { %9791 = vst [vmem:[#allocation237_spill] sm:$0xff] %v6936_v17  ;;  %9792 = vst [vmem:[#allocation238_spill] sm:$0xff] %v6939_v20  ;;  %v6955_v44 = vmul.f32 %v866_v62, %v575_v54  ;;  %v6970_v18 = vpack.i.bf16 %v6928_v33, %v6921_v21  ;;  %v1283_v62 = vrot.slane %v6907_v2, 1  ;;  %v1285_v54 = vrot.slane %v6936_v17, 1  ;;  %v9823_v2 = vld [vmem:[#allocation36_spill] sm:$0xff] }
 0x110   : > { %9786 = vst [vmem:[#allocation232_spill] sm:$0xff] %v6913_v0  ;;  %9793 = vst [vmem:[#allocation239_spill] sm:$0xff] %v6943_v40  ;;  %v6975_v11 = vsel %vm1173_vm0, %v1279_v59, %v1281_v30  ;;  %v6982_v1 = vsel %vm998_vm1, %v9799_v12, %v1106_v6  ;;  %v6985_v28 = vsel %vm998_vm1, %v1106_v6, %v1108_v27  ;;  %v9807_v59 = vld [vmem:[#allocation145_spill] sm:$0xff] }
 0x111   : > { %9794 = vst [vmem:[#allocation240_spill] sm:$0xff] %v6948_v13  ;;  %9795 = vst [vmem:[#allocation241_spill] sm:$0xff] %v6955_v44  ;;  %v6989_v50 = vpack.i.bf16 %v6939_v20, %v6931_v61  ;;  %v7000_v6 = vsel %vm998_vm1, %v1108_v27, %v1110_v39  ;;  %v7004_v16 = vpack.i.bf16 %v6975_v11, %v6948_v13  ;;  %v9808_v53 = vrot.slane %v6955_v44, 7  ;;  %v9818_v27 = vld [vmem:[#allocation18_spill] sm:$0xff]  ;;  %v9824_v13 = vld [vmem:[#allocation37_spill] sm:$0xff] }
 0x112   : > { %4305 = vrot.lane.b32.xlu0 %v6073_v14, %s5233_s25  ;;  %4310 = vrot.lane.b32.xlu1 %v6119_v35, %s5233_s25  ;;  %9796 = vst [vmem:[#allocation242_spill] sm:$0xff] %v6963_v41  ;;  %9797 = vst [vmem:[#allocation243_spill] sm:$0xff] %v6970_v18  ;;  %v7013_v21 = vsel %vm1173_vm0, %v1281_v30, %v1283_v62  ;;  %v7016_v12 = vsel %vm1173_vm0, %v1283_v62, %v1285_v54  ;;  %v9810_v62 = vrot.slane %v6955_v44, 1  ;;  %v7070_v44 = vpop.permute.xlu0 %870  ;;  %v7074_v17 = vpop.permute.xlu1 %875 }
 0x113   : > { %9798 = vst [vmem:[#allocation244_spill] sm:$0xff] %v6975_v11  ;;  %9800 = vst [vmem:[#allocation245_spill] sm:$0xff] %v6982_v1  ;;  %v7029_v30 = vsel %vm998_vm1, %v1110_v39, %v9808_v53  ;;  %v9813_v53 = vld [vmem:[#allocation165_spill] sm:$0xff] }
 0x114   : > { %9801 = vst [vmem:[#allocation246_spill] sm:$0xff] %v6985_v28  ;;  %9802 = vst [vmem:[#allocation247_spill] sm:$0xff] %v6989_v50  ;;  %v7034_v43 = vsel %vm1173_vm0, %v1285_v54, %v9810_v62  ;;  %v9814_v39 = vld [vmem:[#allocation173_spill] sm:$0xff]  ;;  %v9815_v54 = vld [vmem:[#allocation180_spill] sm:$0xff] }
 0x115   : > { %9803 = vst [vmem:[#allocation248_spill] sm:$0xff] %v7000_v6  ;;  %9804 = vst [vmem:[#allocation249_spill] sm:$0xff] %v7004_v16  ;;  %v9816_v62 = vld [vmem:[#allocation10_spill] sm:$0xff]  ;;  %v9817_v11 = vld [vmem:[#allocation17_spill] sm:$0xff] }
 0x116   : > { %4315 = vrot.lane.b32.xlu0 %v6164_v26, %s5233_s25  ;;  %4320 = vrot.lane.b32.xlu1 %v6212_v38, %s5233_s25  ;;  %9805 = vst [vmem:[#allocation250_spill] sm:$0xff] %v7013_v21  ;;  %9806 = vst [vmem:[#allocation251_spill] sm:$0xff] %v7016_v12  ;;  %v9812_v21 = vld [vmem:[#allocation155_spill] sm:$0xff]  ;;  %v4404_v33 = vpack.i.bf16 %v9817_v11, %v9816_v62  ;;  %v9843_v11 = vld [vmem:[#allocation106_spill] sm:$0xff] }
 0x117   : > { %9809 = vst [vmem:[#allocation252_spill] sm:$0xff] %v7029_v30  ;;  %9811 = vst [vmem:[#allocation253_spill] sm:$0xff] %v7034_v43  ;;  %v9819_v43 = vld [vmem:[#allocation26_spill] sm:$0xff]  ;;  %v9822_v12 = vld [vmem:[#allocation27_spill] sm:$0xff] }
 0x118   : > { %v4409_v30 = vpack.i.bf16 %v9819_v43, %v9818_v27  ;;  %9820 = vst [vmem:[#allocation254_spill] sm:$0xff] %v7070_v44  ;;  %9821 = vst [vmem:[#allocation255_spill] sm:$0xff] %v7074_v17  ;;  %v4414_v20 = vpack.i.bf16 %v9823_v2, %v9822_v12  ;;  %v7084_v44 = vpop.permute.xlu1 %4140  ;;  %v9856_v38 = vld [vmem:[#allocation157_spill] sm:$0xff]  ;;  %v9857_v26 = vld [vmem:[#allocation166_spill] sm:$0xff] }
 0x119   : > { %9827 = vst [vmem:[#allocation257_spill] sm:$0xff] %v7084_v44  ;;  %v4479_v35 = vpack.i.bf16 %v9857_v26, %v9856_v38 }
 0x11a   : > { %4325 = vrot.lane.b32.xlu0 %v6257_v42, %s5233_s25  ;;  %4330 = vrot.lane.b32.xlu1 %v6303_v48, %s5233_s25  ;;  %v9853_v48 = vld [vmem:[#allocation146_spill] sm:$0xff] }
 0x11c   : > { %v7094_v60 = vpop.permute.xlu1 %4150 }
 0x11e   : > { %4335 = vrot.lane.b32.xlu0 %v6348_v55, %s5233_s25  ;;  %4340 = vrot.lane.b32.xlu1 %v9807_v59, %s5233_s25 }
 0x120   : > { %v7104_v59 = vpop.permute.xlu1 %4160 }
 0x122   : > { %4345 = vrot.lane.b32.xlu0 %v9812_v21, %s5233_s25  ;;  %4350 = vrot.lane.b32.xlu1 %v9813_v53, %s5233_s25  ;;  %v9831_v53 = vld [vmem:[#allocation66_spill] sm:$0xff]  ;;  %v9834_v21 = vld [vmem:[#allocation67_spill] sm:$0xff] }
 0x123   : > { %9839 = vst [vmem:[#allocation67_spill] sm:$0xff] %v7104_v59 }
 0x124   : > { %v7114_v55 = vpop.permute.xlu1 %4170 }
 0x126   : > { %4355 = vrot.lane.b32.xlu0 %v9814_v39, %s5233_s25  ;;  %4360 = vrot.lane.b32.xlu1 %v9815_v54, %s5233_s25 }
 0x129   : > { %v7124_v44 = vpop.permute.xlu1 %4180 }
 0x12a   : > { %4365 = vrot.lane.b32.xlu0 %v6854_v45, %s5233_s25  ;;  %4370 = vrot.lane.b32.xlu1 %v6899_v63, %s5233_s25  ;;  %v9842_v63 = vld [vmem:[#allocation97_spill] sm:$0xff] }
 0x12e   : > { %4375 = vrot.lane.b32.xlu0 %v6913_v0, %s5233_s25  ;;  %4380 = vrot.lane.b32.xlu1 %v6943_v40, %s5233_s25  ;;  %v9837_v0 = vld [vmem:[#allocation86_spill] sm:$0xff] }
 0x132   : > { %4385 = vrot.lane.b32.xlu0 %v6963_v41, %s5233_s25  ;;  %4390 = vrot.lane.b32.xlu1 %v6970_v18, %s5233_s25  ;;  %v9828_v18 = vld [vmem:[#allocation47_spill] sm:$0xff] }
 0x133   : > { %v7134_v42 = vpop.permute.xlu1 %4190 }
 0x136   : > { %4395 = vrot.lane.b32.xlu0 %v6989_v50, %s5233_s25  ;;  %4400 = vrot.lane.b32.xlu1 %v7004_v16, %s5233_s25  ;;  %v9825_v16 = vld [vmem:[#allocation46_spill] sm:$0xff]  ;;  %v7080_v50 = vpop.permute.xlu0 %4135 }
 0x137   : > { %v4419_v61 = vpack.i.bf16 %v9825_v16, %v9824_v13  ;;  %9826 = vst [vmem:[#allocation256_spill] sm:$0xff] %v7080_v50 }
 0x13a   : > { %4405 = vrot.lane.b32.xlu0 %v4404_v33, %s5234_s26  ;;  %4410 = vrot.lane.b32.xlu1 %v4409_v30, %s5234_s26  ;;  %v9829_v33 = vld [vmem:[#allocation56_spill] sm:$0xff]  ;;  %v9830_v30 = vld [vmem:[#allocation57_spill] sm:$0xff]  ;;  %v7092_v40 = vpop.permute.xlu0 %4145 }
 0x13b   : > { %v4424_v41 = vpack.i.bf16 %v9829_v33, %v9828_v18  ;;  %v4429_v17 = vpack.i.bf16 %v9831_v53, %v9830_v30  ;;  %9832 = vst [vmem:[#allocation56_spill] sm:$0xff] %v7092_v40  ;;  %9833 = vst [vmem:[#allocation57_spill] sm:$0xff] %v7094_v60  ;;  %v4449_v60 = vpack.i.bf16 %v9843_v11, %v9842_v63  ;;  %v9849_v40 = vld [vmem:[#allocation126_spill] sm:$0xff] }
 0x13e   : > { %4415 = vrot.lane.b32.xlu0 %v4414_v20, %s5234_s26  ;;  %4420 = vrot.lane.b32.xlu1 %v4419_v61, %s5234_s26  ;;  %v9835_v20 = vld [vmem:[#allocation76_spill] sm:$0xff]  ;;  %v9836_v61 = vld [vmem:[#allocation77_spill] sm:$0xff]  ;;  %v7102_v5 = vpop.permute.xlu0 %4155 }
 0x13f   : > { %v4434_v34 = vpack.i.bf16 %v9835_v20, %v9834_v21  ;;  %v4439_v56 = vpack.i.bf16 %v9837_v0, %v9836_v61  ;;  %9838 = vst [vmem:[#allocation66_spill] sm:$0xff] %v7102_v5  ;;  %9845 = vst [vmem:[#allocation77_spill] sm:$0xff] %v7114_v55  ;;  %v9848_v5 = vld [vmem:[#allocation117_spill] sm:$0xff] }
 0x140   : > { %v4459_v59 = vpack.i.bf16 %v9849_v40, %v9848_v5  ;;  %v9861_v40 = vld [vmem:[#allocation181_spill] sm:$0xff] }
 0x142   : > { %4425 = vrot.lane.b32.xlu0 %v4424_v41, %s5234_s26  ;;  %4430 = vrot.lane.b32.xlu1 %v4429_v17, %s5234_s26  ;;  %v9840_v41 = vld [vmem:[#allocation87_spill] sm:$0xff]  ;;  %v9841_v17 = vld [vmem:[#allocation96_spill] sm:$0xff]  ;;  %v7112_v27 = vpop.permute.xlu0 %4165 }
 0x143   : > { %v4444_v46 = vpack.i.bf16 %v9841_v17, %v9840_v41  ;;  %9844 = vst [vmem:[#allocation76_spill] sm:$0xff] %v7112_v27  ;;  %v9852_v27 = vld [vmem:[#allocation137_spill] sm:$0xff] }
 0x144   : > { %v4469_v55 = vpack.i.bf16 %v9853_v48, %v9852_v27  ;;  %v7144_v48 = vpop.permute.xlu1 %4200  ;;  %v9860_v27 = vld [vmem:[#allocation175_spill] sm:$0xff] }
 0x146   : > { %4435 = vrot.lane.b32.xlu0 %v4434_v34, %s5234_s26  ;;  %4440 = vrot.lane.b32.xlu1 %v4439_v56, %s5234_s26  ;;  %v9846_v34 = vld [vmem:[#allocation107_spill] sm:$0xff]  ;;  %v9847_v56 = vld [vmem:[#allocation116_spill] sm:$0xff]  ;;  %v7122_v50 = vpop.permute.xlu0 %4175 }
 0x147   : > { %v4454_v62 = vpack.i.bf16 %v9847_v56, %v9846_v34  ;;  %v9866_v56 = vld [vmem:[#allocation191_spill] sm:$0xff] }
 0x148   : > { %v7154_v26 = vpop.permute.xlu1 %4210 }
 0x149   : > { %9862 = vst [vmem:[#allocation258_spill] sm:$0xff] %v7154_v26 }
 0x14a   : > { %4445 = vrot.lane.b32.xlu0 %v4444_v46, %s5234_s26  ;;  %4450 = vrot.lane.b32.xlu1 %v4449_v60, %s5234_s26  ;;  %v9850_v46 = vld [vmem:[#allocation127_spill] sm:$0xff]  ;;  %v9851_v60 = vld [vmem:[#allocation136_spill] sm:$0xff]  ;;  %v7132_v54 = vpop.permute.xlu0 %4185 }
 0x14b   : > { %v4464_v45 = vpack.i.bf16 %v9851_v60, %v9850_v46  ;;  %v4489_v46 = vpack.i.bf16 %v9861_v40, %v9860_v27  ;;  %v9869_v27 = vld [vmem:[#allocation197_spill] sm:$0xff] }
 0x14e   : > { %4455 = vrot.lane.b32.xlu0 %v4454_v62, %s5234_s26  ;;  %4460 = vrot.lane.b32.xlu1 %v4459_v59, %s5234_s26  ;;  %v9854_v62 = vld [vmem:[#allocation147_spill] sm:$0xff]  ;;  %v9855_v59 = vld [vmem:[#allocation156_spill] sm:$0xff]  ;;  %v7142_v14 = vpop.permute.xlu0 %4195 }
 0x14f   : > { %v4474_v39 = vpack.i.bf16 %v9855_v59, %v9854_v62  ;;  %v9865_v62 = vld [vmem:[#allocation187_spill] sm:$0xff] }
 0x150   : > { %v4499_v5 = vpack.i.bf16 %v9866_v56, %v9865_v62 }
 0x151   : > { %v7164_v40 = vpop.permute.xlu1 %4220 }
 0x152   : > { %4465 = vrot.lane.b32.xlu0 %v4464_v45, %s5234_s26  ;;  %4470 = vrot.lane.b32.xlu1 %v4469_v55, %s5234_s26  ;;  %v9858_v45 = vld [vmem:[#allocation167_spill] sm:$0xff]  ;;  %v9859_v55 = vld [vmem:[#allocation174_spill] sm:$0xff]  ;;  %v7152_v59 = vpop.permute.xlu0 %4205  ;;  %9867 = vst [vmem:[#allocation259_spill] sm:$0xff] %v7164_v40 }
 0x153   : > { %v4484_v60 = vpack.i.bf16 %v9859_v55, %v9858_v45  ;;  %v9870_v45 = vld [vmem:[#allocation201_spill] sm:$0xff] }
 0x154   : > { %v4509_v26 = vpack.i.bf16 %v9870_v45, %v9869_v27 }
 0x156   : > { %4475 = vrot.lane.b32.xlu0 %v4474_v39, %s5234_s26  ;;  %4480 = vrot.lane.b32.xlu1 %v4479_v35, %s5234_s26  ;;  %v9863_v39 = vld [vmem:[#allocation182_spill] sm:$0xff]  ;;  %v7162_v55 = vpop.permute.xlu0 %4215 }
 0x157   : > { %v9864_v35 = vld [vmem:[#allocation186_spill] sm:$0xff] }
 0x158   : > { %v4494_v38 = vpack.i.bf16 %v9864_v35, %v9863_v39  ;;  %v9873_v39 = vld [vmem:[#allocation207_spill] sm:$0xff] }
 0x159   : > { %v4519_v40 = vpack.i.bf16 %v6785_v37, %v9873_v39 }
 0x15a   : > { %4485 = vrot.lane.b32.xlu0 %v4484_v60, %s5234_s26  ;;  %4490 = vrot.lane.b32.xlu1 %v4489_v46, %s5234_s26  ;;  %v9868_v60 = vld [vmem:[#allocation192_spill] sm:$0xff]  ;;  %v7172_v35 = vpop.permute.xlu0 %4225 }
 0x15b   : > { %v4504_v46 = vpack.i.bf16 %v6697_v22, %v9868_v60  ;;  %v7174_v56 = vpop.permute.xlu1 %4230  ;;  %v9890_v60 = vld [vmem:[#allocation42_spill] sm:$0xff] }
 0x15e   : > { %4495 = vrot.lane.b32.xlu0 %v4494_v38, %s5234_s26  ;;  %4500 = vrot.lane.b32.xlu1 %v4499_v5, %s5234_s26  ;;  %v9871_v38 = vld [vmem:[#allocation202_spill] sm:$0xff]  ;;  %v7182_v22 = vpop.permute.xlu0 %4235 }
 0x15f   : > { %v9872_v5 = vld [vmem:[#allocation206_spill] sm:$0xff] }
 0x160   : > { %v4514_v62 = vpack.i.bf16 %v9872_v5, %v9871_v38  ;;  %v9882_v38 = vld [vmem:[#allocation23_spill] sm:$0xff] }
 0x161   : > { %v7184_v45 = vpop.permute.xlu1 %4240 }
 0x162   : > { %4505 = vrot.lane.b32.xlu0 %v4504_v46, %s5234_s26  ;;  %4510 = vrot.lane.b32.xlu1 %v4509_v26, %s5234_s26  ;;  %v4524_v26 = vpack.i.bf16 %v6814_v31, %v6788_v25  ;;  %v4529_v46 = vpack.i.bf16 %v6982_v1, %v6819_v49  ;;  %v9875_v31 = vld [vmem:[#allocation4_spill] sm:$0xff]  ;;  %v9880_v49 = vld [vmem:[#allocation7_spill] sm:$0xff] }
 0x164   : > { %v7192_v5 = vpop.permute.xlu0 %4245 }
 0x166   : > { %4515 = vrot.lane.b32.xlu0 %v4514_v62, %s5234_s26  ;;  %4520 = vrot.lane.b32.xlu1 %v4519_v40, %s5234_s26  ;;  %v4534_v40 = vpack.i.bf16 %v7000_v6, %v6985_v28  ;;  %v9874_v62 = vld [vmem:[#allocation8_spill] sm:$0xff]  ;;  %v9883_v6 = vld [vmem:[#allocation14_spill] sm:$0xff] }
 0x167   : > { %v9876_v25 = vpack.i.bf16 %v9874_v62, %v9875_v31  ;;  %v9884_v28 = vpack.i.bf16 %v9882_v38, %v9883_v6  ;;  %v9887_v31 = vld [vmem:[#allocation32_spill] sm:$0xff]  ;;  %v9896_v6 = vld [vmem:[#allocation41_spill] sm:$0xff] }
 0x168   : > { %v7194_v37 = vpop.permute.xlu1 %4250 }
 0x16a   : > { %4525 = vrot.lane.b32.xlu0 %v4524_v26, %s5234_s26  ;;  %4530 = vrot.lane.b32.xlu1 %v4529_v46, %s5234_s26  ;;  %v9879_v46 = vld [vmem:[#allocation15_spill] sm:$0xff] }
 0x16b   : > { %v9881_v39 = vpack.i.bf16 %v9879_v46, %v9880_v49  ;;  %v9898_v46 = vld [vmem:[#allocation62_spill] sm:$0xff] }
 0x16c   : > { %v7203_v1 = vpop.permute.xlu0 %4255 }
 0x16d   : > { %9877 = vst [vmem:[#allocation8_spill] sm:$0xff] %v7203_v1 }
 0x16e   : > { %4535 = vrot.lane.b32.xlu0 %v4534_v40, %s5234_s26  ;;  %4540 = vrot.lane.b32.xlu1 %v9876_v25, %s5235_s27  ;;  %v9888_v25 = vld [vmem:[#allocation22_spill] sm:$0xff] }
 0x16f   : > { %v9889_v62 = vpack.i.bf16 %v9887_v31, %v9888_v25 }
 0x170   : > { %v7205_v26 = vpop.permute.xlu1 %4260 }
 0x171   : > { %9878 = vst [vmem:[#allocation4_spill] sm:$0xff] %v7205_v26  ;;  %v9891_v26 = vld [vmem:[#allocation31_spill] sm:$0xff] }
 0x172   : > { %4545 = vrot.lane.b32.xlu0 %v9881_v39, %s5235_s27  ;;  %4550 = vrot.lane.b32.xlu1 %v9884_v28, %s5235_s27  ;;  %v9892_v1 = vpack.i.bf16 %v9890_v60, %v9891_v26  ;;  %v9895_v28 = vld [vmem:[#allocation52_spill] sm:$0xff]  ;;  %v9904_v60 = vld [vmem:[#allocation61_spill] sm:$0xff] }
 0x173   : > { %v9897_v38 = vpack.i.bf16 %v9895_v28, %v9896_v6 }
 0x174   : > { %v7215_v40 = vpop.permute.xlu0 %4265  ;;  %v7217_v27 = vpop.permute.xlu1 %4270 }
 0x175   : > { %9885 = vst [vmem:[#allocation15_spill] sm:$0xff] %v7215_v40  ;;  %9886 = vst [vmem:[#allocation7_spill] sm:$0xff] %v7217_v27  ;;  %v9899_v27 = vld [vmem:[#allocation51_spill] sm:$0xff] }
 0x176   : > { %4555 = vrot.lane.b32.xlu0 %v9889_v62, %s5235_s27  ;;  %4560 = vrot.lane.b32.xlu1 %v9892_v1, %s5235_s27  ;;  %v9900_v40 = vpack.i.bf16 %v9898_v46, %v9899_v27  ;;  %v9903_v1 = vld [vmem:[#allocation72_spill] sm:$0xff]  ;;  %v9906_v62 = vld [vmem:[#allocation82_spill] sm:$0xff] }
 0x177   : > { %v9905_v26 = vpack.i.bf16 %v9903_v1, %v9904_v60  ;;  %v9911_v27 = vld [vmem:[#allocation92_spill] sm:$0xff]  ;;  %v9914_v46 = vld [vmem:[#allocation102_spill] sm:$0xff] }
 0x178   : > { %v7227_v49 = vpop.permute.xlu0 %4275  ;;  %v7229_v39 = vpop.permute.xlu1 %4280 }
 0x179   : > { %9893 = vst [vmem:[#allocation23_spill] sm:$0xff] %v7227_v49  ;;  %9894 = vst [vmem:[#allocation14_spill] sm:$0xff] %v7229_v39  ;;  %v9907_v39 = vld [vmem:[#allocation71_spill] sm:$0xff] }
 0x17a   : > { %4565 = vrot.lane.b32.xlu0 %v9897_v38, %s5235_s27  ;;  %4570 = vrot.lane.b32.xlu1 %v9900_v40, %s5235_s27  ;;  %v9908_v49 = vpack.i.bf16 %v9906_v62, %v9907_v39  ;;  %v9912_v40 = vld [vmem:[#allocation81_spill] sm:$0xff]  ;;  %v9922_v62 = vld [vmem:[#allocation122_spill] sm:$0xff] }
 0x17b   : > { %v9913_v38 = vpack.i.bf16 %v9911_v27, %v9912_v40  ;;  %v9920_v39 = vld [vmem:[#allocation101_spill] sm:$0xff] }
 0x17c   : > { %v7239_v31 = vpop.permute.xlu0 %4285  ;;  %v7241_v25 = vpop.permute.xlu1 %4290 }
 0x17d   : > { %9901 = vst [vmem:[#allocation32_spill] sm:$0xff] %v7239_v31  ;;  %9902 = vst [vmem:[#allocation22_spill] sm:$0xff] %v7241_v25  ;;  %v9915_v25 = vld [vmem:[#allocation91_spill] sm:$0xff] }
 0x17e   : > { %4575 = vrot.lane.b32.xlu0 %v9905_v26, %s5235_s27  ;;  %4580 = vrot.lane.b32.xlu1 %v9908_v49, %s5235_s27  ;;  %v9916_v31 = vpack.i.bf16 %v9914_v46, %v9915_v25  ;;  %v9919_v49 = vld [vmem:[#allocation112_spill] sm:$0xff]  ;;  %v9928_v25 = vld [vmem:[#allocation121_spill] sm:$0xff]  ;;  %v9930_v46 = vld [vmem:[#allocation142_spill] sm:$0xff] }
 0x17f   : > { %v9921_v26 = vpack.i.bf16 %v9919_v49, %v9920_v39 }
 0x180   : > { %v7251_v28 = vpop.permute.xlu0 %4295  ;;  %v7253_v6 = vpop.permute.xlu1 %4300 }
 0x181   : > { %9909 = vst [vmem:[#allocation42_spill] sm:$0xff] %v7251_v28  ;;  %9910 = vst [vmem:[#allocation31_spill] sm:$0xff] %v7253_v6  ;;  %v9923_v6 = vld [vmem:[#allocation111_spill] sm:$0xff] }
 0x182   : > { %4585 = vrot.lane.b32.xlu0 %v9913_v38, %s5235_s27  ;;  %4590 = vrot.lane.b32.xlu1 %v9916_v31, %s5235_s27  ;;  %v9924_v28 = vpack.i.bf16 %v9922_v62, %v9923_v6  ;;  %v9927_v31 = vld [vmem:[#allocation132_spill] sm:$0xff]  ;;  %v9934_v6 = vld [vmem:[#allocation141_spill] sm:$0xff]  ;;  %v9936_v62 = vld [vmem:[#allocation162_spill] sm:$0xff] }
 0x183   : > { %v9929_v38 = vpack.i.bf16 %v9927_v31, %v9928_v25  ;;  %v5214_v31 = vld [vmem:[%s9181_s2 + $0x20] ss:$0 sps:$4 sm:$0xff]   ;;  %v9471_v25 = vmov 0.0  }
 0x184   : > { %v7263_v1 = vpop.permute.xlu0 %4305  ;;  %v7265_v60 = vpop.permute.xlu1 %4310  ;;  %3983 = vmatprep.subr.bf16.mxu0 %v9471_v25  ;;  %4101 = vmatprep.subr.bf16.mxu1 %v9471_v25 }
 0x185   : > { %9917 = vst [vmem:[#allocation52_spill] sm:$0xff] %v7263_v1  ;;  %9918 = vst [vmem:[#allocation41_spill] sm:$0xff] %v7265_v60  ;;  %v9931_v1 = vld [vmem:[#allocation131_spill] sm:$0xff]  ;;  %3993 = vmatprep.mubr.msk.bf16.mxu0 %vm5238_vm3, %v9471_v25  ;;  %4049 = vmatprep.mubr.msk.bf16.mxu1 %vm5238_vm3, %v9471_v25 }
 0x186   : > { %4595 = vrot.lane.b32.xlu0 %v9921_v26, %s5235_s27  ;;  %4600 = vrot.lane.b32.xlu1 %v9924_v28, %s5235_s27  ;;  %v9932_v60 = vpack.i.bf16 %v9930_v46, %v9931_v1  ;;  %v9933_v28 = vld [vmem:[#allocation152_spill] sm:$0xff] }
 0x187   : > { %v9935_v26 = vpack.i.bf16 %v9933_v28, %v9934_v6  ;;  %v5215_v28 = vld [vmem:[%s9181_s2 + $0x18] sm:$0xff]  }
 0x188   : > { %v7275_v27 = vpop.permute.xlu0 %4315  ;;  %v7277_v40 = vpop.permute.xlu1 %4320 }
 0x189   : > { %9925 = vst [vmem:[#allocation62_spill] sm:$0xff] %v7275_v27  ;;  %9926 = vst [vmem:[#allocation51_spill] sm:$0xff] %v7277_v40  ;;  %v9937_v40 = vld [vmem:[#allocation151_spill] sm:$0xff] }
 0x18a   : > { %4605 = vrot.lane.b32.xlu0 %v9929_v38, %s5235_s27  ;;  %4610 = vrot.lane.b32.xlu1 %v9932_v60, %s5235_s27  ;;  %v9938_v27 = vpack.i.bf16 %v9936_v62, %v9937_v40  ;;  %v9939_v38 = vld [vmem:[#allocation161_spill] sm:$0xff]  ;;  %v3179_v40 = vsel %vm3177_vm2, %v5214_v31, 0 }
 0x18b   : > { %v9940_v46 = vpack.i.bf16 %v6528_v36, %v9939_v38  ;;  %3984 = vmatpush3.bf16.msra.mxu0 %v3179_v40  ;;  %4106 = vmatpush3.bf16.msra.mxu1 %v3179_v40  ;;  %v9943_v36 = vpack.i.bf16 %v6659_v47, %v6622_v15  ;;  %v9945_v15 = vpack.i.bf16 %v6721_v51, %v6687_v10  ;;  %v5217_v38 = vld [vmem:[%s9181_s2 + $0x8] sm:$0xff]   ;;  %v5218_v10 = vld [vmem:[%s9181_s2] sm:$0xff]  }
 0x18c   : > { %v7287_v49 = vpop.permute.xlu0 %4325  ;;  %v7289_v39 = vpop.permute.xlu1 %4330  ;;  %3985 = vmatprep.subr.bf16.mxu0 %v9471_v25  ;;  %4102 = vmatprep.subr.bf16.mxu1 %v9471_v25  ;;  %v9947_v51 = vpack.i.bf16 %v6779_v52, %v6746_v24  ;;  %v4674_v40 = vpack.i.bf16 %v9822_v12, %v9819_v43  ;;  %v9966_v43 = vld [vmem:[#allocation259_spill] sm:$0xff]  ;;  %v9967_v12 = vld [vmem:[#allocation117_spill] sm:$0xff] }
 0x18e   : > { %4615 = vrot.lane.b32.xlu0 %v9935_v26, %s5235_s27  ;;  %4620 = vrot.lane.b32.xlu1 %v9938_v27, %s5235_s27  ;;  %v9941_v27 = vpack.i.bf16 %v6581_v9, %v6523_v8  ;;  %v9942_v8 = vpack.i.bf16 %v6625_v3, %v6576_v58  ;;  %v5216_v9 = vld [vmem:[%s9181_s2 + $0x10] sm:$0xff]   ;;  %v9944_v58 = vpack.i.bf16 %v6690_v7, %v6656_v29 }
 0x18f   : > { %3986 = vmatpush3.bf16.msra.mxu0 %v5215_v28  ;;  %4107 = vmatpush3.bf16.msra.mxu1 %v5215_v28  ;;  %v9946_v29 = vpack.i.bf16 %v6749_v23, %v6718_v4  ;;  %v9950_v4 = vpack.i.bf16 %v6802_v32, %v6776_v19  ;;  %v9951_v23 = vld [vmem:[#allocation16_spill] sm:$0xff]  ;;  %v4178_v19 = vunpack.i.h.bf16 %v7122_v50  ;;  %v4177_v28 = vunpack.i.l.bf16 %v7122_v50 }
 0x190   : > { %v7302_v1 = vpop.permute.xlu0 %4335  ;;  %v7304_v60 = vpop.permute.xlu1 %4340  ;;  %3987 = vmatprep.subr.bf16.mxu0 %v9471_v25  ;;  %4103 = vmatprep.subr.bf16.mxu1 %v9471_v25  ;;  %v9952_v52 = vpack.i.bf16 %v5804_v57, %v9951_v23  ;;  %v9955_v57 = vld [vmem:[#allocation19_spill] sm:$0xff]  ;;  %v4208_v50 = vunpack.i.h.bf16 %v7152_v59 }
 0x191   : > { %v9958_v23 = vld [vmem:[#allocation35_spill] sm:$0xff] }
 0x192   : > { %4625 = vrot.lane.b32.xlu0 %v9940_v46, %s5235_s27  ;;  %4630 = vrot.lane.b32.xlu1 %v9941_v27, %s5235_s27 }
 0x193   : > { %3988 = vmatpush3.bf16.msra.mxu0 %v5216_v9  ;;  %4108 = vmatpush3.bf16.msra.mxu1 %v5216_v9  ;;  %v4188_v9 = vunpack.i.h.bf16 %v7132_v54 }
 0x194   : > { %v7319_v6 = vpop.permute.xlu0 %4345  ;;  %v7321_v26 = vpop.permute.xlu1 %4350  ;;  %3989 = vmatprep.subr.bf16.mxu0 %v9471_v25  ;;  %4104 = vmatprep.subr.bf16.mxu1 %v9471_v25 }
 0x196   : > { %4635 = vrot.lane.b32.xlu0 %v9942_v8, %s5235_s27  ;;  %4640 = vrot.lane.b32.xlu1 %v9943_v36, %s5235_s27  ;;  %v4183_v8 = vunpack.i.h.bf16 %v7124_v44  ;;  %v4182_v36 = vunpack.i.l.bf16 %v7124_v44 }
 0x197   : > { %3990 = vmatpush3.bf16.msra.mxu0 %v5217_v38  ;;  %4109 = vmatpush3.bf16.msra.mxu1 %v5217_v38 }
 0x198   : > { %v7336_v62 = vpop.permute.xlu0 %4355  ;;  %v7338_v31 = vpop.permute.xlu1 %4360  ;;  %3991 = vmatprep.subr.bf16.mxu0 %v9471_v25  ;;  %4105 = vmatprep.subr.bf16.mxu1 %v9471_v25  ;;  %v4203_v25 = vunpack.i.h.bf16 %v7144_v48 }
 0x19a   : > { %4645 = vrot.lane.b32.xlu0 %v9944_v58, %s5235_s27  ;;  %4650 = vrot.lane.b32.xlu1 %v9945_v15, %s5235_s27  ;;  %v4187_v58 = vunpack.i.l.bf16 %v7132_v54  ;;  %v4193_v54 = vunpack.i.h.bf16 %v7134_v42 }
 0x19b   : > { %3992 = vmatpush3.bf16.msra.mxu0 %v5218_v10  ;;  %4110 = vmatpush3.bf16.msra.mxu1 %v5218_v10  ;;  %v7431_v10 = vsel %vm2592_vm4, %v9836_v61, %v4178_v19 }
 0x19c   : > { %v7350_v3 = vpop.permute.xlu0 %4365  ;;  %v7352_v47 = vpop.permute.xlu1 %4370  ;;  %v7451_v19 = vsel %vm2592_vm4, %v9841_v17, %v4187_v58  ;;  %v7465_v58 = vsel %vm2592_vm4, %v9846_v34, %v4193_v54  ;;  %v4223_v54 = vunpack.i.h.bf16 %v9966_v43 }
 0x19e   : > { %4655 = vrot.lane.b32.xlu0 %v9946_v29, %s5235_s27  ;;  %4660 = vrot.lane.b32.xlu1 %v9947_v51, %s5235_s27  ;;  %v4694_v29 = vpack.i.bf16 %v9824_v13, %v9823_v2  ;;  %v4218_v13 = vunpack.i.h.bf16 %v7162_v55 }
 0x1a0   : > { %v7370_v7 = vpop.permute.xlu0 %4375  ;;  %v7372_v46 = vpop.permute.xlu1 %4380 }
 0x1a1   : > { %9948 = vst [vmem:[#allocation72_spill] sm:$0xff] %v7370_v7  ;;  %9949 = vst [vmem:[#allocation61_spill] sm:$0xff] %v7372_v46 }
 0x1a2   : > { %4665 = vrot.lane.b32.xlu0 %v9950_v4, %s5235_s27  ;;  %4670 = vrot.lane.b32.xlu1 %v9952_v52, %s5237_s15  ;;  %v4192_v4 = vunpack.i.l.bf16 %v7134_v42  ;;  %v9959_v52 = vld [vmem:[#allocation25_spill] sm:$0xff]  ;;  %v7435_v42 = vsel %vm2592_vm4, %v9835_v20, %v4177_v28  ;;  %v4197_v28 = vunpack.i.l.bf16 %v7142_v14 }
 0x1a4   : > { %v7384_v24 = vpop.permute.xlu0 %4385  ;;  %v7386_v27 = vpop.permute.xlu1 %4390  ;;  %v7469_v51 = vsel %vm2592_vm4, %v9843_v11, %v4192_v4 }
 0x1a5   : > { %9953 = vst [vmem:[#allocation82_spill] sm:$0xff] %v7384_v24  ;;  %9954 = vst [vmem:[#allocation71_spill] sm:$0xff] %v7386_v27  ;;  %v9994_v27 = vld [vmem:[#allocation4_spill] sm:$0xff] }
 0x1a6   : > { %4675 = vrot.lane.b32.xlu0 %v4674_v40, %s5239_s16  ;;  %4680 = vrot.lane.b32.xlu1 %v9955_v57, %s5240_s17  ;;  %v9960_v40 = vld [vmem:[#allocation24_spill] sm:$0xff] }
 0x1a7   : > { %v9961_v57 = vpack.i.bf16 %v9959_v52, %v9960_v40  ;;  %v7443_v52 = vsel %vm2592_vm4, %v9837_v0, %v4182_v36  ;;  %v7447_v40 = vsel %vm2592_vm4, %v9842_v63, %v4188_v9  ;;  %v4202_v36 = vunpack.i.l.bf16 %v7144_v48  ;;  %v9965_v48 = vld [vmem:[#allocation28_spill] sm:$0xff]  ;;  %v9995_v0 = vld [vmem:[#allocation187_spill] sm:$0xff] }
 0x1a8   : > { %v7403_v15 = vpop.permute.xlu0 %4395  ;;  %v7405_v38 = vpop.permute.xlu1 %4400  ;;  %v4207_v9 = vunpack.i.l.bf16 %v7152_v59  ;;  %v4217_v59 = vunpack.i.l.bf16 %v7162_v55  ;;  %v9971_v55 = vld [vmem:[#allocation127_spill] sm:$0xff] }
 0x1a9   : > { %9956 = vst [vmem:[#allocation92_spill] sm:$0xff] %v7403_v15  ;;  %9957 = vst [vmem:[#allocation81_spill] sm:$0xff] %v7405_v38  ;;  %v7496_v17 = vsel %vm2592_vm4, %v9971_v55, %v4203_v25  ;;  %v4233_v55 = vunpack.i.h.bf16 %v7174_v56  ;;  %v9985_v15 = vld [vmem:[#allocation175_spill] sm:$0xff] }
 0x1aa   : > { %4685 = vrot.lane.b32.xlu0 %v9958_v23, %s5241_s18  ;;  %4690 = vrot.lane.b32.xlu1 %v9961_v57, %s5237_s15  ;;  %v7439_v23 = vsel %vm2592_vm4, %v9840_v41, %v4183_v8  ;;  %v4198_v57 = vunpack.i.h.bf16 %v7142_v14  ;;  %v9964_v14 = vld [vmem:[#allocation258_spill] sm:$0xff] }
 0x1ab   : > { %v4213_v32 = vunpack.i.h.bf16 %v9964_v14  ;;  %v4212_v2 = vunpack.i.l.bf16 %v9964_v14  ;;  %v9996_v41 = vld [vmem:[#allocation186_spill] sm:$0xff] }
 0x1ac   : > { %v7455_v44 = vpop.permute.xlu0 %4405  ;;  %v7457_v8 = vpop.permute.xlu1 %4410  ;;  %v7482_v4 = vsel %vm2592_vm4, %v9967_v12, %v4198_v57  ;;  %v9973_v12 = vld [vmem:[#allocation137_spill] sm:$0xff] }
 0x1ad   : > { %9962 = vst [vmem:[#allocation102_spill] sm:$0xff] %v7455_v44  ;;  %9963 = vst [vmem:[#allocation91_spill] sm:$0xff] %v7457_v8  ;;  %v4222_v8 = vunpack.i.l.bf16 %v9966_v43  ;;  %v9968_v44 = vld [vmem:[#allocation116_spill] sm:$0xff]  ;;  %v9972_v43 = vld [vmem:[#allocation126_spill] sm:$0xff] }
 0x1ae   : > { %4695 = vrot.lane.b32.xlu0 %v4694_v29, %s5239_s16  ;;  %4700 = vrot.lane.b32.xlu1 %v9965_v48, %s5240_s17  ;;  %v7486_v14 = vsel %vm2592_vm4, %v9968_v44, %v4197_v28  ;;  %v4228_v29 = vunpack.i.h.bf16 %v7172_v35  ;;  %v4227_v48 = vunpack.i.l.bf16 %v7172_v35  ;;  %v7500_v57 = vsel %vm2592_vm4, %v9972_v43, %v4202_v36  ;;  %v9974_v44 = vld [vmem:[#allocation136_spill] sm:$0xff]  ;;  %v9975_v35 = vld [vmem:[#allocation147_spill] sm:$0xff]  ;;  %v9977_v43 = vld [vmem:[#allocation45_spill] sm:$0xff] }
 0x1af   : > { %v7504_v28 = vsel %vm2592_vm4, %v9973_v12, %v4208_v50  ;;  %v7508_v63 = vsel %vm2592_vm4, %v9974_v44, %v4207_v9  ;;  %v4232_v36 = vunpack.i.l.bf16 %v7174_v56  ;;  %v9978_v50 = vld [vmem:[#allocation34_spill] sm:$0xff]  ;;  %v9979_v12 = vld [vmem:[#allocation33_spill] sm:$0xff] }
 0x1b0   : > { %v7490_v34 = vpop.permute.xlu0 %4415  ;;  %v7492_v11 = vpop.permute.xlu1 %4420  ;;  %v9980_v9 = vpack.i.bf16 %v9978_v50, %v9979_v12  ;;  %v9981_v44 = vld [vmem:[#allocation157_spill] sm:$0xff]  ;;  %v9984_v56 = vld [vmem:[#allocation166_spill] sm:$0xff]  ;;  %v7544_v12 = vsel %vm2592_vm4, %v9985_v15, %v4228_v29  ;;  %v4247_v29 = vunpack.i.l.bf16 %v7192_v5 }
 0x1b1   : > { %9969 = vst [vmem:[#allocation112_spill] sm:$0xff] %v7490_v34  ;;  %9970 = vst [vmem:[#allocation101_spill] sm:$0xff] %v7492_v11  ;;  %v7512_v34 = vsel %vm2592_vm4, %v9975_v35, %v4213_v32  ;;  %v9976_v11 = vld [vmem:[#allocation146_spill] sm:$0xff]  ;;  %v7528_v32 = vsel %vm2592_vm4, %v9981_v44, %v4218_v13  ;;  %v9982_v35 = vld [vmem:[#allocation156_spill] sm:$0xff] }
 0x1b2   : > { %v7516_v25 = vsel %vm2592_vm4, %v9976_v11, %v4212_v2  ;;  %4705 = vrot.lane.b32.xlu0 %v9977_v43, %s5241_s18  ;;  %4710 = vrot.lane.b32.xlu1 %v9980_v9, %s5237_s15  ;;  %v7532_v2 = vsel %vm2592_vm4, %v9982_v35, %v4217_v59  ;;  %v9983_v11 = vld [vmem:[#allocation167_spill] sm:$0xff]  ;;  %v7540_v43 = vsel %vm2592_vm4, %v9984_v56, %v4222_v8  ;;  %v9986_v50 = vld [vmem:[#allocation174_spill] sm:$0xff]  ;;  %v4238_v59 = vunpack.i.h.bf16 %v7182_v22 }
 0x1b3   : > { %v7536_v38 = vsel %vm2592_vm4, %v9983_v11, %v4223_v54  ;;  %v7548_v13 = vsel %vm2592_vm4, %v9986_v50, %v4227_v48  ;;  %v4237_v9 = vunpack.i.l.bf16 %v7182_v22  ;;  %v4243_v8 = vunpack.i.h.bf16 %v7184_v45  ;;  %v9989_v15 = vld [vmem:[#allocation182_spill] sm:$0xff]  ;;  %v9990_v50 = vld [vmem:[#allocation181_spill] sm:$0xff] }
 0x1b4   : > { %v7552_v44 = vpop.permute.xlu0 %4425  ;;  %v7554_v54 = vpop.permute.xlu1 %4430  ;;  %v4242_v35 = vunpack.i.l.bf16 %v7184_v45  ;;  %v4248_v11 = vunpack.i.h.bf16 %v7192_v5  ;;  %v7562_v48 = vsel %vm2592_vm4, %v9989_v15, %v4233_v55  ;;  %v7566_v56 = vsel %vm2592_vm4, %v9990_v50, %v4232_v36  ;;  %v9992_v5 = vld [vmem:[#allocation38_spill] sm:$0xff] }
 0x1b5   : > { %9987 = vst [vmem:[#allocation122_spill] sm:$0xff] %v7552_v44  ;;  %9988 = vst [vmem:[#allocation111_spill] sm:$0xff] %v7554_v54  ;;  %v4253_v22 = vunpack.i.h.bf16 %v7194_v37  ;;  %v4252_v54 = vunpack.i.l.bf16 %v7194_v37  ;;  %v9991_v45 = vpack.i.bf16 %v9828_v18, %v9825_v16  ;;  %v9993_v44 = vld [vmem:[#allocation8_spill] sm:$0xff]  ;;  %v4263_v36 = vunpack.i.h.bf16 %v9994_v27 }
 0x1b6   : > { %4720 = vrot.lane.b32.xlu1 %v9992_v5, %s5240_s17  ;;  %v4258_v55 = vunpack.i.h.bf16 %v9993_v44  ;;  %v4257_v15 = vunpack.i.l.bf16 %v9993_v44  ;;  %v4262_v50 = vunpack.i.l.bf16 %v9994_v27  ;;  %v7582_v37 = vsel %vm2592_vm4, %v9995_v0, %v4238_v59  ;;  %v10001_v44 = vld [vmem:[#allocation192_spill] sm:$0xff]  ;;  %v10003_v27 = vld [vmem:[#allocation191_spill] sm:$0xff]  ;;  %v10004_v0 = vld [vmem:[#allocation197_spill] sm:$0xff] }
 0x1b7   : > { %4715 = vrot.lane.b32.xlu0 %v9991_v45, %s5239_s16  ;;  %v7586_v24 = vsel %vm2592_vm4, %v9996_v41, %v4237_v9  ;;  %v9998_v45 = vld [vmem:[#allocation41_spill] sm:$0xff]  ;;  %v7596_v7 = vsel %vm2592_vm4, %v10001_v44, %v4243_v8  ;;  %v7600_v59 = vsel %vm2592_vm4, %v10003_v27, %v4242_v35  ;;  %v7604_v9 = vsel %vm2592_vm4, %v10004_v0, %v4248_v11  ;;  %v10005_v41 = vld [vmem:[#allocation196_spill] sm:$0xff]  ;;  %v10009_v44 = vld [vmem:[#allocation62_spill] sm:$0xff] }
 0x1b8   : > { %9997 = vst [vmem:[#allocation132_spill] sm:$0xff] %v7586_v24  ;;  %v4313_v16 = vunpack.i.h.bf16 %v9998_v45  ;;  %v4312_v5 = vunpack.i.l.bf16 %v9998_v45  ;;  %v7590_v18 = vpop.permute.xlu0 %4435  ;;  %v7592_v46 = vpop.permute.xlu1 %4440  ;;  %10002 = vst [vmem:[#allocation131_spill] sm:$0xff] %v7596_v7  ;;  %v7608_v24 = vsel %vm2592_vm4, %v10005_v41, %v4247_v29  ;;  %v10006_v45 = vld [vmem:[#allocation202_spill] sm:$0xff]  ;;  %v4318_v7 = vunpack.i.h.bf16 %v10009_v44  ;;  %v10010_v27 = vld [vmem:[#allocation55_spill] sm:$0xff] }
 0x1b9   : > { %9999 = vst [vmem:[#allocation121_spill] sm:$0xff] %v7590_v18  ;;  %10000 = vst [vmem:[#allocation142_spill] sm:$0xff] %v7592_v46  ;;  %v7612_v18 = vsel %vm2592_vm4, %v10006_v45, %v4253_v22  ;;  %v10007_v46 = vld [vmem:[#allocation201_spill] sm:$0xff]  ;;  %v4317_v35 = vunpack.i.l.bf16 %v10009_v44  ;;  %v10011_v11 = vld [vmem:[#allocation44_spill] sm:$0xff] }
 0x1ba   : > { %v7616_v8 = vsel %vm2592_vm4, %v10007_v46, %v4252_v54  ;;  %v10012_v0 = vld [vmem:[#allocation43_spill] sm:$0xff]  ;;  %v10016_v45 = vld [vmem:[#allocation206_spill] sm:$0xff]  ;;  %v10018_v46 = vld [vmem:[#allocation212_spill] sm:$0xff] }
 0x1bb   : > { %10008 = vst [vmem:[#allocation152_spill] sm:$0xff] %v7616_v8  ;;  %4725 = vrot.lane.b32.xlu0 %v10010_v27, %s5241_s18  ;;  %v10013_v29 = vpack.i.bf16 %v10011_v11, %v10012_v0  ;;  %v10014_v41 = vld [vmem:[#allocation207_spill] sm:$0xff]  ;;  %v7632_v54 = vsel %vm2592_vm4, %v10016_v45, %v4257_v15  ;;  %v7636_v8 = vsel %vm2592_vm4, %v10018_v46, %v4263_v36 }
 0x1bc   : > { %v7628_v22 = vsel %vm2592_vm4, %v10014_v41, %v4258_v55  ;;  %10017 = vst [vmem:[#allocation162_spill] sm:$0xff] %v7632_v54  ;;  %v10019_v44 = vld [vmem:[#allocation211_spill] sm:$0xff]  ;;  %v2665_v0 = vsel %vm2647_vm5, %v7431_v10, %v4313_v16  ;;  %v2664_v11 = vsel %vm2647_vm5, %v7435_v42, %v4312_v5  ;;  %v4446_v15 = vpop.permute.xlu0 %4445  ;;  %v4451_v45 = vpop.permute.xlu1 %4450  ;;  %v4328_v16 = vunpack.i.h.bf16 %v7287_v49  ;;  %v10022_v5 = vld [vmem:[#allocation48_spill] sm:$0xff] }
 0x1bd   : > { %4730 = vrot.lane.b32.xlu1 %v10013_v29, %s5237_s15  ;;  %10015 = vst [vmem:[#allocation141_spill] sm:$0xff] %v7628_v22  ;;  %v7640_v27 = vsel %vm2592_vm4, %v10019_v44, %v4262_v50  ;;  %v10020_v55 = vld [vmem:[#allocation51_spill] sm:$0xff]  ;;  %v4448_v54 = vunpack.i.h.bf16 %v4446_v15  ;;  %v4447_v22 = vunpack.i.l.bf16 %v4446_v15  ;;  %v4453_v36 = vunpack.i.h.bf16 %v4451_v45 }
 0x1be   : > { %v4323_v29 = vunpack.i.h.bf16 %v10020_v55  ;;  %v4322_v41 = vunpack.i.l.bf16 %v10020_v55  ;;  %v4452_v46 = vunpack.i.l.bf16 %v4451_v45  ;;  %v2667_v50 = vsel %vm2647_vm5, %v7439_v23, %v4318_v7 }
 0x1bf   : > { %v2666_v44 = vsel %vm2647_vm5, %v7443_v52, %v4317_v35  ;;  %v4327_v10 = vunpack.i.l.bf16 %v7287_v49  ;;  %v10021_v42 = vpack.i.bf16 %v9830_v30, %v9829_v33  ;;  %v7661_v45 = vsel %vm2702_vm6, %v2664_v11, %v4447_v22 }
 0x1c0   : > { %v7664_v7 = vsel %vm2702_vm6, %v2665_v0, %v4448_v54  ;;  %v7667_v23 = vsel %vm2702_vm6, %v2667_v50, %v4453_v36  ;;  %v7670_v52 = vsel %vm2702_vm6, %v2666_v44, %v4452_v46  ;;  %v2669_v49 = vsel %vm2647_vm5, %v7447_v40, %v4323_v29  ;;  %v4456_v11 = vpop.permute.xlu0 %4455  ;;  %v4461_v15 = vpop.permute.xlu1 %4460  ;;  %v10027_v29 = vld [vmem:[#allocation53_spill] sm:$0xff] }
 0x1c1   : > { %4735 = vrot.lane.b32.xlu0 %v10021_v42, %s5239_s16  ;;  %4740 = vrot.lane.b32.xlu1 %v10022_v5, %s5240_s17  ;;  %10023 = vst [vmem:[#allocation151_spill] sm:$0xff] %v7667_v23  ;;  %10024 = vst [vmem:[#allocation161_spill] sm:$0xff] %v7670_v52  ;;  %v2668_v35 = vsel %vm2647_vm5, %v7451_v19, %v4322_v41  ;;  %v4333_v55 = vunpack.i.h.bf16 %v7289_v39  ;;  %v4332_v22 = vunpack.i.l.bf16 %v7289_v39  ;;  %v4458_v54 = vunpack.i.h.bf16 %v4456_v11  ;;  %v10025_v19 = vld [vmem:[#allocation65_spill] sm:$0xff]  ;;  %v10026_v39 = vld [vmem:[#allocation54_spill] sm:$0xff] }
 0x1c2   : > { %v4457_v0 = vunpack.i.l.bf16 %v4456_v11  ;;  %v4463_v42 = vunpack.i.h.bf16 %v4461_v15  ;;  %v4462_v36 = vunpack.i.l.bf16 %v4461_v15  ;;  %v2671_v46 = vsel %vm2647_vm5, %v7465_v58, %v4328_v16 }
 0x1c3   : > { %v2670_v44 = vsel %vm2647_vm5, %v7469_v51, %v4327_v10  ;;  %v4338_v40 = vunpack.i.h.bf16 %v7302_v1  ;;  %v4337_v41 = vunpack.i.l.bf16 %v7302_v1  ;;  %v10028_v50 = vpack.i.bf16 %v10026_v39, %v10027_v29 }
 0x1c4   : > { %v7691_v5 = vsel %vm2702_vm6, %v2668_v35, %v4457_v0  ;;  %v7694_v58 = vsel %vm2702_vm6, %v2669_v49, %v4458_v54  ;;  %v7697_v51 = vsel %vm2702_vm6, %v2671_v46, %v4463_v42  ;;  %v7700_v16 = vsel %vm2702_vm6, %v2670_v44, %v4462_v36  ;;  %v4466_v15 = vpop.permute.xlu0 %4465  ;;  %v4471_v0 = vpop.permute.xlu1 %4470 }
 0x1c5   : > { %4745 = vrot.lane.b32.xlu0 %v10025_v19, %s5241_s18  ;;  %4750 = vrot.lane.b32.xlu1 %v10028_v50, %s5237_s15  ;;  %10029 = vst [vmem:[#allocation16_spill] sm:$0xff] %v7691_v5  ;;  %10030 = vst [vmem:[#allocation19_spill] sm:$0xff] %v7694_v58  ;;  %v2673_v1 = vsel %vm2647_vm5, %v7482_v4, %v4333_v55  ;;  %v2672_v10 = vsel %vm2647_vm5, %v7486_v14, %v4332_v22  ;;  %v4343_v11 = vunpack.i.h.bf16 %v7304_v60  ;;  %v10034_v55 = vld [vmem:[#allocation58_spill] sm:$0xff]  ;;  %v10184_v58 = vld [vmem:[#allocation207_spill] sm:$0xff] }
 0x1c6   : > { %10031 = vst [vmem:[#allocation35_spill] sm:$0xff] %v7697_v51  ;;  %10032 = vst [vmem:[#allocation25_spill] sm:$0xff] %v7700_v16  ;;  %v4342_v35 = vunpack.i.l.bf16 %v7304_v60  ;;  %v4468_v49 = vunpack.i.h.bf16 %v4466_v15  ;;  %v4467_v54 = vunpack.i.l.bf16 %v4466_v15  ;;  %v4473_v19 = vunpack.i.h.bf16 %v4471_v0  ;;  %v10175_v51 = vld [vmem:[#allocation13_spill] sm:$0xff]  ;;  %v10176_v16 = vld [vmem:[#allocation7_spill] sm:$0xff] }
 0x1c7   : > { %v4472_v42 = vunpack.i.l.bf16 %v4471_v0  ;;  %v2675_v36 = vsel %vm2647_vm5, %v7496_v17, %v4338_v40  ;;  %v2674_v46 = vsel %vm2647_vm5, %v7500_v57, %v4337_v41  ;;  %v4348_v4 = vunpack.i.h.bf16 %v7319_v6 }
 0x1c8   : > { %v4347_v14 = vunpack.i.l.bf16 %v7319_v6  ;;  %v10033_v60 = vpack.i.bf16 %v9834_v21, %v9831_v53  ;;  %v7721_v22 = vsel %vm2702_vm6, %v2672_v10, %v4467_v54  ;;  %v7724_v17 = vsel %vm2702_vm6, %v2673_v1, %v4468_v49  ;;  %v4476_v29 = vpop.permute.xlu0 %4475  ;;  %v4481_v50 = vpop.permute.xlu1 %4480 }
 0x1c9   : > { %4760 = vrot.lane.b32.xlu1 %v10034_v55, %s5240_s17  ;;  %10035 = vst [vmem:[#allocation24_spill] sm:$0xff] %v7721_v22  ;;  %10036 = vst [vmem:[#allocation258_spill] sm:$0xff] %v7724_v17  ;;  %v7727_v57 = vsel %vm2702_vm6, %v2675_v36, %v4473_v19  ;;  %v7730_v44 = vsel %vm2702_vm6, %v2674_v46, %v4472_v42  ;;  %v2677_v6 = vsel %vm2647_vm5, %v7504_v28, %v4343_v11  ;;  %v10039_v11 = vld [vmem:[#allocation75_spill] sm:$0xff] }
 0x1ca   : > { %4755 = vrot.lane.b32.xlu0 %v10033_v60, %s5239_s16  ;;  %10037 = vst [vmem:[#allocation28_spill] sm:$0xff] %v7727_v57  ;;  %10038 = vst [vmem:[#allocation259_spill] sm:$0xff] %v7730_v44  ;;  %v2676_v40 = vsel %vm2647_vm5, %v7508_v63, %v4342_v35  ;;  %v4353_v41 = vunpack.i.h.bf16 %v7321_v26  ;;  %v4352_v39 = vunpack.i.l.bf16 %v7321_v26  ;;  %v4478_v1 = vunpack.i.h.bf16 %v4476_v29  ;;  %v10040_v26 = vld [vmem:[#allocation64_spill] sm:$0xff]  ;;  %v10041_v35 = vld [vmem:[#allocation63_spill] sm:$0xff] }
 0x1cb   : > { %v4477_v10 = vunpack.i.l.bf16 %v4476_v29  ;;  %v4483_v15 = vunpack.i.h.bf16 %v4481_v50  ;;  %v4482_v0 = vunpack.i.l.bf16 %v4481_v50  ;;  %v2679_v49 = vsel %vm2647_vm5, %v7512_v34, %v4348_v4  ;;  %v10159_v57 = vld [vmem:[#allocation187_spill] sm:$0xff]  ;;  %v10160_v44 = vld [vmem:[#allocation136_spill] sm:$0xff] }
 0x1cc   : > { %v2678_v54 = vsel %vm2647_vm5, %v7516_v25, %v4347_v14  ;;  %v4358_v28 = vunpack.i.h.bf16 %v7336_v62  ;;  %v4357_v63 = vunpack.i.l.bf16 %v7336_v62  ;;  %v10042_v19 = vpack.i.bf16 %v10040_v26, %v10041_v35  ;;  %v4486_v60 = vpop.permute.xlu0 %4485  ;;  %v4491_v55 = vpop.permute.xlu1 %4490  ;;  %v10166_v22 = vld [vmem:[#allocation147_spill] sm:$0xff] }
 0x1cd   : > { %v7751_v42 = vsel %vm2702_vm6, %v2676_v40, %v4477_v10  ;;  %v7754_v34 = vsel %vm2702_vm6, %v2677_v6, %v4478_v1  ;;  %v7757_v25 = vsel %vm2702_vm6, %v2679_v49, %v4483_v15  ;;  %v7760_v36 = vsel %vm2702_vm6, %v2678_v54, %v4482_v0 }
 0x1ce   : > { %4765 = vrot.lane.b32.xlu0 %v10039_v11, %s5241_s18  ;;  %4770 = vrot.lane.b32.xlu1 %v10042_v19, %s5237_s15  ;;  %10043 = vst [vmem:[#allocation45_spill] sm:$0xff] %v7757_v25  ;;  %v2681_v62 = vsel %vm2647_vm5, %v7528_v32, %v4353_v41  ;;  %v2680_v46 = vsel %vm2647_vm5, %v7532_v2, %v4352_v39  ;;  %v4363_v4 = vunpack.i.h.bf16 %v7338_v31  ;;  %v4362_v14 = vunpack.i.l.bf16 %v7338_v31  ;;  %v10045_v41 = vld [vmem:[#allocation68_spill] sm:$0xff]  ;;  %v10190_v25 = vld [vmem:[#allocation229_spill] sm:$0xff] }
 0x1cf   : > { %v4488_v6 = vunpack.i.h.bf16 %v4486_v60  ;;  %v4487_v40 = vunpack.i.l.bf16 %v4486_v60  ;;  %v4493_v29 = vunpack.i.h.bf16 %v4491_v55  ;;  %v4492_v50 = vunpack.i.l.bf16 %v4491_v55 }
 0x1d0   : > { %v2683_v1 = vsel %vm2647_vm5, %v7536_v38, %v4358_v28  ;;  %v2682_v10 = vsel %vm2647_vm5, %v7540_v43, %v4357_v63  ;;  %v4368_v32 = vunpack.i.h.bf16 %v7350_v3  ;;  %v4367_v2 = vunpack.i.l.bf16 %v7350_v3  ;;  %v4496_v49 = vpop.permute.xlu0 %4495  ;;  %v4501_v54 = vpop.permute.xlu1 %4500 }
 0x1d1   : > { %v10044_v31 = vpack.i.bf16 %v9836_v61, %v9835_v20  ;;  %v7781_v39 = vsel %vm2702_vm6, %v2680_v46, %v4487_v40  ;;  %v7784_v38 = vsel %vm2702_vm6, %v2681_v62, %v4488_v6  ;;  %v7787_v43 = vsel %vm2702_vm6, %v2683_v1, %v4493_v29  ;;  %v10051_v46 = vld [vmem:[#allocation85_spill] sm:$0xff]  ;;  %v10059_v40 = vld [vmem:[#allocation132_spill] sm:$0xff] }
 0x1d2   : > { %4780 = vrot.lane.b32.xlu1 %v10045_v41, %s5240_s17  ;;  %10046 = vst [vmem:[#allocation34_spill] sm:$0xff] %v7781_v39  ;;  %10047 = vst [vmem:[#allocation33_spill] sm:$0xff] %v7784_v38  ;;  %v7790_v15 = vsel %vm2702_vm6, %v2682_v10, %v4492_v50  ;;  %v2685_v3 = vsel %vm2647_vm5, %v7544_v12, %v4363_v4  ;;  %v2684_v20 = vsel %vm2647_vm5, %v7548_v13, %v4362_v14  ;;  %v10050_v12 = vld [vmem:[#allocation72_spill] sm:$0xff]  ;;  %v10053_v4 = vld [vmem:[#allocation73_spill] sm:$0xff] }
 0x1d3   : > { %4775 = vrot.lane.b32.xlu0 %v10044_v31, %s5239_s16  ;;  %10048 = vst [vmem:[#allocation38_spill] sm:$0xff] %v7787_v43  ;;  %10049 = vst [vmem:[#allocation8_spill] sm:$0xff] %v7790_v15  ;;  %v4373_v61 = vunpack.i.h.bf16 %v7352_v47  ;;  %v4372_v0 = vunpack.i.l.bf16 %v7352_v47  ;;  %v4498_v28 = vunpack.i.h.bf16 %v4496_v49  ;;  %v4497_v63 = vunpack.i.l.bf16 %v4496_v49  ;;  %v10052_v47 = vld [vmem:[#allocation74_spill] sm:$0xff]  ;;  %v10060_v50 = vld [vmem:[#allocation61_spill] sm:$0xff] }
 0x1d4   : > { %v4503_v11 = vunpack.i.h.bf16 %v4501_v54  ;;  %v4502_v26 = vunpack.i.l.bf16 %v4501_v54  ;;  %v2687_v35 = vsel %vm2647_vm5, %v7562_v48, %v4368_v32  ;;  %v2686_v19 = vsel %vm2647_vm5, %v7566_v56, %v4367_v2  ;;  %v4506_v32 = vpop.permute.xlu0 %4505  ;;  %v4511_v2 = vpop.permute.xlu1 %4510  ;;  %v10061_v49 = vld [vmem:[#allocation131_spill] sm:$0xff]  ;;  %v10179_v43 = vld [vmem:[#allocation102_spill] sm:$0xff] }
 0x1d5   : > { %v4378_v62 = vunpack.i.h.bf16 %v10050_v12  ;;  %v4377_v13 = vunpack.i.l.bf16 %v10050_v12  ;;  %v10054_v14 = vpack.i.bf16 %v10052_v47, %v10053_v4  ;;  %v7811_v60 = vsel %vm2702_vm6, %v2684_v20, %v4497_v63  ;;  %v10063_v63 = vld [vmem:[#allocation87_spill] sm:$0xff] }
 0x1d6   : > { %10055 = vst [vmem:[#allocation4_spill] sm:$0xff] %v7811_v60  ;;  %v7814_v48 = vsel %vm2702_vm6, %v2685_v3, %v4498_v28  ;;  %v7817_v56 = vsel %vm2702_vm6, %v2687_v35, %v4503_v11  ;;  %v7820_v55 = vsel %vm2702_vm6, %v2686_v19, %v4502_v26  ;;  %v2689_v6 = vsel %vm2647_vm5, %v7582_v37, %v4373_v61  ;;  %v10062_v37 = vld [vmem:[#allocation82_spill] sm:$0xff]  ;;  %v10071_v47 = vld [vmem:[#allocation71_spill] sm:$0xff] }
 0x1d7   : > { %4785 = vrot.lane.b32.xlu0 %v10051_v46, %s5241_s18  ;;  %4790 = vrot.lane.b32.xlu1 %v10054_v14, %s5237_s15  ;;  %10056 = vst [vmem:[#allocation41_spill] sm:$0xff] %v7814_v48  ;;  %10057 = vst [vmem:[#allocation62_spill] sm:$0xff] %v7817_v56  ;;  %v2688_v29 = vsel %vm2647_vm5, %v10059_v40, %v4372_v0  ;;  %v4383_v1 = vunpack.i.h.bf16 %v10060_v50  ;;  %v4382_v10 = vunpack.i.l.bf16 %v10060_v50  ;;  %v4508_v31 = vunpack.i.h.bf16 %v4506_v32  ;;  %v10064_v11 = vld [vmem:[#allocation86_spill] sm:$0xff]  ;;  %v10171_v56 = vld [vmem:[#allocation135_spill] sm:$0xff] }
 0x1d8   : > { %10058 = vst [vmem:[#allocation55_spill] sm:$0xff] %v7820_v55  ;;  %v4507_v41 = vunpack.i.l.bf16 %v4506_v32  ;;  %v4513_v3 = vunpack.i.h.bf16 %v4511_v2  ;;  %v4512_v20 = vunpack.i.l.bf16 %v4511_v2  ;;  %v2691_v54 = vsel %vm2647_vm5, %v10061_v49, %v4378_v62  ;;  %v10066_v35 = vld [vmem:[#allocation78_spill] sm:$0xff]  ;;  %v4516_v40 = vpop.permute.xlu0 %4515  ;;  %v10076_v49 = vld [vmem:[#allocation83_spill] sm:$0xff]  ;;  %v10163_v55 = vld [vmem:[#allocation192_spill] sm:$0xff] }
 0x1d9   : > { %v2690_v28 = vsel %vm2647_vm5, %v7600_v59, %v4377_v13  ;;  %v4388_v61 = vunpack.i.h.bf16 %v10062_v37  ;;  %v4387_v0 = vunpack.i.l.bf16 %v10062_v37  ;;  %v10065_v26 = vpack.i.bf16 %v10063_v63, %v10064_v11 }
 0x1da   : > { %v7841_v19 = vsel %vm2702_vm6, %v2688_v29, %v4507_v41  ;;  %v7844_v12 = vsel %vm2702_vm6, %v2689_v6, %v4508_v31  ;;  %v7847_v59 = vsel %vm2702_vm6, %v2691_v54, %v4513_v3  ;;  %v7850_v62 = vsel %vm2702_vm6, %v2690_v28, %v4512_v20  ;;  %v4521_v29 = vpop.permute.xlu1 %4520  ;;  %v10072_v41 = vld [vmem:[#allocation152_spill] sm:$0xff] }
 0x1db   : > { %4795 = vrot.lane.b32.xlu0 %v10065_v26, %s5239_s16  ;;  %4800 = vrot.lane.b32.xlu1 %v10066_v35, %s5240_s17  ;;  %10067 = vst [vmem:[#allocation44_spill] sm:$0xff] %v7841_v19  ;;  %10068 = vst [vmem:[#allocation43_spill] sm:$0xff] %v7844_v12  ;;  %v2693_v13 = vsel %vm2647_vm5, %v7604_v9, %v4383_v1  ;;  %v2692_v46 = vsel %vm2647_vm5, %v7608_v24, %v4382_v10  ;;  %v4393_v4 = vunpack.i.h.bf16 %v10071_v47  ;;  %v10073_v9 = vld [vmem:[#allocation92_spill] sm:$0xff]  ;;  %v10074_v10 = vld [vmem:[#allocation95_spill] sm:$0xff] }
 0x1dc   : > { %10069 = vst [vmem:[#allocation51_spill] sm:$0xff] %v7847_v59  ;;  %10070 = vst [vmem:[#allocation48_spill] sm:$0xff] %v7850_v62  ;;  %v4392_v14 = vunpack.i.l.bf16 %v10071_v47  ;;  %v4518_v6 = vunpack.i.h.bf16 %v4516_v40  ;;  %v4517_v50 = vunpack.i.l.bf16 %v4516_v40  ;;  %v4523_v32 = vunpack.i.h.bf16 %v4521_v29  ;;  %v10075_v20 = vld [vmem:[#allocation84_spill] sm:$0xff]  ;;  %v10083_v26 = vld [vmem:[#allocation141_spill] sm:$0xff]  ;;  %v4526_v40 = vpop.permute.xlu0 %4525 }
 0x1dd   : > { %v4522_v2 = vunpack.i.l.bf16 %v4521_v29  ;;  %v2695_v31 = vsel %vm2647_vm5, %v7612_v18, %v4388_v61  ;;  %v2694_v3 = vsel %vm2647_vm5, %v10072_v41, %v4387_v0  ;;  %v4398_v1 = vunpack.i.h.bf16 %v10073_v9  ;;  %v10082_v0 = vld [vmem:[#allocation15_spill] sm:$0xff]  ;;  %v10084_v47 = vld [vmem:[#allocation162_spill] sm:$0xff]  ;;  %v10085_v41 = vld [vmem:[#allocation81_spill] sm:$0xff] }
 0x1de   : > { %v4397_v24 = vunpack.i.l.bf16 %v10073_v9  ;;  %v10077_v54 = vpack.i.bf16 %v10075_v20, %v10076_v49  ;;  %v7871_v28 = vsel %vm2702_vm6, %v2692_v46, %v4517_v50  ;;  %v7874_v18 = vsel %vm2702_vm6, %v2693_v13, %v4518_v6  ;;  %v4531_v29 = vpop.permute.xlu1 %4530  ;;  %v10089_v20 = vld [vmem:[#allocation88_spill] sm:$0xff] }
 0x1df   : > { %4805 = vrot.lane.b32.xlu0 %v10074_v10, %s5241_s18  ;;  %10078 = vst [vmem:[#allocation65_spill] sm:$0xff] %v7871_v28  ;;  %10079 = vst [vmem:[#allocation54_spill] sm:$0xff] %v7874_v18  ;;  %v7877_v37 = vsel %vm2702_vm6, %v2695_v31, %v4523_v32  ;;  %v7880_v61 = vsel %vm2702_vm6, %v2694_v3, %v4522_v2  ;;  %v4268_v63 = vunpack.i.h.bf16 %v10082_v0  ;;  %v4267_v11 = vunpack.i.l.bf16 %v10082_v0  ;;  %v10087_v10 = vld [vmem:[#allocation96_spill] sm:$0xff]  ;;  %v10094_v0 = vld [vmem:[#allocation217_spill] sm:$0xff] }
 0x1e0   : > { %4810 = vrot.lane.b32.xlu1 %v10077_v54, %s5237_s15  ;;  %10080 = vst [vmem:[#allocation53_spill] sm:$0xff] %v7877_v37  ;;  %10081 = vst [vmem:[#allocation58_spill] sm:$0xff] %v7880_v61  ;;  %v2697_v35 = vsel %vm2647_vm5, %v10083_v26, %v4393_v4  ;;  %v2696_v46 = vsel %vm2647_vm5, %v10084_v47, %v4392_v14  ;;  %v4528_v13 = vunpack.i.h.bf16 %v4526_v40  ;;  %v4527_v6 = vunpack.i.l.bf16 %v4526_v40  ;;  %v10086_v4 = vld [vmem:[#allocation97_spill] sm:$0xff]  ;;  %v10095_v47 = vld [vmem:[#allocation216_spill] sm:$0xff] }
 0x1e1   : > { %v4533_v50 = vunpack.i.h.bf16 %v4531_v29  ;;  %v4532_v32 = vunpack.i.l.bf16 %v4531_v29  ;;  %v2699_v2 = vsel %vm2647_vm5, %v7636_v8, %v4398_v1  ;;  %v2698_v31 = vsel %vm2647_vm5, %v7640_v27, %v4397_v24  ;;  %v4536_v24 = vpop.permute.xlu0 %4535  ;;  %v10143_v18 = vld [vmem:[#allocation220_spill] sm:$0xff] }
 0x1e2   : > { %v4403_v3 = vunpack.i.h.bf16 %v10085_v41  ;;  %v4402_v9 = vunpack.i.l.bf16 %v10085_v41  ;;  %v10088_v14 = vpack.i.bf16 %v10086_v4, %v10087_v10  ;;  %v7901_v49 = vsel %vm2702_vm6, %v2696_v46, %v4527_v6  ;;  %v7912_v54 = vpop.permute.xlu1 %4540  ;;  %v10096_v6 = vld [vmem:[#allocation105_spill] sm:$0xff]  ;;  %v10104_v10 = vld [vmem:[#allocation158_spill] sm:$0xff]  ;;  %v10152_v19 = vld [vmem:[#allocation256_spill] sm:$0xff] }
 0x1e3   : > { %10090 = vst [vmem:[#allocation75_spill] sm:$0xff] %v7901_v49  ;;  %v7904_v8 = vsel %vm2702_vm6, %v2697_v35, %v4528_v13  ;;  %v7907_v27 = vsel %vm2702_vm6, %v2699_v2, %v4533_v50  ;;  %v7910_v1 = vsel %vm2702_vm6, %v2698_v31, %v4532_v32  ;;  %v2646_v26 = vsel %vm2592_vm4, %v10094_v0, %v4268_v63  ;;  %v10097_v50 = vld [vmem:[#allocation154_spill] sm:$0xff]  ;;  %v10098_v32 = vld [vmem:[#allocation153_spill] sm:$0xff] }
 0x1e4   : > { %4815 = vrot.lane.b32.xlu0 %v10088_v14, %s5239_s16  ;;  %4820 = vrot.lane.b32.xlu1 %v10089_v20, %s5240_s17  ;;  %10091 = vst [vmem:[#allocation64_spill] sm:$0xff] %v7904_v8  ;;  %10092 = vst [vmem:[#allocation63_spill] sm:$0xff] %v7907_v27  ;;  %v2645_v40 = vsel %vm2592_vm4, %v10095_v47, %v4267_v11  ;;  %v4538_v46 = vunpack.i.h.bf16 %v4536_v24  ;;  %v4537_v29 = vunpack.i.l.bf16 %v4536_v24  ;;  %v10105_v24 = vld [vmem:[#allocation173_spill] sm:$0xff] }
 0x1e5   : > { %10093 = vst [vmem:[#allocation68_spill] sm:$0xff] %v7910_v1  ;;  %v2701_v35 = vsel %vm2647_vm5, %v2646_v26, %v4403_v3  ;;  %v2700_v13 = vsel %vm2647_vm5, %v2645_v40, %v4402_v9  ;;  %v10099_v2 = vpack.i.bf16 %v10097_v50, %v10098_v32  ;;  %v7932_v11 = vpop.permute.xlu0 %4545  ;;  %v10102_v3 = vld [vmem:[#allocation166_spill] sm:$0xff]  ;;  %v10103_v9 = vld [vmem:[#allocation167_spill] sm:$0xff]  ;;  %v10107_v40 = vld [vmem:[#allocation93_spill] sm:$0xff] }
 0x1e6   : > { %v7927_v31 = vsel %vm2702_vm6, %v2700_v13, %v4537_v29  ;;  %v7930_v63 = vsel %vm2702_vm6, %v2701_v35, %v4538_v46  ;;  %v7934_v41 = vpop.permute.xlu1 %4550  ;;  %v4834_v4 = vpack.i.bf16 %v10103_v9, %v10102_v3  ;;  %v10106_v26 = vld [vmem:[#allocation94_spill] sm:$0xff]  ;;  %v10112_v9 = vld [vmem:[#allocation115_spill] sm:$0xff]  ;;  %v10132_v8 = vld [vmem:[#allocation125_spill] sm:$0xff] }
 0x1e7   : > { %10100 = vst [vmem:[#allocation72_spill] sm:$0xff] %v7927_v31  ;;  %10101 = vst [vmem:[#allocation85_spill] sm:$0xff] %v7930_v63  ;;  %v10108_v46 = vpack.i.bf16 %v10106_v26, %v10107_v40  ;;  %v10109_v13 = vld [vmem:[#allocation106_spill] sm:$0xff]  ;;  %v10123_v63 = vld [vmem:[#allocation180_spill] sm:$0xff] }
 0x1e8   : > { %4825 = vrot.lane.b32.xlu0 %v10096_v6, %s5241_s18  ;;  %4830 = vrot.lane.b32.xlu1 %v10099_v2, %s5237_s15  ;;  %v10110_v6 = vld [vmem:[#allocation107_spill] sm:$0xff]  ;;  %v10111_v32 = vld [vmem:[#allocation98_spill] sm:$0xff] }
 0x1e9   : > { %v7941_v14 = vpop.permute.xlu0 %4555  ;;  %v4854_v50 = vpack.i.bf16 %v10110_v6, %v10109_v13  ;;  %v10119_v13 = vld [vmem:[#allocation175_spill] sm:$0xff] }
 0x1ea   : > { %v7943_v20 = vpop.permute.xlu1 %4560 }
 0x1ec   : > { %4835 = vrot.lane.b32.xlu0 %v4834_v4, %s5239_s16  ;;  %4840 = vrot.lane.b32.xlu1 %v10104_v10, %s5240_s17  ;;  %v10113_v4 = vld [vmem:[#allocation164_spill] sm:$0xff]  ;;  %v10114_v10 = vld [vmem:[#allocation163_spill] sm:$0xff] }
 0x1ed   : > { %v7951_v29 = vpop.permute.xlu0 %4565 }
 0x1ee   : > { %v7953_v35 = vpop.permute.xlu1 %4570 }
 0x1f0   : > { %4845 = vrot.lane.b32.xlu0 %v10105_v24, %s5241_s18  ;;  %4850 = vrot.lane.b32.xlu1 %v10108_v46, %s5237_s15  ;;  %v10115_v24 = vpack.i.bf16 %v10113_v4, %v10114_v10  ;;  %v10118_v46 = vld [vmem:[#allocation174_spill] sm:$0xff]  ;;  %v10124_v4 = vld [vmem:[#allocation104_spill] sm:$0xff]  ;;  %v10125_v10 = vld [vmem:[#allocation103_spill] sm:$0xff] }
 0x1f1   : > { %v7960_v2 = vpop.permute.xlu0 %4575  ;;  %v4874_v6 = vpack.i.bf16 %v10119_v13, %v10118_v46  ;;  %v10128_v13 = vld [vmem:[#allocation116_spill] sm:$0xff] }
 0x1f2   : > { %v7962_v3 = vpop.permute.xlu1 %4580 }
 0x1f4   : > { %4855 = vrot.lane.b32.xlu0 %v4854_v50, %s5239_s16  ;;  %4860 = vrot.lane.b32.xlu1 %v10111_v32, %s5240_s17  ;;  %v10120_v50 = vld [vmem:[#allocation168_spill] sm:$0xff] }
 0x1f5   : > { %v7970_v26 = vpop.permute.xlu0 %4585 }
 0x1f6   : > { %10116 = vst [vmem:[#allocation74_spill] sm:$0xff] %v7970_v26  ;;  %v7972_v40 = vpop.permute.xlu1 %4590 }
 0x1f7   : > { %10117 = vst [vmem:[#allocation73_spill] sm:$0xff] %v7972_v40  ;;  %v4543_v40 = vunpack.i.h.bf16 %v7912_v54 }
 0x1f8   : > { %4865 = vrot.lane.b32.xlu0 %v10112_v9, %s5241_s18  ;;  %4870 = vrot.lane.b32.xlu1 %v10115_v24, %s5237_s15  ;;  %v10126_v24 = vpack.i.bf16 %v10124_v4, %v10125_v10  ;;  %v10133_v4 = vld [vmem:[#allocation172_spill] sm:$0xff]  ;;  %v10134_v10 = vld [vmem:[#allocation171_spill] sm:$0xff] }
 0x1f9   : > { %v7979_v32 = vpop.permute.xlu0 %4595 }
 0x1fa   : > { %10121 = vst [vmem:[#allocation132_spill] sm:$0xff] %v7979_v32  ;;  %v7981_v9 = vpop.permute.xlu1 %4600  ;;  %v10177_v32 = vld [vmem:[#allocation156_spill] sm:$0xff] }
 0x1fb   : > { %10122 = vst [vmem:[#allocation61_spill] sm:$0xff] %v7981_v9  ;;  %v10167_v9 = vld [vmem:[#allocation196_spill] sm:$0xff] }
 0x1fc   : > { %4875 = vrot.lane.b32.xlu0 %v4874_v6, %s5239_s16  ;;  %4880 = vrot.lane.b32.xlu1 %v10120_v50, %s5240_s17  ;;  %v10129_v6 = vld [vmem:[#allocation117_spill] sm:$0xff]  ;;  %v10130_v50 = vld [vmem:[#allocation108_spill] sm:$0xff] }
 0x1fd   : > { %v7989_v31 = vpop.permute.xlu0 %4605  ;;  %v4894_v27 = vpack.i.bf16 %v10129_v6, %v10128_v13  ;;  %v10139_v6 = vld [vmem:[#allocation182_spill] sm:$0xff] }
 0x1fe   : > { %10127 = vst [vmem:[#allocation131_spill] sm:$0xff] %v7989_v31  ;;  %v7991_v46 = vpop.permute.xlu1 %4610  ;;  %v10161_v31 = vld [vmem:[#allocation137_spill] sm:$0xff] }
 0x200   : > { %4885 = vrot.lane.b32.xlu0 %v10123_v63, %s5241_s18  ;;  %4890 = vrot.lane.b32.xlu1 %v10126_v24, %s5237_s15  ;;  %v10135_v24 = vpack.i.bf16 %v10133_v4, %v10134_v10  ;;  %v10144_v4 = vld [vmem:[#allocation114_spill] sm:$0xff]  ;;  %v10145_v10 = vld [vmem:[#allocation113_spill] sm:$0xff] }
 0x201   : > { %v7998_v1 = vpop.permute.xlu0 %4615 }
 0x202   : > { %v8000_v63 = vpop.permute.xlu1 %4620 }
 0x203   : > { %10131 = vst [vmem:[#allocation82_spill] sm:$0xff] %v8000_v63 }
 0x204   : > { %4895 = vrot.lane.b32.xlu0 %v4894_v27, %s5239_s16  ;;  %4900 = vrot.lane.b32.xlu1 %v10130_v50, %s5240_s17  ;;  %v10138_v27 = vld [vmem:[#allocation181_spill] sm:$0xff]  ;;  %v10140_v50 = vld [vmem:[#allocation176_spill] sm:$0xff] }
 0x205   : > { %v8008_v49 = vpop.permute.xlu0 %4625  ;;  %v4914_v37 = vpack.i.bf16 %v10139_v6, %v10138_v27  ;;  %v10150_v6 = vld [vmem:[#allocation127_spill] sm:$0xff] }
 0x206   : > { %10136 = vst [vmem:[#allocation87_spill] sm:$0xff] %v8008_v49  ;;  %v8010_v13 = vpop.permute.xlu1 %4630  ;;  %v10181_v49 = vld [vmem:[#allocation201_spill] sm:$0xff] }
 0x207   : > { %10137 = vst [vmem:[#allocation86_spill] sm:$0xff] %v8010_v13  ;;  %v10173_v13 = vld [vmem:[#allocation179_spill] sm:$0xff] }
 0x208   : > { %4905 = vrot.lane.b32.xlu0 %v10132_v8, %s5241_s18  ;;  %4910 = vrot.lane.b32.xlu1 %v10135_v24, %s5237_s15  ;;  %v10146_v24 = vpack.i.bf16 %v10144_v4, %v10145_v10  ;;  %v4138_v4 = vunpack.i.h.bf16 %v10152_v19  ;;  %v10154_v10 = vld [vmem:[#allocation2_spill] sm:$0xff] }
 0x209   : > { %v8017_v61 = vpop.permute.xlu0 %4635 }
 0x20a   : > { %10141 = vst [vmem:[#allocation78_spill] sm:$0xff] %v8017_v61  ;;  %v8019_v8 = vpop.permute.xlu1 %4640  ;;  %v2594_v48 = vsel %vm2592_vm4, %v10175_v51, %v4138_v4  ;;  %v10185_v4 = vld [vmem:[#allocation18_spill] sm:$0xff]  ;;  %v10188_v51 = vld [vmem:[#allocation183_spill] sm:$0xff] }
 0x20b   : > { %10142 = vst [vmem:[#allocation71_spill] sm:$0xff] %v8019_v8  ;;  %v4137_v8 = vunpack.i.l.bf16 %v10152_v19 }
 0x20c   : > { %4915 = vrot.lane.b32.xlu0 %v4914_v37, %s5239_s16  ;;  %4920 = vrot.lane.b32.xlu1 %v10140_v50, %s5240_s17  ;;  %v10149_v37 = vld [vmem:[#allocation126_spill] sm:$0xff]  ;;  %v10151_v50 = vld [vmem:[#allocation257_spill] sm:$0xff] }
 0x20d   : > { %v8027_v28 = vpop.permute.xlu0 %4645  ;;  %v4934_v59 = vpack.i.bf16 %v10150_v6, %v10149_v37  ;;  %v4143_v62 = vunpack.i.h.bf16 %v10151_v50  ;;  %v4142_v12 = vunpack.i.l.bf16 %v10151_v50  ;;  %v10158_v6 = vld [vmem:[#allocation186_spill] sm:$0xff] }
 0x20e   : > { %10147 = vst [vmem:[#allocation152_spill] sm:$0xff] %v8027_v28  ;;  %v8029_v27 = vpop.permute.xlu1 %4650  ;;  %v4954_v50 = vpack.i.bf16 %v10159_v57, %v10158_v6  ;;  %v10170_v57 = vld [vmem:[#allocation10_spill] sm:$0xff] }
 0x20f   : > { %10148 = vst [vmem:[#allocation92_spill] sm:$0xff] %v8029_v27  ;;  %v8065_v6 = vsel %vm2592_vm4, %v10170_v57, %v4143_v62  ;;  %v10178_v62 = vld [vmem:[#allocation157_spill] sm:$0xff] }
 0x210   : > { %4925 = vrot.lane.b32.xlu0 %v10143_v18, %s5241_s18  ;;  %4930 = vrot.lane.b32.xlu1 %v10146_v24, %s5237_s15  ;;  %v10153_v18 = vld [vmem:[#allocation118_spill] sm:$0xff]  ;;  %v10155_v24 = vrot.slane %v10154_v10, 7 }
 0x211   : > { %v8043_v28 = vpop.permute.xlu0 %4655  ;;  %v10165_v10 = vld [vmem:[#allocation146_spill] sm:$0xff] }
 0x212   : > { %v1172_v27 = vsel %vm998_vm1, 0.0, %v10155_v24  ;;  %10156 = vst [vmem:[#allocation95_spill] sm:$0xff] %v8043_v28  ;;  %v8045_v37 = vpop.permute.xlu1 %4660  ;;  %v10168_v28 = vld [vmem:[#allocation197_spill] sm:$0xff] }
 0x213   : > { %10157 = vst [vmem:[#allocation84_spill] sm:$0xff] %v8045_v37  ;;  %v10169_v37 = vld [vmem:[#allocation9_spill] sm:$0xff]  ;;  %v2593_v61 = vsel %vm2592_vm4, %v1172_v27, %v4137_v8  ;;  %v4408_v8 = vunpack.i.h.bf16 %v10179_v43  ;;  %v4407_v27 = vunpack.i.l.bf16 %v10179_v43  ;;  %v4542_v43 = vunpack.i.l.bf16 %v7912_v54 }
 0x214   : > { %4935 = vrot.lane.b32.xlu0 %v4934_v59, %s5239_s16  ;;  %4940 = vrot.lane.b32.xlu1 %v10153_v18, %s5240_s17  ;;  %v10162_v59 = vld [vmem:[#allocation191_spill] sm:$0xff]  ;;  %v10164_v18 = vld [vmem:[#allocation56_spill] sm:$0xff]  ;;  %v8061_v60 = vsel %vm2592_vm4, %v10169_v37, %v4142_v12  ;;  %v4273_v12 = vunpack.i.h.bf16 %v10176_v16  ;;  %v4272_v37 = vunpack.i.l.bf16 %v10176_v16  ;;  %v10186_v16 = vld [vmem:[#allocation17_spill] sm:$0xff] }
 0x215   : > { %v4148_v17 = vunpack.i.h.bf16 %v10164_v18  ;;  %v4147_v19 = vunpack.i.l.bf16 %v10164_v18  ;;  %v10172_v18 = vld [vmem:[#allocation219_spill] sm:$0xff] }
 0x216   : > { %v10174_v24 = vpack.i.bf16 %v10172_v18, %v10173_v13  ;;  %v4671_v15 = vpop.permute.xlu1 %4670  ;;  %v10182_v13 = vld [vmem:[#allocation202_spill] sm:$0xff] }
 0x217   : > { %v10183_v18 = vld [vmem:[#allocation206_spill] sm:$0xff]  ;;  %v8090_v5 = vsel %vm2592_vm4, %v10185_v4, %v4148_v17  ;;  %v8094_v57 = vsel %vm2592_vm4, %v10186_v16, %v4147_v19  ;;  %v4673_v39 = vunpack.i.h.bf16 %v4671_v15  ;;  %v2648_v4 = vsel %vm2647_vm5, %v2593_v61, %v4272_v37  ;;  %v10189_v16 = vld [vmem:[#allocation23_spill] sm:$0xff] }
 0x218   : > { %4945 = vrot.lane.b32.xlu0 %v10171_v56, %s5241_s18  ;;  %4950 = vrot.lane.b32.xlu1 %v10174_v24, %s5237_s15  ;;  %v8082_v56 = vpop.permute.xlu0 %4665  ;;  %v4672_v24 = vunpack.i.l.bf16 %v4671_v15  ;;  %v2649_v19 = vsel %vm2647_vm5, %v2594_v48, %v4273_v12  ;;  %v4278_v63 = vunpack.i.h.bf16 %v10189_v16  ;;  %v2703_v54 = vsel %vm2702_vm6, %v2648_v4, %v4407_v27  ;;  %v10192_v27 = vld [vmem:[#allocation123_spill] sm:$0xff] }
 0x219   : > { %10180 = vst [vmem:[#allocation83_spill] sm:$0xff] %v8082_v56  ;;  %v10187_v56 = vld [vmem:[#allocation57_spill] sm:$0xff]  ;;  %v2704_v23 = vsel %vm2702_vm6, %v2649_v19, %v4408_v8  ;;  %v10191_v8 = vld [vmem:[#allocation124_spill] sm:$0xff] }
 0x21a   : > { %v4153_v38 = vunpack.i.h.bf16 %v10187_v56  ;;  %v4681_v52 = vpop.permute.xlu1 %4680  ;;  %v10193_v4 = vpack.i.bf16 %v10191_v8, %v10192_v27  ;;  %v10196_v8 = vpack.i.bf16 %v10161_v31, %v10160_v44  ;;  %v10197_v27 = vld [vmem:[#allocation128_spill] sm:$0xff] }
 0x21b   : > { %v4683_v12 = vunpack.i.h.bf16 %v4681_v52  ;;  %v4682_v37 = vunpack.i.l.bf16 %v4681_v52  ;;  %v10195_v52 = vld [vmem:[#allocation91_spill] sm:$0xff] }
 0x21c   : > { %4955 = vrot.lane.b32.xlu0 %v4954_v50, %s5239_s16  ;;  %4960 = vrot.lane.b32.xlu1 %v10188_v51, %s5240_s17  ;;  %v4676_v15 = vpop.permute.xlu0 %4675  ;;  %v2758_v50 = vsel %vm2757_vm7, %v2703_v54, %v4542_v43  ;;  %v2759_v51 = vsel %vm2757_vm7, %v2704_v23, %v4543_v40  ;;  %v4277_v43 = vunpack.i.l.bf16 %v10189_v16  ;;  %v4413_v19 = vunpack.i.h.bf16 %v10195_v52 }
 0x21d   : > { %v4678_v26 = vunpack.i.h.bf16 %v4676_v15  ;;  %v4677_v17 = vunpack.i.l.bf16 %v4676_v15  ;;  %v2813_v61 = vsel %vm2812_vm8, %v2758_v50, %v4672_v24  ;;  %v2814_v48 = vsel %vm2812_vm8, %v2759_v51, %v4673_v39  ;;  %v10194_v24 = vld [vmem:[#allocation27_spill] sm:$0xff] }
 0x21e   : > { %v8123_v39 = vsel %vm2592_vm4, %v10194_v24, %v4153_v38  ;;  %v4691_v15 = vpop.permute.xlu1 %4690  ;;  %v4548_v50 = vunpack.i.h.bf16 %v7932_v11  ;;  %v4547_v16 = vunpack.i.l.bf16 %v7932_v11  ;;  %v2650_v11 = vsel %vm2647_vm5, %v8061_v60, %v4277_v43 }
 0x21f   : > { %v2868_v23 = vsel %vm2867_vm9, %v2813_v61, %v4677_v17  ;;  %v2869_v40 = vsel %vm2867_vm9, %v2814_v48, %v4678_v26  ;;  %v4693_v48 = vunpack.i.h.bf16 %v4691_v15  ;;  %v4692_v38 = vunpack.i.l.bf16 %v4691_v15 }
 0x220   : > { %4965 = vrot.lane.b32.xlu0 %v10190_v25, %s5241_s18  ;;  %4970 = vrot.lane.b32.xlu1 %v10193_v4, %s5237_s15  ;;  %v4412_v25 = vunpack.i.l.bf16 %v10195_v52  ;;  %v4686_v54 = vpop.permute.xlu0 %4685  ;;  %v2923_v26 = vsel %vm2922_vm10, %v2868_v23, %v4682_v37  ;;  %v2924_v61 = vsel %vm2922_vm10, %v2869_v40, %v4683_v12  ;;  %v2651_v4 = vsel %vm2647_vm5, %v8065_v6, %v4278_v63 }
 0x221   : > { %v4688_v51 = vunpack.i.h.bf16 %v4686_v54  ;;  %v4687_v17 = vunpack.i.l.bf16 %v4686_v54  ;;  %v2706_v23 = vsel %vm2702_vm6, %v2651_v4, %v4413_v19  ;;  %v10198_v19 = vld [vmem:[#allocation145_spill] sm:$0xff] }
 0x222   : > { %v2705_v40 = vsel %vm2702_vm6, %v2650_v11, %v4412_v25  ;;  %v4701_v44 = vpop.permute.xlu1 %4700  ;;  %v2761_v54 = vsel %vm2757_vm7, %v2706_v23, %v4548_v50  ;;  %v10199_v25 = vld [vmem:[#allocation221_spill] sm:$0xff]  ;;  %v10205_v11 = vld [vmem:[#allocation66_spill] sm:$0xff] }
 0x223   : > { %v2978_v37 = vsel %vm2977_vm11, %v2923_v26, %v4687_v17  ;;  %v2979_v12 = vsel %vm2977_vm11, %v2924_v61, %v4688_v51  ;;  %v2760_v52 = vsel %vm2757_vm7, %v2705_v40, %v4547_v16  ;;  %v2816_v43 = vsel %vm2812_vm8, %v2761_v54, %v4693_v48  ;;  %v10200_v17 = vld [vmem:[#allocation218_spill] sm:$0xff] }
 0x224   : > { %4975 = vrot.lane.b32.xlu0 %v10196_v8, %s5239_s16  ;;  %4980 = vrot.lane.b32.xlu1 %v10197_v27, %s5240_s17  ;;  %v4696_v24 = vpop.permute.xlu0 %4695  ;;  %v3032_v31 = vpack.c.bf16 %v2979_v12, %v2978_v37  ;;  %v2815_v60 = vsel %vm2812_vm8, %v2760_v52, %v4692_v38  ;;  %v4703_v15 = vunpack.i.h.bf16 %v4701_v44  ;;  %v4702_v51 = vunpack.i.l.bf16 %v4701_v44  ;;  %v10202_v61 = vld [vmem:[#allocation14_spill] sm:$0xff]  ;;  %v10206_v12 = vld [vmem:[#allocation112_spill] sm:$0xff] }
 0x225   : > { %v4698_v63 = vunpack.i.h.bf16 %v4696_v24  ;;  %v4697_v6 = vunpack.i.l.bf16 %v4696_v24  ;;  %v10201_v26 = vpack.i.bf16 %v10199_v25, %v10200_v17  ;;  %v4283_v16 = vunpack.i.h.bf16 %v10202_v61  ;;  %v10204_v27 = vld [vmem:[#allocation26_spill] sm:$0xff]  ;;  %v10209_v17 = vld [vmem:[#allocation188_spill] sm:$0xff] }
 0x226   : > { %v4282_v50 = vunpack.i.l.bf16 %v10202_v61  ;;  %3994 = vmatmul.mubr.msk.bf16.vlgmr.msra.gmra.mxu0 %vm3095_vm12, %v3032_v31  ;;  %v10203_v48 = vunpack.i.l.bf16 %v10187_v56  ;;  %v4158_v37 = vunpack.i.h.bf16 %v10205_v11  ;;  %v4418_v23 = vunpack.i.h.bf16 %v10206_v12  ;;  %v4711_v44 = vpop.permute.xlu1 %4710 }
 0x227   : > { %v2870_v8 = vsel %vm2867_vm9, %v2815_v60, %v4697_v6  ;;  %v2871_v38 = vsel %vm2867_vm9, %v2816_v43, %v4698_v63  ;;  %v4417_v40 = vunpack.i.l.bf16 %v10206_v12  ;;  %v10207_v52 = vmov 0.0  }
 0x228   : > { %4985 = vrot.lane.b32.xlu0 %v10198_v19, %s5241_s18  ;;  %4990 = vrot.lane.b32.xlu1 %v10201_v26, %s5237_s15  ;;  %v2599_v4 = vsel %vm2592_vm4, %v10204_v27, %v10203_v48  ;;  %v4706_v24 = vpop.permute.xlu0 %4705  ;;  %v4553_v54 = vunpack.i.h.bf16 %v7934_v41  ;;  %v4552_v31 = vunpack.i.l.bf16 %v7934_v41  ;;  %v2925_v6 = vsel %vm2922_vm10, %v2870_v8, %v4702_v51 }
 0x229   : > { %3997 = vmatprep.mubr.msk.bf16.mxu0 %vm5238_vm3, %v10207_v52  ;;  %v4708_v63 = vunpack.i.h.bf16 %v4706_v24  ;;  %v4707_v56 = vunpack.i.l.bf16 %v4706_v24  ;;  %v2926_v60 = vsel %vm2922_vm10, %v2871_v38, %v4703_v15  ;;  %v4713_v43 = vunpack.i.h.bf16 %v4711_v44 }
 0x22a   : > { %v4712_v19 = vunpack.i.l.bf16 %v4711_v44  ;;  %v10208_v25 = vpack.i.bf16 %v10163_v55, %v10162_v59  ;;  %v2653_v26 = vsel %vm2647_vm5, %v8090_v5, %v4283_v16  ;;  %v2652_v41 = vsel %vm2647_vm5, %v8094_v57, %v4282_v50  ;;  %v4721_v38 = vpop.permute.xlu1 %4720 }
 0x22b   : > { %v2980_v51 = vsel %vm2977_vm11, %v2925_v6, %v4707_v56  ;;  %v2981_v15 = vsel %vm2977_vm11, %v2926_v60, %v4708_v63  ;;  %v4157_v61 = vunpack.i.l.bf16 %v10205_v11  ;;  %v2707_v8 = vsel %vm2702_vm6, %v2652_v41, %v4417_v40  ;;  %v10210_v11 = vld [vmem:[#allocation232_spill] sm:$0xff]  ;;  %v10212_v40 = vld [vmem:[#allocation133_spill] sm:$0xff] }
 0x22c   : > { %4995 = vrot.lane.b32.xlu0 %v10208_v25, %s5239_s16  ;;  %5000 = vrot.lane.b32.xlu1 %v10209_v17, %s5240_s17  ;;  %v2708_v55 = vsel %vm2702_vm6, %v2653_v26, %v4418_v23  ;;  %v4716_v59 = vpop.permute.xlu0 %4715  ;;  %v3033_v48 = vpack.c.bf16 %v2981_v15, %v2980_v51  ;;  %v2762_v27 = vsel %vm2757_vm7, %v2707_v8, %v4552_v31  ;;  %v4723_v24 = vunpack.i.h.bf16 %v4721_v38  ;;  %v10211_v23 = vld [vmem:[#allocation134_spill] sm:$0xff]  ;;  %v10214_v56 = vld [vmem:[#allocation32_spill] sm:$0xff]  ;;  %v10217_v26 = vld [vmem:[#allocation101_spill] sm:$0xff] }
 0x22d   : > { %v2763_v5 = vsel %vm2757_vm7, %v2708_v55, %v4553_v54  ;;  %v4718_v16 = vunpack.i.h.bf16 %v4716_v59  ;;  %v4717_v12 = vunpack.i.l.bf16 %v4716_v59  ;;  %v2817_v57 = vsel %vm2812_vm8, %v2762_v27, %v4712_v19  ;;  %v10216_v25 = vld [vmem:[#allocation36_spill] sm:$0xff] }
 0x22e   : > { %v2818_v50 = vsel %vm2812_vm8, %v2763_v5, %v4713_v43  ;;  %v4722_v44 = vunpack.i.l.bf16 %v4721_v38  ;;  %v10213_v63 = vpack.i.bf16 %v10211_v23, %v10212_v40  ;;  %v4288_v31 = vunpack.i.h.bf16 %v10214_v56  ;;  %3998 = vmatmul.mubr.msk.bf16.gmra.mxu0 %vm3095_vm12, %v3033_v48  ;;  %v10215_v43 = vld [vmem:[#allocation37_spill] sm:$0xff] }
 0x22f   : > { %v4287_v54 = vunpack.i.l.bf16 %v10214_v56  ;;  %v2872_v6 = vsel %vm2867_vm9, %v2817_v57, %v4717_v12  ;;  %v2873_v60 = vsel %vm2867_vm9, %v2818_v50, %v4718_v16  ;;  %v2602_v19 = vsel %vm2592_vm4, %v10215_v43, %v4158_v37  ;;  %v4731_v8 = vpop.permute.xlu1 %4730  ;;  %4001 = vmatprep.mubr.msk.bf16.mxu0 %vm5238_vm3, %v10207_v52  ;;  %v10219_v12 = vld [vmem:[#allocation138_spill] sm:$0xff] }
 0x230   : > { %5005 = vrot.lane.b32.xlu0 %v10210_v11, %s5241_s18  ;;  %5010 = vrot.lane.b32.xlu1 %v10213_v63, %s5237_s15  ;;  %v2601_v17 = vsel %vm2592_vm4, %v10216_v25, %v4157_v61  ;;  %v4423_v41 = vunpack.i.h.bf16 %v10217_v26  ;;  %v4422_v51 = vunpack.i.l.bf16 %v10217_v26  ;;  %v4726_v15 = vpop.permute.xlu0 %4725  ;;  %v4558_v55 = vunpack.i.h.bf16 %v7941_v14  ;;  %v10221_v25 = vld [vmem:[#allocation155_spill] sm:$0xff] }
 0x231   : > { %v4557_v59 = vunpack.i.l.bf16 %v7941_v14  ;;  %v4728_v38 = vunpack.i.h.bf16 %v4726_v15  ;;  %v4727_v48 = vunpack.i.l.bf16 %v4726_v15  ;;  %v2927_v37 = vsel %vm2922_vm10, %v2872_v6, %v4722_v44  ;;  %v10222_v26 = vld [vmem:[#allocation223_spill] sm:$0xff]  ;;  %v10225_v15 = vld [vmem:[#allocation22_spill] sm:$0xff] }
 0x232   : > { %v2928_v27 = vsel %vm2922_vm10, %v2873_v60, %v4723_v24  ;;  %v4733_v61 = vunpack.i.h.bf16 %v4731_v8  ;;  %v4732_v5 = vunpack.i.l.bf16 %v4731_v8  ;;  %v10218_v16 = vpack.i.bf16 %v10166_v22, %v10165_v10  ;;  %v10220_v24 = vld [vmem:[#allocation67_spill] sm:$0xff] }
 0x233   : > { %v2655_v57 = vsel %vm2647_vm5, %v8123_v39, %v4288_v31  ;;  %v2654_v14 = vsel %vm2647_vm5, %v2599_v4, %v4287_v54  ;;  %v2982_v50 = vsel %vm2977_vm11, %v2927_v37, %v4727_v48  ;;  %v2983_v44 = vsel %vm2977_vm11, %v2928_v27, %v4728_v38  ;;  %v4741_v63 = vpop.permute.xlu1 %4740  ;;  %v10226_v48 = vld [vmem:[#allocation47_spill] sm:$0xff] }
 0x234   : > { %5015 = vrot.lane.b32.xlu0 %v10218_v16, %s5239_s16  ;;  %5020 = vrot.lane.b32.xlu1 %v10219_v12, %s5240_s17  ;;  %v4163_v11 = vunpack.i.h.bf16 %v10220_v24  ;;  %v2710_v23 = vsel %vm2702_vm6, %v2655_v57, %v4423_v41  ;;  %v2709_v40 = vsel %vm2702_vm6, %v2654_v14, %v4422_v51  ;;  %v3034_v22 = vpack.c.bf16 %v2983_v44, %v2982_v50  ;;  %v4736_v10 = vpop.permute.xlu0 %4735  ;;  %v10223_v41 = vld [vmem:[#allocation222_spill] sm:$0xff] }
 0x235   : > { %v2764_v56 = vsel %vm2757_vm7, %v2709_v40, %v4557_v59  ;;  %v2765_v6 = vsel %vm2757_vm7, %v2710_v23, %v4558_v55  ;;  %v4738_v39 = vunpack.i.h.bf16 %v4736_v10  ;;  %v4737_v31 = vunpack.i.l.bf16 %v4736_v10 }
 0x236   : > { %v2819_v4 = vsel %vm2812_vm8, %v2764_v56, %v4732_v5  ;;  %v2820_v54 = vsel %vm2812_vm8, %v2765_v6, %v4733_v61  ;;  %v4743_v60 = vunpack.i.h.bf16 %v4741_v63  ;;  %v4742_v43 = vunpack.i.l.bf16 %v4741_v63  ;;  %4002 = vmatmul.mubr.msk.bf16.gmra.mxu0 %vm3095_vm12, %v3034_v22  ;;  %v10227_v61 = vld [vmem:[#allocation122_spill] sm:$0xff]  ;;  %v10229_v63 = vld [vmem:[#allocation193_spill] sm:$0xff] }
 0x237   : > { %v10224_v51 = vpack.i.bf16 %v10222_v26, %v10223_v41  ;;  %v4293_v8 = vunpack.i.h.bf16 %v10225_v15  ;;  %v4292_v55 = vunpack.i.l.bf16 %v10225_v15  ;;  %v2874_v59 = vsel %vm2867_vm9, %v2819_v4, %v4737_v31  ;;  %v4751_v57 = vpop.permute.xlu1 %4750  ;;  %4005 = vmatprep.mubr.msk.bf16.mxu0 %vm5238_vm3, %v10207_v52  ;;  %v10230_v31 = vld [vmem:[#allocation46_spill] sm:$0xff] }
 0x238   : > { %5025 = vrot.lane.b32.xlu0 %v10221_v25, %s5241_s18  ;;  %v2875_v38 = vsel %vm2867_vm9, %v2820_v54, %v4738_v39  ;;  %v2604_v37 = vsel %vm2592_vm4, %v10226_v48, %v4163_v11  ;;  %v4162_v27 = vunpack.i.l.bf16 %v10220_v24  ;;  %v4428_v5 = vunpack.i.h.bf16 %v10227_v61  ;;  %v4746_v12 = vpop.permute.xlu0 %4745 }
 0x239   : > { %5030 = vrot.lane.b32.xlu1 %v10224_v51, %s5237_s15  ;;  %v4427_v16 = vunpack.i.l.bf16 %v10227_v61  ;;  %v4563_v14 = vunpack.i.h.bf16 %v7943_v20  ;;  %v4562_v50 = vunpack.i.l.bf16 %v7943_v20  ;;  %v4748_v44 = vunpack.i.h.bf16 %v4746_v12 }
 0x23a   : > { %v4747_v23 = vunpack.i.l.bf16 %v4746_v12  ;;  %v2929_v40 = vsel %vm2922_vm10, %v2874_v59, %v4742_v43  ;;  %v2930_v11 = vsel %vm2922_vm10, %v2875_v38, %v4743_v60  ;;  %v4753_v24 = vunpack.i.h.bf16 %v4751_v57  ;;  %v10232_v59 = vld [vmem:[#allocation144_spill] sm:$0xff]  ;;  %v10233_v38 = vld [vmem:[#allocation143_spill] sm:$0xff] }
 0x23b   : > { %v4752_v22 = vunpack.i.l.bf16 %v4751_v57  ;;  %v10228_v10 = vpack.i.bf16 %v10168_v28, %v10167_v9  ;;  %v2657_v56 = vsel %vm2647_vm5, %v2602_v19, %v4293_v8  ;;  %v2656_v20 = vsel %vm2647_vm5, %v2601_v17, %v4292_v55  ;;  %v4761_v43 = vpop.permute.xlu1 %4760  ;;  %v10231_v55 = vld [vmem:[#allocation239_spill] sm:$0xff]  ;;  %v10236_v57 = vld [vmem:[#allocation76_spill] sm:$0xff] }
 0x23c   : > { %v2984_v6 = vsel %vm2977_vm11, %v2929_v40, %v4747_v23  ;;  %v2985_v39 = vsel %vm2977_vm11, %v2930_v11, %v4748_v44  ;;  %v2603_v4 = vsel %vm2592_vm4, %v10230_v31, %v4162_v27  ;;  %v2711_v54 = vsel %vm2702_vm6, %v2656_v20, %v4427_v16  ;;  %v4756_v9 = vpop.permute.xlu0 %4755  ;;  %v10235_v27 = vld [vmem:[#allocation42_spill] sm:$0xff]  ;;  %v10237_v44 = vld [vmem:[#allocation111_spill] sm:$0xff] }
 0x23d   : > { %5035 = vrot.lane.b32.xlu0 %v10228_v10, %s5239_s16  ;;  %5040 = vrot.lane.b32.xlu1 %v10229_v63, %s5240_s17  ;;  %v2712_v60 = vsel %vm2702_vm6, %v2657_v56, %v4428_v5  ;;  %v3035_v28 = vpack.c.bf16 %v2985_v39, %v2984_v6  ;;  %v2766_v25 = vsel %vm2757_vm7, %v2711_v54, %v4562_v50  ;;  %v4758_v26 = vunpack.i.h.bf16 %v4756_v9 }
 0x23e   : > { %v2767_v19 = vsel %vm2757_vm7, %v2712_v60, %v4563_v14  ;;  %v4757_v17 = vunpack.i.l.bf16 %v4756_v9  ;;  %v2821_v41 = vsel %vm2812_vm8, %v2766_v25, %v4752_v22  ;;  %v4763_v15 = vunpack.i.h.bf16 %v4761_v43  ;;  %v10239_v60 = vld [vmem:[#allocation148_spill] sm:$0xff] }
 0x23f   : > { %v2822_v51 = vsel %vm2812_vm8, %v2767_v19, %v4753_v24  ;;  %v4762_v8 = vunpack.i.l.bf16 %v4761_v43  ;;  %v10234_v48 = vpack.i.bf16 %v10232_v59, %v10233_v38  ;;  %v4298_v61 = vunpack.i.h.bf16 %v10235_v27  ;;  %4006 = vmatmul.mubr.msk.bf16.gmra.mxu0 %vm3095_vm12, %v3035_v28  ;;  %v10241_v38 = vld [vmem:[#allocation225_spill] sm:$0xff] }
 0x240   : > { %v4297_v5 = vunpack.i.l.bf16 %v10235_v27  ;;  %v2876_v16 = vsel %vm2867_vm9, %v2821_v41, %v4757_v17  ;;  %v2877_v12 = vsel %vm2867_vm9, %v2822_v51, %v4758_v26  ;;  %v4168_v14 = vunpack.i.h.bf16 %v10236_v57  ;;  %v4766_v11 = vpop.permute.xlu0 %4765  ;;  %v4771_v24 = vpop.permute.xlu1 %4770  ;;  %4009 = vmatprep.mubr.msk.bf16.mxu0 %vm5238_vm3, %v10207_v52 }
 0x241   : > { %5045 = vrot.lane.b32.xlu0 %v10231_v55, %s5241_s18  ;;  %5050 = vrot.lane.b32.xlu1 %v10234_v48, %s5237_s15  ;;  %v4167_v50 = vunpack.i.l.bf16 %v10236_v57  ;;  %v4433_v23 = vunpack.i.h.bf16 %v10237_v44  ;;  %v4432_v40 = vunpack.i.l.bf16 %v10237_v44  ;;  %v4568_v22 = vunpack.i.h.bf16 %v7951_v29  ;;  %v10242_v48 = vld [vmem:[#allocation224_spill] sm:$0xff]  ;;  %v10245_v44 = vld [vmem:[#allocation77_spill] sm:$0xff] }
 0x242   : > { %v4567_v10 = vunpack.i.l.bf16 %v7951_v29  ;;  %v4768_v63 = vunpack.i.h.bf16 %v4766_v11  ;;  %v4767_v56 = vunpack.i.l.bf16 %v4766_v11  ;;  %v2931_v20 = vsel %vm2922_vm10, %v2876_v16, %v4762_v8 }
 0x243   : > { %v2932_v6 = vsel %vm2922_vm10, %v2877_v12, %v4763_v15  ;;  %v4773_v39 = vunpack.i.h.bf16 %v4771_v24  ;;  %v4772_v31 = vunpack.i.l.bf16 %v4771_v24  ;;  %v10238_v54 = vpack.i.bf16 %v10178_v62, %v10177_v32 }
 0x244   : > { %v2659_v28 = vsel %vm2647_vm5, %v2604_v37, %v4298_v61  ;;  %v2658_v29 = vsel %vm2647_vm5, %v2603_v4, %v4297_v5  ;;  %v2986_v9 = vsel %vm2977_vm11, %v2931_v20, %v4767_v56  ;;  %v2987_v43 = vsel %vm2977_vm11, %v2932_v6, %v4768_v63  ;;  %v4781_v17 = vpop.permute.xlu1 %4780  ;;  %v10244_v61 = vld [vmem:[#allocation31_spill] sm:$0xff] }
 0x245   : > { %5055 = vrot.lane.b32.xlu0 %v10238_v54, %s5239_s16  ;;  %5060 = vrot.lane.b32.xlu1 %v10239_v60, %s5240_s17  ;;  %v2606_v25 = vsel %vm2592_vm4, %v9830_v30, %v4168_v14  ;;  %v2714_v19 = vsel %vm2702_vm6, %v2659_v28, %v4433_v23  ;;  %v2713_v26 = vsel %vm2702_vm6, %v2658_v29, %v4432_v40  ;;  %v4776_v62 = vpop.permute.xlu0 %4775  ;;  %v4783_v55 = vunpack.i.h.bf16 %v4781_v17  ;;  %v10240_v30 = vld [vmem:[#allocation165_spill] sm:$0xff]  ;;  %v10248_v60 = vld [vmem:[#allocation198_spill] sm:$0xff] }
 0x246   : > { %v3036_v32 = vpack.c.bf16 %v2987_v43, %v2986_v9  ;;  %v2768_v41 = vsel %vm2757_vm7, %v2713_v26, %v4567_v10  ;;  %v2769_v37 = vsel %vm2757_vm7, %v2714_v19, %v4568_v22  ;;  %v4778_v51 = vunpack.i.h.bf16 %v4776_v62  ;;  %v10246_v40 = vld [vmem:[#allocation121_spill] sm:$0xff] }
 0x247   : > { %v4777_v4 = vunpack.i.l.bf16 %v4776_v62  ;;  %v2823_v15 = vsel %vm2812_vm8, %v2768_v41, %v4772_v31  ;;  %v2824_v8 = vsel %vm2812_vm8, %v2769_v37, %v4773_v39  ;;  %v4782_v59 = vunpack.i.l.bf16 %v4781_v17 }
 0x248   : > { %v10243_v27 = vpack.i.bf16 %v10241_v38, %v10242_v48  ;;  %v4303_v5 = vunpack.i.h.bf16 %v10244_v61  ;;  %v4302_v16 = vunpack.i.l.bf16 %v10244_v61  ;;  %v2879_v57 = vsel %vm2867_vm9, %v2824_v8, %v4778_v51  ;;  %4010 = vmatmul.mubr.msk.bf16.gmra.mxu0 %vm3095_vm12, %v3036_v32  ;;  %v10249_v8 = vld [vmem:[#allocation242_spill] sm:$0xff]  ;;  %v10253_v38 = vld [vmem:[#allocation52_spill] sm:$0xff] }
 0x249   : > { %5065 = vrot.lane.b32.xlu0 %v10240_v30, %s5241_s18  ;;  %v2878_v12 = vsel %vm2867_vm9, %v2823_v15, %v4777_v4  ;;  %v2605_v14 = vsel %vm2592_vm4, %v9829_v33, %v4167_v50  ;;  %v4173_v23 = vunpack.i.h.bf16 %v10245_v44  ;;  %v4438_v11 = vunpack.i.h.bf16 %v10246_v40  ;;  %v4786_v22 = vpop.permute.xlu0 %4785  ;;  %v4791_v10 = vpop.permute.xlu1 %4790  ;;  %4013 = vmatprep.mubr.msk.bf16.mxu0 %vm5238_vm3, %v10207_v52 }
 0x24a   : > { %5070 = vrot.lane.b32.xlu1 %v10243_v27, %s5237_s15  ;;  %v4437_v24 = vunpack.i.l.bf16 %v10246_v40  ;;  %v4573_v63 = vunpack.i.h.bf16 %v7953_v35  ;;  %v4572_v56 = vunpack.i.l.bf16 %v7953_v35  ;;  %v4788_v20 = vunpack.i.h.bf16 %v4786_v22 }
 0x24b   : > { %v4787_v6 = vunpack.i.l.bf16 %v4786_v22  ;;  %v2933_v39 = vsel %vm2922_vm10, %v2878_v12, %v4782_v59  ;;  %v2934_v33 = vsel %vm2922_vm10, %v2879_v57, %v4783_v55  ;;  %v4793_v50 = vunpack.i.h.bf16 %v4791_v10  ;;  %v10250_v55 = vld [vmem:[#allocation227_spill] sm:$0xff]  ;;  %v10251_v59 = vld [vmem:[#allocation226_spill] sm:$0xff] }
 0x24c   : > { %v4792_v31 = vunpack.i.l.bf16 %v4791_v10  ;;  %v10247_v54 = vpack.i.bf16 %v10182_v13, %v10181_v49  ;;  %v2661_v28 = vsel %vm2647_vm5, %v2606_v25, %v4303_v5  ;;  %v2660_v35 = vsel %vm2647_vm5, %v2605_v14, %v4302_v16  ;;  %v10254_v57 = vld [vmem:[#allocation142_spill] sm:$0xff] }
 0x24d   : > { %v2988_v29 = vsel %vm2977_vm11, %v2933_v39, %v4787_v6  ;;  %v2989_v9 = vsel %vm2977_vm11, %v2934_v33, %v4788_v20  ;;  %v4172_v43 = vunpack.i.l.bf16 %v10245_v44  ;;  %v2715_v19 = vsel %vm2702_vm6, %v2660_v35, %v4437_v24  ;;  %v4796_v49 = vpop.permute.xlu0 %4795  ;;  %v4801_v13 = vpop.permute.xlu1 %4800  ;;  %v10256_v6 = vld [vmem:[#allocation203_spill] sm:$0xff] }
 0x24e   : > { %5075 = vrot.lane.b32.xlu0 %v10247_v54, %s5239_s16  ;;  %5080 = vrot.lane.b32.xlu1 %v10248_v60, %s5240_s17  ;;  %v2716_v26 = vsel %vm2702_vm6, %v2661_v28, %v4438_v11  ;;  %v3037_v32 = vpack.c.bf16 %v2989_v9, %v2988_v29  ;;  %v2770_v62 = vsel %vm2757_vm7, %v2715_v19, %v4572_v56  ;;  %v4798_v25 = vunpack.i.h.bf16 %v4796_v49 }
 0x24f   : > { %v2771_v17 = vsel %vm2757_vm7, %v2716_v26, %v4573_v63  ;;  %v4797_v41 = vunpack.i.l.bf16 %v4796_v49  ;;  %v2825_v37 = vsel %vm2812_vm8, %v2770_v62, %v4792_v31  ;;  %v4803_v4 = vunpack.i.h.bf16 %v4801_v13  ;;  %v10257_v49 = vld [vmem:[#allocation243_spill] sm:$0xff]  ;;  %v10259_v62 = vld [vmem:[#allocation233_spill] sm:$0xff] }
 0x250   : > { %v2826_v51 = vsel %vm2812_vm8, %v2771_v17, %v4793_v50  ;;  %v4802_v15 = vunpack.i.l.bf16 %v4801_v13  ;;  %v10252_v30 = vpack.i.bf16 %v10250_v55, %v10251_v59  ;;  %v4308_v48 = vunpack.i.h.bf16 %v10253_v38  ;;  %4014 = vmatmul.mubr.msk.bf16.gmra.mxu0 %vm3095_vm12, %v3037_v32  ;;  %v10258_v13 = vld [vmem:[#allocation234_spill] sm:$0xff]  ;;  %v322_v55 = vld [vmem:[%s5439_s10 + $0x1d0] sm:$0xff] }
 0x251   : > { %v4307_v27 = vunpack.i.l.bf16 %v10253_v38  ;;  %v2880_v61 = vsel %vm2867_vm9, %v2825_v37, %v4797_v41  ;;  %v2881_v5 = vsel %vm2867_vm9, %v2826_v51, %v4798_v25  ;;  %v2608_v16 = vsel %vm2592_vm4, %v9834_v21, %v4173_v23  ;;  %v4806_v40 = vpop.permute.xlu0 %4805  ;;  %4017 = vmatprep.mubr.msk.bf16.mxu0 %vm5238_vm3, %v10207_v52 }
 0x252   : > { %5085 = vrot.lane.b32.xlu0 %v10249_v8, %s5241_s18  ;;  %5090 = vrot.lane.b32.xlu1 %v10252_v30, %s5237_s15  ;;  %v2607_v12 = vsel %vm2592_vm4, %v9831_v53, %v4172_v43  ;;  %v4443_v14 = vunpack.i.h.bf16 %v10254_v57  ;;  %v4442_v44 = vunpack.i.l.bf16 %v10254_v57  ;;  %v4811_v11 = vpop.permute.xlu1 %4810  ;;  %v4578_v24 = vunpack.i.h.bf16 %v7960_v2 }
 0x253   : > { %v4577_v22 = vunpack.i.l.bf16 %v7960_v2  ;;  %v4808_v10 = vunpack.i.h.bf16 %v4806_v40  ;;  %v4807_v63 = vunpack.i.l.bf16 %v4806_v40  ;;  %v2935_v21 = vsel %vm2922_vm10, %v2880_v61, %v4802_v15  ;;  %v10262_v15 = vld [vmem:[#allocation212_spill] sm:$0xff] }
 0x254   : > { %v2936_v23 = vsel %vm2922_vm10, %v2881_v5, %v4803_v4  ;;  %v4813_v53 = vunpack.i.h.bf16 %v4811_v11  ;;  %v4812_v56 = vunpack.i.l.bf16 %v4811_v11  ;;  %v10255_v20 = vpack.i.bf16 %v10184_v58, %v10183_v18  ;;  %v10261_v4 = vld [vmem:[#allocation211_spill] sm:$0xff] }
 0x255   : > { %v2663_v39 = vsel %vm2647_vm5, %v2608_v16, %v4308_v48  ;;  %v2662_v2 = vsel %vm2647_vm5, %v2607_v12, %v4307_v27  ;;  %v2990_v33 = vsel %vm2977_vm11, %v2935_v21, %v4807_v63  ;;  %v2991_v50 = vsel %vm2977_vm11, %v2936_v23, %v4808_v10  ;;  %v10263_v12 = vld [vmem:[#allocation208_spill] sm:$0xff] }
 0x256   : > { %5095 = vrot.lane.b32.xlu0 %v10255_v20, %s5239_s16  ;;  %5100 = vrot.lane.b32.xlu1 %v10256_v6, %s5240_s17  ;;  %v2718_v31 = vsel %vm2702_vm6, %v2663_v39, %v4443_v14  ;;  %v2717_v54 = vsel %vm2702_vm6, %v2662_v2, %v4442_v44  ;;  %v3038_v60 = vpack.c.bf16 %v2991_v50, %v2990_v33  ;;  %v4816_v28 = vpop.permute.xlu0 %4815  ;;  %v4821_v35 = vpop.permute.xlu1 %4820  ;;  %v4613_v59 = vunpack.i.h.bf16 %v7991_v46  ;;  %v10264_v39 = vld [vmem:[#allocation247_spill] sm:$0xff]  ;;  %v10265_v2 = vld [vmem:[#allocation236_spill] sm:$0xff] }
 0x257   : > { %v2772_v58 = vsel %vm2757_vm7, %v2717_v54, %v4577_v22  ;;  %v2773_v18 = vsel %vm2757_vm7, %v2718_v31, %v4578_v24  ;;  %v4818_v29 = vunpack.i.h.bf16 %v4816_v28  ;;  %v4817_v9 = vunpack.i.l.bf16 %v4816_v28  ;;  %v323_v22 = vld [vmem:[%s5439_s10 + $0x1d8] sm:$0xff]  ;;  %v10266_v33 = vld [vmem:[#allocation235_spill] sm:$0xff]  ;;  %v5222_v54 = vld [vmem:[%s9183_s4] ss:$0 sm:$0xff] }
 0x258   : > { %v2827_v43 = vsel %vm2812_vm8, %v2772_v58, %v4812_v56  ;;  %v2828_v19 = vsel %vm2812_vm8, %v2773_v18, %v4813_v53  ;;  %v4823_v26 = vunpack.i.h.bf16 %v4821_v35  ;;  %v4822_v32 = vunpack.i.l.bf16 %v4821_v35  ;;  %4018 = vmatmul.mubr.msk.bf16.gmra.mxu0 %vm3095_vm12, %v3038_v60 }
 0x259   : > { %v10260_v17 = vpack.i.bf16 %v10258_v13, %v10259_v62  ;;  %v2882_v25 = vsel %vm2867_vm9, %v2827_v43, %v4817_v9  ;;  %v2883_v41 = vsel %vm2867_vm9, %v2828_v19, %v4818_v29  ;;  %v5114_v8 = vpack.i.bf16 %v10262_v15, %v10261_v4  ;;  %4021 = vmatprep.mubr.msk.bf16.mxu0 %vm5238_vm3, %v10207_v52  ;;  %v10268_v13 = vld [vmem:[#allocation213_spill] sm:$0xff] }
 0x25a   : > { %5105 = vrot.lane.b32.xlu0 %v10257_v49, %s5241_s18  ;;  %v4826_v37 = vpop.permute.xlu0 %4825  ;;  %v4831_v51 = vpop.permute.xlu1 %4830  ;;  %v4612_v30 = vunpack.i.l.bf16 %v7991_v46  ;;  %v2937_v27 = vsel %vm2922_vm10, %v2882_v25, %v4822_v32  ;;  %v2938_v61 = vsel %vm2922_vm10, %v2883_v41, %v4823_v26  ;;  %v5221_v46 = vld [vmem:[%s9182_s3] ss:$0 sm:$0xff]  ;;  %v2787_v63 = vsel %vm2757_vm7, %v7754_v34, %v4613_v59 }
 0x25b   : > { %5110 = vrot.lane.b32.xlu1 %v10260_v17, %s5237_s15  ;;  %v4828_v38 = vunpack.i.h.bf16 %v4826_v37  ;;  %v4827_v48 = vunpack.i.l.bf16 %v4826_v37  ;;  %v4833_v5 = vunpack.i.h.bf16 %v4831_v51  ;;  %v4832_v16 = vunpack.i.l.bf16 %v4831_v51 }
 0x25c   : > { %v449_v44 = vmul.f32 %v5221_v46, %v322_v55  ;;  %v2786_v10 = vsel %vm2757_vm7, %v7751_v42, %v4612_v30  ;;  %v10267_v50 = vpack.i.bf16 %v10265_v2, %v10266_v33  ;;  %v450_v31 = vmul.f32 %v5221_v46, %v323_v22  ;;  %v10280_v2 = vld [vmem:[#allocation255_spill] sm:$0xff] }
 0x25d   : > { %v2992_v57 = vsel %vm2977_vm11, %v2937_v27, %v4827_v48  ;;  %v2993_v14 = vsel %vm2977_vm11, %v2938_v61, %v4828_v38  ;;  %v2841_v53 = vsel %vm2812_vm8, %v2786_v10, %v4832_v16  ;;  %v2842_v56 = vsel %vm2812_vm8, %v2787_v63, %v4833_v5  ;;  %v10269_v38 = vld [vmem:[#allocation249_spill] sm:$0xff]  ;;  %v10270_v48 = vld [vmem:[#allocation240_spill] sm:$0xff]  ;;  %v10271_v27 = vld [vmem:[#allocation238_spill] sm:$0xff] }
 0x25e   : > { %5115 = vrot.lane.b32.xlu0 %v5114_v8, %s5239_s16  ;;  %v3039_v40 = vpack.c.bf16 %v2993_v14, %v2992_v57  ;;  %v4836_v11 = vpop.permute.xlu0 %4835  ;;  %v4841_v24 = vpop.permute.xlu1 %4840  ;;  %v516_v60 = vadd.f32 %v5222_v54, %v449_v44  ;;  %v5134_v58 = vpack.i.bf16 %v10094_v0, %v10095_v47  ;;  %v4583_v18 = vunpack.i.h.bf16 %v7962_v3  ;;  %v10273_v16 = vld [vmem:[#allocation254_spill] sm:$0xff] }
 0x25f   : > { %5120 = vrot.lane.b32.xlu1 %v10263_v12, %s5240_s17  ;;  %v4838_v21 = vunpack.i.h.bf16 %v4836_v11  ;;  %v4837_v23 = vunpack.i.l.bf16 %v4836_v11  ;;  %v4843_v20 = vunpack.i.h.bf16 %v4841_v24  ;;  %v4842_v6 = vunpack.i.l.bf16 %v4841_v24 }
 0x260   : > { %4022 = vmatmul.mubr.msk.bf16.gmra.mxu0 %vm3095_vm12, %v3039_v40  ;;  %v4582_v29 = vunpack.i.l.bf16 %v7962_v3  ;;  %v517_v62 = vadd.f32 %v5222_v54, %v450_v31  ;;  %v576_v17 = vmax.f32 %v516_v60, 0.0  ;;  %v2775_v51 = vsel %vm2757_vm7, %v7664_v7, %v4583_v18  ;;  %v10281_v60 = vld [vmem:[#allocation45_spill] sm:$0xff] }
 0x261   : > { %v2896_v42 = vsel %vm2867_vm9, %v2841_v53, %v4837_v23  ;;  %v2897_v34 = vsel %vm2867_vm9, %v2842_v56, %v4838_v21  ;;  %4025 = vmatprep.mubr.msk.bf16.mxu0 %vm5238_vm3, %v10207_v52  ;;  %v10272_v61 = vpack.i.bf16 %v10270_v48, %v10271_v27  ;;  %v4618_v46 = vunpack.i.h.bf16 %v7998_v1  ;;  %v10274_v21 = vld [vmem:[#allocation246_spill] sm:$0xff]  ;;  %v10275_v23 = vld [vmem:[#allocation245_spill] sm:$0xff] }
 0x262   : > { %5125 = vrot.lane.b32.xlu0 %v10264_v39, %s5241_s18  ;;  %v4846_v28 = vpop.permute.xlu0 %4845  ;;  %v4851_v35 = vpop.permute.xlu1 %4850  ;;  %v2951_v19 = vsel %vm2922_vm10, %v2896_v42, %v4842_v6  ;;  %v2952_v26 = vsel %vm2922_vm10, %v2897_v34, %v4843_v20  ;;  %v2774_v37 = vsel %vm2757_vm7, %v7661_v45, %v4582_v29  ;;  %v577_v5 = vmax.f32 %v517_v62, 0.0  ;;  %v10277_v56 = vld [vmem:[#allocation230_spill] sm:$0xff]  ;;  %v10278_v20 = vld [vmem:[#allocation215_spill] sm:$0xff] }
 0x263   : > { %5130 = vrot.lane.b32.xlu1 %v10267_v50, %s5237_s15  ;;  %v4848_v9 = vunpack.i.h.bf16 %v4846_v28  ;;  %v4847_v43 = vunpack.i.l.bf16 %v4846_v28  ;;  %v4853_v32 = vunpack.i.h.bf16 %v4851_v35  ;;  %v4852_v49 = vunpack.i.l.bf16 %v4851_v35 }
 0x264   : > { %v8464_v12 = vmul.f32 %v10273_v16, %v576_v17  ;;  %v4617_v44 = vunpack.i.l.bf16 %v7998_v1  ;;  %v10276_v53 = vpack.i.bf16 %v10274_v21, %v10275_v23  ;;  %v10279_v6 = vpack.i.bf16 %v10277_v56, %v10278_v20  ;;  %v10296_v21 = vld [vmem:[#allocation161_spill] sm:$0xff] }
 0x265   : > { %v3006_v0 = vsel %vm2977_vm11, %v2951_v19, %v4847_v43  ;;  %v3007_v47 = vsel %vm2977_vm11, %v2952_v26, %v4848_v9  ;;  %v2829_v8 = vsel %vm2812_vm8, %v2774_v37, %v4852_v49  ;;  %v2830_v55 = vsel %vm2812_vm8, %v2775_v51, %v4853_v32  ;;  %v10282_v19 = vld [vmem:[#allocation251_spill] sm:$0xff]  ;;  %v10283_v26 = vld [vmem:[#allocation250_spill] sm:$0xff]  ;;  %v10285_v49 = vld [vmem:[#allocation244_spill] sm:$0xff] }
 0x266   : > { %5135 = vrot.lane.b32.xlu0 %v5134_v58, %s5239_s16  ;;  %v3046_v3 = vpack.c.bf16 %v3007_v47, %v3006_v0  ;;  %v4856_v25 = vpop.permute.xlu0 %4855  ;;  %v4861_v41 = vpop.permute.xlu1 %4860  ;;  %v8483_v33 = vmul.f32 %v10280_v2, %v577_v5  ;;  %v1289_v50 = vrot.slane %v8464_v12, 1  ;;  %v2788_v54 = vsel %vm2757_vm7, %v7760_v36, %v4617_v44 }
 0x267   : > { %5140 = vrot.lane.b32.xlu1 %v10268_v13, %s5240_s17  ;;  %v4858_v4 = vunpack.i.h.bf16 %v4856_v25  ;;  %v4857_v15 = vunpack.i.l.bf16 %v4856_v25  ;;  %v4863_v59 = vunpack.i.h.bf16 %v4861_v41  ;;  %v4862_v30 = vunpack.i.l.bf16 %v4861_v41  ;;  %v10287_v25 = vld [vmem:[#allocation237_spill] sm:$0xff] }
 0x268   : > { %4050 = vmatmul.mubr.msk.bf16.vlgmr.msra.gmra.mxu1 %vm3095_vm12, %v3046_v3  ;;  %v2789_v28 = vsel %vm2757_vm7, %v10281_v60, %v4618_v46  ;;  %v10284_v32 = vpack.i.bf16 %v10282_v19, %v10283_v26  ;;  %v10286_v36 = vpack.i.bf16 %v10283_v26, %v10285_v49  ;;  %v1116_v47 = vrot.slane %v8483_v33, 7  ;;  %v10288_v41 = vld [vmem:[#allocation241_spill] sm:$0xff] }
 0x269   : > { %v2884_v45 = vsel %vm2867_vm9, %v2829_v8, %v4857_v15  ;;  %v2885_v7 = vsel %vm2867_vm9, %v2830_v55, %v4858_v4  ;;  %4053 = vmatprep.mubr.msk.bf16.mxu1 %vm5238_vm3, %v10207_v52  ;;  %v1114_v62 = vrot.slane %v8464_v12, 7  ;;  %v5179_v37 = vpack.i.bf16 %v10288_v41, %v10287_v25  ;;  %v10290_v15 = vld [vmem:[#allocation74_spill] sm:$0xff] }
 0x26a   : > { %5145 = vrot.lane.b32.xlu0 %v10269_v38, %s5241_s18  ;;  %v4866_v57 = vpop.permute.xlu0 %4865  ;;  %v4871_v14 = vpop.permute.xlu1 %4870  ;;  %v2939_v24 = vsel %vm2922_vm10, %v2884_v45, %v4862_v30  ;;  %v2940_v22 = vsel %vm2922_vm10, %v2885_v7, %v4863_v59  ;;  %v10289_v51 = vrot.slane %v10288_v41, 1  ;;  %v4588_v8 = vunpack.i.h.bf16 %v10290_v15  ;;  %v10291_v45 = vld [vmem:[#allocation252_spill] sm:$0xff] }
 0x26b   : > { %5150 = vrot.lane.b32.xlu1 %v10272_v61, %s5237_s15  ;;  %v4868_v40 = vunpack.i.h.bf16 %v4866_v57  ;;  %v4867_v11 = vunpack.i.l.bf16 %v4866_v57  ;;  %v4873_v10 = vunpack.i.h.bf16 %v4871_v14  ;;  %v4872_v63 = vunpack.i.l.bf16 %v4871_v14  ;;  %v10292_v7 = vld [vmem:[#allocation248_spill] sm:$0xff] }
 0x26c   : > { %v1290_v4 = vsel %vm1173_vm0, %v10289_v51, %v1289_v50  ;;  %v4587_v55 = vunpack.i.l.bf16 %v10290_v15  ;;  %v10293_v5 = vpack.i.bf16 %v10291_v45, %v10292_v7  ;;  %v1291_v16 = vrot.slane %v8483_v33, 1  ;;  %v10301_v51 = vld [vmem:[#allocation34_spill] sm:$0xff]  ;;  %v10302_v15 = vld [vmem:[#allocation33_spill] sm:$0xff] }
 0x26d   : > { %v2994_v1 = vsel %vm2977_vm11, %v2939_v24, %v4867_v11  ;;  %v2995_v39 = vsel %vm2977_vm11, %v2940_v22, %v4868_v40  ;;  %v2843_v18 = vsel %vm2812_vm8, %v2788_v54, %v4872_v63  ;;  %v2844_v29 = vsel %vm2812_vm8, %v2789_v28, %v4873_v10  ;;  %v10294_v11 = vld [vmem:[#allocation253_spill] sm:$0xff] }
 0x26e   : > { %5155 = vrot.lane.b32.xlu0 %v10276_v53, %s5239_s16  ;;  %v3040_v42 = vpack.c.bf16 %v2995_v39, %v2994_v1  ;;  %v4876_v34 = vpop.permute.xlu0 %4875  ;;  %v4881_v31 = vpop.permute.xlu1 %4880  ;;  %v5184_v24 = vpack.i.bf16 %v1290_v4, %v10294_v11  ;;  %v10295_v22 = vrot.slane %v10288_v41, 7  ;;  %v1117_v63 = vsel %vm998_vm1, %v1114_v62, %v1116_v47  ;;  %v10297_v53 = vld [vmem:[#allocation151_spill] sm:$0xff]  ;;  %v10303_v45 = vld [vmem:[#allocation73_spill] sm:$0xff] }
 0x26f   : > { %5160 = vrot.lane.b32.xlu1 %v10279_v6, %s5240_s17  ;;  %v4878_v35 = vunpack.i.h.bf16 %v4876_v34  ;;  %v4877_v58 = vunpack.i.l.bf16 %v4876_v34  ;;  %v4883_v9 = vunpack.i.h.bf16 %v4881_v31  ;;  %v4882_v43 = vunpack.i.l.bf16 %v4881_v31 }
 0x270   : > { %4026 = vmatmul.mubr.msk.bf16.gmra.mxu0 %vm3095_vm12, %v3040_v42  ;;  %v1115_v10 = vsel %vm998_vm1, %v10295_v22, %v1114_v62  ;;  %v2776_v23 = vsel %vm2757_vm7, %v10296_v21, %v4587_v55  ;;  %v2777_v20 = vsel %vm2757_vm7, %v10297_v53, %v4588_v8  ;;  %v10298_v31 = vpack.i.bf16 %v10287_v25, %v10277_v56  ;;  %v10304_v21 = vld [vmem:[#allocation16_spill] sm:$0xff]  ;;  %v10305_v53 = vld [vmem:[#allocation19_spill] sm:$0xff] }
 0x271   : > { %v2898_v13 = vsel %vm2867_vm9, %v2843_v18, %v4877_v58  ;;  %v2899_v0 = vsel %vm2867_vm9, %v2844_v29, %v4878_v35  ;;  %4029 = vmatprep.mubr.msk.bf16.mxu0 %vm5238_vm3, %v10207_v52  ;;  %v1294_v28 = vsel %vm1173_vm0, %v1291_v16, 0.0  ;;  %v5199_v18 = vpack.i.bf16 %v1117_v63, %v1115_v10 }
 0x272   : > { %5165 = vrot.lane.b32.xlu0 %v10284_v32, %s5241_s18  ;;  %v4886_v17 = vpop.permute.xlu0 %4885  ;;  %v4891_v3 = vpop.permute.xlu1 %4890  ;;  %v2953_v38 = vsel %vm2922_vm10, %v2898_v13, %v4882_v43  ;;  %v2954_v48 = vsel %vm2922_vm10, %v2899_v0, %v4883_v9  ;;  %v1292_v29 = vsel %vm1173_vm0, %v1289_v50, %v1291_v16  ;;  %v10299_v9 = vld [vmem:[#allocation82_spill] sm:$0xff]  ;;  %v10300_v47 = vpack.i.bf16 %v10294_v11, %v10282_v19 }
 0x273   : > { %5170 = vrot.lane.b32.xlu1 %v10286_v36, %s5237_s15  ;;  %v4888_v59 = vunpack.i.h.bf16 %v4886_v17  ;;  %v4887_v30 = vunpack.i.l.bf16 %v4886_v17  ;;  %v4893_v27 = vunpack.i.h.bf16 %v4891_v3  ;;  %v4892_v61 = vunpack.i.l.bf16 %v4891_v3 }
 0x274   : > { %v4623_v43 = vunpack.i.h.bf16 %v10299_v9  ;;  %v4622_v56 = vunpack.i.l.bf16 %v10299_v9  ;;  %v5204_v17 = vpack.i.bf16 %v8483_v33, %v8464_v12  ;;  %v4593_v7 = vunpack.i.h.bf16 %v10303_v45 }
 0x275   : > { %v3008_v57 = vsel %vm2977_vm11, %v2953_v38, %v4887_v30  ;;  %v3009_v14 = vsel %vm2977_vm11, %v2954_v48, %v4888_v59  ;;  %v2831_v39 = vsel %vm2812_vm8, %v2776_v23, %v4892_v61  ;;  %v2832_v2 = vsel %vm2812_vm8, %v2777_v20, %v4893_v27 }
 0x276   : > { %5175 = vrot.lane.b32.xlu0 %v10293_v5, %s5239_s16  ;;  %v3047_v46 = vpack.c.bf16 %v3009_v14, %v3008_v57  ;;  %v4896_v44 = vpop.permute.xlu0 %4895  ;;  %v4901_v40 = vpop.permute.xlu1 %4900  ;;  %v2790_v4 = vsel %vm2757_vm7, %v10301_v51, %v4622_v56  ;;  %v2791_v19 = vsel %vm2757_vm7, %v10302_v15, %v4623_v43  ;;  %v4592_v5 = vunpack.i.l.bf16 %v10303_v45 }
 0x277   : > { %5180 = vrot.lane.b32.xlu1 %v5179_v37, %s5240_s17  ;;  %v4898_v6 = vunpack.i.h.bf16 %v4896_v44  ;;  %v4897_v1 = vunpack.i.l.bf16 %v4896_v44  ;;  %v4903_v42 = vunpack.i.h.bf16 %v4901_v40  ;;  %v4902_v34 = vunpack.i.l.bf16 %v4901_v40 }
 0x278   : > { %4054 = vmatmul.mubr.msk.bf16.gmra.mxu1 %vm3095_vm12, %v3047_v46  ;;  %v5209_v37 = vpack.i.bf16 %v1294_v28, %v1292_v29  ;;  %v2778_v23 = vsel %vm2757_vm7, %v10304_v21, %v4592_v5  ;;  %v2779_v20 = vsel %vm2757_vm7, %v10305_v53, %v4593_v7 }
 0x279   : > { %v2886_v54 = vsel %vm2867_vm9, %v2831_v39, %v4897_v1  ;;  %v2887_v60 = vsel %vm2867_vm9, %v2832_v2, %v4898_v6  ;;  %4057 = vmatprep.mubr.msk.bf16.mxu1 %vm5238_vm3, %v10207_v52 }
 0x27a   : > { %5185 = vrot.lane.b32.xlu0 %v5184_v24, %s5241_s18  ;;  %v4906_v35 = vpop.permute.xlu0 %4905  ;;  %v4911_v58 = vpop.permute.xlu1 %4910  ;;  %v2941_v49 = vsel %vm2922_vm10, %v2886_v54, %v4902_v34  ;;  %v2942_v36 = vsel %vm2922_vm10, %v2887_v60, %v4903_v42 }
 0x27b   : > { %5190 = vrot.lane.b32.xlu1 %v10298_v31, %s5235_s27  ;;  %v4908_v26 = vunpack.i.h.bf16 %v4906_v35  ;;  %v4907_v32 = vunpack.i.l.bf16 %v4906_v35  ;;  %v4913_v13 = vunpack.i.h.bf16 %v4911_v58  ;;  %v4912_v0 = vunpack.i.l.bf16 %v4911_v58  ;;  %v10306_v35 = vld [vmem:[#allocation87_spill] sm:$0xff]  ;;  %s8789_s27 = scalar_lea.vmem %s9184_s5, %s4112_s24 }
 0x27c   : > { %v4628_v58 = vunpack.i.h.bf16 %v10306_v35 }
 0x27d   : > { %v2996_v50 = vsel %vm2977_vm11, %v2941_v49, %v4907_v32  ;;  %v2997_v62 = vsel %vm2977_vm11, %v2942_v36, %v4908_v26  ;;  %v2845_v59 = vsel %vm2812_vm8, %v2790_v4, %v4912_v0  ;;  %v2846_v30 = vsel %vm2812_vm8, %v2791_v19, %v4913_v13 }
 0x27e   : > { %5195 = vrot.lane.b32.xlu0 %v10300_v47, %s5237_s15  ;;  %v3041_v3 = vpack.c.bf16 %v2997_v62, %v2996_v50  ;;  %v4916_v25 = vpop.permute.xlu0 %4915  ;;  %v4921_v41 = vpop.permute.xlu1 %4920  ;;  %v10307_v50 = vld [vmem:[#allocation8_spill] sm:$0xff] }
 0x27f   : > { %5200 = vrot.lane.b32.xlu1 %v5199_v18, %s5239_s16  ;;  %v4918_v8 = vunpack.i.h.bf16 %v4916_v25  ;;  %v4917_v55 = vunpack.i.l.bf16 %v4916_v25  ;;  %v4923_v38 = vunpack.i.h.bf16 %v4921_v41  ;;  %v4922_v48 = vunpack.i.l.bf16 %v4921_v41 }
 0x280   : > { %4030 = vmatmul.mubr.msk.bf16.gmra.mxu0 %vm3095_vm12, %v3041_v3  ;;  %v4627_v18 = vunpack.i.l.bf16 %v10306_v35 }
 0x281   : > { %v2900_v12 = vsel %vm2867_vm9, %v2845_v59, %v4917_v55  ;;  %v2901_v33 = vsel %vm2867_vm9, %v2846_v30, %v4918_v8  ;;  %4033 = vmatprep.mubr.msk.bf16.mxu0 %vm5238_vm3, %v10207_v52  ;;  %v10309_v30 = vld [vmem:[#allocation132_spill] sm:$0xff] }
 0x282   : > { %5205 = vrot.lane.b32.xlu0 %v5204_v17, %s5240_s17  ;;  %v4926_v27 = vpop.permute.xlu0 %4925  ;;  %v4931_v61 = vpop.permute.xlu1 %4930  ;;  %v2955_v14 = vsel %vm2922_vm10, %v2900_v12, %v4922_v48  ;;  %v2956_v46 = vsel %vm2922_vm10, %v2901_v33, %v4923_v38  ;;  %v2792_v62 = vsel %vm2757_vm7, %v10307_v50, %v4627_v18  ;;  %v10308_v17 = vld [vmem:[#allocation38_spill] sm:$0xff]  ;;  %v4598_v38 = vunpack.i.h.bf16 %v10309_v30 }
 0x283   : > { %5210 = vrot.lane.b32.xlu1 %v5209_v37, %s5241_s18  ;;  %v4928_v16 = vunpack.i.h.bf16 %v4926_v27  ;;  %v4927_v57 = vunpack.i.l.bf16 %v4926_v27  ;;  %v4933_v44 = vunpack.i.h.bf16 %v4931_v61  ;;  %v4932_v40 = vunpack.i.l.bf16 %v4931_v61 }
 0x284   : > { %v2793_v3 = vsel %vm2757_vm7, %v10308_v17, %v4628_v58  ;;  %v4597_v48 = vunpack.i.l.bf16 %v10309_v30 }
 0x285   : > { %v3010_v11 = vsel %vm2977_vm11, %v2955_v14, %v4927_v57  ;;  %v3011_v24 = vsel %vm2977_vm11, %v2956_v46, %v4928_v16  ;;  %v2833_v39 = vsel %vm2812_vm8, %v2778_v23, %v4932_v40  ;;  %v2834_v2 = vsel %vm2812_vm8, %v2779_v20, %v4933_v44  ;;  %v10310_v44 = vld [vmem:[#allocation25_spill] sm:$0xff] }
 0x286   : > { %v3048_v22 = vpack.c.bf16 %v3011_v24, %v3010_v11  ;;  %v4936_v10 = vpop.permute.xlu0 %4935  ;;  %v4941_v63 = vpop.permute.xlu1 %4940  ;;  %v2780_v40 = vsel %vm2757_vm7, %v10310_v44, %v4597_v48  ;;  %v10311_v11 = vld [vmem:[#allocation35_spill] sm:$0xff] }
 0x287   : > { %v4938_v6 = vunpack.i.h.bf16 %v4936_v10  ;;  %v4937_v1 = vunpack.i.l.bf16 %v4936_v10  ;;  %v4943_v42 = vunpack.i.h.bf16 %v4941_v63  ;;  %v4942_v34 = vunpack.i.l.bf16 %v4941_v63 }
 0x288   : > { %4058 = vmatmul.mubr.msk.bf16.gmra.mxu1 %vm3095_vm12, %v3048_v22  ;;  %v2781_v24 = vsel %vm2757_vm7, %v10311_v11, %v4598_v38 }
 0x289   : > { %v2888_v31 = vsel %vm2867_vm9, %v2833_v39, %v4937_v1  ;;  %v2889_v54 = vsel %vm2867_vm9, %v2834_v2, %v4938_v6  ;;  %4061 = vmatprep.mubr.msk.bf16.mxu1 %vm5238_vm3, %v10207_v52  ;;  %v10312_v2 = vld [vmem:[#allocation86_spill] sm:$0xff] }
 0x28a   : > { %v4946_v60 = vpop.permute.xlu0 %4945  ;;  %v4951_v28 = vpop.permute.xlu1 %4950  ;;  %v2943_v43 = vsel %vm2922_vm10, %v2888_v31, %v4942_v34  ;;  %v2944_v56 = vsel %vm2922_vm10, %v2889_v54, %v4943_v42  ;;  %v4633_v42 = vunpack.i.h.bf16 %v10312_v2  ;;  %v4632_v34 = vunpack.i.l.bf16 %v10312_v2 }
 0x28b   : > { %v4948_v29 = vunpack.i.h.bf16 %v4946_v60  ;;  %v4947_v9 = vunpack.i.l.bf16 %v4946_v60  ;;  %v4953_v26 = vunpack.i.h.bf16 %v4951_v28  ;;  %v4952_v32 = vunpack.i.l.bf16 %v4951_v28 }
 0x28d   : > { %v2998_v49 = vsel %vm2977_vm11, %v2943_v43, %v4947_v9  ;;  %v2999_v36 = vsel %vm2977_vm11, %v2944_v56, %v4948_v29  ;;  %v2847_v37 = vsel %vm2812_vm8, %v2792_v62, %v4952_v32  ;;  %v2848_v51 = vsel %vm2812_vm8, %v2793_v3, %v4953_v26  ;;  %v10313_v26 = vld [vmem:[#allocation4_spill] sm:$0xff] }
 0x28e   : > { %v3042_v13 = vpack.c.bf16 %v2999_v36, %v2998_v49  ;;  %v4956_v0 = vpop.permute.xlu0 %4955  ;;  %v4961_v47 = vpop.permute.xlu1 %4960  ;;  %v2794_v32 = vsel %vm2757_vm7, %v10313_v26, %v4632_v34  ;;  %v10314_v49 = vld [vmem:[#allocation41_spill] sm:$0xff] }
 0x28f   : > { %v4958_v25 = vunpack.i.h.bf16 %v4956_v0  ;;  %v4957_v41 = vunpack.i.l.bf16 %v4956_v0  ;;  %v4963_v4 = vunpack.i.h.bf16 %v4961_v47  ;;  %v4962_v15 = vunpack.i.l.bf16 %v4961_v47 }
 0x290   : > { %4034 = vmatmul.mubr.msk.bf16.gmra.mxu0 %vm3095_vm12, %v3042_v13  ;;  %v2795_v36 = vsel %vm2757_vm7, %v10314_v49, %v4633_v42 }
 0x291   : > { %v2902_v19 = vsel %vm2867_vm9, %v2847_v37, %v4957_v41  ;;  %v2903_v8 = vsel %vm2867_vm9, %v2848_v51, %v4958_v25  ;;  %4037 = vmatprep.mubr.msk.bf16.mxu0 %vm5238_vm3, %v10207_v52  ;;  %v10315_v51 = vld [vmem:[#allocation61_spill] sm:$0xff] }
 0x292   : > { %v4966_v55 = vpop.permute.xlu0 %4965  ;;  %v4971_v59 = vpop.permute.xlu1 %4970  ;;  %v2957_v27 = vsel %vm2922_vm10, %v2902_v19, %v4962_v15  ;;  %v2958_v61 = vsel %vm2922_vm10, %v2903_v8, %v4963_v4  ;;  %v4603_v4 = vunpack.i.h.bf16 %v10315_v51  ;;  %v4602_v15 = vunpack.i.l.bf16 %v10315_v51 }
 0x293   : > { %v4968_v12 = vunpack.i.h.bf16 %v4966_v55  ;;  %v4967_v33 = vunpack.i.l.bf16 %v4966_v55  ;;  %v4973_v45 = vunpack.i.h.bf16 %v4971_v59  ;;  %v4972_v7 = vunpack.i.l.bf16 %v4971_v59 }
 0x295   : > { %v3012_v5 = vsel %vm2977_vm11, %v2957_v27, %v4967_v33  ;;  %v3013_v16 = vsel %vm2977_vm11, %v2958_v61, %v4968_v12  ;;  %v2835_v63 = vsel %vm2812_vm8, %v2780_v40, %v4972_v7  ;;  %v2836_v21 = vsel %vm2812_vm8, %v2781_v24, %v4973_v45  ;;  %v10316_v45 = vld [vmem:[#allocation24_spill] sm:$0xff] }
 0x296   : > { %v3049_v57 = vpack.c.bf16 %v3013_v16, %v3012_v5  ;;  %v4976_v14 = vpop.permute.xlu0 %4975  ;;  %v4981_v46 = vpop.permute.xlu1 %4980  ;;  %v2782_v7 = vsel %vm2757_vm7, %v10316_v45, %v4602_v15  ;;  %v10317_v5 = vld [vmem:[#allocation258_spill] sm:$0xff] }
 0x297   : > { %v4978_v22 = vunpack.i.h.bf16 %v4976_v14  ;;  %v4977_v10 = vunpack.i.l.bf16 %v4976_v14  ;;  %v4983_v23 = vunpack.i.h.bf16 %v4981_v46  ;;  %v4982_v53 = vunpack.i.l.bf16 %v4981_v46 }
 0x298   : > { %4062 = vmatmul.mubr.msk.bf16.gmra.mxu1 %vm3095_vm12, %v3049_v57  ;;  %v2783_v16 = vsel %vm2757_vm7, %v10317_v5, %v4603_v4 }
 0x299   : > { %v2890_v20 = vsel %vm2867_vm9, %v2835_v63, %v4977_v10  ;;  %v2891_v6 = vsel %vm2867_vm9, %v2836_v21, %v4978_v22  ;;  %4065 = vmatprep.mubr.msk.bf16.mxu1 %vm5238_vm3, %v10207_v52  ;;  %v10318_v21 = vld [vmem:[#allocation78_spill] sm:$0xff] }
 0x29a   : > { %v4986_v1 = vpop.permute.xlu0 %4985  ;;  %v4991_v39 = vpop.permute.xlu1 %4990  ;;  %v2945_v60 = vsel %vm2922_vm10, %v2890_v20, %v4982_v53  ;;  %v2946_v28 = vsel %vm2922_vm10, %v2891_v6, %v4983_v23  ;;  %v4638_v23 = vunpack.i.h.bf16 %v10318_v21  ;;  %v4637_v53 = vunpack.i.l.bf16 %v10318_v21 }
 0x29b   : > { %v4988_v31 = vunpack.i.h.bf16 %v4986_v1  ;;  %v4987_v54 = vunpack.i.l.bf16 %v4986_v1  ;;  %v4993_v35 = vunpack.i.h.bf16 %v4991_v39  ;;  %v4992_v58 = vunpack.i.l.bf16 %v4991_v39 }
 0x29d   : > { %v3000_v18 = vsel %vm2977_vm11, %v2945_v60, %v4987_v54  ;;  %v3001_v29 = vsel %vm2977_vm11, %v2946_v28, %v4988_v31  ;;  %v2849_v47 = vsel %vm2812_vm8, %v2794_v32, %v4992_v58  ;;  %v2850_v50 = vsel %vm2812_vm8, %v2795_v36, %v4993_v35  ;;  %v10319_v35 = vld [vmem:[#allocation55_spill] sm:$0xff] }
 0x29e   : > { %v3043_v9 = vpack.c.bf16 %v3001_v29, %v3000_v18  ;;  %v4996_v43 = vpop.permute.xlu0 %4995  ;;  %v5001_v56 = vpop.permute.xlu1 %5000  ;;  %v2796_v58 = vsel %vm2757_vm7, %v10319_v35, %v4637_v53  ;;  %v10320_v18 = vld [vmem:[#allocation62_spill] sm:$0xff] }
 0x29f   : > { %v4998_v13 = vunpack.i.h.bf16 %v4996_v43  ;;  %v4997_v0 = vunpack.i.l.bf16 %v4996_v43  ;;  %v5003_v62 = vunpack.i.h.bf16 %v5001_v56  ;;  %v5002_v17 = vunpack.i.l.bf16 %v5001_v56 }
 0x2a0   : > { %4038 = vmatmul.mubr.msk.bf16.gmra.mxu0 %vm3095_vm12, %v3043_v9  ;;  %v2797_v29 = vsel %vm2757_vm7, %v10320_v18, %v4638_v23 }
 0x2a1   : > { %v2904_v3 = vsel %vm2867_vm9, %v2849_v47, %v4997_v0  ;;  %v2905_v25 = vsel %vm2867_vm9, %v2850_v50, %v4998_v13  ;;  %4041 = vmatprep.mubr.msk.bf16.mxu0 %vm5238_vm3, %v10207_v52  ;;  %v10321_v50 = vld [vmem:[#allocation131_spill] sm:$0xff] }
 0x2a2   : > { %v5006_v41 = vpop.permute.xlu0 %5005  ;;  %v5011_v37 = vpop.permute.xlu1 %5010  ;;  %v2959_v55 = vsel %vm2922_vm10, %v2904_v3, %v5002_v17  ;;  %v2960_v59 = vsel %vm2922_vm10, %v2905_v25, %v5003_v62  ;;  %v4608_v62 = vunpack.i.h.bf16 %v10321_v50  ;;  %v4607_v17 = vunpack.i.l.bf16 %v10321_v50 }
 0x2a3   : > { %v5008_v19 = vunpack.i.h.bf16 %v5006_v41  ;;  %v5007_v8 = vunpack.i.l.bf16 %v5006_v41  ;;  %v5013_v30 = vunpack.i.h.bf16 %v5011_v37  ;;  %v5012_v38 = vunpack.i.l.bf16 %v5011_v37 }
 0x2a5   : > { %v3014_v48 = vsel %vm2977_vm11, %v2959_v55, %v5007_v8  ;;  %v3015_v12 = vsel %vm2977_vm11, %v2960_v59, %v5008_v19  ;;  %v2837_v46 = vsel %vm2812_vm8, %v2782_v7, %v5012_v38  ;;  %v2838_v44 = vsel %vm2812_vm8, %v2783_v16, %v5013_v30  ;;  %v10322_v30 = vld [vmem:[#allocation259_spill] sm:$0xff] }
 0x2a6   : > { %v3050_v33 = vpack.c.bf16 %v3015_v12, %v3014_v48  ;;  %v5016_v27 = vpop.permute.xlu0 %5015  ;;  %v5021_v61 = vpop.permute.xlu1 %5020  ;;  %v2784_v38 = vsel %vm2757_vm7, %v10322_v30, %v4607_v17  ;;  %v10323_v48 = vld [vmem:[#allocation28_spill] sm:$0xff] }
 0x2a7   : > { %v5018_v57 = vunpack.i.h.bf16 %v5016_v27  ;;  %v5017_v14 = vunpack.i.l.bf16 %v5016_v27  ;;  %v5023_v40 = vunpack.i.h.bf16 %v5021_v61  ;;  %v5022_v11 = vunpack.i.l.bf16 %v5021_v61 }
 0x2a8   : > { %4066 = vmatmul.mubr.msk.bf16.gmra.mxu1 %vm3095_vm12, %v3050_v33  ;;  %v2785_v12 = vsel %vm2757_vm7, %v10323_v48, %v4608_v62 }
 0x2a9   : > { %v2892_v24 = vsel %vm2867_vm9, %v2837_v46, %v5017_v14  ;;  %v2893_v22 = vsel %vm2867_vm9, %v2838_v44, %v5018_v57  ;;  %4069 = vmatprep.mubr.msk.bf16.mxu1 %vm5238_vm3, %v10207_v52  ;;  %v10324_v44 = vld [vmem:[#allocation71_spill] sm:$0xff] }
 0x2aa   : > { %v5026_v10 = vpop.permute.xlu0 %5025  ;;  %v2947_v1 = vsel %vm2922_vm10, %v2892_v24, %v5022_v11  ;;  %v2948_v39 = vsel %vm2922_vm10, %v2893_v22, %v5023_v40  ;;  %v4643_v40 = vunpack.i.h.bf16 %v10324_v44  ;;  %v4642_v11 = vunpack.i.l.bf16 %v10324_v44 }
 0x2ab   : > { %v5031_v63 = vpop.permute.xlu1 %5030  ;;  %v5028_v20 = vunpack.i.h.bf16 %v5026_v10  ;;  %v5027_v6 = vunpack.i.l.bf16 %v5026_v10 }
 0x2ac   : > { %v5033_v2 = vunpack.i.h.bf16 %v5031_v63  ;;  %v5032_v42 = vunpack.i.l.bf16 %v5031_v63 }
 0x2ad   : > { %v3002_v34 = vsel %vm2977_vm11, %v2947_v1, %v5027_v6  ;;  %v3003_v31 = vsel %vm2977_vm11, %v2948_v39, %v5028_v20 }
 0x2ae   : > { %v3044_v54 = vpack.c.bf16 %v3003_v31, %v3002_v34  ;;  %v2851_v56 = vsel %vm2812_vm8, %v2796_v58, %v5032_v42  ;;  %v2852_v26 = vsel %vm2812_vm8, %v2797_v29, %v5033_v2  ;;  %v10325_v2 = vld [vmem:[#allocation44_spill] sm:$0xff]  ;;  %v10326_v34 = vld [vmem:[#allocation43_spill] sm:$0xff] }
 0x2af   : > { %v5036_v60 = vpop.permute.xlu0 %5035  ;;  %v5041_v28 = vpop.permute.xlu1 %5040  ;;  %v2798_v42 = vsel %vm2757_vm7, %v10325_v2, %v4642_v11  ;;  %v2799_v31 = vsel %vm2757_vm7, %v10326_v34, %v4643_v40 }
 0x2b0   : > { %v5038_v9 = vunpack.i.h.bf16 %v5036_v60  ;;  %v5037_v43 = vunpack.i.l.bf16 %v5036_v60  ;;  %v5043_v32 = vunpack.i.h.bf16 %v5041_v28  ;;  %v5042_v49 = vunpack.i.l.bf16 %v5041_v28  ;;  %4042 = vmatmul.mubr.msk.bf16.gmra.mxu0 %vm3095_vm12, %v3044_v54 }
 0x2b1   : > { %4045 = vmatprep.mubr.msk.bf16.mxu0 %vm5238_vm3, %v10207_v52 }
 0x2b2   : > { %v2906_v36 = vsel %vm2867_vm9, %v2851_v56, %v5037_v43  ;;  %v2907_v13 = vsel %vm2867_vm9, %v2852_v26, %v5038_v9  ;;  %v10327_v26 = vld [vmem:[#allocation152_spill] sm:$0xff] }
 0x2b3   : > { %v5046_v0 = vpop.permute.xlu0 %5045  ;;  %v5051_v47 = vpop.permute.xlu1 %5050  ;;  %v2961_v41 = vsel %vm2922_vm10, %v2906_v36, %v5042_v49  ;;  %v2962_v37 = vsel %vm2922_vm10, %v2907_v13, %v5043_v32  ;;  %v4648_v32 = vunpack.i.h.bf16 %v10327_v26  ;;  %v4647_v49 = vunpack.i.l.bf16 %v10327_v26 }
 0x2b4   : > { %v5048_v3 = vunpack.i.h.bf16 %v5046_v0  ;;  %v5047_v25 = vunpack.i.l.bf16 %v5046_v0  ;;  %v5053_v51 = vunpack.i.h.bf16 %v5051_v47  ;;  %v5052_v4 = vunpack.i.l.bf16 %v5051_v47 }
 0x2b6   : > { %v3016_v15 = vsel %vm2977_vm11, %v2961_v41, %v5047_v25  ;;  %v3017_v19 = vsel %vm2977_vm11, %v2962_v37, %v5048_v3  ;;  %v2839_v61 = vsel %vm2812_vm8, %v2784_v38, %v5052_v4  ;;  %v2840_v45 = vsel %vm2812_vm8, %v2785_v12, %v5053_v51  ;;  %v10328_v51 = vld [vmem:[#allocation48_spill] sm:$0xff] }
 0x2b7   : > { %v3051_v8 = vpack.c.bf16 %v3017_v19, %v3016_v15  ;;  %v5056_v55 = vpop.permute.xlu0 %5055  ;;  %v5061_v59 = vpop.permute.xlu1 %5060  ;;  %v2800_v4 = vsel %vm2757_vm7, %v10328_v51, %v4647_v49  ;;  %v10329_v15 = vld [vmem:[#allocation51_spill] sm:$0xff] }
 0x2b8   : > { %v5058_v33 = vunpack.i.h.bf16 %v5056_v55  ;;  %v5057_v27 = vunpack.i.l.bf16 %v5056_v55  ;;  %v5063_v7 = vunpack.i.h.bf16 %v5061_v59  ;;  %v5062_v5 = vunpack.i.l.bf16 %v5061_v59 }
 0x2b9   : > { %4070 = vmatmul.mubr.msk.bf16.gmra.mxu1 %vm3095_vm12, %v3051_v8  ;;  %v2801_v19 = vsel %vm2757_vm7, %v10329_v15, %v4648_v32 }
 0x2ba   : > { %v2894_v16 = vsel %vm2867_vm9, %v2839_v61, %v5057_v27  ;;  %v2895_v57 = vsel %vm2867_vm9, %v2840_v45, %v5058_v33  ;;  %4073 = vmatprep.mubr.msk.bf16.mxu1 %vm5238_vm3, %v10207_v52  ;;  %v10330_v45 = vld [vmem:[#allocation92_spill] sm:$0xff] }
 0x2bb   : > { %v5066_v14 = vpop.permute.xlu0 %5065  ;;  %v2949_v10 = vsel %vm2922_vm10, %v2894_v16, %v5062_v5  ;;  %v2950_v63 = vsel %vm2922_vm10, %v2895_v57, %v5063_v7  ;;  %v4653_v7 = vunpack.i.h.bf16 %v10330_v45  ;;  %v4652_v5 = vunpack.i.l.bf16 %v10330_v45 }
 0x2bc   : > { %v5071_v46 = vpop.permute.xlu1 %5070  ;;  %v5068_v24 = vunpack.i.h.bf16 %v5066_v14  ;;  %v5067_v22 = vunpack.i.l.bf16 %v5066_v14 }
 0x2bd   : > { %v5073_v21 = vunpack.i.h.bf16 %v5071_v46  ;;  %v5072_v23 = vunpack.i.l.bf16 %v5071_v46 }
 0x2be   : > { %v3004_v53 = vsel %vm2977_vm11, %v2949_v10, %v5067_v22  ;;  %v3005_v20 = vsel %vm2977_vm11, %v2950_v63, %v5068_v24 }
 0x2bf   : > { %v3045_v6 = vpack.c.bf16 %v3005_v20, %v3004_v53  ;;  %v2853_v28 = vsel %vm2812_vm8, %v2798_v42, %v5072_v23  ;;  %v2854_v35 = vsel %vm2812_vm8, %v2799_v31, %v5073_v21  ;;  %v10331_v21 = vld [vmem:[#allocation65_spill] sm:$0xff]  ;;  %v10332_v53 = vld [vmem:[#allocation54_spill] sm:$0xff] }
 0x2c0   : > { %v5076_v1 = vpop.permute.xlu0 %5075  ;;  %v5081_v39 = vpop.permute.xlu1 %5080  ;;  %v2802_v23 = vsel %vm2757_vm7, %v10331_v21, %v4652_v5  ;;  %v2803_v20 = vsel %vm2757_vm7, %v10332_v53, %v4653_v7 }
 0x2c1   : > { %v5078_v54 = vunpack.i.h.bf16 %v5076_v1  ;;  %v5077_v60 = vunpack.i.l.bf16 %v5076_v1  ;;  %v5083_v58 = vunpack.i.h.bf16 %v5081_v39  ;;  %v5082_v18 = vunpack.i.l.bf16 %v5081_v39  ;;  %4046 = vmatmul.mubr.msk.bf16.gmra.mxu0 %vm3095_vm12, %v3045_v6 }
 0x2c3   : > { %v2908_v29 = vsel %vm2867_vm9, %v2853_v28, %v5077_v60  ;;  %v2909_v9 = vsel %vm2867_vm9, %v2854_v35, %v5078_v54  ;;  %v10333_v35 = vld [vmem:[#allocation95_spill] sm:$0xff] }
 0x2c4   : > { %v5086_v43 = vpop.permute.xlu0 %5085  ;;  %v5091_v56 = vpop.permute.xlu1 %5090  ;;  %v2963_v0 = vsel %vm2922_vm10, %v2908_v29, %v5082_v18  ;;  %v2964_v47 = vsel %vm2922_vm10, %v2909_v9, %v5083_v58  ;;  %v4658_v58 = vunpack.i.h.bf16 %v10333_v35  ;;  %v4657_v18 = vunpack.i.l.bf16 %v10333_v35 }
 0x2c5   : > { %v5088_v36 = vunpack.i.h.bf16 %v5086_v43  ;;  %v5087_v13 = vunpack.i.l.bf16 %v5086_v43  ;;  %v5093_v50 = vunpack.i.h.bf16 %v5091_v56  ;;  %v5092_v62 = vunpack.i.l.bf16 %v5091_v56 }
 0x2c7   : > { %v3018_v17 = vsel %vm2977_vm11, %v2963_v0, %v5087_v13  ;;  %v3019_v3 = vsel %vm2977_vm11, %v2964_v47, %v5088_v36  ;;  %v2855_v59 = vsel %vm2812_vm8, %v2800_v4, %v5092_v62  ;;  %v2856_v30 = vsel %vm2812_vm8, %v2801_v19, %v5093_v50  ;;  %v10334_v50 = vld [vmem:[#allocation58_spill] sm:$0xff] }
 0x2c8   : > { %v3052_v25 = vpack.c.bf16 %v3019_v3, %v3018_v17  ;;  %v5096_v41 = vpop.permute.xlu0 %5095  ;;  %v5101_v37 = vpop.permute.xlu1 %5100  ;;  %v2804_v62 = vsel %vm2757_vm7, %v10334_v50, %v4657_v18  ;;  %v10335_v17 = vld [vmem:[#allocation53_spill] sm:$0xff] }
 0x2c9   : > { %v5098_v8 = vunpack.i.h.bf16 %v5096_v41  ;;  %v5097_v55 = vunpack.i.l.bf16 %v5096_v41  ;;  %v5103_v38 = vunpack.i.h.bf16 %v5101_v37  ;;  %v5102_v48 = vunpack.i.l.bf16 %v5101_v37 }
 0x2ca   : > { %4074 = vmatmul.mubr.msk.bf16.gmra.mxu1 %vm3095_vm12, %v3052_v25  ;;  %v2805_v3 = vsel %vm2757_vm7, %v10335_v17, %v4658_v58 }
 0x2cb   : > { %v2910_v12 = vsel %vm2867_vm9, %v2855_v59, %v5097_v55  ;;  %v2911_v33 = vsel %vm2867_vm9, %v2856_v30, %v5098_v8  ;;  %4077 = vmatprep.mubr.msk.bf16.mxu1 %vm5238_vm3, %v10207_v52  ;;  %v10336_v30 = vld [vmem:[#allocation84_spill] sm:$0xff] }
 0x2cc   : > { %v5106_v27 = vpop.permute.xlu0 %5105  ;;  %v2965_v14 = vsel %vm2922_vm10, %v2910_v12, %v5102_v48  ;;  %v2966_v46 = vsel %vm2922_vm10, %v2911_v33, %v5103_v38  ;;  %v4663_v38 = vunpack.i.h.bf16 %v10336_v30  ;;  %v4662_v48 = vunpack.i.l.bf16 %v10336_v30 }
 0x2cd   : > { %v5111_v61 = vpop.permute.xlu1 %5110  ;;  %v5108_v16 = vunpack.i.h.bf16 %v5106_v27  ;;  %v5107_v57 = vunpack.i.l.bf16 %v5106_v27 }
 0x2ce   : > { %v5113_v44 = vunpack.i.h.bf16 %v5111_v61  ;;  %v5112_v40 = vunpack.i.l.bf16 %v5111_v61 }
 0x2cf   : > { %v3020_v11 = vsel %vm2977_vm11, %v2965_v14, %v5107_v57  ;;  %v3021_v24 = vsel %vm2977_vm11, %v2966_v46, %v5108_v16 }
 0x2d0   : > { %v3053_v22 = vpack.c.bf16 %v3021_v24, %v3020_v11  ;;  %v5116_v10 = vpop.permute.xlu0 %5115  ;;  %v2857_v39 = vsel %vm2812_vm8, %v2802_v23, %v5112_v40  ;;  %v2858_v2 = vsel %vm2812_vm8, %v2803_v20, %v5113_v44  ;;  %v10337_v44 = vld [vmem:[#allocation75_spill] sm:$0xff]  ;;  %v10338_v11 = vld [vmem:[#allocation64_spill] sm:$0xff] }
 0x2d1   : > { %v5121_v63 = vpop.permute.xlu1 %5120  ;;  %v5118_v6 = vunpack.i.h.bf16 %v5116_v10  ;;  %v5117_v1 = vunpack.i.l.bf16 %v5116_v10  ;;  %v2806_v40 = vsel %vm2757_vm7, %v10337_v44, %v4662_v48  ;;  %v2807_v24 = vsel %vm2757_vm7, %v10338_v11, %v4663_v38 }
 0x2d2   : > { %v5123_v42 = vunpack.i.h.bf16 %v5121_v63  ;;  %v5122_v34 = vunpack.i.l.bf16 %v5121_v63  ;;  %4078 = vmatmul.mubr.msk.bf16.gmra.mxu1 %vm3095_vm12, %v3053_v22 }
 0x2d3   : > { %v2912_v31 = vsel %vm2867_vm9, %v2857_v39, %v5117_v1  ;;  %v2913_v54 = vsel %vm2867_vm9, %v2858_v2, %v5118_v6  ;;  %4081 = vmatprep.mubr.msk.bf16.mxu1 %vm5238_vm3, %v10207_v52  ;;  %v10339_v2 = vld [vmem:[#allocation83_spill] sm:$0xff] }
 0x2d4   : > { %v5126_v60 = vpop.permute.xlu0 %5125  ;;  %v2967_v43 = vsel %vm2922_vm10, %v2912_v31, %v5122_v34  ;;  %v2968_v56 = vsel %vm2922_vm10, %v2913_v54, %v5123_v42  ;;  %v4668_v42 = vunpack.i.h.bf16 %v10339_v2  ;;  %v4667_v34 = vunpack.i.l.bf16 %v10339_v2 }
 0x2d5   : > { %v5131_v28 = vpop.permute.xlu1 %5130  ;;  %v5128_v29 = vunpack.i.h.bf16 %v5126_v60  ;;  %v5127_v9 = vunpack.i.l.bf16 %v5126_v60 }
 0x2d6   : > { %v5133_v26 = vunpack.i.h.bf16 %v5131_v28  ;;  %v5132_v32 = vunpack.i.l.bf16 %v5131_v28 }
 0x2d7   : > { %v3022_v49 = vsel %vm2977_vm11, %v2967_v43, %v5127_v9  ;;  %v3023_v36 = vsel %vm2977_vm11, %v2968_v56, %v5128_v29 }
 0x2d8   : > { %v3054_v13 = vpack.c.bf16 %v3023_v36, %v3022_v49  ;;  %v5136_v0 = vpop.permute.xlu0 %5135  ;;  %v2859_v37 = vsel %vm2812_vm8, %v2804_v62, %v5132_v32  ;;  %v2860_v51 = vsel %vm2812_vm8, %v2805_v3, %v5133_v26  ;;  %v10340_v26 = vld [vmem:[#allocation68_spill] sm:$0xff]  ;;  %v10341_v49 = vld [vmem:[#allocation63_spill] sm:$0xff] }
 0x2d9   : > { %v5141_v47 = vpop.permute.xlu1 %5140  ;;  %v5138_v25 = vunpack.i.h.bf16 %v5136_v0  ;;  %v5137_v41 = vunpack.i.l.bf16 %v5136_v0  ;;  %v2808_v32 = vsel %vm2757_vm7, %v10340_v26, %v4667_v34  ;;  %v2809_v36 = vsel %vm2757_vm7, %v10341_v49, %v4668_v42 }
 0x2da   : > { %v5143_v4 = vunpack.i.h.bf16 %v5141_v47  ;;  %v5142_v15 = vunpack.i.l.bf16 %v5141_v47  ;;  %4082 = vmatmul.mubr.msk.bf16.gmra.mxu1 %vm3095_vm12, %v3054_v13 }
 0x2db   : > { %v2914_v19 = vsel %vm2867_vm9, %v2859_v37, %v5137_v41  ;;  %v2915_v8 = vsel %vm2867_vm9, %v2860_v51, %v5138_v25  ;;  %4085 = vmatprep.mubr.msk.bf16.mxu1 %vm5238_vm3, %v10207_v52  ;;  %v10342_v37 = vld [vmem:[#allocation3_spill] sm:$0xff] }
 0x2dc   : > { %v5146_v55 = vpop.permute.xlu0 %5145  ;;  %v2969_v27 = vsel %vm2922_vm10, %v2914_v19, %v5142_v15  ;;  %v2970_v61 = vsel %vm2922_vm10, %v2915_v8, %v5143_v4 }
 0x2dd   : > { %v5151_v59 = vpop.permute.xlu1 %5150  ;;  %v5148_v12 = vunpack.i.h.bf16 %v5146_v55  ;;  %v5147_v33 = vunpack.i.l.bf16 %v5146_v55 }
 0x2de   : > { %v5153_v45 = vunpack.i.h.bf16 %v5151_v59  ;;  %v5152_v7 = vunpack.i.l.bf16 %v5151_v59 }
 0x2df   : > { %v3024_v5 = vsel %vm2977_vm11, %v2969_v27, %v5147_v33  ;;  %v3025_v16 = vsel %vm2977_vm11, %v2970_v61, %v5148_v12 }
 0x2e0   : > { %v3055_v57 = vpack.c.bf16 %v3025_v16, %v3024_v5  ;;  %v5156_v14 = vpop.permute.xlu0 %5155  ;;  %v2861_v63 = vsel %vm2812_vm8, %v2806_v40, %v5152_v7  ;;  %v2862_v21 = vsel %vm2812_vm8, %v2807_v24, %v5153_v45  ;;  %v10343_v5 = vld [vmem:[#allocation6_spill] sm:$0xff] }
 0x2e1   : > { %v5161_v46 = vpop.permute.xlu1 %5160  ;;  %v5158_v22 = vunpack.i.h.bf16 %v5156_v14  ;;  %v5157_v10 = vunpack.i.l.bf16 %v5156_v14 }
 0x2e2   : > { %v5163_v23 = vunpack.i.h.bf16 %v5161_v46  ;;  %v5162_v53 = vunpack.i.l.bf16 %v5161_v46  ;;  %4086 = vmatmul.mubr.msk.bf16.gmra.mxu1 %vm3095_vm12, %v3055_v57  ;;  %v10344_v46 = vld [vmem:[#allocation72_spill] sm:$0xff] }
 0x2e3   : > { %v2916_v20 = vsel %vm2867_vm9, %v2861_v63, %v5157_v10  ;;  %v2917_v6 = vsel %vm2867_vm9, %v2862_v21, %v5158_v22  ;;  %4089 = vmatprep.mubr.msk.bf16.mxu1 %vm5238_vm3, %v10207_v52  ;;  %v10345_v10 = vld [vmem:[#allocation85_spill] sm:$0xff] }
 0x2e4   : > { %v5166_v1 = vpop.permute.xlu0 %5165  ;;  %v2971_v60 = vsel %vm2922_vm10, %v2916_v20, %v5162_v53  ;;  %v2972_v28 = vsel %vm2922_vm10, %v2917_v6, %v5163_v23 }
 0x2e5   : > { %v5171_v39 = vpop.permute.xlu1 %5170  ;;  %v5168_v31 = vunpack.i.h.bf16 %v5166_v1  ;;  %v5167_v54 = vunpack.i.l.bf16 %v5166_v1 }
 0x2e6   : > { %v5173_v35 = vunpack.i.h.bf16 %v5171_v39  ;;  %v5172_v58 = vunpack.i.l.bf16 %v5171_v39  ;;  %v3215_v41 = vpop.f32.mrf.mxu0 }
 0x2e7   : > { %v3026_v18 = vsel %vm2977_vm11, %v2971_v60, %v5167_v54  ;;  %v3027_v29 = vsel %vm2977_vm11, %v2972_v28, %v5168_v31  ;;  %3430 = vst.msk [vmem:[%s8789_s27] sm:$0xff] %vm2592_vm4, %v3215_v41  ;;  %v3484_v51 = vmul.f32 %v3215_v41, %v10342_v37  ;;  %v10346_v31 = vld [vmem:[#allocation5_spill] sm:$0xff] }
 0x2e8   : > { %v3056_v9 = vpack.c.bf16 %v3027_v29, %v3026_v18  ;;  %v5176_v43 = vpop.permute.xlu0 %5175  ;;  %v2863_v47 = vsel %vm2812_vm8, %v2808_v32, %v5172_v58  ;;  %v2864_v50 = vsel %vm2812_vm8, %v2809_v36, %v5173_v35  ;;  %v3995_v59 = vpop.f32.mrf.mxu0 }
 0x2e9   : > { %v5181_v56 = vpop.permute.xlu1 %5180  ;;  %v5178_v13 = vunpack.i.h.bf16 %v5176_v43  ;;  %v5177_v0 = vunpack.i.l.bf16 %v5176_v43  ;;  %v3538_v61 = vsel %vm2592_vm4, %v3484_v51, 0.0  ;;  %v3651_v45 = vmul.f32 %v3484_v51, %v3215_v41 }
 0x2ea   : > { %v5183_v62 = vunpack.i.h.bf16 %v5181_v56  ;;  %v5182_v17 = vunpack.i.l.bf16 %v5181_v56  ;;  %4090 = vmatmul.mubr.msk.bf16.gmra.mxu1 %vm3095_vm12, %v3056_v9  ;;  %v3218_v27 = vpop.f32.mrf.mxu0 }
 0x2eb   : > { %v2918_v3 = vsel %vm2867_vm9, %v2863_v47, %v5177_v0  ;;  %v2919_v25 = vsel %vm2867_vm9, %v2864_v50, %v5178_v13  ;;  %4093 = vmatprep.mubr.msk.bf16.mxu1 %vm5238_vm3, %v10207_v52  ;;  %3431 = vst.msk [vmem:[%s8789_s27 + $0x8] sm:$0xff] %vm2592_vm4, %v3218_v27  ;;  %v3485_v16 = vmul.f32 %v3218_v27, %v10343_v5  ;;  %v3705_v2 = vsel %vm2592_vm4, %v3651_v45, 0.0 }
 0x2ec   : > { %v5186_v4 = vpop.permute.xlu0 %5185  ;;  %v2973_v30 = vsel %vm2922_vm10, %v2918_v3, %v5182_v17  ;;  %v2974_v38 = vsel %vm2922_vm10, %v2919_v25, %v5183_v62  ;;  %v3996_v22 = vpop.f32.mrf.mxu0  ;;  %v10347_v62 = vld [vmem:[#allocation12_spill] sm:$0xff] }
 0x2ed   : > { %v5191_v15 = vpop.permute.xlu1 %5190  ;;  %v5188_v19 = vunpack.i.h.bf16 %v5186_v4  ;;  %v5187_v8 = vunpack.i.l.bf16 %v5186_v4  ;;  %v3539_v21 = vsel %vm2592_vm4, %v3485_v16, 0.0  ;;  %v3652_v23 = vmul.f32 %v3485_v16, %v3218_v27 }
 0x2ee   : > { %v5192_v55 = vunpack.i.l.bf16 %v5191_v15  ;;  %v5193_v48 = vunpack.i.h.bf16 %v5191_v15  ;;  %v3540_v20 = vadd.f32 %v3539_v21, %v3538_v61  ;;  %v3223_v39 = vpop.f32.mrf.mxu0  ;;  %v10349_v61 = vld [vmem:[#allocation21_spill] sm:$0xff] }
 0x2ef   : > { %v3028_v12 = vsel %vm2977_vm11, %v2973_v30, %v5187_v8  ;;  %v3029_v33 = vsel %vm2977_vm11, %v2974_v38, %v5188_v19  ;;  %v3706_v42 = vsel %vm2592_vm4, %v3652_v23, 0.0  ;;  %3432 = vst.msk [vmem:[%s8789_s27 + $0x10] sm:$0xff] %vm2592_vm4, %v3223_v39  ;;  %v3486_v54 = vmul.f32 %v3223_v39, %v10346_v31  ;;  %v10348_v8 = vld [vmem:[#allocation11_spill] sm:$0xff] }
 0x2f0   : > { %v3057_v7 = vpack.c.bf16 %v3029_v33, %v3028_v12  ;;  %v5196_v57 = vpop.permute.xlu0 %5195  ;;  %v2810_v44 = vsel %vm2757_vm7, %v10344_v46, %v5192_v55  ;;  %v2811_v63 = vsel %vm2757_vm7, %v10345_v10, %v5193_v48  ;;  %v3707_v35 = vadd.f32 %v3706_v42, %v3705_v2  ;;  %v3999_v9 = vpop.f32.mrf.mxu0 }
 0x2f1   : > { %v5201_v14 = vpop.permute.xlu1 %5200  ;;  %v5198_v40 = vunpack.i.h.bf16 %v5196_v57  ;;  %v5197_v11 = vunpack.i.l.bf16 %v5196_v57  ;;  %v3541_v43 = vsel %vm2592_vm4, %v3486_v54, 0.0  ;;  %v3653_v56 = vmul.f32 %v3486_v54, %v3223_v39 }
 0x2f2   : > { %v5202_v24 = vunpack.i.l.bf16 %v5201_v14  ;;  %v5203_v53 = vunpack.i.h.bf16 %v5201_v14  ;;  %4094 = vmatmul.mubr.msk.bf16.gmra.mxu1 %vm3095_vm12, %v3057_v7  ;;  %v3542_v32 = vadd.f32 %v3541_v43, %v3540_v20  ;;  %v3226_v13 = vpop.f32.mrf.mxu0  ;;  %v10351_v20 = vld [vmem:[#allocation30_spill] sm:$0xff] }
 0x2f3   : > { %v2865_v6 = vsel %vm2812_vm8, %v2810_v44, %v5197_v11  ;;  %v2866_v1 = vsel %vm2812_vm8, %v2811_v63, %v5198_v40  ;;  %4097 = vmatprep.mubr.msk.bf16.mxu1 %vm5238_vm3, %v10207_v52  ;;  %v3708_v0 = vsel %vm2592_vm4, %v3653_v56, 0.0  ;;  %3433 = vst.msk [vmem:[%s8789_s27 + $0x18] sm:$0xff] %vm2592_vm4, %v3226_v13  ;;  %v3487_v17 = vmul.f32 %v3226_v13, %v10347_v62  ;;  %v10350_v40 = vld [vmem:[#allocation20_spill] sm:$0xff]  ;;  %v10354_v62 = vld [vmem:[#allocation39_spill] sm:$0xff] }
 0x2f4   : > { %v2920_v34 = vsel %vm2867_vm9, %v2865_v6, %v5202_v24  ;;  %v5206_v60 = vpop.permute.xlu0 %5205  ;;  %v2921_v52 = vsel %vm2867_vm9, %v2866_v1, %v5203_v53  ;;  %v3709_v3 = vadd.f32 %v3708_v0, %v3707_v35  ;;  %v4000_v41 = vpop.f32.mrf.mxu0  ;;  %v10353_v56 = vld [vmem:[#allocation40_spill] sm:$0xff] }
 0x2f5   : > { %v5211_v28 = vpop.permute.xlu1 %5210  ;;  %v5208_v58 = vunpack.i.h.bf16 %v5206_v60  ;;  %v5207_v18 = vunpack.i.l.bf16 %v5206_v60  ;;  %v3543_v37 = vsel %vm2592_vm4, %v3487_v17, 0.0  ;;  %v3654_v51 = vmul.f32 %v3487_v17, %v3226_v13  ;;  %v10352_v60 = vld [vmem:[#allocation29_spill] sm:$0xff] }
 0x2f6   : > { %v5213_v29 = vunpack.i.h.bf16 %v5211_v28  ;;  %v5212_v26 = vunpack.i.l.bf16 %v5211_v28  ;;  %v3544_v4 = vadd.f32 %v3543_v37, %v3542_v32  ;;  %v3231_v15 = vpop.f32.mrf.mxu0 }
 0x2f7   : > { %v2975_v49 = vsel %vm2922_vm10, %v2920_v34, %v5207_v18  ;;  %v2976_v36 = vsel %vm2922_vm10, %v2921_v52, %v5208_v58  ;;  %v3710_v19 = vsel %vm2592_vm4, %v3654_v51, 0.0  ;;  %3434 = vst.msk [vmem:[%s8789_s27 + $0x20] sm:$0xff] %vm2592_vm4, %v3231_v15  ;;  %v3488_v55 = vmul.f32 %v3231_v15, %v10348_v8 }
 0x2f8   : > { %v3030_v47 = vsel %vm2977_vm11, %v2975_v49, %v5212_v26  ;;  %v3031_v50 = vsel %vm2977_vm11, %v2976_v36, %v5213_v29  ;;  %v3711_v59 = vadd.f32 %v3710_v19, %v3709_v3  ;;  %v4003_v30 = vpop.f32.mrf.mxu0  ;;  %v10355_v19 = vld [vmem:[#allocation50_spill] sm:$0xff] }
 0x2f9   : > { %v3058_v25 = vpack.c.bf16 %v3031_v50, %v3030_v47  ;;  %v3545_v38 = vsel %vm2592_vm4, %v3488_v55, 0.0  ;;  %v3655_v48 = vmul.f32 %v3488_v55, %v3231_v15 }
 0x2fa   : > { %v3546_v12 = vadd.f32 %v3545_v38, %v3544_v4  ;;  %v3234_v33 = vpop.f32.mrf.mxu0 }
 0x2fb   : > { %4098 = vmatmul.mubr.msk.bf16.gmra.mxu1 %vm3095_vm12, %v3058_v25  ;;  %v3712_v27 = vsel %vm2592_vm4, %v3655_v48, 0.0  ;;  %3435 = vst.msk [vmem:[%s8789_s27 + $0x28] sm:$0xff] %vm2592_vm4, %v3234_v33  ;;  %v3489_v45 = vmul.f32 %v3234_v33, %v10349_v61 }
 0x2fc   : > { %v3713_v7 = vadd.f32 %v3712_v27, %v3711_v59  ;;  %v4004_v5 = vpop.f32.mrf.mxu0  ;;  %v10356_v27 = vld [vmem:[#allocation49_spill] sm:$0xff] }
 0x2fd   : > { %v3547_v16 = vsel %vm2592_vm4, %v3489_v45, 0.0  ;;  %v3656_v57 = vmul.f32 %v3489_v45, %v3234_v33 }
 0x2fe   : > { %v3548_v14 = vadd.f32 %v3547_v16, %v3546_v12 }
 0x2ff   : > { %v3239_v46 = vpop.f32.mrf.mxu0  ;;  %v3714_v44 = vsel %vm2592_vm4, %v3656_v57, 0.0 }
 0x300   : > { %3436 = vst.msk [vmem:[%s8789_s27 + $0x30] sm:$0xff] %vm2592_vm4, %v3239_v46  ;;  %v3490_v11 = vmul.f32 %v3239_v46, %v10350_v40  ;;  %v3715_v24 = vadd.f32 %v3714_v44, %v3713_v7  ;;  %v10357_v44 = vld [vmem:[#allocation60_spill] sm:$0xff] }
 0x301   : > { %v4007_v22 = vpop.f32.mrf.mxu0 }
 0x302   : > { %v3549_v10 = vsel %vm2592_vm4, %v3490_v11, 0.0  ;;  %v3657_v63 = vmul.f32 %v3490_v11, %v3239_v46 }
 0x303   : > { %v3550_v21 = vadd.f32 %v3549_v10, %v3548_v14  ;;  %v3242_v23 = vpop.f32.mrf.mxu0 }
 0x304   : > { %v3716_v53 = vsel %vm2592_vm4, %v3657_v63, 0.0  ;;  %3437 = vst.msk [vmem:[%s8789_s27 + $0x38] sm:$0xff] %vm2592_vm4, %v3242_v23  ;;  %v3491_v6 = vmul.f32 %v3242_v23, %v10351_v20 }
 0x305   : > { %v3717_v1 = vadd.f32 %v3716_v53, %v3715_v24  ;;  %v4008_v39 = vpop.f32.mrf.mxu0  ;;  %v10358_v53 = vld [vmem:[#allocation59_spill] sm:$0xff] }
 0x306   : > { %v3551_v2 = vsel %vm2592_vm4, %v3491_v6, 0.0  ;;  %v3658_v42 = vmul.f32 %v3491_v6, %v3242_v23 }
 0x307   : > { %v3552_v34 = vadd.f32 %v3551_v2, %v3550_v21 }
 0x308   : > { %v3247_v31 = vpop.f32.mrf.mxu0  ;;  %v3718_v54 = vsel %vm2592_vm4, %v3658_v42, 0.0 }
 0x309   : > { %3438 = vst.msk [vmem:[%s8789_s27 + $0x40] sm:$0xff] %vm2592_vm4, %v3247_v31  ;;  %v3492_v28 = vmul.f32 %v3247_v31, %v10352_v60  ;;  %v3719_v35 = vadd.f32 %v3718_v54, %v3717_v1  ;;  %v10359_v54 = vld [vmem:[#allocation70_spill] sm:$0xff] }
 0x30a   : > { %v4011_v58 = vpop.f32.mrf.mxu0 }
 0x30b   : > { %v3553_v18 = vsel %vm2592_vm4, %v3492_v28, 0.0  ;;  %v3659_v29 = vmul.f32 %v3492_v28, %v3247_v31 }
 0x30c   : > { %v3554_v9 = vadd.f32 %v3553_v18, %v3552_v34  ;;  %v3250_v52 = vpop.f32.mrf.mxu0 }
 0x30d   : > { %v3720_v43 = vsel %vm2592_vm4, %v3659_v29, 0.0  ;;  %3439 = vst.msk [vmem:[%s8789_s27 + $0x48] sm:$0xff] %vm2592_vm4, %v3250_v52  ;;  %v3493_v26 = vmul.f32 %v3250_v52, %v10353_v56 }
 0x30e   : > { %v3721_v32 = vadd.f32 %v3720_v43, %v3719_v35  ;;  %v4012_v49 = vpop.f32.mrf.mxu0 }
 0x30f   : > { %v3555_v36 = vsel %vm2592_vm4, %v3493_v26, 0.0  ;;  %v3660_v13 = vmul.f32 %v3493_v26, %v3250_v52 }
 0x310   : > { %v3556_v0 = vadd.f32 %v3555_v36, %v3554_v9  ;;  %v3255_v47 = vpop.f32.mrf.mxu0  ;;  %v10360_v36 = vld [vmem:[#allocation69_spill] sm:$0xff] }
 0x311   : > { %v3722_v50 = vsel %vm2592_vm4, %v3660_v13, 0.0  ;;  %3440 = vst.msk [vmem:[%s8789_s27 + $0x50] sm:$0xff] %vm2592_vm4, %v3255_v47  ;;  %v3494_v17 = vmul.f32 %v3255_v47, %v10354_v62 }
 0x312   : > { %v3723_v3 = vadd.f32 %v3722_v50, %v3721_v32  ;;  %v4015_v25 = vpop.f32.mrf.mxu0 }
 0x313   : > { %v3557_v41 = vsel %vm2592_vm4, %v3494_v17, 0.0  ;;  %v3661_v37 = vmul.f32 %v3494_v17, %v3255_v47  ;;  %v10361_v25 = vld [vmem:[#allocation80_spill] sm:$0xff] }
 0x314   : > { %v3558_v51 = vadd.f32 %v3557_v41, %v3556_v0  ;;  %v3258_v4 = vpop.f32.mrf.mxu0 }
 0x315   : > { %v3724_v15 = vsel %vm2592_vm4, %v3661_v37, 0.0  ;;  %3441 = vst.msk [vmem:[%s8789_s27 + $0x58] sm:$0xff] %vm2592_vm4, %v3258_v4  ;;  %v3495_v8 = vmul.f32 %v3258_v4, %v10355_v19 }
 0x316   : > { %v3725_v55 = vadd.f32 %v3724_v15, %v3723_v3  ;;  %v4016_v59 = vpop.f32.mrf.mxu0 }
 0x317   : > { %v3559_v30 = vsel %vm2592_vm4, %v3495_v8, 0.0  ;;  %v3662_v38 = vmul.f32 %v3495_v8, %v3258_v4 }
 0x318   : > { %v3560_v48 = vadd.f32 %v3559_v30, %v3558_v51  ;;  %v3263_v12 = vpop.f32.mrf.mxu0 }
 0x319   : > { %v3726_v33 = vsel %vm2592_vm4, %v3662_v38, 0.0  ;;  %3442 = vst.msk [vmem:[%s8789_s27 + $0x60] sm:$0xff] %vm2592_vm4, %v3263_v12  ;;  %v3496_v61 = vmul.f32 %v3263_v12, %v10356_v27 }
 0x31a   : > { %v3727_v45 = vadd.f32 %v3726_v33, %v3725_v55  ;;  %v4019_v7 = vpop.f32.mrf.mxu0 }
 0x31b   : > { %v3561_v5 = vsel %vm2592_vm4, %v3496_v61, 0.0  ;;  %v3663_v16 = vmul.f32 %v3496_v61, %v3263_v12 }
 0x31c   : > { %v3562_v57 = vadd.f32 %v3561_v5, %v3560_v48  ;;  %v3266_v14 = vpop.f32.mrf.mxu0 }
 0x31d   : > { %v3728_v46 = vsel %vm2592_vm4, %v3663_v16, 0.0  ;;  %3443 = vst.msk [vmem:[%s8789_s27 + $0x68] sm:$0xff] %vm2592_vm4, %v3266_v14  ;;  %v3497_v40 = vmul.f32 %v3266_v14, %v10357_v44 }
 0x31e   : > { %v3729_v11 = vadd.f32 %v3728_v46, %v3727_v45  ;;  %v4020_v24 = vpop.f32.mrf.mxu0 }
 0x31f   : > { %v3563_v22 = vsel %vm2592_vm4, %v3497_v40, 0.0  ;;  %v3664_v10 = vmul.f32 %v3497_v40, %v3266_v14 }
 0x320   : > { %v3564_v63 = vadd.f32 %v3563_v22, %v3562_v57  ;;  %v3271_v21 = vpop.f32.mrf.mxu0 }
 0x321   : > { %v3730_v23 = vsel %vm2592_vm4, %v3664_v10, 0.0  ;;  %3444 = vst.msk [vmem:[%s8789_s27 + $0x70] sm:$0xff] %vm2592_vm4, %v3271_v21  ;;  %v3498_v20 = vmul.f32 %v3271_v21, %v10358_v53 }
 0x322   : > { %v3731_v6 = vadd.f32 %v3730_v23, %v3729_v11  ;;  %v4023_v1 = vpop.f32.mrf.mxu0 }
 0x323   : > { %v3565_v39 = vsel %vm2592_vm4, %v3498_v20, 0.0  ;;  %v3665_v2 = vmul.f32 %v3498_v20, %v3271_v21  ;;  %v10362_v1 = vld [vmem:[#allocation79_spill] sm:$0xff] }
 0x324   : > { %v3566_v42 = vadd.f32 %v3565_v39, %v3564_v63  ;;  %v3274_v34 = vpop.f32.mrf.mxu0 }
 0x325   : > { %v3732_v31 = vsel %vm2592_vm4, %v3665_v2, 0.0  ;;  %3445 = vst.msk [vmem:[%s8789_s27 + $0x78] sm:$0xff] %vm2592_vm4, %v3274_v34  ;;  %v3499_v60 = vmul.f32 %v3274_v34, %v10359_v54 }
 0x326   : > { %v3733_v28 = vadd.f32 %v3732_v31, %v3731_v6  ;;  %v4024_v35 = vpop.f32.mrf.mxu0 }
 0x327   : > { %v3567_v58 = vsel %vm2592_vm4, %v3499_v60, 0.0  ;;  %v3666_v18 = vmul.f32 %v3499_v60, %v3274_v34  ;;  %v10364_v60 = vld [vmem:[#allocation89_spill] sm:$0xff] }
 0x328   : > { %v3568_v29 = vadd.f32 %v3567_v58, %v3566_v42  ;;  %v8897_v9 = vpop.f32.mrf.mxu1  ;;  %v10363_v42 = vld [vmem:[#allocation90_spill] sm:$0xff] }
 0x329   : > { %v3734_v52 = vsel %vm2592_vm4, %v3666_v18, 0.0  ;;  %3458 = vst.msk [vmem:[%s8789_s27 + $0xe0] sm:$0xff] %vm2592_vm4, %v8897_v9 }
 0x32a   : > { %v3735_v43 = vadd.f32 %v3734_v52, %v3733_v28  ;;  %v4051_v56 = vpop.f32.mrf.mxu1 }
 0x32c   : > { %v8903_v26 = vpop.f32.mrf.mxu1 }
 0x32d   : > { %3459 = vst.msk [vmem:[%s8789_s27 + $0xe8] sm:$0xff] %vm2592_vm4, %v8903_v26 }
 0x32e   : > { %v4052_v32 = vpop.f32.mrf.mxu1 }
 0x330   : > { %v3279_v49 = vpop.f32.mrf.mxu0 }
 0x331   : > { %3446 = vst.msk [vmem:[%s8789_s27 + $0x80] sm:$0xff] %vm2592_vm4, %v3279_v49  ;;  %v3500_v13 = vmul.f32 %v3279_v49, %v10360_v36  ;;  %v10366_v36 = vld [vmem:[#allocation99_spill] sm:$0xff] }
 0x332   : > { %v4027_v0 = vpop.f32.mrf.mxu0 }
 0x333   : > { %v3569_v47 = vsel %vm2592_vm4, %v3500_v13, 0.0  ;;  %v3667_v50 = vmul.f32 %v3500_v13, %v3279_v49 }
 0x334   : > { %v3570_v62 = vadd.f32 %v3569_v47, %v3568_v29  ;;  %v3282_v17 = vpop.f32.mrf.mxu0  ;;  %v10365_v29 = vld [vmem:[#allocation100_spill] sm:$0xff] }
 0x335   : > { %v3736_v3 = vsel %vm2592_vm4, %v3667_v50, 0.0  ;;  %3447 = vst.msk [vmem:[%s8789_s27 + $0x88] sm:$0xff] %vm2592_vm4, %v3282_v17  ;;  %v3501_v41 = vmul.f32 %v3282_v17, %v10361_v25 }
 0x336   : > { %v3737_v37 = vadd.f32 %v3736_v3, %v3735_v43  ;;  %v4028_v51 = vpop.f32.mrf.mxu0  ;;  %v10367_v3 = vld [vmem:[#allocation110_spill] sm:$0xff] }
 0x337   : > { %v3571_v4 = vsel %vm2592_vm4, %v3501_v41, 0.0  ;;  %v3668_v15 = vmul.f32 %v3501_v41, %v3282_v17 }
 0x338   : > { %v3572_v19 = vadd.f32 %v3571_v4, %v3570_v62  ;;  %v8917_v8 = vpop.f32.mrf.mxu1 }
 0x339   : > { %v3738_v55 = vsel %vm2592_vm4, %v3668_v15, 0.0  ;;  %3460 = vst.msk [vmem:[%s8789_s27 + $0xf0] sm:$0xff] %vm2592_vm4, %v8917_v8 }
 0x33a   : > { %v8923_v59 = vadd.f32 %v3738_v55, %v3737_v37  ;;  %v4055_v30 = vpop.f32.mrf.mxu1 }
 0x33b   : > { %v10368_v30 = vld [vmem:[#allocation109_spill] sm:$0xff] }
 0x33c   : > { %v8925_v38 = vpop.f32.mrf.mxu1 }
 0x33d   : > { %3461 = vst.msk [vmem:[%s8789_s27 + $0xf8] sm:$0xff] %vm2592_vm4, %v8925_v38 }
 0x33e   : > { %v4056_v48 = vpop.f32.mrf.mxu1 }
 0x340   : > { %v3287_v12 = vpop.f32.mrf.mxu0 }
 0x341   : > { %3448 = vst.msk [vmem:[%s8789_s27 + $0x90] sm:$0xff] %vm2592_vm4, %v3287_v12  ;;  %v3502_v39 = vmul.f32 %v3287_v12, %v10362_v1 }
 0x342   : > { %v4031_v33 = vpop.f32.mrf.mxu0 }
 0x343   : > { %v3669_v54 = vmul.f32 %v3502_v39, %v3287_v12  ;;  %v3573_v58 = vsel %vm2592_vm4, %v3502_v39, 0.0 }
 0x344   : > { %v3290_v27 = vpop.f32.mrf.mxu0  ;;  %v3574_v0 = vadd.f32 %v3573_v58, %v3572_v19 }
 0x345   : > { %3449 = vst.msk [vmem:[%s8789_s27 + $0x98] sm:$0xff] %vm2592_vm4, %v3290_v27  ;;  %v3503_v34 = vmul.f32 %v3290_v27, %v10363_v42  ;;  %v3740_v56 = vsel %vm2592_vm4, %v3669_v54, 0.0 }
 0x346   : > { %v4032_v61 = vpop.f32.mrf.mxu0  ;;  %v3741_v41 = vadd.f32 %v3740_v56, %v8923_v59 }
 0x347   : > { %v3670_v18 = vmul.f32 %v3503_v34, %v3290_v27  ;;  %v3575_v32 = vsel %vm2592_vm4, %v3503_v34, 0.0 }
 0x348   : > { %v8934_v45 = vpop.f32.mrf.mxu1  ;;  %v3576_v37 = vadd.f32 %v3575_v32, %v3574_v0 }
 0x349   : > { %3462 = vst.msk [vmem:[%s8789_s27 + $0x100] sm:$0xff] %vm2592_vm4, %v8934_v45  ;;  %v3742_v50 = vsel %vm2592_vm4, %v3670_v18, 0.0  ;;  %v10371_v18 = vld [vmem:[#allocation129_spill] sm:$0xff] }
 0x34a   : > { %v4059_v7 = vpop.f32.mrf.mxu1  ;;  %v3743_v48 = vadd.f32 %v3742_v50, %v3741_v41  ;;  %v10373_v50 = vld [vmem:[#allocation130_spill] sm:$0xff] }
 0x34b   : > { %v10369_v7 = vld [vmem:[#allocation120_spill] sm:$0xff] }
 0x34c   : > { %v8939_v5 = vpop.f32.mrf.mxu1 }
 0x34d   : > { %3463 = vst.msk [vmem:[%s8789_s27 + $0x108] sm:$0xff] %vm2592_vm4, %v8939_v5 }
 0x34e   : > { %v4060_v16 = vpop.f32.mrf.mxu1 }
 0x350   : > { %v3295_v57 = vpop.f32.mrf.mxu0 }
 0x351   : > { %3450 = vst.msk [vmem:[%s8789_s27 + $0xa0] sm:$0xff] %vm2592_vm4, %v3295_v57  ;;  %v3504_v28 = vmul.f32 %v3295_v57, %v10364_v60 }
 0x352   : > { %v4035_v14 = vpop.f32.mrf.mxu0 }
 0x353   : > { %v3671_v49 = vmul.f32 %v3504_v28, %v3295_v57  ;;  %v3577_v62 = vsel %vm2592_vm4, %v3504_v28, 0.0 }
 0x354   : > { %v3298_v46 = vpop.f32.mrf.mxu0  ;;  %v3578_v12 = vadd.f32 %v3577_v62, %v3576_v37  ;;  %v10374_v37 = vld [vmem:[#allocation139_spill] sm:$0xff] }
 0x355   : > { %3451 = vst.msk [vmem:[%s8789_s27 + $0xa8] sm:$0xff] %vm2592_vm4, %v3298_v46  ;;  %v3505_v52 = vmul.f32 %v3298_v46, %v10365_v29  ;;  %v3744_v4 = vsel %vm2592_vm4, %v3671_v49, 0.0  ;;  %v3512_v29 = vmul.f32 %v8897_v9, %v10371_v18 }
 0x356   : > { %v4036_v44 = vpop.f32.mrf.mxu0  ;;  %v3745_v57 = vadd.f32 %v3744_v4, %v3743_v48  ;;  %v3514_v4 = vmul.f32 %v8917_v8, %v10374_v37  ;;  %v10381_v37 = vld [vmem:[#allocation178_spill] sm:$0xff] }
 0x357   : > { %v3672_v17 = vmul.f32 %v3505_v52, %v3298_v46  ;;  %v3579_v15 = vsel %vm2592_vm4, %v3505_v52, 0.0  ;;  %v3679_v41 = vmul.f32 %v3512_v29, %v8897_v9 }
 0x358   : > { %v8948_v40 = vpop.f32.mrf.mxu1  ;;  %v3580_v14 = vadd.f32 %v3579_v15, %v3578_v12  ;;  %v3593_v12 = vsel %vm2592_vm4, %v3512_v29, 0.0 }
 0x359   : > { %3464 = vst.msk [vmem:[%s8789_s27 + $0x110] sm:$0xff] %vm2592_vm4, %v8948_v40  ;;  %v3746_v27 = vsel %vm2592_vm4, %v3672_v17, 0.0 }
 0x35a   : > { %v4063_v11 = vpop.f32.mrf.mxu1 }
 0x35c   : > { %v8953_v24 = vpop.f32.mrf.mxu1 }
 0x35d   : > { %3465 = vst.msk [vmem:[%s8789_s27 + $0x118] sm:$0xff] %vm2592_vm4, %v8953_v24 }
 0x35e   : > { %v4064_v22 = vpop.f32.mrf.mxu1 }
 0x360   : > { %v3303_v10 = vpop.f32.mrf.mxu0 }
 0x361   : > { %3452 = vst.msk [vmem:[%s8789_s27 + $0xb0] sm:$0xff] %vm2592_vm4, %v3303_v10  ;;  %v3506_v13 = vmul.f32 %v3303_v10, %v10366_v36 }
 0x362   : > { %v4039_v63 = vpop.f32.mrf.mxu0 }
 0x363   : > { %v3673_v55 = vmul.f32 %v3506_v13, %v3303_v10  ;;  %v3581_v59 = vsel %vm2592_vm4, %v3506_v13, 0.0  ;;  %v3747_v10 = vadd.f32 %v3746_v27, %v3745_v57  ;;  %v10372_v13 = vld [vmem:[#allocation140_spill] sm:$0xff]  ;;  %v10375_v27 = vld [vmem:[#allocation150_spill] sm:$0xff]  ;;  %v3760_v57 = vsel %vm2592_vm4, %v3679_v41, 0.0 }
 0x364   : > { %v3306_v21 = vpop.f32.mrf.mxu0  ;;  %v3582_v63 = vadd.f32 %v3581_v59, %v3580_v14  ;;  %v3513_v0 = vmul.f32 %v8903_v26, %v10372_v13  ;;  %v3515_v59 = vmul.f32 %v8925_v38, %v10375_v27 }
 0x365   : > { %3453 = vst.msk [vmem:[%s8789_s27 + $0xb8] sm:$0xff] %vm2592_vm4, %v3306_v21  ;;  %v3507_v25 = vmul.f32 %v3306_v21, %v10367_v3  ;;  %v3748_v44 = vsel %vm2592_vm4, %v3673_v55, 0.0 }
 0x366   : > { %v4040_v23 = vpop.f32.mrf.mxu0  ;;  %v3749_v39 = vadd.f32 %v3748_v44, %v3747_v10  ;;  %v3595_v14 = vsel %vm2592_vm4, %v3513_v0, 0.0  ;;  %v3681_v44 = vmul.f32 %v3514_v4, %v8917_v8 }
 0x367   : > { %v3674_v61 = vmul.f32 %v3507_v25, %v3306_v21  ;;  %v3583_v11 = vsel %vm2592_vm4, %v3507_v25, 0.0 }
 0x368   : > { %v8962_v53 = vpop.f32.mrf.mxu1 }
 0x369   : > { %3466 = vst.msk [vmem:[%s8789_s27 + $0x120] sm:$0xff] %vm2592_vm4, %v8962_v53  ;;  %v3750_v21 = vsel %vm2592_vm4, %v3674_v61, 0.0 }
 0x36a   : > { %v4067_v20 = vpop.f32.mrf.mxu1  ;;  %v3751_v28 = vadd.f32 %v3750_v21, %v3749_v39  ;;  %v3597_v21 = vsel %vm2592_vm4, %v3514_v4, 0.0 }
 0x36c   : > { %v8967_v6 = vpop.f32.mrf.mxu1 }
 0x36d   : > { %3467 = vst.msk [vmem:[%s8789_s27 + $0x128] sm:$0xff] %vm2592_vm4, %v8967_v6  ;;  %v3521_v4 = vmul.f32 %v8967_v6, %v10381_v37 }
 0x36e   : > { %v4068_v2 = vpop.f32.mrf.mxu1 }
 0x36f   : > { %v3584_v2 = vadd.f32 %v3583_v11, %v3582_v63  ;;  %v10376_v11 = vld [vmem:[#allocation149_spill] sm:$0xff] }
 0x370   : > { %v3311_v31 = vpop.f32.mrf.mxu0 }
 0x371   : > { %3454 = vst.msk [vmem:[%s8789_s27 + $0xc0] sm:$0xff] %vm2592_vm4, %v3311_v31  ;;  %v3508_v19 = vmul.f32 %v3311_v31, %v10368_v30 }
 0x372   : > { %v4043_v35 = vpop.f32.mrf.mxu0 }
 0x373   : > { %v3675_v22 = vmul.f32 %v3508_v19, %v3311_v31  ;;  %v3585_v20 = vsel %vm2592_vm4, %v3508_v19, 0.0  ;;  %v10370_v31 = vld [vmem:[#allocation119_spill] sm:$0xff] }
 0x374   : > { %v3314_v43 = vpop.f32.mrf.mxu0  ;;  %v3586_v35 = vadd.f32 %v3585_v20, %v3584_v2  ;;  %v3682_v20 = vmul.f32 %v3515_v59, %v8925_v38 }
 0x375   : > { %3455 = vst.msk [vmem:[%s8789_s27 + $0xc8] sm:$0xff] %vm2592_vm4, %v3314_v43  ;;  %v3509_v16 = vmul.f32 %v3314_v43, %v10369_v7  ;;  %v3752_v34 = vsel %vm2592_vm4, %v3675_v22, 0.0 }
 0x376   : > { %v4044_v47 = vpop.f32.mrf.mxu0  ;;  %v3753_v32 = vadd.f32 %v3752_v34, %v3751_v28  ;;  %v3764_v34 = vsel %vm2592_vm4, %v3681_v44, 0.0  ;;  %v3766_v18 = vsel %vm2592_vm4, %v3682_v20, 0.0 }
 0x377   : > { %v3676_v1 = vmul.f32 %v3509_v16, %v3314_v43  ;;  %v3587_v54 = vsel %vm2592_vm4, %v3509_v16, 0.0 }
 0x378   : > { %v3588_v49 = vadd.f32 %v3587_v54, %v3586_v35  ;;  %v3599_v54 = vsel %vm2592_vm4, %v3515_v59, 0.0 }
 0x379   : > { %v8988_v51 = vpop.f32.mrf.mxu1  ;;  %v3754_v52 = vsel %vm2592_vm4, %v3676_v1, 0.0  ;;  %v10377_v1 = vld [vmem:[#allocation160_spill] sm:$0xff] }
 0x37a   : > { %3468 = vst.msk [vmem:[%s8789_s27 + $0x130] sm:$0xff] %vm2592_vm4, %v8988_v51  ;;  %v3755_v17 = vadd.f32 %v3754_v52, %v3753_v32  ;;  %v3517_v39 = vmul.f32 %v8939_v5, %v10377_v1 }
 0x37b   : > { %v4071_v33 = vpop.f32.mrf.mxu1 }
 0x37c   : > { %v3680_v33 = vmul.f32 %v3513_v0, %v8903_v26  ;;  %v3516_v26 = vmul.f32 %v8934_v45, %v10376_v11  ;;  %v3684_v52 = vmul.f32 %v3517_v39, %v8939_v5  ;;  %v3603_v13 = vsel %vm2592_vm4, %v3517_v39, 0.0 }
 0x37d   : > { %v8999_v46 = vpop.f32.mrf.mxu1 }
 0x37e   : > { %3469 = vst.msk [vmem:[%s8789_s27 + $0x138] sm:$0xff] %vm2592_vm4, %v8999_v46  ;;  %v3601_v29 = vsel %vm2592_vm4, %v3516_v26, 0.0 }
 0x37f   : > { %v4072_v23 = vpop.f32.mrf.mxu1 }
 0x380   : > { %v3762_v23 = vsel %vm2592_vm4, %v3680_v33, 0.0  ;;  %v10382_v33 = vld [vmem:[#allocation177_spill] sm:$0xff] }
 0x381   : > { %v3319_v42 = vpop.f32.mrf.mxu0  ;;  %v3522_v27 = vmul.f32 %v8988_v51, %v10382_v33 }
 0x382   : > { %3456 = vst.msk [vmem:[%s8789_s27 + $0xd0] sm:$0xff] %vm2592_vm4, %v3319_v42  ;;  %v3510_v60 = vmul.f32 %v3319_v42, %v10370_v31  ;;  %v3683_v31 = vmul.f32 %v3516_v26, %v8934_v45 }
 0x383   : > { %v4047_v58 = vpop.f32.mrf.mxu0 }
 0x384   : > { %v3589_v43 = vsel %vm2592_vm4, %v3510_v60, 0.0  ;;  %v3677_v56 = vmul.f32 %v3510_v60, %v3319_v42  ;;  %v10378_v60 = vld [vmem:[#allocation159_spill] sm:$0xff] }
 0x385   : > { %v3322_v36 = vpop.f32.mrf.mxu0  ;;  %v3590_v3 = vadd.f32 %v3589_v43, %v3588_v49  ;;  %v3518_v28 = vmul.f32 %v8948_v40, %v10378_v60  ;;  %v10379_v43 = vld [vmem:[#allocation170_spill] sm:$0xff] }
 0x386   : > { %v3756_v47 = vsel %vm2592_vm4, %v3677_v56, 0.0  ;;  %3457 = vst.msk [vmem:[%s8789_s27 + $0xd8] sm:$0xff] %vm2592_vm4, %v3322_v36  ;;  %v3511_v62 = vmul.f32 %v3322_v36, %v10373_v50  ;;  %v3519_v56 = vmul.f32 %v8953_v24, %v10379_v43 }
 0x387   : > { %v4048_v25 = vpop.f32.mrf.mxu0  ;;  %v3757_v30 = vadd.f32 %v3756_v47, %v3755_v17  ;;  %v3685_v0 = vmul.f32 %v3518_v28, %v8948_v40  ;;  %v10380_v47 = vld [vmem:[#allocation169_spill] sm:$0xff] }
 0x388   : > { %v3591_v15 = vsel %vm2592_vm4, %v3511_v62, 0.0  ;;  %v3678_v55 = vmul.f32 %v3511_v62, %v3322_v36  ;;  %v3768_v36 = vsel %vm2592_vm4, %v3683_v31, 0.0  ;;  %v3520_v50 = vmul.f32 %v8962_v53, %v10380_v47 }
 0x389   : > { %v3592_v19 = vadd.f32 %v3591_v15, %v3590_v3  ;;  %v3770_v3 = vsel %vm2592_vm4, %v3684_v52, 0.0  ;;  %v3605_v25 = vsel %vm2592_vm4, %v3518_v28, 0.0  ;;  %v3686_v41 = vmul.f32 %v3519_v56, %v8953_v24 }
 0x38a   : > { %v9027_v48 = vpop.f32.mrf.mxu1  ;;  %v3758_v61 = vsel %vm2592_vm4, %v3678_v55, 0.0 }
 0x38b   : > { %3470 = vst.msk [vmem:[%s8789_s27 + $0x140] sm:$0xff] %vm2592_vm4, %v9027_v48  ;;  %v3594_v9 = vadd.f32 %v3593_v12, %v3592_v19  ;;  %v3759_v7 = vadd.f32 %v3758_v61, %v3757_v30  ;;  %v3772_v30 = vsel %vm2592_vm4, %v3685_v0, 0.0  ;;  %v3607_v19 = vsel %vm2592_vm4, %v3519_v56, 0.0 }
 0x38c   : > { %v4075_v16 = vpop.f32.mrf.mxu1  ;;  %v3687_v12 = vmul.f32 %v3520_v50, %v8962_v53 }
 0x38d   : > { %v3596_v22 = vadd.f32 %v3595_v14, %v3594_v9  ;;  %v3761_v10 = vadd.f32 %v3760_v57, %v3759_v7  ;;  %v3774_v9 = vsel %vm2592_vm4, %v3686_v41, 0.0  ;;  %v3609_v7 = vsel %vm2592_vm4, %v3520_v50, 0.0  ;;  %v10383_v57 = vld [vmem:[#allocation185_spill] sm:$0xff] }
 0x38e   : > { %v9042_v63 = vpop.f32.mrf.mxu1  ;;  %v3688_v16 = vmul.f32 %v3521_v4, %v8967_v6  ;;  %v3523_v14 = vmul.f32 %v8999_v46, %v10383_v57  ;;  %v3776_v26 = vsel %vm2592_vm4, %v3687_v12, 0.0 }
 0x38f   : > { %3471 = vst.msk [vmem:[%s8789_s27 + $0x148] sm:$0xff] %vm2592_vm4, %v9042_v63  ;;  %v3598_v8 = vadd.f32 %v3597_v21, %v3596_v22  ;;  %v3763_v2 = vadd.f32 %v3762_v23, %v3761_v10  ;;  %v3611_v22 = vsel %vm2592_vm4, %v3521_v4, 0.0  ;;  %v3689_v10 = vmul.f32 %v3522_v27, %v8988_v51  ;;  %v10384_v23 = vld [vmem:[#allocation184_spill] sm:$0xff] }
 0x390   : > { %v4076_v42 = vpop.f32.mrf.mxu1  ;;  %v3524_v21 = vmul.f32 %v9027_v48, %v10384_v23  ;;  %v3778_v39 = vsel %vm2592_vm4, %v3688_v16, 0.0  ;;  %v3615_v28 = vsel %vm2592_vm4, %v3523_v14, 0.0  ;;  %v10392_v23 = vld [vmem:[#allocation204_spill] sm:$0xff] }
 0x391   : > { %v3600_v38 = vadd.f32 %v3599_v54, %v3598_v8  ;;  %v3765_v35 = vadd.f32 %v3764_v34, %v3763_v2  ;;  %v3613_v8 = vsel %vm2592_vm4, %v3522_v27, 0.0  ;;  %v3690_v2 = vmul.f32 %v3523_v14, %v8999_v46  ;;  %v10385_v42 = vld [vmem:[#allocation190_spill] sm:$0xff]  ;;  %v10390_v27 = vld [vmem:[#allocation199_spill] sm:$0xff]  ;;  %v10391_v14 = vld [vmem:[#allocation205_spill] sm:$0xff] }
 0x392   : > { %v9057_v58 = vpop.f32.mrf.mxu1  ;;  %v3525_v34 = vmul.f32 %v9042_v63, %v10385_v42  ;;  %v3780_v60 = vsel %vm2592_vm4, %v3689_v10, 0.0  ;;  %v3617_v56 = vsel %vm2592_vm4, %v3524_v21, 0.0 }
 0x393   : > { %3472 = vst.msk [vmem:[%s8789_s27 + $0x150] sm:$0xff] %vm2592_vm4, %v9057_v58  ;;  %v3602_v45 = vadd.f32 %v3601_v29, %v3600_v38  ;;  %v3767_v32 = vadd.f32 %v3766_v18, %v3765_v35  ;;  %v3691_v38 = vmul.f32 %v3524_v21, %v9027_v48  ;;  %v10386_v35 = vld [vmem:[#allocation189_spill] sm:$0xff]  ;;  %v3782_v43 = vsel %vm2592_vm4, %v3690_v2, 0.0 }
 0x394   : > { %v4079_v49 = vpop.f32.mrf.mxu1  ;;  %v3526_v18 = vmul.f32 %v9057_v58, %v10386_v35  ;;  %v3619_v47 = vsel %vm2592_vm4, %v3525_v34, 0.0 }
 0x395   : > { %v3604_v5 = vadd.f32 %v3603_v13, %v3602_v45  ;;  %v3769_v62 = vadd.f32 %v3768_v36, %v3767_v32  ;;  %v3692_v45 = vmul.f32 %v3525_v34, %v9042_v63  ;;  %v10387_v32 = vld [vmem:[#allocation195_spill] sm:$0xff]  ;;  %v3784_v0 = vsel %vm2592_vm4, %v3691_v38, 0.0 }
 0x396   : > { %v9072_v17 = vpop.f32.mrf.mxu1  ;;  %v3693_v50 = vmul.f32 %v3526_v18, %v9057_v58  ;;  %v3621_v37 = vsel %vm2592_vm4, %v3526_v18, 0.0 }
 0x397   : > { %3473 = vst.msk [vmem:[%s8789_s27 + $0x158] sm:$0xff] %vm2592_vm4, %v9072_v17  ;;  %v3771_v40 = vadd.f32 %v3770_v3, %v3769_v62  ;;  %v3606_v15 = vadd.f32 %v3605_v25, %v3604_v5  ;;  %v3527_v49 = vmul.f32 %v9072_v17, %v10387_v32  ;;  %v10388_v5 = vld [vmem:[#allocation194_spill] sm:$0xff]  ;;  %v3786_v41 = vsel %vm2592_vm4, %v3692_v45, 0.0  ;;  %v10394_v32 = vld [vmem:[#allocation209_spill] sm:$0xff] }
 0x398   : > { %v4080_v55 = vpop.f32.mrf.mxu1  ;;  %v3788_v58 = vsel %vm2592_vm4, %v3693_v50, 0.0 }
 0x399   : > { %v3608_v24 = vadd.f32 %v3607_v19, %v3606_v15  ;;  %v3773_v59 = vadd.f32 %v3772_v30, %v3771_v40  ;;  %v3694_v4 = vmul.f32 %v3527_v49, %v9072_v17  ;;  %v10389_v40 = vld [vmem:[#allocation200_spill] sm:$0xff]  ;;  %v3623_v12 = vsel %vm2592_vm4, %v3527_v49, 0.0 }
 0x39a   : > { %v3391_v61 = vpop.f32.mrf.mxu1 }
 0x39b   : > { %3474 = vst.msk [vmem:[%s8789_s27 + $0x160] sm:$0xff] %vm2592_vm4, %v3391_v61  ;;  %v3610_v44 = vadd.f32 %v3609_v7, %v3608_v24  ;;  %v3775_v53 = vadd.f32 %v3774_v9, %v3773_v59  ;;  %v3528_v62 = vmul.f32 %v3391_v61, %v10388_v5  ;;  %v3790_v17 = vsel %vm2592_vm4, %v3694_v4, 0.0  ;;  %v10395_v5 = vld [vmem:[#allocation214_spill] sm:$0xff] }
 0x39c   : > { %v4083_v11 = vpop.f32.mrf.mxu1 }
 0x39d   : > { %v3612_v20 = vadd.f32 %v3611_v22, %v3610_v44  ;;  %v3777_v6 = vadd.f32 %v3776_v26, %v3775_v53  ;;  %v3695_v33 = vmul.f32 %v3528_v62, %v3391_v61  ;;  %v3625_v16 = vsel %vm2592_vm4, %v3528_v62, 0.0 }
 0x39e   : > { %v3394_v1 = vpop.f32.mrf.mxu1 }
 0x39f   : > { %3475 = vst.msk [vmem:[%s8789_s27 + $0x168] sm:$0xff] %vm2592_vm4, %v3394_v1  ;;  %v3614_v54 = vadd.f32 %v3613_v8, %v3612_v20  ;;  %v3779_v51 = vadd.f32 %v3778_v39, %v3777_v6  ;;  %v3529_v15 = vmul.f32 %v3394_v1, %v10389_v40  ;;  %v3792_v61 = vsel %vm2592_vm4, %v3695_v33, 0.0 }
 0x3a0   : > { %v4084_v31 = vpop.f32.mrf.mxu1 }
 0x3a1   : > { %v3616_v29 = vadd.f32 %v3615_v28, %v3614_v54  ;;  %v3781_v46 = vadd.f32 %v3780_v60, %v3779_v51  ;;  %v3696_v57 = vmul.f32 %v3529_v15, %v3394_v1  ;;  %v3627_v22 = vsel %vm2592_vm4, %v3529_v15, 0.0  ;;  %v10393_v54 = vld [vmem:[#allocation210_spill] sm:$0xff] }
 0x3a2   : > { %v3399_v52 = vpop.f32.mrf.mxu1 }
 0x3a3   : > { %3476 = vst.msk [vmem:[%s8789_s27 + $0x170] sm:$0xff] %vm2592_vm4, %v3399_v52  ;;  %v3618_v36 = vadd.f32 %v3617_v56, %v3616_v29  ;;  %v3783_v48 = vadd.f32 %v3782_v43, %v3781_v46  ;;  %v3530_v24 = vmul.f32 %v3399_v52, %v10390_v27  ;;  %v3794_v1 = vsel %vm2592_vm4, %v3696_v57, 0.0 }
 0x3a4   : > { %v4087_v13 = vpop.f32.mrf.mxu1 }
 0x3a5   : > { %v3785_v3 = vadd.f32 %v3784_v0, %v3783_v48  ;;  %v3620_v25 = vadd.f32 %v3619_v47, %v3618_v36  ;;  %v3697_v10 = vmul.f32 %v3530_v24, %v3399_v52  ;;  %v3629_v8 = vsel %vm2592_vm4, %v3530_v24, 0.0 }
 0x3a6   : > { %v3402_v63 = vpop.f32.mrf.mxu1 }
 0x3a7   : > { %3477 = vst.msk [vmem:[%s8789_s27 + $0x178] sm:$0xff] %vm2592_vm4, %v3402_v63  ;;  %v3787_v55 = vadd.f32 %v3786_v41, %v3785_v3  ;;  %v3622_v30 = vadd.f32 %v3621_v37, %v3620_v25  ;;  %v3531_v44 = vmul.f32 %v3402_v63, %v10391_v14  ;;  %v3796_v60 = vsel %vm2592_vm4, %v3697_v10, 0.0 }
 0x3a8   : > { %v4088_v19 = vpop.f32.mrf.mxu1 }
 0x3a9   : > { %v3789_v59 = vadd.f32 %v3788_v58, %v3787_v55  ;;  %v3624_v9 = vadd.f32 %v3623_v12, %v3622_v30  ;;  %v3698_v2 = vmul.f32 %v3531_v44, %v3402_v63  ;;  %v3631_v28 = vsel %vm2592_vm4, %v3531_v44, 0.0  ;;  %v10396_v19 = vld [vmem:[#allocation228_spill] sm:$0xff] }
 0x3aa   : > { %v3407_v7 = vpop.f32.mrf.mxu1 }
 0x3ab   : > { %3478 = vst.msk [vmem:[%s8789_s27 + $0x180] sm:$0xff] %vm2592_vm4, %v3407_v7  ;;  %v3791_v53 = vadd.f32 %v3790_v17, %v3789_v59  ;;  %v3626_v11 = vadd.f32 %v3625_v16, %v3624_v9  ;;  %v3532_v21 = vmul.f32 %v3407_v7, %v10392_v23  ;;  %v3798_v46 = vsel %vm2592_vm4, %v3698_v2, 0.0  ;;  %v10397_v16 = vld [vmem:[#allocation231_spill] sm:$0xff] }
 0x3ac   : > { %v4091_v26 = vpop.f32.mrf.mxu1 }
 0x3ad   : > { %v3793_v20 = vadd.f32 %v3792_v61, %v3791_v53  ;;  %v3628_v6 = vadd.f32 %v3627_v22, %v3626_v11  ;;  %v3699_v38 = vmul.f32 %v3532_v21, %v3407_v7  ;;  %v3633_v52 = vsel %vm2592_vm4, %v3532_v21, 0.0 }
 0x3ae   : > { %v3410_v39 = vpop.f32.mrf.mxu1 }
 0x3af   : > { %3479 = vst.msk [vmem:[%s8789_s27 + $0x188] sm:$0xff] %vm2592_vm4, %v3410_v39  ;;  %v3795_v42 = vadd.f32 %v3794_v1, %v3793_v20  ;;  %v3630_v34 = vadd.f32 %v3629_v8, %v3628_v6  ;;  %v3533_v51 = vmul.f32 %v3410_v39, %v10393_v54  ;;  %v3800_v48 = vsel %vm2592_vm4, %v3699_v38, 0.0 }
 0x3b0   : > { %v4092_v31 = vpop.f32.mrf.mxu1 }
 0x3b1   : > { %v3797_v35 = vadd.f32 %v3796_v60, %v3795_v42  ;;  %v3632_v18 = vadd.f32 %v3631_v28, %v3630_v34  ;;  %v3700_v45 = vmul.f32 %v3533_v51, %v3410_v39  ;;  %v3635_v0 = vsel %vm2592_vm4, %v3533_v51, 0.0 }
 0x3b2   : > { %v3415_v29 = vpop.f32.mrf.mxu1 }
 0x3b3   : > { %3480 = vst.msk [vmem:[%s8789_s27 + $0x190] sm:$0xff] %vm2592_vm4, %v3415_v29  ;;  %v3799_v43 = vadd.f32 %v3798_v46, %v3797_v35  ;;  %v3634_v56 = vadd.f32 %v3633_v52, %v3632_v18  ;;  %v3534_v49 = vmul.f32 %v3415_v29, %v10394_v32  ;;  %v3802_v3 = vsel %vm2592_vm4, %v3700_v45, 0.0 }
 0x3b4   : > { %v4095_v36 = vpop.f32.mrf.mxu1 }
 0x3b5   : > { %v3801_v13 = vadd.f32 %v3800_v48, %v3799_v43  ;;  %v3636_v50 = vadd.f32 %v3635_v0, %v3634_v56  ;;  %v3701_v25 = vmul.f32 %v3534_v49, %v3415_v29  ;;  %v3637_v37 = vsel %vm2592_vm4, %v3534_v49, 0.0 }
 0x3b6   : > { %v3418_v47 = vpop.f32.mrf.mxu1 }
 0x3b7   : > { %3481 = vst.msk [vmem:[%s8789_s27 + $0x198] sm:$0xff] %vm2592_vm4, %v3418_v47  ;;  %v3535_v62 = vmul.f32 %v3418_v47, %v10395_v5  ;;  %v3803_v41 = vadd.f32 %v3802_v3, %v3801_v13  ;;  %v3638_v40 = vadd.f32 %v3637_v37, %v3636_v50  ;;  %v3804_v55 = vsel %vm2592_vm4, %v3701_v25, 0.0 }
 0x3b8   : > { %v4096_v63 = vpop.f32.mrf.mxu1 }
 0x3b9   : > { %v3702_v4 = vmul.f32 %v3535_v62, %v3418_v47  ;;  %v3639_v30 = vsel %vm2592_vm4, %v3535_v62, 0.0  ;;  %v3805_v12 = vadd.f32 %v3804_v55, %v3803_v41 }
 0x3ba   : > { %v3640_v9 = vadd.f32 %v3639_v30, %v3638_v40 }
 0x3bb   : > { %v3423_v15 = vpop.f32.mrf.mxu1  ;;  %v3806_v27 = vsel %vm2592_vm4, %v3702_v4, 0.0 }
 0x3bc   : > { %3482 = vst.msk [vmem:[%s8789_s27 + $0x1a0] sm:$0xff] %vm2592_vm4, %v3423_v15  ;;  %v3536_v58 = vmul.f32 %v3423_v15, %v10396_v19  ;;  %v3807_v14 = vadd.f32 %v3806_v27, %v3805_v12 }
 0x3bd   : > { %v4099_v33 = vpop.f32.mrf.mxu1 }
 0x3be   : > { %v3641_v24 = vsel %vm2592_vm4, %v3536_v58, 0.0  ;;  %v3703_v59 = vmul.f32 %v3536_v58, %v3423_v15 }
 0x3bf   : > { %v3426_v7 = vpop.f32.mrf.mxu1  ;;  %v3642_v44 = vadd.f32 %v3641_v24, %v3640_v9 }
 0x3c0   : > { %v3808_v17 = vsel %vm2592_vm4, %v3703_v59, 0.0  ;;  %3483 = vst.msk [vmem:[%s8789_s27 + $0x1a8] sm:$0xff] %vm2592_vm4, %v3426_v7  ;;  %v3537_v57 = vmul.f32 %v3426_v7, %v10397_v16 }
 0x3c1   : > { %v4100_v53 = vpop.f32.mrf.mxu1  ;;  %v3809_v61 = vadd.f32 %v3808_v17, %v3807_v14 }
 0x3c2   : > { %v3643_v11 = vsel %vm2592_vm4, %v3537_v57, 0.0  ;;  %v3704_v26 = vmul.f32 %v3537_v57, %v3426_v7 }
 0x3c3   : > { %v3644_v22 = vadd.f32 %v3643_v11, %v3642_v44 }
 0x3c4   : > { %v3810_v10 = vsel %vm2592_vm4, %v3704_v26, 0.0 }
 0x3c5   : > { %v3645_v23 = vrot.slane %v3644_v22, 4  ;;  %v3811_v21 = vadd.f32 %v3810_v10, %v3809_v61 }
 0x3c7   : > { %v3646_v20 = vadd.f32 %v3645_v23, %v3644_v22  ;;  %v3812_v6 = vrot.slane %v3811_v21, 4 }
 0x3c9   : > { %v3647_v39 = vrot.slane %v3646_v20, 2  ;;  %v3813_v1 = vadd.f32 %v3812_v6, %v3811_v21 }
 0x3cb   : > { %v3648_v8 = vadd.f32 %v3647_v39, %v3646_v20  ;;  %v3814_v2 = vrot.slane %v3813_v1, 2 }
 0x3cd   : > { %v3649_v42 = vrot.slane %v3648_v8, 1  ;;  %v3815_v34 = vadd.f32 %v3814_v2, %v3813_v1 }
 0x3cf   : > { %v3816_v54 = vrot.slane %v3815_v34, 1  ;;  %v3650_v51 = vadd.f32 %v3649_v42, %v3648_v8 }
 0x3d1   : > { %v3817_v31 = vadd.f32 %v3816_v54, %v3815_v34 }
 0x3d3   : > { %v3818_v60 = vsel %vm998_vm1, %v3650_v51, %v3817_v31 }
 0x3d4   : > { %3820 = vst.msk [vmem:[%s262_s7] sm:$0x3] %vm3819_vm13, %v3818_v60 }
 0x3d5 PF: > { %s17_s21 = sadd.s32 1, %s5229_s21  }
 0x3d6   : > { %p14_p4 = scmp.ge.s32.totalorder %s17_s21, 4  }
 0x3d8   :  { %16 = sbr.rel (!%p14_p4) target bundleno = 1 (0x1), region = 82 }

</bundles_post_ra>
